<compile_context>
chip_gen: v6e
topology: v6e:2x2x1
jax: 0.10.0
libtpu: 0.0.40
codegen_flags: <defaults>
</compile_context>

<pallas_src>
import functools
import math

import jax
import jax.numpy as jnp
from jax import lax
from jax.experimental import pallas as pl
from jax.experimental.pallas import tpu as pltpu


# ----------------------------------------------------------------------------
# In-kernel helpers
# ----------------------------------------------------------------------------
def _gelu(x):
    # tanh-approx GELU (EUP friendly).
    # TODO(synk): PyTorch wav2vec2 uses exact erf-GELU; tanh approx drifts ~1e-3.
    c = math.sqrt(2.0 / math.pi)
    return 0.5 * x * (1.0 + jnp.tanh(c * (x + 0.044715 * x * x * x)))


def _parallel(n=1):
    return pltpu.CompilerParams(dimension_semantics=("parallel",) * n)


def _row_tiling(m, cap=256):
    """Single block when M fits in one tile, else cap-row tiles (padded)."""
    if m <= cap:
        return m, m
    mp = pl.cdiv(m, cap) * cap
    return cap, mp


# ----------------------------------------------------------------------------
# Kernel 1: fused (X @ W + b) with optional activation (bf16 MXU, f32 acc)
# ----------------------------------------------------------------------------
def _matmul_bias_act_kernel(x_ref, w_ref, b_ref, o_ref, *, act):
    x = x_ref[...].astype(jnp.bfloat16)
    w = w_ref[...].astype(jnp.bfloat16)
    y = jnp.dot(x, w, preferred_element_type=jnp.float32) + b_ref[...]
    if act == "relu":
        y = jnp.maximum(y, 0.0)
    elif act == "gelu":
        y = _gelu(y)
    o_ref[...] = y.astype(o_ref.dtype)


def matmul_bias_act(x, w, b, act="none", cap=256):
    """x:(M,K) f32, w:(K,N) bf16, b:(N,) -> (M,N) f32."""
    M, K = x.shape
    Kw, N = w.shape
    assert K == Kw
    tm, Mp = _row_tiling(M, cap)
    xp = x if Mp == M else jnp.pad(x, ((0, Mp - M), (0, 0)))
    out = pl.pallas_call(
        functools.partial(_matmul_bias_act_kernel, act=act),
        out_shape=jax.ShapeDtypeStruct((Mp, N), jnp.float32),
        grid=(Mp // tm,),
        in_specs=[
            pl.BlockSpec((tm, K), lambda i: (i, 0)),
            pl.BlockSpec((K, N), lambda i: (0, 0)),
            pl.BlockSpec((1, N), lambda i: (0, 0)),
        ],
        out_specs=pl.BlockSpec((tm, N), lambda i: (i, 0)),
        compiler_params=_parallel(),
    )(xp, w, b.reshape(1, N).astype(jnp.float32))
    return out if Mp == M else out[:M]


# ----------------------------------------------------------------------------
# Kernel 2: fused LayerNorm + Linear (feature projection)
# ----------------------------------------------------------------------------
def _ln_matmul_kernel(x_ref, g_ref, b_ref, w_ref, bias_ref, o_ref, *, eps):
    x = x_ref[...].astype(jnp.float32)
    mean = jnp.mean(x, axis=-1, keepdims=True)
    var = jnp.mean((x - mean) ** 2, axis=-1, keepdims=True)
    xn = (x - mean) * lax.rsqrt(var + eps) * g_ref[...] + b_ref[...]
    y = jnp.dot(xn.astype(jnp.bfloat16), w_ref[...].astype(jnp.bfloat16),
                preferred_element_type=jnp.float32) + bias_ref[...]
    o_ref[...] = y.astype(o_ref.dtype)


def layernorm_matmul(x, gamma, beta, w, bias, eps=1e-5, cap=256):
    M, K = x.shape
    N = w.shape[1]
    tm, Mp = _row_tiling(M, cap)
    xp = x if Mp == M else jnp.pad(x, ((0, Mp - M), (0, 0)))
    out = pl.pallas_call(
        functools.partial(_ln_matmul_kernel, eps=eps),
        out_shape=jax.ShapeDtypeStruct((Mp, N), jnp.float32),
        grid=(Mp // tm,),
        in_specs=[
            pl.BlockSpec((tm, K), lambda i: (i, 0)),
            pl.BlockSpec((1, K), lambda i: (0, 0)),
            pl.BlockSpec((1, K), lambda i: (0, 0)),
            pl.BlockSpec((K, N), lambda i: (0, 0)),
            pl.BlockSpec((1, N), lambda i: (0, 0)),
        ],
        out_specs=pl.BlockSpec((tm, N), lambda i: (i, 0)),
        compiler_params=_parallel(),
    )(xp, gamma.reshape(1, K).astype(jnp.float32),
      beta.reshape(1, K).astype(jnp.float32), w,
      bias.reshape(1, N).astype(jnp.float32))
    return out if Mp == M else out[:M]


# ----------------------------------------------------------------------------
# Kernel 3: channels-last GroupNorm(num_groups = C) + GELU
#           (per (b, c) stats over time: reduce along the sublane axis,
#            no transposes, gamma/beta as (1, C))
# ----------------------------------------------------------------------------
def _groupnorm_gelu_kernel(x_ref, g_ref, b_ref, o_ref, *, eps):
    x = x_ref[0].astype(jnp.float32)                       # (T, C)
    mean = jnp.mean(x, axis=0, keepdims=True)              # (1, C)
    var = jnp.mean((x - mean) ** 2, axis=0, keepdims=True)
    y = (x - mean) * lax.rsqrt(var + eps) * g_ref[...] + b_ref[...]
    o_ref[0] = _gelu(y).astype(o_ref.dtype)


def groupnorm_gelu(x, gamma, beta, eps=1e-5):
    B, T, C = x.shape
    return pl.pallas_call(
        functools.partial(_groupnorm_gelu_kernel, eps=eps),
        out_shape=jax.ShapeDtypeStruct((B, T, C), jnp.float32),
        grid=(B,),
        in_specs=[
            pl.BlockSpec((1, T, C), lambda i: (i, 0, 0)),
            pl.BlockSpec((1, C), lambda i: (0, 0)),
            pl.BlockSpec((1, C), lambda i: (0, 0)),
        ],
        out_specs=pl.BlockSpec((1, T, C), lambda i: (i, 0, 0)),
        compiler_params=_parallel(),
    )(x, gamma.reshape(1, C).astype(jnp.float32),
      beta.reshape(1, C).astype(jnp.float32))


# ----------------------------------------------------------------------------
# Kernel 4: Conv1d as K shifted-slice matmuls accumulated in-kernel.
#           The stride is folded into the lane axis by reshaping x to
#           (B, T/stride, stride*C_in); every tap then becomes a unit-stride
#           shifted slice -> no im2col patch tensor is ever written to HBM.
#           Optional fused GELU and fused residual (for the pos-conv embed).
# ----------------------------------------------------------------------------
def _conv_tap_kernel(x_ref, w_ref, b_ref, o_ref, *, taps, stride, c_in, act,
                     residual_pad):
    T_out = o_ref.shape[1]
    c_out = o_ref.shape[2]
    xx = x_ref[0].astype(jnp.float32)              # (R, stride * c_in)
    acc = jnp.zeros((T_out, c_out), jnp.float32)
    for k in range(taps):                          # small static unroll (<= 10)
        q, r = divmod(k, stride)
        xk = xx[q:q + T_out, r * c_in:(r + 1) * c_in]          # (T_out, c_in)
        acc = acc + jnp.dot(xk.astype(jnp.bfloat16),
                            w_ref[k].astype(jnp.bfloat16),
                            preferred_element_type=jnp.float32)
    acc = acc + b_ref[...]
    if act == "gelu":
        acc = _gelu(acc)
    if residual_pad is not None:                   # stride == 1, c_in == c_out
        acc = acc + xx[residual_pad:residual_pad + T_out, :]
    o_ref[0] = acc.astype(o_ref.dtype)


def conv1d_tap(x, w_taps, b, *, stride, act="none", residual_pad=None):
    """x:(B,T_in,C_in) f32; w_taps:(K,C_in,C_out) bf16 -> (B,T_out,C_out) f32."""
    B, T_in, C_in = x.shape
    K, _, C_out = w_taps.shape
    T_out = (T_in - K) // stride + 1
    need = (T_out - 1) * stride + K
    T_pad = ((need + stride - 1) // stride) * stride
    if T_pad > T_in:
        x = jnp.pad(x, ((0, 0), (0, T_pad - T_in), (0, 0)))
    elif T_pad < T_in:
        x = x[:, :T_pad, :]
    R = T_pad // stride
    if residual_pad is not None:
        assert stride == 1 and C_in == C_out
    return pl.pallas_call(
        functools.partial(_conv_tap_kernel, taps=K, stride=stride, c_in=C_in,
                          act=act, residual_pad=residual_pad),
        out_shape=jax.ShapeDtypeStruct((B, T_out, C_out), jnp.float32),
        grid=(B,),
        in_specs=[
            pl.BlockSpec((1, R, stride * C_in), lambda i: (i, 0, 0)),
            pl.BlockSpec((K, C_in, C_out), lambda i: (0, 0, 0)),
            pl.BlockSpec((1, C_out), lambda i: (0, 0)),
        ],
        out_specs=pl.BlockSpec((1, T_out, C_out), lambda i: (i, 0, 0)),
        compiler_params=_parallel(),
    )(x.reshape(B, R, stride * C_in), w_taps,
      b.reshape(1, C_out).astype(jnp.float32))


def conv0_waveform(wave, w_taps, b):
    """First extractor conv (C_in=1, kernel=10, stride=5) as a dense matmul.

    The waveform is reshaped to (B, L/5, 5); each patch is two adjacent rows,
    so only a ~2x duplication of a tiny tensor instead of full im2col.
    """
    B, L = wave.shape
    Kw, C_out = w_taps.shape                       # (10, C)
    s = 5
    R = L // s
    xr = wave[:, :R * s].reshape(B, R, s)
    patches = jnp.concatenate([xr[:, :-1, :], xr[:, 1:, :]], axis=-1)   # (B,R-1,10)
    T0 = R - 1
    y = matmul_bias_act(patches.reshape(B * T0, Kw), w_taps, b)
    return y.reshape(B, T0, C_out)


# ----------------------------------------------------------------------------
# Kernel 5: fused attention block (per batch item):
#           QKV proj -> per-head SDPA -> output proj -> residual -> LayerNorm
# ----------------------------------------------------------------------------
def _attn_block_kernel(x_ref, wqkv_ref, bqkv_ref, wo_ref, bo_ref, g_ref,
                       bln_ref, o_ref, *, num_heads, eps):
    T, D = x_ref.shape[1], x_ref.shape[2]
    Dh = D // num_heads
    scale = 1.0 / math.sqrt(Dh)
    x = x_ref[0].astype(jnp.float32)                                   # (T, D)
    qkv = jnp.dot(x.astype(jnp.bfloat16), wqkv_ref[...].astype(jnp.bfloat16),
                  preferred_element_type=jnp.float32) + bqkv_ref[...]  # (T, 3D)
    wo = wo_ref[...].astype(jnp.bfloat16)                              # (D, D)
    proj = jnp.zeros((T, D), jnp.float32)
    for h in range(num_heads):                     # static unroll over heads
        q = qkv[:, h * Dh:(h + 1) * Dh] * scale
        k = qkv[:, D + h * Dh:D + (h + 1) * Dh]
        v = qkv[:, 2 * D + h * Dh:2 * D + (h + 1) * Dh]
        s = lax.dot_general(q.astype(jnp.bfloat16), k.astype(jnp.bfloat16),
                            dimension_numbers=(((1,), (1,)), ((), ())),
                            preferred_element_type=jnp.float32)        # (T, T)
        s = s - jnp.max(s, axis=-1, keepdims=True)
        p = jnp.exp(s)
        p = p * pl.reciprocal(jnp.sum(p, axis=-1, keepdims=True), approx=True)
        oh = jnp.dot(p.astype(jnp.bfloat16), v.astype(jnp.bfloat16),
                     preferred_element_type=jnp.float32)               # (T, Dh)
        # fold head h straight through its slice of the output projection
        proj = proj + jnp.dot(oh.astype(jnp.bfloat16), wo[h * Dh:(h + 1) * Dh, :],
                              preferred_element_type=jnp.float32)
    y = proj + bo_ref[...] + x                                         # residual
    mean = jnp.mean(y, axis=-1, keepdims=True)
    var = jnp.mean((y - mean) ** 2, axis=-1, keepdims=True)
    out = (y - mean) * lax.rsqrt(var + eps) * g_ref[...] + bln_ref[...]
    o_ref[0] = out.astype(o_ref.dtype)


def attention_block(x, lp, num_heads, eps=1e-5):
    B, T, D = x.shape
    return pl.pallas_call(
        functools.partial(_attn_block_kernel, num_heads=num_heads, eps=eps),
        out_shape=jax.ShapeDtypeStruct((B, T, D), jnp.float32),
        grid=(B,),
        in_specs=[
            pl.BlockSpec((1, T, D), lambda i: (i, 0, 0)),
            pl.BlockSpec((D, 3 * D), lambda i: (0, 0)),
            pl.BlockSpec((1, 3 * D), lambda i: (0, 0)),
            pl.BlockSpec((D, D), lambda i: (0, 0)),
            pl.BlockSpec((1, D), lambda i: (0, 0)),
            pl.BlockSpec((1, D), lambda i: (0, 0)),
            pl.BlockSpec((1, D), lambda i: (0, 0)),
        ],
        out_specs=pl.BlockSpec((1, T, D), lambda i: (i, 0, 0)),
        compiler_params=_parallel(),
    )(x, lp["wqkv"], lp["bqkv"].reshape(1, 3 * D).astype(jnp.float32),
      lp["wo"], lp["bo"].reshape(1, D).astype(jnp.float32),
      lp["ln1_g"].reshape(1, D).astype(jnp.float32),
      lp["ln1_b"].reshape(1, D).astype(jnp.float32))


# ----------------------------------------------------------------------------
# Kernel 6: fused FFN block: (x@W1+b1 -> GELU -> @W2+b2) + residual + LayerNorm
# ----------------------------------------------------------------------------
def _ffn_block_kernel(x_ref, w1_ref, b1_ref, w2_ref, b2_ref, g_ref, bln_ref,
                      o_ref, *, eps):
    x = x_ref[...].astype(jnp.float32)
    h = jnp.dot(x.astype(jnp.bfloat16), w1_ref[...].astype(jnp.bfloat16),
                preferred_element_type=jnp.float32) + b1_ref[...]
    h = _gelu(h)
    y = jnp.dot(h.astype(jnp.bfloat16), w2_ref[...].astype(jnp.bfloat16),
                preferred_element_type=jnp.float32) + b2_ref[...]
    y = y + x                                                          # residual
    mean = jnp.mean(y, axis=-1, keepdims=True)
    var = jnp.mean((y - mean) ** 2, axis=-1, keepdims=True)
    o_ref[...] = ((y - mean) * lax.rsqrt(var + eps) * g_ref[...]
                  + bln_ref[...]).astype(o_ref.dtype)


def ffn_block(x2, lp, eps=1e-5, cap=256):
    M, D = x2.shape
    F = lp["w1"].shape[1]
    tm, Mp = _row_tiling(M, cap)
    xp = x2 if Mp == M else jnp.pad(x2, ((0, Mp - M), (0, 0)))
    out = pl.pallas_call(
        functools.partial(_ffn_block_kernel, eps=eps),
        out_shape=jax.ShapeDtypeStruct((Mp, D), jnp.float32),
        grid=(Mp // tm,),
        in_specs=[
            pl.BlockSpec((tm, D), lambda i: (i, 0)),
            pl.BlockSpec((D, F), lambda i: (0, 0)),
            pl.BlockSpec((1, F), lambda i: (0, 0)),
            pl.BlockSpec((F, D), lambda i: (0, 0)),
            pl.BlockSpec((1, D), lambda i: (0, 0)),
            pl.BlockSpec((1, D), lambda i: (0, 0)),
            pl.BlockSpec((1, D), lambda i: (0, 0)),
        ],
        out_specs=pl.BlockSpec((tm, D), lambda i: (i, 0)),
        compiler_params=_parallel(),
    )(xp, lp["w1"], lp["b1"].reshape(1, F).astype(jnp.float32),
      lp["w2"], lp["b2"].reshape(1, D).astype(jnp.float32),
      lp["ln2_g"].reshape(1, D).astype(jnp.float32),
      lp["ln2_b"].reshape(1, D).astype(jnp.float32))
    return out if Mp == M else out[:M]


# ----------------------------------------------------------------------------
# Kernel 7: final LayerNorm + mean-pool over time + classifier head
#           (grid over B so both TensorCores are used on v7x)
# ----------------------------------------------------------------------------
def _final_pool_classify_kernel(x_ref, g_ref, bln_ref, w1_ref, b1_ref,
                                w2_ref, b2_ref, logits_ref, pooled_ref, *, eps):
    x = x_ref[0].astype(jnp.float32)                                   # (T, D)
    mean = jnp.mean(x, axis=-1, keepdims=True)
    var = jnp.mean((x - mean) ** 2, axis=-1, keepdims=True)
    f = (x - mean) * lax.rsqrt(var + eps) * g_ref[...] + bln_ref[...]
    pooled = jnp.mean(f, axis=0, keepdims=True)                        # (1, D)
    h = jnp.dot(pooled.astype(jnp.bfloat16), w1_ref[...].astype(jnp.bfloat16),
                preferred_element_type=jnp.float32) + b1_ref[...]
    h = jnp.maximum(h, 0.0)
    logits = jnp.dot(h.astype(jnp.bfloat16), w2_ref[...].astype(jnp.bfloat16),
                     preferred_element_type=jnp.float32) + b2_ref[...]
    logits_ref[0] = logits.astype(logits_ref.dtype)
    pooled_ref[0] = pooled.astype(pooled_ref.dtype)


def final_pool_classify(x, gamma, beta, w1, b1, w2, b2, eps=1e-5):
    B, T, D = x.shape
    Nh = w1.shape[1]
    C = w2.shape[1]
    logits3, pooled3 = pl.pallas_call(
        functools.partial(_final_pool_classify_kernel, eps=eps),
        out_shape=(jax.ShapeDtypeStruct((B, 1, C), jnp.float32),
                   jax.ShapeDtypeStruct((B, 1, D), jnp.float32)),
        grid=(B,),
        in_specs=[
            pl.BlockSpec((1, T, D), lambda i: (i, 0, 0)),
            pl.BlockSpec((1, D), lambda i: (0, 0)),
            pl.BlockSpec((1, D), lambda i: (0, 0)),
            pl.BlockSpec((D, Nh), lambda i: (0, 0)),
            pl.BlockSpec((1, Nh), lambda i: (0, 0)),
            pl.BlockSpec((Nh, C), lambda i: (0, 0)),
            pl.BlockSpec((1, C), lambda i: (0, 0)),
        ],
        out_specs=(pl.BlockSpec((1, 1, C), lambda i: (i, 0, 0)),
                   pl.BlockSpec((1, 1, D), lambda i: (i, 0, 0))),
        compiler_params=_parallel(),
    )(x, gamma.reshape(1, D).astype(jnp.float32),
      beta.reshape(1, D).astype(jnp.float32),
      w1, b1.reshape(1, Nh).astype(jnp.float32),
      w2, b2.reshape(1, C).astype(jnp.float32))
    return logits3[:, 0, :], pooled3[:, 0, :]


# ----------------------------------------------------------------------------
# Full forward (== Wav2Vec2Classifier.forward)
# ----------------------------------------------------------------------------
def wav2vec2_classifier_forward(params, input_values, cfg):
    B = input_values.shape[0]
    D = cfg["embed_dim"]

    # --- wav2vec2 conv feature extractor ---
    x = conv0_waveform(input_values.astype(jnp.float32),
                       params["conv0_w"], params["conv0_b"])           # (B,T0,C)
    x = groupnorm_gelu(x, params["gn_g"], params["gn_b"])
    x = conv1d_tap(x, params["conv1_w"], params["conv1_b"], stride=2, act="gelu")
    x = conv1d_tap(x, params["conv2_w"], params["conv2_b"], stride=2, act="gelu")

    # --- feature projection: LayerNorm + Linear fused ---
    Bx, T, C = x.shape
    x = layernorm_matmul(x.reshape(Bx * T, C), params["fp_ln_g"], params["fp_ln_b"],
                         params["fp_w"], params["fp_b"]).reshape(B, T, D)

    # --- convolutional positional embedding (GELU + residual fused in kernel) ---
    pad = cfg["pos_kernel"] // 2
    xp = jnp.pad(x, ((0, 0), (pad, pad), (0, 0)))
    x = conv1d_tap(xp, params["pos_conv_w"], params["pos_conv_b"], stride=1,
                   act="gelu", residual_pad=pad)

    # --- post-norm transformer layers ---
    for lp in params["layers"]:
        x = attention_block(x, lp, cfg["num_heads"])          # attn+res+LN fused
        x = ffn_block(x.reshape(B * T, D), lp).reshape(B, T, D)  # ffn+res+LN fused

    # --- final LayerNorm, pooled = mean(dim=1), logits = classifier(pooled) ---
    logits, pooled = final_pool_classify(
        x, params["final_ln_g"], params["final_ln_b"],
        params["cls_w1"], params["cls_b1"], params["cls_w2"], params["cls_b2"])
    return logits, pooled


# ----------------------------------------------------------------------------
# Deterministic synthetic parameters (stored in kernel-friendly layouts;
# matmul weights in bf16, biases / norm params in f32)
# ----------------------------------------------------------------------------
def init_params(key, cfg):
    keys = iter(jax.random.split(key, 128))

    def nrm(shape, scale=0.05, dtype=jnp.bfloat16):
        return (scale * jax.random.normal(next(keys), shape, dtype=jnp.float32)
                ).astype(dtype)

    def zeros(shape):
        return jnp.zeros(shape, jnp.float32)

    def ones(shape):
        return jnp.ones(shape, jnp.float32)

    C, D, F = cfg["conv_dim"], cfg["embed_dim"], cfg["ffn_dim"]
    G, PK = cfg["pos_groups"], cfg["pos_kernel"]
    Cg = D // G
    Nh, NC = cfg["cls_hidden"], cfg["num_classes"]

    # grouped pos-conv weight -> block-diagonal (K, D, D) tap weight
    pw = 0.05 * jax.random.normal(next(keys), (PK, G, Cg, Cg), dtype=jnp.float32)
    pos_w = jnp.zeros((PK, D, D), jnp.float32)
    for g in range(G):
        pos_w = pos_w.at[:, g * Cg:(g + 1) * Cg, g * Cg:(g + 1) * Cg].set(pw[:, g])

    p = {
        # conv taps stored as (K, C_in, C_out) == PyTorch (C_out, C_in, K).T
        "conv0_w": nrm((10, C)), "conv0_b": zeros((C,)),
        "gn_g": ones((C,)), "gn_b": zeros((C,)),
        "conv1_w": nrm((3, C, C)), "conv1_b": zeros((C,)),
        "conv2_w": nrm((2, C, C)), "conv2_b": zeros((C,)),
        "fp_ln_g": ones((C,)), "fp_ln_b": zeros((C,)),
        "fp_w": nrm((C, D)), "fp_b": zeros((D,)),
        "pos_conv_w": pos_w.astype(jnp.bfloat16), "pos_conv_b": zeros((D,)),
        "final_ln_g": ones((D,)), "final_ln_b": zeros((D,)),
        "cls_w1": nrm((D, Nh)), "cls_b1": zeros((Nh,)),
        "cls_w2": nrm((Nh, NC)), "cls_b2": zeros((NC,)),
    }
    layers = []
    for _ in range(cfg["num_layers"]):
        layers.append({
            "wqkv": nrm((D, 3 * D)), "bqkv": zeros((3 * D,)),   # fused Q|K|V
            "wo": nrm((D, D)), "bo": zeros((D,)),
            "ln1_g": ones((D,)), "ln1_b": zeros((D,)),
            "w1": nrm((D, F)), "b1": zeros((F,)),
            "w2": nrm((F, D)), "b2": zeros((D,)),
            "ln2_g": ones((D,)), "ln2_b": zeros((D,)),
        })
    p["layers"] = layers
    return p


if __name__ == "__main__":
    cfg = dict(
        conv_dim=128,     # scaled-down conv feature dim (512 in WAV2VEC2_BASE)
        embed_dim=128,    # scaled-down encoder_embed_dim (768 in WAV2VEC2_BASE)
        ffn_dim=512,      # scaled-down FFN dim (3072 in WAV2VEC2_BASE)
        num_heads=4,
        num_layers=2,
        pos_groups=4,
        pos_kernel=9,
        cls_hidden=256,   # classifier hidden size (as in the module)
        num_classes=8,
    )
    key = jax.random.PRNGKey(0)
    pkey, xkey = jax.random.split(key)
    params = init_params(pkey, cfg)

    # raw waveform input, like torchaudio wav2vec2: (batch, num_samples)
    input_values = jax.random.normal(xkey, (2, 640), dtype=jnp.float32)

    forward = jax.jit(lambda p, x: wav2vec2_classifier_forward(p, x, cfg))
    logits, pooled = forward(params, input_values)
    jax.block_until_ready((logits, pooled))

    assert logits.shape == (2, cfg["num_classes"]), logits.shape
    assert pooled.shape == (2, cfg["embed_dim"]), pooled.shape
    assert bool(jnp.all(jnp.isfinite(logits))) and bool(jnp.all(jnp.isfinite(pooled)))
    print("KERNEL_OK")
</pallas_src>

<mosaic_0001>
module attributes {stable_mosaic.version = 11 : i64} {
  func.func @_matmul_bias_act_kernel(%arg0: i32, %arg1: memref<254x10xf32, #tpu.memory_space<vmem>>, %arg2: memref<10x128xbf16, #tpu.memory_space<vmem>>, %arg3: memref<1x128xf32, #tpu.memory_space<vmem>>, %arg4: memref<254x128xf32, #tpu.memory_space<vmem>>) attributes {dimension_semantics = [#tpu.dimension_semantics<parallel>], iteration_bounds = array<i64: 1>, scalar_prefetch = 0 : i64, scratch_operands = 0 : i64, tpu.core_type = #tpu.core_type<tc>, window_params = [{transform_indices = @transform_0, window_bounds = array<i64: 254, 10>}, {pipeline_mode = #tpu.pipeline_mode<synchronous>, transform_indices = @transform_1, window_bounds = array<i64: 10, 128>}, {pipeline_mode = #tpu.pipeline_mode<synchronous>, transform_indices = @transform_2, window_bounds = array<i64: 1, 128>}, {transform_indices = @transform_3, window_bounds = array<i64: 254, 128>}]} {
    %c0 = arith.constant 0 : index
    %c0_0 = arith.constant 0 : index
    %0 = vector.load %arg1[%c0, %c0_0] : memref<254x10xf32, #tpu.memory_space<vmem>>, vector<254x10xf32>
    %1 = arith.truncf %0 : vector<254x10xf32> to vector<254x10xbf16>
    %c0_1 = arith.constant 0 : index
    %c0_2 = arith.constant 0 : index
    %2 = vector.load %arg2[%c0_1, %c0_2] : memref<10x128xbf16, #tpu.memory_space<vmem>>, vector<10x128xbf16>
    %cst = arith.constant dense<0.000000e+00> : vector<254x128xf32>
    %3 = tpu.matmul %1, %2, %cst {dimension_numbers = #tpu.dot_dimension_numbers<[1], [0], [0], [1], [0, 0, 1, 1], [], []>} : vector<254x10xbf16>, vector<10x128xbf16>, vector<254x128xf32> -> vector<254x128xf32>
    %c0_3 = arith.constant 0 : index
    %c0_4 = arith.constant 0 : index
    %4 = vector.load %arg3[%c0_3, %c0_4] : memref<1x128xf32, #tpu.memory_space<vmem>>, vector<1x128xf32>
    %5 = vector.broadcast %4 : vector<1x128xf32> to vector<254x128xf32>
    %6 = arith.addf %3, %5 : vector<254x128xf32>
    %c0_5 = arith.constant 0 : index
    %c0_6 = arith.constant 0 : index
    %7 = vector.load %arg4[%c0_5, %c0_6] : memref<254x128xf32, #tpu.memory_space<vmem>>, vector<254x128xf32>
    tpu.vector_store %arg4[%c0_5, %c0_6], %6 {strides = array<i32>} : memref<254x128xf32, #tpu.memory_space<vmem>>, vector<254x128xf32>,
    return
  }
  func.func @transform_0(%arg0: i32) -> (i32, i32) {
    %c0_i32 = arith.constant 0 : i32
    %c0_i32_0 = arith.constant 0 : i32
    return %arg0, %c0_i32 : i32, i32
  }
  func.func @transform_1(%arg0: i32) -> (i32, i32) {
    %c0_i32 = arith.constant 0 : i32
    %c0_i32_0 = arith.constant 0 : i32
    %c0_i32_1 = arith.constant 0 : i32
    return %c0_i32, %c0_i32_0 : i32, i32
  }
  func.func @transform_2(%arg0: i32) -> (i32, i32) {
    %c0_i32 = arith.constant 0 : i32
    %c0_i32_0 = arith.constant 0 : i32
    %c0_i32_1 = arith.constant 0 : i32
    return %c0_i32, %c0_i32_0 : i32, i32
  }
  func.func @transform_3(%arg0: i32) -> (i32, i32) {
    %c0_i32 = arith.constant 0 : i32
    %c0_i32_0 = arith.constant 0 : i32
    return %arg0, %c0_i32 : i32, i32
  }
}

module attributes {stable_mosaic.version = 11 : i64} {
  func.func @_groupnorm_gelu_kernel(%arg0: i32, %arg1: memref<1x127x128xf32, #tpu.memory_space<vmem>>, %arg2: memref<1x128xf32, #tpu.memory_space<vmem>>, %arg3: memref<1x128xf32, #tpu.memory_space<vmem>>, %arg4: memref<1x127x128xf32, #tpu.memory_space<vmem>>) attributes {dimension_semantics = [#tpu.dimension_semantics<parallel>], iteration_bounds = array<i64: 2>, scalar_prefetch = 0 : i64, scratch_operands = 0 : i64, tpu.core_type = #tpu.core_type<tc>, window_params = [{transform_indices = @transform_0, window_bounds = array<i64: 1, 127, 128>}, {pipeline_mode = #tpu.pipeline_mode<synchronous>, transform_indices = @transform_1, window_bounds = array<i64: 1, 128>}, {pipeline_mode = #tpu.pipeline_mode<synchronous>, transform_indices = @transform_2, window_bounds = array<i64: 1, 128>}, {transform_indices = @transform_3, window_bounds = array<i64: 1, 127, 128>}]} {
    %c0 = arith.constant 0 : index
    %c0_0 = arith.constant 0 : index
    %c0_1 = arith.constant 0 : index
    %0 = vector.load %arg1[%c0, %c0_0, %c0_1] : memref<1x127x128xf32, #tpu.memory_space<vmem>>, vector<1x127x128xf32>
    %1 = vector.shape_cast %0 : vector<1x127x128xf32> to vector<127x128xf32>
    %cst = arith.constant dense<0.000000e+00> : vector<128xf32>
    %2 = vector.multi_reduction <add>, %1, %cst [0] : vector<127x128xf32> to vector<128xf32>
    %3 = vector.shape_cast %2 : vector<128xf32> to vector<1x128xf32>
    %cst_2 = arith.constant 1.270000e+02 : f32
    %4 = vector.broadcast %cst_2 : f32 to vector<1x128xf32>
    %5 = arith.divf %3, %4 : vector<1x128xf32>
    %6 = vector.broadcast %5 : vector<1x128xf32> to vector<127x128xf32>
    %7 = arith.subf %1, %6 : vector<127x128xf32>
    %8 = arith.mulf %7, %7 : vector<127x128xf32>
    %cst_3 = arith.constant dense<0.000000e+00> : vector<128xf32>
    %9 = vector.multi_reduction <add>, %8, %cst_3 [0] : vector<127x128xf32> to vector<128xf32>
    %10 = vector.shape_cast %9 : vector<128xf32> to vector<1x128xf32>
    %cst_4 = arith.constant 1.270000e+02 : f32
    %11 = vector.broadcast %cst_4 : f32 to vector<1x128xf32>
    %12 = arith.divf %10, %11 : vector<1x128xf32>
    %13 = vector.broadcast %5 : vector<1x128xf32> to vector<127x128xf32>
    %14 = arith.subf %1, %13 : vector<127x128xf32>
    %cst_5 = arith.constant 9.99999974E-6 : f32
    %15 = vector.broadcast %cst_5 : f32 to vector<1x128xf32>
    %16 = arith.addf %12, %15 : vector<1x128xf32>
    %17 = math.rsqrt %16 : vector<1x128xf32>
    %18 = vector.broadcast %17 : vector<1x128xf32> to vector<127x128xf32>
    %19 = arith.mulf %14, %18 : vector<127x128xf32>
    %c0_6 = arith.constant 0 : index
    %c0_7 = arith.constant 0 : index
    %20 = vector.load %arg2[%c0_6, %c0_7] : memref<1x128xf32, #tpu.memory_space<vmem>>, vector<1x128xf32>
    %21 = vector.broadcast %20 : vector<1x128xf32> to vector<127x128xf32>
    %22 = arith.mulf %19, %21 : vector<127x128xf32>
    %c0_8 = arith.constant 0 : index
    %c0_9 = arith.constant 0 : index
    %23 = vector.load %arg3[%c0_8, %c0_9] : memref<1x128xf32, #tpu.memory_space<vmem>>, vector<1x128xf32>
    %24 = vector.broadcast %23 : vector<1x128xf32> to vector<127x128xf32>
    %25 = arith.addf %22, %24 : vector<127x128xf32>
    %cst_10 = arith.constant 5.000000e-01 : f32
    %26 = vector.broadcast %cst_10 : f32 to vector<127x128xf32>
    %27 = arith.mulf %26, %25 : vector<127x128xf32>
    %cst_11 = arith.constant 4.471500e-02 : f32
    %28 = vector.broadcast %cst_11 : f32 to vector<127x128xf32>
    %29 = arith.mulf %28, %25 : vector<127x128xf32>
    %30 = arith.mulf %29, %25 : vector<127x128xf32>
    %31 = arith.mulf %30, %25 : vector<127x128xf32>
    %32 = arith.addf %25, %31 : vector<127x128xf32>
    %cst_12 = arith.constant 0.797884583 : f32
    %33 = vector.broadcast %cst_12 : f32 to vector<127x128xf32>
    %34 = arith.mulf %33, %32 : vector<127x128xf32>
    %35 = math.tanh %34 : vector<127x128xf32>
    %cst_13 = arith.constant 1.000000e+00 : f32
    %36 = vector.broadcast %cst_13 : f32 to vector<127x128xf32>
    %37 = arith.addf %36, %35 : vector<127x128xf32>
    %38 = arith.mulf %27, %37 : vector<127x128xf32>
    %c0_14 = arith.constant 0 : index
    %c0_15 = arith.constant 0 : index
    %c0_16 = arith.constant 0 : index
    %39 = vector.load %arg4[%c0_14, %c0_15, %c0_16] : memref<1x127x128xf32, #tpu.memory_space<vmem>>, vector<1x127x128xf32>
    %40 = vector.shape_cast %39 : vector<1x127x128xf32> to vector<127x128xf32>
    %41 = vector.shape_cast %38 : vector<127x128xf32> to vector<1x127x128xf32>
    tpu.vector_store %arg4[%c0_14, %c0_15, %c0_16], %41 {strides = array<i32>} : memref<1x127x128xf32, #tpu.memory_space<vmem>>, vector<1x127x128xf32>,
    return
  }
  func.func @transform_0(%arg0: i32) -> (i32, i32, i32) {
    %c0_i32 = arith.constant 0 : i32
    %c0_i32_0 = arith.constant 0 : i32
    %c0_i32_1 = arith.constant 0 : i32
    return %arg0, %c0_i32, %c0_i32_0 : i32, i32, i32
  }
  func.func @transform_1(%arg0: i32) -> (i32, i32) {
    %c0_i32 = arith.constant 0 : i32
    %c0_i32_0 = arith.constant 0 : i32
    %c0_i32_1 = arith.constant 0 : i32
    return %c0_i32, %c0_i32_0 : i32, i32
  }
  func.func @transform_2(%arg0: i32) -> (i32, i32) {
    %c0_i32 = arith.constant 0 : i32
    %c0_i32_0 = arith.constant 0 : i32
    %c0_i32_1 = arith.constant 0 : i32
    return %c0_i32, %c0_i32_0 : i32, i32
  }
  func.func @transform_3(%arg0: i32) -> (i32, i32, i32) {
    %c0_i32 = arith.constant 0 : i32
    %c0_i32_0 = arith.constant 0 : i32
    %c0_i32_1 = arith.constant 0 : i32
    return %arg0, %c0_i32, %c0_i32_0 : i32, i32, i32
  }
}

module attributes {stable_mosaic.version = 11 : i64} {
  func.func @_conv_tap_kernel(%arg0: i32, %arg1: memref<1x64x256xf32, #tpu.memory_space<vmem>>, %arg2: memref<3x128x128xbf16, #tpu.memory_space<vmem>>, %arg3: memref<1x128xf32, #tpu.memory_space<vmem>>, %arg4: memref<1x63x128xf32, #tpu.memory_space<vmem>>) attributes {dimension_semantics = [#tpu.dimension_semantics<parallel>], iteration_bounds = array<i64: 2>, scalar_prefetch = 0 : i64, scratch_operands = 0 : i64, tpu.core_type = #tpu.core_type<tc>, window_params = [{transform_indices = @transform_0, window_bounds = array<i64: 1, 64, 256>}, {pipeline_mode = #tpu.pipeline_mode<synchronous>, transform_indices = @transform_1, window_bounds = array<i64: 3, 128, 128>}, {pipeline_mode = #tpu.pipeline_mode<synchronous>, transform_indices = @transform_2, window_bounds = array<i64: 1, 128>}, {transform_indices = @transform_3, window_bounds = array<i64: 1, 63, 128>}]} {
    %c0 = arith.constant 0 : index
    %c0_0 = arith.constant 0 : index
    %c0_1 = arith.constant 0 : index
    %0 = vector.load %arg1[%c0, %c0_0, %c0_1] : memref<1x64x256xf32, #tpu.memory_space<vmem>>, vector<1x64x256xf32>
    %1 = vector.shape_cast %0 : vector<1x64x256xf32> to vector<64x256xf32>
    %cst = arith.constant 0.000000e+00 : f32
    %2 = vector.broadcast %cst : f32 to vector<63x128xf32>
    %3 = vector.extract_strided_slice %1 {offsets = [0, 0], sizes = [63, 128], strides = [1, 1]} : vector<64x256xf32> to vector<63x128xf32>
    %4 = arith.truncf %3 : vector<63x128xf32> to vector<63x128xbf16>
    %c0_2 = arith.constant 0 : index
    %c0_3 = arith.constant 0 : index
    %c0_4 = arith.constant 0 : index
    %5 = vector.load %arg2[%c0_2, %c0_3, %c0_4] : memref<3x128x128xbf16, #tpu.memory_space<vmem>>, vector<1x128x128xbf16>
    %6 = vector.shape_cast %5 : vector<1x128x128xbf16> to vector<128x128xbf16>
    %cst_5 = arith.constant dense<0.000000e+00> : vector<63x128xf32>
    %7 = tpu.matmul %4, %6, %cst_5 {dimension_numbers = #tpu.dot_dimension_numbers<[1], [0], [0], [1], [0, 0, 1, 1], [], []>} : vector<63x128xbf16>, vector<128x128xbf16>, vector<63x128xf32> -> vector<63x128xf32>
    %8 = arith.addf %2, %7 : vector<63x128xf32>
    %9 = vector.extract_strided_slice %1 {offsets = [0, 128], sizes = [63, 128], strides = [1, 1]} : vector<64x256xf32> to vector<63x128xf32>
    %10 = arith.truncf %9 : vector<63x128xf32> to vector<63x128xbf16>
    %c1 = arith.constant 1 : index
    %c0_6 = arith.constant 0 : index
    %c0_7 = arith.constant 0 : index
    %11 = vector.load %arg2[%c1, %c0_6, %c0_7] : memref<3x128x128xbf16, #tpu.memory_space<vmem>>, vector<1x128x128xbf16>
    %12 = vector.shape_cast %11 : vector<1x128x128xbf16> to vector<128x128xbf16>
    %cst_8 = arith.constant dense<0.000000e+00> : vector<63x128xf32>
    %13 = tpu.matmul %10, %12, %cst_8 {dimension_numbers = #tpu.dot_dimension_numbers<[1], [0], [0], [1], [0, 0, 1, 1], [], []>} : vector<63x128xbf16>, vector<128x128xbf16>, vector<63x128xf32> -> vector<63x128xf32>
    %14 = arith.addf %8, %13 : vector<63x128xf32>
    %15 = vector.extract_strided_slice %1 {offsets = [1, 0], sizes = [63, 128], strides = [1, 1]} : vector<64x256xf32> to vector<63x128xf32>
    %16 = arith.truncf %15 : vector<63x128xf32> to vector<63x128xbf16>
    %c2 = arith.constant 2 : index
    %c0_9 = arith.constant 0 : index
    %c0_10 = arith.constant 0 : index
    %17 = vector.load %arg2[%c2, %c0_9, %c0_10] : memref<3x128x128xbf16, #tpu.memory_space<vmem>>, vector<1x128x128xbf16>
    %18 = vector.shape_cast %17 : vector<1x128x128xbf16> to vector<128x128xbf16>
    %cst_11 = arith.constant dense<0.000000e+00> : vector<63x128xf32>
    %19 = tpu.matmul %16, %18, %cst_11 {dimension_numbers = #tpu.dot_dimension_numbers<[1], [0], [0], [1], [0, 0, 1, 1], [], []>} : vector<63x128xbf16>, vector<128x128xbf16>, vector<63x128xf32> -> vector<63x128xf32>
    %20 = arith.addf %14, %19 : vector<63x128xf32>
    %c0_12 = arith.constant 0 : index
    %c0_13 = arith.constant 0 : index
    %21 = vector.load %arg3[%c0_12, %c0_13] : memref<1x128xf32, #tpu.memory_space<vmem>>, vector<1x128xf32>
    %22 = vector.broadcast %21 : vector<1x128xf32> to vector<63x128xf32>
    %23 = arith.addf %20, %22 : vector<63x128xf32>
    %cst_14 = arith.constant 5.000000e-01 : f32
    %24 = vector.broadcast %cst_14 : f32 to vector<63x128xf32>
    %25 = arith.mulf %24, %23 : vector<63x128xf32>
    %cst_15 = arith.constant 4.471500e-02 : f32
    %26 = vector.broadcast %cst_15 : f32 to vector<63x128xf32>
    %27 = arith.mulf %26, %23 : vector<63x128xf32>
    %28 = arith.mulf %27, %23 : vector<63x128xf32>
    %29 = arith.mulf %28, %23 : vector<63x128xf32>
    %30 = arith.addf %23, %29 : vector<63x128xf32>
    %cst_16 = arith.constant 0.797884583 : f32
    %31 = vector.broadcast %cst_16 : f32 to vector<63x128xf32>
    %32 = arith.mulf %31, %30 : vector<63x128xf32>
    %33 = math.tanh %32 : vector<63x128xf32>
    %cst_17 = arith.constant 1.000000e+00 : f32
    %34 = vector.broadcast %cst_17 : f32 to vector<63x128xf32>
    %35 = arith.addf %34, %33 : vector<63x128xf32>
    %36 = arith.mulf %25, %35 : vector<63x128xf32>
    %c0_18 = arith.constant 0 : index
    %c0_19 = arith.constant 0 : index
    %c0_20 = arith.constant 0 : index
    %37 = vector.load %arg4[%c0_18, %c0_19, %c0_20] : memref<1x63x128xf32, #tpu.memory_space<vmem>>, vector<1x63x128xf32>
    %38 = vector.shape_cast %37 : vector<1x63x128xf32> to vector<63x128xf32>
    %39 = vector.shape_cast %36 : vector<63x128xf32> to vector<1x63x128xf32>
    tpu.vector_store %arg4[%c0_18, %c0_19, %c0_20], %39 {strides = array<i32>} : memref<1x63x128xf32, #tpu.memory_space<vmem>>, vector<1x63x128xf32>,
    return
  }
  func.func @transform_0(%arg0: i32) -> (i32, i32, i32) {
    %c0_i32 = arith.constant 0 : i32
    %c0_i32_0 = arith.constant 0 : i32
    %c0_i32_1 = arith.constant 0 : i32
    return %arg0, %c0_i32, %c0_i32_0 : i32, i32, i32
  }
  func.func @transform_1(%arg0: i32) -> (i32, i32, i32) {
    %c0_i32 = arith.constant 0 : i32
    %c0_i32_0 = arith.constant 0 : i32
    %c0_i32_1 = arith.constant 0 : i32
    %c0_i32_2 = arith.constant 0 : i32
    return %c0_i32, %c0_i32_0, %c0_i32_1 : i32, i32, i32
  }
  func.func @transform_2(%arg0: i32) -> (i32, i32) {
    %c0_i32 = arith.constant 0 : i32
    %c0_i32_0 = arith.constant 0 : i32
    %c0_i32_1 = arith.constant 0 : i32
    return %c0_i32, %c0_i32_0 : i32, i32
  }
  func.func @transform_3(%arg0: i32) -> (i32, i32, i32) {
    %c0_i32 = arith.constant 0 : i32
    %c0_i32_0 = arith.constant 0 : i32
    %c0_i32_1 = arith.constant 0 : i32
    return %arg0, %c0_i32, %c0_i32_0 : i32, i32, i32
  }
}

module attributes {stable_mosaic.version = 11 : i64} {
  func.func @_conv_tap_kernel(%arg0: i32, %arg1: memref<1x31x256xf32, #tpu.memory_space<vmem>>, %arg2: memref<2x128x128xbf16, #tpu.memory_space<vmem>>, %arg3: memref<1x128xf32, #tpu.memory_space<vmem>>, %arg4: memref<1x31x128xf32, #tpu.memory_space<vmem>>) attributes {dimension_semantics = [#tpu.dimension_semantics<parallel>], iteration_bounds = array<i64: 2>, scalar_prefetch = 0 : i64, scratch_operands = 0 : i64, tpu.core_type = #tpu.core_type<tc>, window_params = [{transform_indices = @transform_0, window_bounds = array<i64: 1, 31, 256>}, {pipeline_mode = #tpu.pipeline_mode<synchronous>, transform_indices = @transform_1, window_bounds = array<i64: 2, 128, 128>}, {pipeline_mode = #tpu.pipeline_mode<synchronous>, transform_indices = @transform_2, window_bounds = array<i64: 1, 128>}, {transform_indices = @transform_3, window_bounds = array<i64: 1, 31, 128>}]} {
    %c0 = arith.constant 0 : index
    %c0_0 = arith.constant 0 : index
    %c0_1 = arith.constant 0 : index
    %0 = vector.load %arg1[%c0, %c0_0, %c0_1] : memref<1x31x256xf32, #tpu.memory_space<vmem>>, vector<1x31x256xf32>
    %1 = vector.shape_cast %0 : vector<1x31x256xf32> to vector<31x256xf32>
    %cst = arith.constant 0.000000e+00 : f32
    %2 = vector.broadcast %cst : f32 to vector<31x128xf32>
    %3 = vector.extract_strided_slice %1 {offsets = [0, 0], sizes = [31, 128], strides = [1, 1]} : vector<31x256xf32> to vector<31x128xf32>
    %4 = arith.truncf %3 : vector<31x128xf32> to vector<31x128xbf16>
    %c0_2 = arith.constant 0 : index
    %c0_3 = arith.constant 0 : index
    %c0_4 = arith.constant 0 : index
    %5 = vector.load %arg2[%c0_2, %c0_3, %c0_4] : memref<2x128x128xbf16, #tpu.memory_space<vmem>>, vector<1x128x128xbf16>
    %6 = vector.shape_cast %5 : vector<1x128x128xbf16> to vector<128x128xbf16>
    %cst_5 = arith.constant dense<0.000000e+00> : vector<31x128xf32>
    %7 = tpu.matmul %4, %6, %cst_5 {dimension_numbers = #tpu.dot_dimension_numbers<[1], [0], [0], [1], [0, 0, 1, 1], [], []>} : vector<31x128xbf16>, vector<128x128xbf16>, vector<31x128xf32> -> vector<31x128xf32>
    %8 = arith.addf %2, %7 : vector<31x128xf32>
    %9 = vector.extract_strided_slice %1 {offsets = [0, 128], sizes = [31, 128], strides = [1, 1]} : vector<31x256xf32> to vector<31x128xf32>
    %10 = arith.truncf %9 : vector<31x128xf32> to vector<31x128xbf16>
    %c1 = arith.constant 1 : index
    %c0_6 = arith.constant 0 : index
    %c0_7 = arith.constant 0 : index
    %11 = vector.load %arg2[%c1, %c0_6, %c0_7] : memref<2x128x128xbf16, #tpu.memory_space<vmem>>, vector<1x128x128xbf16>
    %12 = vector.shape_cast %11 : vector<1x128x128xbf16> to vector<128x128xbf16>
    %cst_8 = arith.constant dense<0.000000e+00> : vector<31x128xf32>
    %13 = tpu.matmul %10, %12, %cst_8 {dimension_numbers = #tpu.dot_dimension_numbers<[1], [0], [0], [1], [0, 0, 1, 1], [], []>} : vector<31x128xbf16>, vector<128x128xbf16>, vector<31x128xf32> -> vector<31x128xf32>
    %14 = arith.addf %8, %13 : vector<31x128xf32>
    %c0_9 = arith.constant 0 : index
    %c0_10 = arith.constant 0 : index
    %15 = vector.load %arg3[%c0_9, %c0_10] : memref<1x128xf32, #tpu.memory_space<vmem>>, vector<1x128xf32>
    %16 = vector.broadcast %15 : vector<1x128xf32> to vector<31x128xf32>
    %17 = arith.addf %14, %16 : vector<31x128xf32>
    %cst_11 = arith.constant 5.000000e-01 : f32
    %18 = vector.broadcast %cst_11 : f32 to vector<31x128xf32>
    %19 = arith.mulf %18, %17 : vector<31x128xf32>
    %cst_12 = arith.constant 4.471500e-02 : f32
    %20 = vector.broadcast %cst_12 : f32 to vector<31x128xf32>
    %21 = arith.mulf %20, %17 : vector<31x128xf32>
    %22 = arith.mulf %21, %17 : vector<31x128xf32>
    %23 = arith.mulf %22, %17 : vector<31x128xf32>
    %24 = arith.addf %17, %23 : vector<31x128xf32>
    %cst_13 = arith.constant 0.797884583 : f32
    %25 = vector.broadcast %cst_13 : f32 to vector<31x128xf32>
    %26 = arith.mulf %25, %24 : vector<31x128xf32>
    %27 = math.tanh %26 : vector<31x128xf32>
    %cst_14 = arith.constant 1.000000e+00 : f32
    %28 = vector.broadcast %cst_14 : f32 to vector<31x128xf32>
    %29 = arith.addf %28, %27 : vector<31x128xf32>
    %30 = arith.mulf %19, %29 : vector<31x128xf32>
    %c0_15 = arith.constant 0 : index
    %c0_16 = arith.constant 0 : index
    %c0_17 = arith.constant 0 : index
    %31 = vector.load %arg4[%c0_15, %c0_16, %c0_17] : memref<1x31x128xf32, #tpu.memory_space<vmem>>, vector<1x31x128xf32>
    %32 = vector.shape_cast %31 : vector<1x31x128xf32> to vector<31x128xf32>
    %33 = vector.shape_cast %30 : vector<31x128xf32> to vector<1x31x128xf32>
    tpu.vector_store %arg4[%c0_15, %c0_16, %c0_17], %33 {strides = array<i32>} : memref<1x31x128xf32, #tpu.memory_space<vmem>>, vector<1x31x128xf32>,
    return
  }
  func.func @transform_0(%arg0: i32) -> (i32, i32, i32) {
    %c0_i32 = arith.constant 0 : i32
    %c0_i32_0 = arith.constant 0 : i32
    %c0_i32_1 = arith.constant 0 : i32
    return %arg0, %c0_i32, %c0_i32_0 : i32, i32, i32
  }
  func.func @transform_1(%arg0: i32) -> (i32, i32, i32) {
    %c0_i32 = arith.constant 0 : i32
    %c0_i32_0 = arith.constant 0 : i32
    %c0_i32_1 = arith.constant 0 : i32
    %c0_i32_2 = arith.constant 0 : i32
    return %c0_i32, %c0_i32_0, %c0_i32_1 : i32, i32, i32
  }
  func.func @transform_2(%arg0: i32) -> (i32, i32) {
    %c0_i32 = arith.constant 0 : i32
    %c0_i32_0 = arith.constant 0 : i32
    %c0_i32_1 = arith.constant 0 : i32
    return %c0_i32, %c0_i32_0 : i32, i32
  }
  func.func @transform_3(%arg0: i32) -> (i32, i32, i32) {
    %c0_i32 = arith.constant 0 : i32
    %c0_i32_0 = arith.constant 0 : i32
    %c0_i32_1 = arith.constant 0 : i32
    return %arg0, %c0_i32, %c0_i32_0 : i32, i32, i32
  }
}

module attributes {stable_mosaic.version = 11 : i64} {
  func.func @_ln_matmul_kernel(%arg0: i32, %arg1: memref<62x128xf32, #tpu.memory_space<vmem>>, %arg2: memref<1x128xf32, #tpu.memory_space<vmem>>, %arg3: memref<1x128xf32, #tpu.memory_space<vmem>>, %arg4: memref<128x128xbf16, #tpu.memory_space<vmem>>, %arg5: memref<1x128xf32, #tpu.memory_space<vmem>>, %arg6: memref<62x128xf32, #tpu.memory_space<vmem>>) attributes {dimension_semantics = [#tpu.dimension_semantics<parallel>], iteration_bounds = array<i64: 1>, scalar_prefetch = 0 : i64, scratch_operands = 0 : i64, tpu.core_type = #tpu.core_type<tc>, window_params = [{transform_indices = @transform_0, window_bounds = array<i64: 62, 128>}, {pipeline_mode = #tpu.pipeline_mode<synchronous>, transform_indices = @transform_1, window_bounds = array<i64: 1, 128>}, {pipeline_mode = #tpu.pipeline_mode<synchronous>, transform_indices = @transform_2, window_bounds = array<i64: 1, 128>}, {pipeline_mode = #tpu.pipeline_mode<synchronous>, transform_indices = @transform_3, window_bounds = array<i64: 128, 128>}, {pipeline_mode = #tpu.pipeline_mode<synchronous>, transform_indices = @transform_4, window_bounds = array<i64: 1, 128>}, {transform_indices = @transform_5, window_bounds = array<i64: 62, 128>}]} {
    %c0 = arith.constant 0 : index
    %c0_0 = arith.constant 0 : index
    %0 = vector.load %arg1[%c0, %c0_0] : memref<62x128xf32, #tpu.memory_space<vmem>>, vector<62x128xf32>
    %cst = arith.constant dense<0.000000e+00> : vector<62xf32>
    %1 = vector.multi_reduction <add>, %0, %cst [1] : vector<62x128xf32> to vector<62xf32>
    %2 = vector.shape_cast %1 : vector<62xf32> to vector<62x1xf32>
    %cst_1 = arith.constant 1.280000e+02 : f32
    %3 = vector.broadcast %cst_1 : f32 to vector<62x1xf32>
    %4 = arith.divf %2, %3 : vector<62x1xf32>
    %5 = vector.broadcast %4 : vector<62x1xf32> to vector<62x128xf32>
    %6 = arith.subf %0, %5 : vector<62x128xf32>
    %7 = arith.mulf %6, %6 : vector<62x128xf32>
    %cst_2 = arith.constant dense<0.000000e+00> : vector<62xf32>
    %8 = vector.multi_reduction <add>, %7, %cst_2 [1] : vector<62x128xf32> to vector<62xf32>
    %9 = vector.shape_cast %8 : vector<62xf32> to vector<62x1xf32>
    %cst_3 = arith.constant 1.280000e+02 : f32
    %10 = vector.broadcast %cst_3 : f32 to vector<62x1xf32>
    %11 = arith.divf %9, %10 : vector<62x1xf32>
    %12 = vector.broadcast %4 : vector<62x1xf32> to vector<62x128xf32>
    %13 = arith.subf %0, %12 : vector<62x128xf32>
    %cst_4 = arith.constant 9.99999974E-6 : f32
    %14 = vector.broadcast %cst_4 : f32 to vector<62x1xf32>
    %15 = arith.addf %11, %14 : vector<62x1xf32>
    %16 = math.rsqrt %15 : vector<62x1xf32>
    %17 = vector.broadcast %16 : vector<62x1xf32> to vector<62x128xf32>
    %18 = arith.mulf %13, %17 : vector<62x128xf32>
    %c0_5 = arith.constant 0 : index
    %c0_6 = arith.constant 0 : index
    %19 = vector.load %arg2[%c0_5, %c0_6] : memref<1x128xf32, #tpu.memory_space<vmem>>, vector<1x128xf32>
    %20 = vector.broadcast %19 : vector<1x128xf32> to vector<62x128xf32>
    %21 = arith.mulf %18, %20 : vector<62x128xf32>
    %c0_7 = arith.constant 0 : index
    %c0_8 = arith.constant 0 : index
    %22 = vector.load %arg3[%c0_7, %c0_8] : memref<1x128xf32, #tpu.memory_space<vmem>>, vector<1x128xf32>
    %23 = vector.broadcast %22 : vector<1x128xf32> to vector<62x128xf32>
    %24 = arith.addf %21, %23 : vector<62x128xf32>
    %25 = arith.truncf %24 : vector<62x128xf32> to vector<62x128xbf16>
    %c0_9 = arith.constant 0 : index
    %c0_10 = arith.constant 0 : index
    %26 = vector.load %arg4[%c0_9, %c0_10] : memref<128x128xbf16, #tpu.memory_space<vmem>>, vector<128x128xbf16>
    %cst_11 = arith.constant dense<0.000000e+00> : vector<62x128xf32>
    %27 = tpu.matmul %25, %26, %cst_11 {dimension_numbers = #tpu.dot_dimension_numbers<[1], [0], [0], [1], [0, 0, 1, 1], [], []>} : vector<62x128xbf16>, vector<128x128xbf16>, vector<62x128xf32> -> vector<62x128xf32>
    %c0_12 = arith.constant 0 : index
    %c0_13 = arith.constant 0 : index
    %28 = vector.load %arg5[%c0_12, %c0_13] : memref<1x128xf32, #tpu.memory_space<vmem>>, vector<1x128xf32>
    %29 = vector.broadcast %28 : vector<1x128xf32> to vector<62x128xf32>
    %30 = arith.addf %27, %29 : vector<62x128xf32>
    %c0_14 = arith.constant 0 : index
    %c0_15 = arith.constant 0 : index
    %31 = vector.load %arg6[%c0_14, %c0_15] : memref<62x128xf32, #tpu.memory_space<vmem>>, vector<62x128xf32>
    tpu.vector_store %arg6[%c0_14, %c0_15], %30 {strides = array<i32>} : memref<62x128xf32, #tpu.memory_space<vmem>>, vector<62x128xf32>,
    return
  }
  func.func @transform_0(%arg0: i32) -> (i32, i32) {
    %c0_i32 = arith.constant 0 : i32
    %c0_i32_0 = arith.constant 0 : i32
    return %arg0, %c0_i32 : i32, i32
  }
  func.func @transform_1(%arg0: i32) -> (i32, i32) {
    %c0_i32 = arith.constant 0 : i32
    %c0_i32_0 = arith.constant 0 : i32
    %c0_i32_1 = arith.constant 0 : i32
    return %c0_i32, %c0_i32_0 : i32, i32
  }
  func.func @transform_2(%arg0: i32) -> (i32, i32) {
    %c0_i32 = arith.constant 0 : i32
    %c0_i32_0 = arith.constant 0 : i32
    %c0_i32_1 = arith.constant 0 : i32
    return %c0_i32, %c0_i32_0 : i32, i32
  }
  func.func @transform_3(%arg0: i32) -> (i32, i32) {
    %c0_i32 = arith.constant 0 : i32
    %c0_i32_0 = arith.constant 0 : i32
    %c0_i32_1 = arith.constant 0 : i32
    return %c0_i32, %c0_i32_0 : i32, i32
  }
  func.func @transform_4(%arg0: i32) -> (i32, i32) {
    %c0_i32 = arith.constant 0 : i32
    %c0_i32_0 = arith.constant 0 : i32
    %c0_i32_1 = arith.constant 0 : i32
    return %c0_i32, %c0_i32_0 : i32, i32
  }
  func.func @transform_5(%arg0: i32) -> (i32, i32) {
    %c0_i32 = arith.constant 0 : i32
    %c0_i32_0 = arith.constant 0 : i32
    return %arg0, %c0_i32 : i32, i32
  }
}

module attributes {stable_mosaic.version = 11 : i64} {
  func.func @_conv_tap_kernel(%arg0: i32, %arg1: memref<1x39x128xf32, #tpu.memory_space<vmem>>, %arg2: memref<9x128x128xbf16, #tpu.memory_space<vmem>>, %arg3: memref<1x128xf32, #tpu.memory_space<vmem>>, %arg4: memref<1x31x128xf32, #tpu.memory_space<vmem>>) attributes {dimension_semantics = [#tpu.dimension_semantics<parallel>], iteration_bounds = array<i64: 2>, scalar_prefetch = 0 : i64, scratch_operands = 0 : i64, tpu.core_type = #tpu.core_type<tc>, window_params = [{transform_indices = @transform_0, window_bounds = array<i64: 1, 39, 128>}, {pipeline_mode = #tpu.pipeline_mode<synchronous>, transform_indices = @transform_1, window_bounds = array<i64: 9, 128, 128>}, {pipeline_mode = #tpu.pipeline_mode<synchronous>, transform_indices = @transform_2, window_bounds = array<i64: 1, 128>}, {transform_indices = @transform_3, window_bounds = array<i64: 1, 31, 128>}]} {
    %c0 = arith.constant 0 : index
    %c0_0 = arith.constant 0 : index
    %c0_1 = arith.constant 0 : index
    %0 = vector.load %arg1[%c0, %c0_0, %c0_1] : memref<1x39x128xf32, #tpu.memory_space<vmem>>, vector<1x39x128xf32>
    %1 = vector.shape_cast %0 : vector<1x39x128xf32> to vector<39x128xf32>
    %cst = arith.constant 0.000000e+00 : f32
    %2 = vector.broadcast %cst : f32 to vector<31x128xf32>
    %3 = vector.extract_strided_slice %1 {offsets = [0, 0], sizes = [31, 128], strides = [1, 1]} : vector<39x128xf32> to vector<31x128xf32>
    %4 = arith.truncf %3 : vector<31x128xf32> to vector<31x128xbf16>
    %c0_2 = arith.constant 0 : index
    %c0_3 = arith.constant 0 : index
    %c0_4 = arith.constant 0 : index
    %5 = vector.load %arg2[%c0_2, %c0_3, %c0_4] : memref<9x128x128xbf16, #tpu.memory_space<vmem>>, vector<1x128x128xbf16>
    %6 = vector.shape_cast %5 : vector<1x128x128xbf16> to vector<128x128xbf16>
    %cst_5 = arith.constant dense<0.000000e+00> : vector<31x128xf32>
    %7 = tpu.matmul %4, %6, %cst_5 {dimension_numbers = #tpu.dot_dimension_numbers<[1], [0], [0], [1], [0, 0, 1, 1], [], []>} : vector<31x128xbf16>, vector<128x128xbf16>, vector<31x128xf32> -> vector<31x128xf32>
    %8 = arith.addf %2, %7 : vector<31x128xf32>
    %9 = vector.extract_strided_slice %1 {offsets = [1, 0], sizes = [31, 128], strides = [1, 1]} : vector<39x128xf32> to vector<31x128xf32>
    %10 = arith.truncf %9 : vector<31x128xf32> to vector<31x128xbf16>
    %c1 = arith.constant 1 : index
    %c0_6 = arith.constant 0 : index
    %c0_7 = arith.constant 0 : index
    %11 = vector.load %arg2[%c1, %c0_6, %c0_7] : memref<9x128x128xbf16, #tpu.memory_space<vmem>>, vector<1x128x128xbf16>
    %12 = vector.shape_cast %11 : vector<1x128x128xbf16> to vector<128x128xbf16>
    %cst_8 = arith.constant dense<0.000000e+00> : vector<31x128xf32>
    %13 = tpu.matmul %10, %12, %cst_8 {dimension_numbers = #tpu.dot_dimension_numbers<[1], [0], [0], [1], [0, 0, 1, 1], [], []>} : vector<31x128xbf16>, vector<128x128xbf16>, vector<31x128xf32> -> vector<31x128xf32>
    %14 = arith.addf %8, %13 : vector<31x128xf32>
    %15 = vector.extract_strided_slice %1 {offsets = [2, 0], sizes = [31, 128], strides = [1, 1]} : vector<39x128xf32> to vector<31x128xf32>
    %16 = arith.truncf %15 : vector<31x128xf32> to vector<31x128xbf16>
    %c2 = arith.constant 2 : index
    %c0_9 = arith.constant 0 : index
    %c0_10 = arith.constant 0 : index
    %17 = vector.load %arg2[%c2, %c0_9, %c0_10] : memref<9x128x128xbf16, #tpu.memory_space<vmem>>, vector<1x128x128xbf16>
    %18 = vector.shape_cast %17 : vector<1x128x128xbf16> to vector<128x128xbf16>
    %cst_11 = arith.constant dense<0.000000e+00> : vector<31x128xf32>
    %19 = tpu.matmul %16, %18, %cst_11 {dimension_numbers = #tpu.dot_dimension_numbers<[1], [0], [0], [1], [0, 0, 1, 1], [], []>} : vector<31x128xbf16>, vector<128x128xbf16>, vector<31x128xf32> -> vector<31x128xf32>
    %20 = arith.addf %14, %19 : vector<31x128xf32>
    %21 = vector.extract_strided_slice %1 {offsets = [3, 0], sizes = [31, 128], strides = [1, 1]} : vector<39x128xf32> to vector<31x128xf32>
    %22 = arith.truncf %21 : vector<31x128xf32> to vector<31x128xbf16>
    %c3 = arith.constant 3 : index
    %c0_12 = arith.constant 0 : index
    %c0_13 = arith.constant 0 : index
    %23 = vector.load %arg2[%c3, %c0_12, %c0_13] : memref<9x128x128xbf16, #tpu.memory_space<vmem>>, vector<1x128x128xbf16>
    %24 = vector.shape_cast %23 : vector<1x128x128xbf16> to vector<128x128xbf16>
    %cst_14 = arith.constant dense<0.000000e+00> : vector<31x128xf32>
    %25 = tpu.matmul %22, %24, %cst_14 {dimension_numbers = #tpu.dot_dimension_numbers<[1], [0], [0], [1], [0, 0, 1, 1], [], []>} : vector<31x128xbf16>, vector<128x128xbf16>, vector<31x128xf32> -> vector<31x128xf32>
    %26 = arith.addf %20, %25 : vector<31x128xf32>
    %27 = vector.extract_strided_slice %1 {offsets = [4, 0], sizes = [31, 128], strides = [1, 1]} : vector<39x128xf32> to vector<31x128xf32>
    %28 = arith.truncf %27 : vector<31x128xf32> to vector<31x128xbf16>
    %c4 = arith.constant 4 : index
    %c0_15 = arith.constant 0 : index
    %c0_16 = arith.constant 0 : index
    %29 = vector.load %arg2[%c4, %c0_15, %c0_16] : memref<9x128x128xbf16, #tpu.memory_space<vmem>>, vector<1x128x128xbf16>
    %30 = vector.shape_cast %29 : vector<1x128x128xbf16> to vector<128x128xbf16>
    %cst_17 = arith.constant dense<0.000000e+00> : vector<31x128xf32>
    %31 = tpu.matmul %28, %30, %cst_17 {dimension_numbers = #tpu.dot_dimension_numbers<[1], [0], [0], [1], [0, 0, 1, 1], [], []>} : vector<31x128xbf16>, vector<128x128xbf16>, vector<31x128xf32> -> vector<31x128xf32>
    %32 = arith.addf %26, %31 : vector<31x128xf32>
    %33 = vector.extract_strided_slice %1 {offsets = [5, 0], sizes = [31, 128], strides = [1, 1]} : vector<39x128xf32> to vector<31x128xf32>
    %34 = arith.truncf %33 : vector<31x128xf32> to vector<31x128xbf16>
    %c5 = arith.constant 5 : index
    %c0_18 = arith.constant 0 : index
    %c0_19 = arith.constant 0 : index
    %35 = vector.load %arg2[%c5, %c0_18, %c0_19] : memref<9x128x128xbf16, #tpu.memory_space<vmem>>, vector<1x128x128xbf16>
    %36 = vector.shape_cast %35 : vector<1x128x128xbf16> to vector<128x128xbf16>
    %cst_20 = arith.constant dense<0.000000e+00> : vector<31x128xf32>
    %37 = tpu.matmul %34, %36, %cst_20 {dimension_numbers = #tpu.dot_dimension_numbers<[1], [0], [0], [1], [0, 0, 1, 1], [], []>} : vector<31x128xbf16>, vector<128x128xbf16>, vector<31x128xf32> -> vector<31x128xf32>
    %38 = arith.addf %32, %37 : vector<31x128xf32>
    %39 = vector.extract_strided_slice %1 {offsets = [6, 0], sizes = [31, 128], strides = [1, 1]} : vector<39x128xf32> to vector<31x128xf32>
    %40 = arith.truncf %39 : vector<31x128xf32> to vector<31x128xbf16>
    %c6 = arith.constant 6 : index
    %c0_21 = arith.constant 0 : index
    %c0_22 = arith.constant 0 : index
    %41 = vector.load %arg2[%c6, %c0_21, %c0_22] : memref<9x128x128xbf16, #tpu.memory_space<vmem>>, vector<1x128x128xbf16>
    %42 = vector.shape_cast %41 : vector<1x128x128xbf16> to vector<128x128xbf16>
    %cst_23 = arith.constant dense<0.000000e+00> : vector<31x128xf32>
    %43 = tpu.matmul %40, %42, %cst_23 {dimension_numbers = #tpu.dot_dimension_numbers<[1], [0], [0], [1], [0, 0, 1, 1], [], []>} : vector<31x128xbf16>, vector<128x128xbf16>, vector<31x128xf32> -> vector<31x128xf32>
    %44 = arith.addf %38, %43 : vector<31x128xf32>
    %45 = vector.extract_strided_slice %1 {offsets = [7, 0], sizes = [31, 128], strides = [1, 1]} : vector<39x128xf32> to vector<31x128xf32>
    %46 = arith.truncf %45 : vector<31x128xf32> to vector<31x128xbf16>
    %c7 = arith.constant 7 : index
    %c0_24 = arith.constant 0 : index
    %c0_25 = arith.constant 0 : index
    %47 = vector.load %arg2[%c7, %c0_24, %c0_25] : memref<9x128x128xbf16, #tpu.memory_space<vmem>>, vector<1x128x128xbf16>
    %48 = vector.shape_cast %47 : vector<1x128x128xbf16> to vector<128x128xbf16>
    %cst_26 = arith.constant dense<0.000000e+00> : vector<31x128xf32>
    %49 = tpu.matmul %46, %48, %cst_26 {dimension_numbers = #tpu.dot_dimension_numbers<[1], [0], [0], [1], [0, 0, 1, 1], [], []>} : vector<31x128xbf16>, vector<128x128xbf16>, vector<31x128xf32> -> vector<31x128xf32>
    %50 = arith.addf %44, %49 : vector<31x128xf32>
    %51 = vector.extract_strided_slice %1 {offsets = [8, 0], sizes = [31, 128], strides = [1, 1]} : vector<39x128xf32> to vector<31x128xf32>
    %52 = arith.truncf %51 : vector<31x128xf32> to vector<31x128xbf16>
    %c8 = arith.constant 8 : index
    %c0_27 = arith.constant 0 : index
    %c0_28 = arith.constant 0 : index
    %53 = vector.load %arg2[%c8, %c0_27, %c0_28] : memref<9x128x128xbf16, #tpu.memory_space<vmem>>, vector<1x128x128xbf16>
    %54 = vector.shape_cast %53 : vector<1x128x128xbf16> to vector<128x128xbf16>
    %cst_29 = arith.constant dense<0.000000e+00> : vector<31x128xf32>
    %55 = tpu.matmul %52, %54, %cst_29 {dimension_numbers = #tpu.dot_dimension_numbers<[1], [0], [0], [1], [0, 0, 1, 1], [], []>} : vector<31x128xbf16>, vector<128x128xbf16>, vector<31x128xf32> -> vector<31x128xf32>
    %56 = arith.addf %50, %55 : vector<31x128xf32>
    %c0_30 = arith.constant 0 : index
    %c0_31 = arith.constant 0 : index
    %57 = vector.load %arg3[%c0_30, %c0_31] : memref<1x128xf32, #tpu.memory_space<vmem>>, vector<1x128xf32>
    %58 = vector.broadcast %57 : vector<1x128xf32> to vector<31x128xf32>
    %59 = arith.addf %56, %58 : vector<31x128xf32>
    %cst_32 = arith.constant 5.000000e-01 : f32
    %60 = vector.broadcast %cst_32 : f32 to vector<31x128xf32>
    %61 = arith.mulf %60, %59 : vector<31x128xf32>
    %cst_33 = arith.constant 4.471500e-02 : f32
    %62 = vector.broadcast %cst_33 : f32 to vector<31x128xf32>
    %63 = arith.mulf %62, %59 : vector<31x128xf32>
    %64 = arith.mulf %63, %59 : vector<31x128xf32>
    %65 = arith.mulf %64, %59 : vector<31x128xf32>
    %66 = arith.addf %59, %65 : vector<31x128xf32>
    %cst_34 = arith.constant 0.797884583 : f32
    %67 = vector.broadcast %cst_34 : f32 to vector<31x128xf32>
    %68 = arith.mulf %67, %66 : vector<31x128xf32>
    %69 = math.tanh %68 : vector<31x128xf32>
    %cst_35 = arith.constant 1.000000e+00 : f32
    %70 = vector.broadcast %cst_35 : f32 to vector<31x128xf32>
    %71 = arith.addf %70, %69 : vector<31x128xf32>
    %72 = arith.mulf %61, %71 : vector<31x128xf32>
    %73 = vector.extract_strided_slice %1 {offsets = [4, 0], sizes = [31, 128], strides = [1, 1]} : vector<39x128xf32> to vector<31x128xf32>
    %74 = arith.addf %72, %73 : vector<31x128xf32>
    %c0_36 = arith.constant 0 : index
    %c0_37 = arith.constant 0 : index
    %c0_38 = arith.constant 0 : index
    %75 = vector.load %arg4[%c0_36, %c0_37, %c0_38] : memref<1x31x128xf32, #tpu.memory_space<vmem>>, vector<1x31x128xf32>
    %76 = vector.shape_cast %75 : vector<1x31x128xf32> to vector<31x128xf32>
    %77 = vector.shape_cast %74 : vector<31x128xf32> to vector<1x31x128xf32>
    tpu.vector_store %arg4[%c0_36, %c0_37, %c0_38], %77 {strides = array<i32>} : memref<1x31x128xf32, #tpu.memory_space<vmem>>, vector<1x31x128xf32>,
    return
  }
  func.func @transform_0(%arg0: i32) -> (i32, i32, i32) {
    %c0_i32 = arith.constant 0 : i32
    %c0_i32_0 = arith.constant 0 : i32
    %c0_i32_1 = arith.constant 0 : i32
    return %arg0, %c0_i32, %c0_i32_0 : i32, i32, i32
  }
  func.func @transform_1(%arg0: i32) -> (i32, i32, i32) {
    %c0_i32 = arith.constant 0 : i32
    %c0_i32_0 = arith.constant 0 : i32
    %c0_i32_1 = arith.constant 0 : i32
    %c0_i32_2 = arith.constant 0 : i32
    return %c0_i32, %c0_i32_0, %c0_i32_1 : i32, i32, i32
  }
  func.func @transform_2(%arg0: i32) -> (i32, i32) {
    %c0_i32 = arith.constant 0 : i32
    %c0_i32_0 = arith.constant 0 : i32
    %c0_i32_1 = arith.constant 0 : i32
    return %c0_i32, %c0_i32_0 : i32, i32
  }
  func.func @transform_3(%arg0: i32) -> (i32, i32, i32) {
    %c0_i32 = arith.constant 0 : i32
    %c0_i32_0 = arith.constant 0 : i32
    %c0_i32_1 = arith.constant 0 : i32
    return %arg0, %c0_i32, %c0_i32_0 : i32, i32, i32
  }
}

module attributes {stable_mosaic.version = 11 : i64} {
  func.func @_attn_block_kernel(%arg0: i32, %arg1: memref<1x31x128xf32, #tpu.memory_space<vmem>>, %arg2: memref<128x384xbf16, #tpu.memory_space<vmem>>, %arg3: memref<1x384xf32, #tpu.memory_space<vmem>>, %arg4: memref<128x128xbf16, #tpu.memory_space<vmem>>, %arg5: memref<1x128xf32, #tpu.memory_space<vmem>>, %arg6: memref<1x128xf32, #tpu.memory_space<vmem>>, %arg7: memref<1x128xf32, #tpu.memory_space<vmem>>, %arg8: memref<1x31x128xf32, #tpu.memory_space<vmem>>) attributes {dimension_semantics = [#tpu.dimension_semantics<parallel>], iteration_bounds = array<i64: 2>, scalar_prefetch = 0 : i64, scratch_operands = 0 : i64, tpu.core_type = #tpu.core_type<tc>, window_params = [{transform_indices = @transform_0, window_bounds = array<i64: 1, 31, 128>}, {pipeline_mode = #tpu.pipeline_mode<synchronous>, transform_indices = @transform_1, window_bounds = array<i64: 128, 384>}, {pipeline_mode = #tpu.pipeline_mode<synchronous>, transform_indices = @transform_2, window_bounds = array<i64: 1, 384>}, {pipeline_mode = #tpu.pipeline_mode<synchronous>, transform_indices = @transform_3, window_bounds = array<i64: 128, 128>}, {pipeline_mode = #tpu.pipeline_mode<synchronous>, transform_indices = @transform_4, window_bounds = array<i64: 1, 128>}, {pipeline_mode = #tpu.pipeline_mode<synchronous>, transform_indices = @transform_5, window_bounds = array<i64: 1, 128>}, {pipeline_mode = #tpu.pipeline_mode<synchronous>, transform_indices = @transform_6, window_bounds = array<i64: 1, 128>}, {transform_indices = @transform_7, window_bounds = array<i64: 1, 31, 128>}]} {
    %c0 = arith.constant 0 : index
    %c0_0 = arith.constant 0 : index
    %c0_1 = arith.constant 0 : index
    %0 = vector.load %arg1[%c0, %c0_0, %c0_1] : memref<1x31x128xf32, #tpu.memory_space<vmem>>, vector<1x31x128xf32>
    %1 = vector.shape_cast %0 : vector<1x31x128xf32> to vector<31x128xf32>
    %2 = arith.truncf %1 : vector<31x128xf32> to vector<31x128xbf16>
    %c0_2 = arith.constant 0 : index
    %c0_3 = arith.constant 0 : index
    %3 = vector.load %arg2[%c0_2, %c0_3] : memref<128x384xbf16, #tpu.memory_space<vmem>>, vector<128x384xbf16>
    %cst = arith.constant dense<0.000000e+00> : vector<31x384xf32>
    %4 = tpu.matmul %2, %3, %cst {dimension_numbers = #tpu.dot_dimension_numbers<[1], [0], [0], [1], [0, 0, 1, 1], [], []>} : vector<31x128xbf16>, vector<128x384xbf16>, vector<31x384xf32> -> vector<31x384xf32>
    %c0_4 = arith.constant 0 : index
    %c0_5 = arith.constant 0 : index
    %5 = vector.load %arg3[%c0_4, %c0_5] : memref<1x384xf32, #tpu.memory_space<vmem>>, vector<1x384xf32>
    %6 = vector.broadcast %5 : vector<1x384xf32> to vector<31x384xf32>
    %7 = arith.addf %4, %6 : vector<31x384xf32>
    %c0_6 = arith.constant 0 : index
    %c0_7 = arith.constant 0 : index
    %8 = vector.load %arg4[%c0_6, %c0_7] : memref<128x128xbf16, #tpu.memory_space<vmem>>, vector<128x128xbf16>
    %cst_8 = arith.constant 0.000000e+00 : f32
    %9 = vector.broadcast %cst_8 : f32 to vector<31x128xf32>
    %10 = vector.extract_strided_slice %7 {offsets = [0, 0], sizes = [31, 32], strides = [1, 1]} : vector<31x384xf32> to vector<31x32xf32>
    %cst_9 = arith.constant 0.176776692 : f32
    %11 = vector.broadcast %cst_9 : f32 to vector<31x32xf32>
    %12 = arith.mulf %10, %11 : vector<31x32xf32>
    %13 = vector.extract_strided_slice %7 {offsets = [0, 128], sizes = [31, 32], strides = [1, 1]} : vector<31x384xf32> to vector<31x32xf32>
    %14 = vector.extract_strided_slice %7 {offsets = [0, 256], sizes = [31, 32], strides = [1, 1]} : vector<31x384xf32> to vector<31x32xf32>
    %15 = arith.truncf %12 : vector<31x32xf32> to vector<31x32xbf16>
    %16 = arith.truncf %13 : vector<31x32xf32> to vector<31x32xbf16>
    %cst_10 = arith.constant dense<0.000000e+00> : vector<31x31xf32>
    %17 = tpu.matmul %15, %16, %cst_10 {dimension_numbers = #tpu.dot_dimension_numbers<[1], [1], [0], [0], [0, 0, 1, 0], [], []>} : vector<31x32xbf16>, vector<31x32xbf16>, vector<31x31xf32> -> vector<31x31xf32>
    %cst_11 = arith.constant dense<0xFF800000> : vector<31xf32>
    %18 = vector.multi_reduction <maximumf>, %17, %cst_11 [1] : vector<31x31xf32> to vector<31xf32>
    %19 = vector.shape_cast %18 : vector<31xf32> to vector<31x1xf32>
    %20 = vector.broadcast %19 : vector<31x1xf32> to vector<31x31xf32>
    %21 = arith.subf %17, %20 : vector<31x31xf32>
    %22 = math.exp %21 : vector<31x31xf32>
    %cst_12 = arith.constant dense<0.000000e+00> : vector<31xf32>
    %23 = vector.multi_reduction <add>, %22, %cst_12 [1] : vector<31x31xf32> to vector<31xf32>
    %24 = vector.shape_cast %23 : vector<31xf32> to vector<31x1xf32>
    %25 = tpu.reciprocal %24 {approx = true} : vector<31x1xf32> -> vector<31x1xf32>
    %26 = vector.broadcast %25 : vector<31x1xf32> to vector<31x31xf32>
    %27 = arith.mulf %22, %26 : vector<31x31xf32>
    %28 = arith.truncf %27 : vector<31x31xf32> to vector<31x31xbf16>
    %29 = arith.truncf %14 : vector<31x32xf32> to vector<31x32xbf16>
    %cst_13 = arith.constant dense<0.000000e+00> : vector<31x32xf32>
    %30 = tpu.matmul %28, %29, %cst_13 {dimension_numbers = #tpu.dot_dimension_numbers<[1], [0], [0], [1], [0, 0, 1, 1], [], []>} : vector<31x31xbf16>, vector<31x32xbf16>, vector<31x32xf32> -> vector<31x32xf32>
    %31 = arith.truncf %30 : vector<31x32xf32> to vector<31x32xbf16>
    %32 = vector.extract_strided_slice %8 {offsets = [0, 0], sizes = [32, 128], strides = [1, 1]} : vector<128x128xbf16> to vector<32x128xbf16>
    %cst_14 = arith.constant dense<0.000000e+00> : vector<31x128xf32>
    %33 = tpu.matmul %31, %32, %cst_14 {dimension_numbers = #tpu.dot_dimension_numbers<[1], [0], [0], [1], [0, 0, 1, 1], [], []>} : vector<31x32xbf16>, vector<32x128xbf16>, vector<31x128xf32> -> vector<31x128xf32>
    %34 = arith.addf %9, %33 : vector<31x128xf32>
    %35 = vector.extract_strided_slice %7 {offsets = [0, 32], sizes = [31, 32], strides = [1, 1]} : vector<31x384xf32> to vector<31x32xf32>
    %cst_15 = arith.constant 0.176776692 : f32
    %36 = vector.broadcast %cst_15 : f32 to vector<31x32xf32>
    %37 = arith.mulf %35, %36 : vector<31x32xf32>
    %38 = vector.extract_strided_slice %7 {offsets = [0, 160], sizes = [31, 32], strides = [1, 1]} : vector<31x384xf32> to vector<31x32xf32>
    %39 = vector.extract_strided_slice %7 {offsets = [0, 288], sizes = [31, 32], strides = [1, 1]} : vector<31x384xf32> to vector<31x32xf32>
    %40 = arith.truncf %37 : vector<31x32xf32> to vector<31x32xbf16>
    %41 = arith.truncf %38 : vector<31x32xf32> to vector<31x32xbf16>
    %cst_16 = arith.constant dense<0.000000e+00> : vector<31x31xf32>
    %42 = tpu.matmul %40, %41, %cst_16 {dimension_numbers = #tpu.dot_dimension_numbers<[1], [1], [0], [0], [0, 0, 1, 0], [], []>} : vector<31x32xbf16>, vector<31x32xbf16>, vector<31x31xf32> -> vector<31x31xf32>
    %cst_17 = arith.constant dense<0xFF800000> : vector<31xf32>
    %43 = vector.multi_reduction <maximumf>, %42, %cst_17 [1] : vector<31x31xf32> to vector<31xf32>
    %44 = vector.shape_cast %43 : vector<31xf32> to vector<31x1xf32>
    %45 = vector.broadcast %44 : vector<31x1xf32> to vector<31x31xf32>
    %46 = arith.subf %42, %45 : vector<31x31xf32>
    %47 = math.exp %46 : vector<31x31xf32>
    %cst_18 = arith.constant dense<0.000000e+00> : vector<31xf32>
    %48 = vector.multi_reduction <add>, %47, %cst_18 [1] : vector<31x31xf32> to vector<31xf32>
    %49 = vector.shape_cast %48 : vector<31xf32> to vector<31x1xf32>
    %50 = tpu.reciprocal %49 {approx = true} : vector<31x1xf32> -> vector<31x1xf32>
    %51 = vector.broadcast %50 : vector<31x1xf32> to vector<31x31xf32>
    %52 = arith.mulf %47, %51 : vector<31x31xf32>
    %53 = arith.truncf %52 : vector<31x31xf32> to vector<31x31xbf16>
    %54 = arith.truncf %39 : vector<31x32xf32> to vector<31x32xbf16>
    %cst_19 = arith.constant dense<0.000000e+00> : vector<31x32xf32>
    %55 = tpu.matmul %53, %54, %cst_19 {dimension_numbers = #tpu.dot_dimension_numbers<[1], [0], [0], [1], [0, 0, 1, 1], [], []>} : vector<31x31xbf16>, vector<31x32xbf16>, vector<31x32xf32> -> vector<31x32xf32>
    %56 = arith.truncf %55 : vector<31x32xf32> to vector<31x32xbf16>
    %57 = vector.extract_strided_slice %8 {offsets = [32, 0], sizes = [32, 128], strides = [1, 1]} : vector<128x128xbf16> to vector<32x128xbf16>
    %cst_20 = arith.constant dense<0.000000e+00> : vector<31x128xf32>
    %58 = tpu.matmul %56, %57, %cst_20 {dimension_numbers = #tpu.dot_dimension_numbers<[1], [0], [0], [1], [0, 0, 1, 1], [], []>} : vector<31x32xbf16>, vector<32x128xbf16>, vector<31x128xf32> -> vector<31x128xf32>
    %59 = arith.addf %34, %58 : vector<31x128xf32>
    %60 = vector.extract_strided_slice %7 {offsets = [0, 64], sizes = [31, 32], strides = [1, 1]} : vector<31x384xf32> to vector<31x32xf32>
    %cst_21 = arith.constant 0.176776692 : f32
    %61 = vector.broadcast %cst_21 : f32 to vector<31x32xf32>
    %62 = arith.mulf %60, %61 : vector<31x32xf32>
    %63 = vector.extract_strided_slice %7 {offsets = [0, 192], sizes = [31, 32], strides = [1, 1]} : vector<31x384xf32> to vector<31x32xf32>
    %64 = vector.extract_strided_slice %7 {offsets = [0, 320], sizes = [31, 32], strides = [1, 1]} : vector<31x384xf32> to vector<31x32xf32>
    %65 = arith.truncf %62 : vector<31x32xf32> to vector<31x32xbf16>
    %66 = arith.truncf %63 : vector<31x32xf32> to vector<31x32xbf16>
    %cst_22 = arith.constant dense<0.000000e+00> : vector<31x31xf32>
    %67 = tpu.matmul %65, %66, %cst_22 {dimension_numbers = #tpu.dot_dimension_numbers<[1], [1], [0], [0], [0, 0, 1, 0], [], []>} : vector<31x32xbf16>, vector<31x32xbf16>, vector<31x31xf32> -> vector<31x31xf32>
    %cst_23 = arith.constant dense<0xFF800000> : vector<31xf32>
    %68 = vector.multi_reduction <maximumf>, %67, %cst_23 [1] : vector<31x31xf32> to vector<31xf32>
    %69 = vector.shape_cast %68 : vector<31xf32> to vector<31x1xf32>
    %70 = vector.broadcast %69 : vector<31x1xf32> to vector<31x31xf32>
    %71 = arith.subf %67, %70 : vector<31x31xf32>
    %72 = math.exp %71 : vector<31x31xf32>
    %cst_24 = arith.constant dense<0.000000e+00> : vector<31xf32>
    %73 = vector.multi_reduction <add>, %72, %cst_24 [1] : vector<31x31xf32> to vector<31xf32>
    %74 = vector.shape_cast %73 : vector<31xf32> to vector<31x1xf32>
    %75 = tpu.reciprocal %74 {approx = true} : vector<31x1xf32> -> vector<31x1xf32>
    %76 = vector.broadcast %75 : vector<31x1xf32> to vector<31x31xf32>
    %77 = arith.mulf %72, %76 : vector<31x31xf32>
    %78 = arith.truncf %77 : vector<31x31xf32> to vector<31x31xbf16>
    %79 = arith.truncf %64 : vector<31x32xf32> to vector<31x32xbf16>
    %cst_25 = arith.constant dense<0.000000e+00> : vector<31x32xf32>
    %80 = tpu.matmul %78, %79, %cst_25 {dimension_numbers = #tpu.dot_dimension_numbers<[1], [0], [0], [1], [0, 0, 1, 1], [], []>} : vector<31x31xbf16>, vector<31x32xbf16>, vector<31x32xf32> -> vector<31x32xf32>
    %81 = arith.truncf %80 : vector<31x32xf32> to vector<31x32xbf16>
    %82 = vector.extract_strided_slice %8 {offsets = [64, 0], sizes = [32, 128], strides = [1, 1]} : vector<128x128xbf16> to vector<32x128xbf16>
    %cst_26 = arith.constant dense<0.000000e+00> : vector<31x128xf32>
    %83 = tpu.matmul %81, %82, %cst_26 {dimension_numbers = #tpu.dot_dimension_numbers<[1], [0], [0], [1], [0, 0, 1, 1], [], []>} : vector<31x32xbf16>, vector<32x128xbf16>, vector<31x128xf32> -> vector<31x128xf32>
    %84 = arith.addf %59, %83 : vector<31x128xf32>
    %85 = vector.extract_strided_slice %7 {offsets = [0, 96], sizes = [31, 32], strides = [1, 1]} : vector<31x384xf32> to vector<31x32xf32>
    %cst_27 = arith.constant 0.176776692 : f32
    %86 = vector.broadcast %cst_27 : f32 to vector<31x32xf32>
    %87 = arith.mulf %85, %86 : vector<31x32xf32>
    %88 = vector.extract_strided_slice %7 {offsets = [0, 224], sizes = [31, 32], strides = [1, 1]} : vector<31x384xf32> to vector<31x32xf32>
    %89 = vector.extract_strided_slice %7 {offsets = [0, 352], sizes = [31, 32], strides = [1, 1]} : vector<31x384xf32> to vector<31x32xf32>
    %90 = arith.truncf %87 : vector<31x32xf32> to vector<31x32xbf16>
    %91 = arith.truncf %88 : vector<31x32xf32> to vector<31x32xbf16>
    %cst_28 = arith.constant dense<0.000000e+00> : vector<31x31xf32>
    %92 = tpu.matmul %90, %91, %cst_28 {dimension_numbers = #tpu.dot_dimension_numbers<[1], [1], [0], [0], [0, 0, 1, 0], [], []>} : vector<31x32xbf16>, vector<31x32xbf16>, vector<31x31xf32> -> vector<31x31xf32>
    %cst_29 = arith.constant dense<0xFF800000> : vector<31xf32>
    %93 = vector.multi_reduction <maximumf>, %92, %cst_29 [1] : vector<31x31xf32> to vector<31xf32>
    %94 = vector.shape_cast %93 : vector<31xf32> to vector<31x1xf32>
    %95 = vector.broadcast %94 : vector<31x1xf32> to vector<31x31xf32>
    %96 = arith.subf %92, %95 : vector<31x31xf32>
    %97 = math.exp %96 : vector<31x31xf32>
    %cst_30 = arith.constant dense<0.000000e+00> : vector<31xf32>
    %98 = vector.multi_reduction <add>, %97, %cst_30 [1] : vector<31x31xf32> to vector<31xf32>
    %99 = vector.shape_cast %98 : vector<31xf32> to vector<31x1xf32>
    %100 = tpu.reciprocal %99 {approx = true} : vector<31x1xf32> -> vector<31x1xf32>
    %101 = vector.broadcast %100 : vector<31x1xf32> to vector<31x31xf32>
    %102 = arith.mulf %97, %101 : vector<31x31xf32>
    %103 = arith.truncf %102 : vector<31x31xf32> to vector<31x31xbf16>
    %104 = arith.truncf %89 : vector<31x32xf32> to vector<31x32xbf16>
    %cst_31 = arith.constant dense<0.000000e+00> : vector<31x32xf32>
    %105 = tpu.matmul %103, %104, %cst_31 {dimension_numbers = #tpu.dot_dimension_numbers<[1], [0], [0], [1], [0, 0, 1, 1], [], []>} : vector<31x31xbf16>, vector<31x32xbf16>, vector<31x32xf32> -> vector<31x32xf32>
    %106 = arith.truncf %105 : vector<31x32xf32> to vector<31x32xbf16>
    %107 = vector.extract_strided_slice %8 {offsets = [96, 0], sizes = [32, 128], strides = [1, 1]} : vector<128x128xbf16> to vector<32x128xbf16>
    %cst_32 = arith.constant dense<0.000000e+00> : vector<31x128xf32>
    %108 = tpu.matmul %106, %107, %cst_32 {dimension_numbers = #tpu.dot_dimension_numbers<[1], [0], [0], [1], [0, 0, 1, 1], [], []>} : vector<31x32xbf16>, vector<32x128xbf16>, vector<31x128xf32> -> vector<31x128xf32>
    %109 = arith.addf %84, %108 : vector<31x128xf32>
    %c0_33 = arith.constant 0 : index
    %c0_34 = arith.constant 0 : index
    %110 = vector.load %arg5[%c0_33, %c0_34] : memref<1x128xf32, #tpu.memory_space<vmem>>, vector<1x128xf32>
    %111 = vector.broadcast %110 : vector<1x128xf32> to vector<31x128xf32>
    %112 = arith.addf %109, %111 : vector<31x128xf32>
    %113 = arith.addf %112, %1 : vector<31x128xf32>
    %cst_35 = arith.constant dense<0.000000e+00> : vector<31xf32>
    %114 = vector.multi_reduction <add>, %113, %cst_35 [1] : vector<31x128xf32> to vector<31xf32>
    %115 = vector.shape_cast %114 : vector<31xf32> to vector<31x1xf32>
    %cst_36 = arith.constant 1.280000e+02 : f32
    %116 = vector.broadcast %cst_36 : f32 to vector<31x1xf32>
    %117 = arith.divf %115, %116 : vector<31x1xf32>
    %118 = vector.broadcast %117 : vector<31x1xf32> to vector<31x128xf32>
    %119 = arith.subf %113, %118 : vector<31x128xf32>
    %120 = arith.mulf %119, %119 : vector<31x128xf32>
    %cst_37 = arith.constant dense<0.000000e+00> : vector<31xf32>
    %121 = vector.multi_reduction <add>, %120, %cst_37 [1] : vector<31x128xf32> to vector<31xf32>
    %122 = vector.shape_cast %121 : vector<31xf32> to vector<31x1xf32>
    %cst_38 = arith.constant 1.280000e+02 : f32
    %123 = vector.broadcast %cst_38 : f32 to vector<31x1xf32>
    %124 = arith.divf %122, %123 : vector<31x1xf32>
    %125 = vector.broadcast %117 : vector<31x1xf32> to vector<31x128xf32>
    %126 = arith.subf %113, %125 : vector<31x128xf32>
    %cst_39 = arith.constant 9.99999974E-6 : f32
    %127 = vector.broadcast %cst_39 : f32 to vector<31x1xf32>
    %128 = arith.addf %124, %127 : vector<31x1xf32>
    %129 = math.rsqrt %128 : vector<31x1xf32>
    %130 = vector.broadcast %129 : vector<31x1xf32> to vector<31x128xf32>
    %131 = arith.mulf %126, %130 : vector<31x128xf32>
    %c0_40 = arith.constant 0 : index
    %c0_41 = arith.constant 0 : index
    %132 = vector.load %arg6[%c0_40, %c0_41] : memref<1x128xf32, #tpu.memory_space<vmem>>, vector<1x128xf32>
    %133 = vector.broadcast %132 : vector<1x128xf32> to vector<31x128xf32>
    %134 = arith.mulf %131, %133 : vector<31x128xf32>
    %c0_42 = arith.constant 0 : index
    %c0_43 = arith.constant 0 : index
    %135 = vector.load %arg7[%c0_42, %c0_43] : memref<1x128xf32, #tpu.memory_space<vmem>>, vector<1x128xf32>
    %136 = vector.broadcast %135 : vector<1x128xf32> to vector<31x128xf32>
    %137 = arith.addf %134, %136 : vector<31x128xf32>
    %c0_44 = arith.constant 0 : index
    %c0_45 = arith.constant 0 : index
    %c0_46 = arith.constant 0 : index
    %138 = vector.load %arg8[%c0_44, %c0_45, %c0_46] : memref<1x31x128xf32, #tpu.memory_space<vmem>>, vector<1x31x128xf32>
    %139 = vector.shape_cast %138 : vector<1x31x128xf32> to vector<31x128xf32>
    %140 = vector.shape_cast %137 : vector<31x128xf32> to vector<1x31x128xf32>
    tpu.vector_store %arg8[%c0_44, %c0_45, %c0_46], %140 {strides = array<i32>} : memref<1x31x128xf32, #tpu.memory_space<vmem>>, vector<1x31x128xf32>,
    return
  }
  func.func @transform_0(%arg0: i32) -> (i32, i32, i32) {
    %c0_i32 = arith.constant 0 : i32
    %c0_i32_0 = arith.constant 0 : i32
    %c0_i32_1 = arith.constant 0 : i32
    return %arg0, %c0_i32, %c0_i32_0 : i32, i32, i32
  }
  func.func @transform_1(%arg0: i32) -> (i32, i32) {
    %c0_i32 = arith.constant 0 : i32
    %c0_i32_0 = arith.constant 0 : i32
    %c0_i32_1 = arith.constant 0 : i32
    return %c0_i32, %c0_i32_0 : i32, i32
  }
  func.func @transform_2(%arg0: i32) -> (i32, i32) {
    %c0_i32 = arith.constant 0 : i32
    %c0_i32_0 = arith.constant 0 : i32
    %c0_i32_1 = arith.constant 0 : i32
    return %c0_i32, %c0_i32_0 : i32, i32
  }
  func.func @transform_3(%arg0: i32) -> (i32, i32) {
    %c0_i32 = arith.constant 0 : i32
    %c0_i32_0 = arith.constant 0 : i32
    %c0_i32_1 = arith.constant 0 : i32
    return %c0_i32, %c0_i32_0 : i32, i32
  }
  func.func @transform_4(%arg0: i32) -> (i32, i32) {
    %c0_i32 = arith.constant 0 : i32
    %c0_i32_0 = arith.constant 0 : i32
    %c0_i32_1 = arith.constant 0 : i32
    return %c0_i32, %c0_i32_0 : i32, i32
  }
  func.func @transform_5(%arg0: i32) -> (i32, i32) {
    %c0_i32 = arith.constant 0 : i32
    %c0_i32_0 = arith.constant 0 : i32
    %c0_i32_1 = arith.constant 0 : i32
    return %c0_i32, %c0_i32_0 : i32, i32
  }
  func.func @transform_6(%arg0: i32) -> (i32, i32) {
    %c0_i32 = arith.constant 0 : i32
    %c0_i32_0 = arith.constant 0 : i32
    %c0_i32_1 = arith.constant 0 : i32
    return %c0_i32, %c0_i32_0 : i32, i32
  }
  func.func @transform_7(%arg0: i32) -> (i32, i32, i32) {
    %c0_i32 = arith.constant 0 : i32
    %c0_i32_0 = arith.constant 0 : i32
    %c0_i32_1 = arith.constant 0 : i32
    return %arg0, %c0_i32, %c0_i32_0 : i32, i32, i32
  }
}

module attributes {stable_mosaic.version = 11 : i64} {
  func.func @_ffn_block_kernel(%arg0: i32, %arg1: memref<62x128xf32, #tpu.memory_space<vmem>>, %arg2: memref<128x512xbf16, #tpu.memory_space<vmem>>, %arg3: memref<1x512xf32, #tpu.memory_space<vmem>>, %arg4: memref<512x128xbf16, #tpu.memory_space<vmem>>, %arg5: memref<1x128xf32, #tpu.memory_space<vmem>>, %arg6: memref<1x128xf32, #tpu.memory_space<vmem>>, %arg7: memref<1x128xf32, #tpu.memory_space<vmem>>, %arg8: memref<62x128xf32, #tpu.memory_space<vmem>>) attributes {dimension_semantics = [#tpu.dimension_semantics<parallel>], iteration_bounds = array<i64: 1>, scalar_prefetch = 0 : i64, scratch_operands = 0 : i64, tpu.core_type = #tpu.core_type<tc>, window_params = [{transform_indices = @transform_0, window_bounds = array<i64: 62, 128>}, {pipeline_mode = #tpu.pipeline_mode<synchronous>, transform_indices = @transform_1, window_bounds = array<i64: 128, 512>}, {pipeline_mode = #tpu.pipeline_mode<synchronous>, transform_indices = @transform_2, window_bounds = array<i64: 1, 512>}, {pipeline_mode = #tpu.pipeline_mode<synchronous>, transform_indices = @transform_3, window_bounds = array<i64: 512, 128>}, {pipeline_mode = #tpu.pipeline_mode<synchronous>, transform_indices = @transform_4, window_bounds = array<i64: 1, 128>}, {pipeline_mode = #tpu.pipeline_mode<synchronous>, transform_indices = @transform_5, window_bounds = array<i64: 1, 128>}, {pipeline_mode = #tpu.pipeline_mode<synchronous>, transform_indices = @transform_6, window_bounds = array<i64: 1, 128>}, {transform_indices = @transform_7, window_bounds = array<i64: 62, 128>}]} {
    %c0 = arith.constant 0 : index
    %c0_0 = arith.constant 0 : index
    %0 = vector.load %arg1[%c0, %c0_0] : memref<62x128xf32, #tpu.memory_space<vmem>>, vector<62x128xf32>
    %1 = arith.truncf %0 : vector<62x128xf32> to vector<62x128xbf16>
    %c0_1 = arith.constant 0 : index
    %c0_2 = arith.constant 0 : index
    %2 = vector.load %arg2[%c0_1, %c0_2] : memref<128x512xbf16, #tpu.memory_space<vmem>>, vector<128x512xbf16>
    %cst = arith.constant dense<0.000000e+00> : vector<62x512xf32>
    %3 = tpu.matmul %1, %2, %cst {dimension_numbers = #tpu.dot_dimension_numbers<[1], [0], [0], [1], [0, 0, 1, 1], [], []>} : vector<62x128xbf16>, vector<128x512xbf16>, vector<62x512xf32> -> vector<62x512xf32>
    %c0_3 = arith.constant 0 : index
    %c0_4 = arith.constant 0 : index
    %4 = vector.load %arg3[%c0_3, %c0_4] : memref<1x512xf32, #tpu.memory_space<vmem>>, vector<1x512xf32>
    %5 = vector.broadcast %4 : vector<1x512xf32> to vector<62x512xf32>
    %6 = arith.addf %3, %5 : vector<62x512xf32>
    %cst_5 = arith.constant 5.000000e-01 : f32
    %7 = vector.broadcast %cst_5 : f32 to vector<62x512xf32>
    %8 = arith.mulf %7, %6 : vector<62x512xf32>
    %cst_6 = arith.constant 4.471500e-02 : f32
    %9 = vector.broadcast %cst_6 : f32 to vector<62x512xf32>
    %10 = arith.mulf %9, %6 : vector<62x512xf32>
    %11 = arith.mulf %10, %6 : vector<62x512xf32>
    %12 = arith.mulf %11, %6 : vector<62x512xf32>
    %13 = arith.addf %6, %12 : vector<62x512xf32>
    %cst_7 = arith.constant 0.797884583 : f32
    %14 = vector.broadcast %cst_7 : f32 to vector<62x512xf32>
    %15 = arith.mulf %14, %13 : vector<62x512xf32>
    %16 = math.tanh %15 : vector<62x512xf32>
    %cst_8 = arith.constant 1.000000e+00 : f32
    %17 = vector.broadcast %cst_8 : f32 to vector<62x512xf32>
    %18 = arith.addf %17, %16 : vector<62x512xf32>
    %19 = arith.mulf %8, %18 : vector<62x512xf32>
    %20 = arith.truncf %19 : vector<62x512xf32> to vector<62x512xbf16>
    %c0_9 = arith.constant 0 : index
    %c0_10 = arith.constant 0 : index
    %21 = vector.load %arg4[%c0_9, %c0_10] : memref<512x128xbf16, #tpu.memory_space<vmem>>, vector<512x128xbf16>
    %cst_11 = arith.constant dense<0.000000e+00> : vector<62x128xf32>
    %22 = tpu.matmul %20, %21, %cst_11 {dimension_numbers = #tpu.dot_dimension_numbers<[1], [0], [0], [1], [0, 0, 1, 1], [], []>} : vector<62x512xbf16>, vector<512x128xbf16>, vector<62x128xf32> -> vector<62x128xf32>
    %c0_12 = arith.constant 0 : index
    %c0_13 = arith.constant 0 : index
    %23 = vector.load %arg5[%c0_12, %c0_13] : memref<1x128xf32, #tpu.memory_space<vmem>>, vector<1x128xf32>
    %24 = vector.broadcast %23 : vector<1x128xf32> to vector<62x128xf32>
    %25 = arith.addf %22, %24 : vector<62x128xf32>
    %26 = arith.addf %25, %0 : vector<62x128xf32>
    %cst_14 = arith.constant dense<0.000000e+00> : vector<62xf32>
    %27 = vector.multi_reduction <add>, %26, %cst_14 [1] : vector<62x128xf32> to vector<62xf32>
    %28 = vector.shape_cast %27 : vector<62xf32> to vector<62x1xf32>
    %cst_15 = arith.constant 1.280000e+02 : f32
    %29 = vector.broadcast %cst_15 : f32 to vector<62x1xf32>
    %30 = arith.divf %28, %29 : vector<62x1xf32>
    %31 = vector.broadcast %30 : vector<62x1xf32> to vector<62x128xf32>
    %32 = arith.subf %26, %31 : vector<62x128xf32>
    %33 = arith.mulf %32, %32 : vector<62x128xf32>
    %cst_16 = arith.constant dense<0.000000e+00> : vector<62xf32>
    %34 = vector.multi_reduction <add>, %33, %cst_16 [1] : vector<62x128xf32> to vector<62xf32>
    %35 = vector.shape_cast %34 : vector<62xf32> to vector<62x1xf32>
    %cst_17 = arith.constant 1.280000e+02 : f32
    %36 = vector.broadcast %cst_17 : f32 to vector<62x1xf32>
    %37 = arith.divf %35, %36 : vector<62x1xf32>
    %38 = vector.broadcast %30 : vector<62x1xf32> to vector<62x128xf32>
    %39 = arith.subf %26, %38 : vector<62x128xf32>
    %cst_18 = arith.constant 9.99999974E-6 : f32
    %40 = vector.broadcast %cst_18 : f32 to vector<62x1xf32>
    %41 = arith.addf %37, %40 : vector<62x1xf32>
    %42 = math.rsqrt %41 : vector<62x1xf32>
    %43 = vector.broadcast %42 : vector<62x1xf32> to vector<62x128xf32>
    %44 = arith.mulf %39, %43 : vector<62x128xf32>
    %c0_19 = arith.constant 0 : index
    %c0_20 = arith.constant 0 : index
    %45 = vector.load %arg6[%c0_19, %c0_20] : memref<1x128xf32, #tpu.memory_space<vmem>>, vector<1x128xf32>
    %46 = vector.broadcast %45 : vector<1x128xf32> to vector<62x128xf32>
    %47 = arith.mulf %44, %46 : vector<62x128xf32>
    %c0_21 = arith.constant 0 : index
    %c0_22 = arith.constant 0 : index
    %48 = vector.load %arg7[%c0_21, %c0_22] : memref<1x128xf32, #tpu.memory_space<vmem>>, vector<1x128xf32>
    %49 = vector.broadcast %48 : vector<1x128xf32> to vector<62x128xf32>
    %50 = arith.addf %47, %49 : vector<62x128xf32>
    %c0_23 = arith.constant 0 : index
    %c0_24 = arith.constant 0 : index
    %51 = vector.load %arg8[%c0_23, %c0_24] : memref<62x128xf32, #tpu.memory_space<vmem>>, vector<62x128xf32>
    tpu.vector_store %arg8[%c0_23, %c0_24], %50 {strides = array<i32>} : memref<62x128xf32, #tpu.memory_space<vmem>>, vector<62x128xf32>,
    return
  }
  func.func @transform_0(%arg0: i32) -> (i32, i32) {
    %c0_i32 = arith.constant 0 : i32
    %c0_i32_0 = arith.constant 0 : i32
    return %arg0, %c0_i32 : i32, i32
  }
  func.func @transform_1(%arg0: i32) -> (i32, i32) {
    %c0_i32 = arith.constant 0 : i32
    %c0_i32_0 = arith.constant 0 : i32
    %c0_i32_1 = arith.constant 0 : i32
    return %c0_i32, %c0_i32_0 : i32, i32
  }
  func.func @transform_2(%arg0: i32) -> (i32, i32) {
    %c0_i32 = arith.constant 0 : i32
    %c0_i32_0 = arith.constant 0 : i32
    %c0_i32_1 = arith.constant 0 : i32
    return %c0_i32, %c0_i32_0 : i32, i32
  }
  func.func @transform_3(%arg0: i32) -> (i32, i32) {
    %c0_i32 = arith.constant 0 : i32
    %c0_i32_0 = arith.constant 0 : i32
    %c0_i32_1 = arith.constant 0 : i32
    return %c0_i32, %c0_i32_0 : i32, i32
  }
  func.func @transform_4(%arg0: i32) -> (i32, i32) {
    %c0_i32 = arith.constant 0 : i32
    %c0_i32_0 = arith.constant 0 : i32
    %c0_i32_1 = arith.constant 0 : i32
    return %c0_i32, %c0_i32_0 : i32, i32
  }
  func.func @transform_5(%arg0: i32) -> (i32, i32) {
    %c0_i32 = arith.constant 0 : i32
    %c0_i32_0 = arith.constant 0 : i32
    %c0_i32_1 = arith.constant 0 : i32
    return %c0_i32, %c0_i32_0 : i32, i32
  }
  func.func @transform_6(%arg0: i32) -> (i32, i32) {
    %c0_i32 = arith.constant 0 : i32
    %c0_i32_0 = arith.constant 0 : i32
    %c0_i32_1 = arith.constant 0 : i32
    return %c0_i32, %c0_i32_0 : i32, i32
  }
  func.func @transform_7(%arg0: i32) -> (i32, i32) {
    %c0_i32 = arith.constant 0 : i32
    %c0_i32_0 = arith.constant 0 : i32
    return %arg0, %c0_i32 : i32, i32
  }
}

module attributes {stable_mosaic.version = 11 : i64} {
  func.func @_final_pool_classify_kernel(%arg0: i32, %arg1: memref<1x31x128xf32, #tpu.memory_space<vmem>>, %arg2: memref<1x128xf32, #tpu.memory_space<vmem>>, %arg3: memref<1x128xf32, #tpu.memory_space<vmem>>, %arg4: memref<128x256xbf16, #tpu.memory_space<vmem>>, %arg5: memref<1x256xf32, #tpu.memory_space<vmem>>, %arg6: memref<256x8xbf16, #tpu.memory_space<vmem>>, %arg7: memref<1x8xf32, #tpu.memory_space<vmem>>, %arg8: memref<1x1x8xf32, #tpu.memory_space<vmem>>, %arg9: memref<1x1x128xf32, #tpu.memory_space<vmem>>) attributes {dimension_semantics = [#tpu.dimension_semantics<parallel>], iteration_bounds = array<i64: 2>, scalar_prefetch = 0 : i64, scratch_operands = 0 : i64, tpu.core_type = #tpu.core_type<tc>, window_params = [{transform_indices = @transform_0, window_bounds = array<i64: 1, 31, 128>}, {pipeline_mode = #tpu.pipeline_mode<synchronous>, transform_indices = @transform_1, window_bounds = array<i64: 1, 128>}, {pipeline_mode = #tpu.pipeline_mode<synchronous>, transform_indices = @transform_2, window_bounds = array<i64: 1, 128>}, {pipeline_mode = #tpu.pipeline_mode<synchronous>, transform_indices = @transform_3, window_bounds = array<i64: 128, 256>}, {pipeline_mode = #tpu.pipeline_mode<synchronous>, transform_indices = @transform_4, window_bounds = array<i64: 1, 256>}, {pipeline_mode = #tpu.pipeline_mode<synchronous>, transform_indices = @transform_5, window_bounds = array<i64: 256, 8>}, {pipeline_mode = #tpu.pipeline_mode<synchronous>, transform_indices = @transform_6, window_bounds = array<i64: 1, 8>}, {transform_indices = @transform_7, window_bounds = array<i64: 1, 1, 8>}, {transform_indices = @transform_8, window_bounds = array<i64: 1, 1, 128>}]} {
    %c0 = arith.constant 0 : index
    %c0_0 = arith.constant 0 : index
    %c0_1 = arith.constant 0 : index
    %0 = vector.load %arg1[%c0, %c0_0, %c0_1] : memref<1x31x128xf32, #tpu.memory_space<vmem>>, vector<1x31x128xf32>
    %1 = vector.shape_cast %0 : vector<1x31x128xf32> to vector<31x128xf32>
    %cst = arith.constant dense<0.000000e+00> : vector<31xf32>
    %2 = vector.multi_reduction <add>, %1, %cst [1] : vector<31x128xf32> to vector<31xf32>
    %3 = vector.shape_cast %2 : vector<31xf32> to vector<31x1xf32>
    %cst_2 = arith.constant 1.280000e+02 : f32
    %4 = vector.broadcast %cst_2 : f32 to vector<31x1xf32>
    %5 = arith.divf %3, %4 : vector<31x1xf32>
    %6 = vector.broadcast %5 : vector<31x1xf32> to vector<31x128xf32>
    %7 = arith.subf %1, %6 : vector<31x128xf32>
    %8 = arith.mulf %7, %7 : vector<31x128xf32>
    %cst_3 = arith.constant dense<0.000000e+00> : vector<31xf32>
    %9 = vector.multi_reduction <add>, %8, %cst_3 [1] : vector<31x128xf32> to vector<31xf32>
    %10 = vector.shape_cast %9 : vector<31xf32> to vector<31x1xf32>
    %cst_4 = arith.constant 1.280000e+02 : f32
    %11 = vector.broadcast %cst_4 : f32 to vector<31x1xf32>
    %12 = arith.divf %10, %11 : vector<31x1xf32>
    %13 = vector.broadcast %5 : vector<31x1xf32> to vector<31x128xf32>
    %14 = arith.subf %1, %13 : vector<31x128xf32>
    %cst_5 = arith.constant 9.99999974E-6 : f32
    %15 = vector.broadcast %cst_5 : f32 to vector<31x1xf32>
    %16 = arith.addf %12, %15 : vector<31x1xf32>
    %17 = math.rsqrt %16 : vector<31x1xf32>
    %18 = vector.broadcast %17 : vector<31x1xf32> to vector<31x128xf32>
    %19 = arith.mulf %14, %18 : vector<31x128xf32>
    %c0_6 = arith.constant 0 : index
    %c0_7 = arith.constant 0 : index
    %20 = vector.load %arg2[%c0_6, %c0_7] : memref<1x128xf32, #tpu.memory_space<vmem>>, vector<1x128xf32>
    %21 = vector.broadcast %20 : vector<1x128xf32> to vector<31x128xf32>
    %22 = arith.mulf %19, %21 : vector<31x128xf32>
    %c0_8 = arith.constant 0 : index
    %c0_9 = arith.constant 0 : index
    %23 = vector.load %arg3[%c0_8, %c0_9] : memref<1x128xf32, #tpu.memory_space<vmem>>, vector<1x128xf32>
    %24 = vector.broadcast %23 : vector<1x128xf32> to vector<31x128xf32>
    %25 = arith.addf %22, %24 : vector<31x128xf32>
    %cst_10 = arith.constant dense<0.000000e+00> : vector<128xf32>
    %26 = vector.multi_reduction <add>, %25, %cst_10 [0] : vector<31x128xf32> to vector<128xf32>
    %27 = vector.shape_cast %26 : vector<128xf32> to vector<1x128xf32>
    %cst_11 = arith.constant 3.100000e+01 : f32
    %28 = vector.broadcast %cst_11 : f32 to vector<1x128xf32>
    %29 = arith.divf %27, %28 : vector<1x128xf32>
    %30 = arith.truncf %29 : vector<1x128xf32> to vector<1x128xbf16>
    %c0_12 = arith.constant 0 : index
    %c0_13 = arith.constant 0 : index
    %31 = vector.load %arg4[%c0_12, %c0_13] : memref<128x256xbf16, #tpu.memory_space<vmem>>, vector<128x256xbf16>
    %cst_14 = arith.constant dense<0.000000e+00> : vector<1x256xf32>
    %32 = tpu.matmul %30, %31, %cst_14 {dimension_numbers = #tpu.dot_dimension_numbers<[1], [0], [0], [1], [0, 0, 1, 1], [], []>} : vector<1x128xbf16>, vector<128x256xbf16>, vector<1x256xf32> -> vector<1x256xf32>
    %c0_15 = arith.constant 0 : index
    %c0_16 = arith.constant 0 : index
    %33 = vector.load %arg5[%c0_15, %c0_16] : memref<1x256xf32, #tpu.memory_space<vmem>>, vector<1x256xf32>
    %34 = arith.addf %32, %33 : vector<1x256xf32>
    %cst_17 = arith.constant 0.000000e+00 : f32
    %35 = vector.broadcast %cst_17 : f32 to vector<1x256xf32>
    %36 = arith.maximumf %34, %35 : vector<1x256xf32>
    %37 = arith.truncf %36 : vector<1x256xf32> to vector<1x256xbf16>
    %c0_18 = arith.constant 0 : index
    %c0_19 = arith.constant 0 : index
    %38 = vector.load %arg6[%c0_18, %c0_19] : memref<256x8xbf16, #tpu.memory_space<vmem>>, vector<256x8xbf16>
    %cst_20 = arith.constant dense<0.000000e+00> : vector<1x8xf32>
    %39 = tpu.matmul %37, %38, %cst_20 {dimension_numbers = #tpu.dot_dimension_numbers<[1], [0], [0], [1], [0, 0, 1, 1], [], []>} : vector<1x256xbf16>, vector<256x8xbf16>, vector<1x8xf32> -> vector<1x8xf32>
    %c0_21 = arith.constant 0 : index
    %c0_22 = arith.constant 0 : index
    %40 = vector.load %arg7[%c0_21, %c0_22] : memref<1x8xf32, #tpu.memory_space<vmem>>, vector<1x8xf32>
    %41 = arith.addf %39, %40 : vector<1x8xf32>
    %c0_23 = arith.constant 0 : index
    %c0_24 = arith.constant 0 : index
    %c0_25 = arith.constant 0 : index
    %42 = vector.load %arg8[%c0_23, %c0_24, %c0_25] : memref<1x1x8xf32, #tpu.memory_space<vmem>>, vector<1x1x8xf32>
    %43 = vector.shape_cast %42 : vector<1x1x8xf32> to vector<1x8xf32>
    %44 = vector.shape_cast %41 : vector<1x8xf32> to vector<1x1x8xf32>
    tpu.vector_store %arg8[%c0_23, %c0_24, %c0_25], %44 {strides = array<i32>} : memref<1x1x8xf32, #tpu.memory_space<vmem>>, vector<1x1x8xf32>,
    %c0_26 = arith.constant 0 : index
    %c0_27 = arith.constant 0 : index
    %c0_28 = arith.constant 0 : index
    %45 = vector.load %arg9[%c0_26, %c0_27, %c0_28] : memref<1x1x128xf32, #tpu.memory_space<vmem>>, vector<1x1x128xf32>
    %46 = vector.shape_cast %45 : vector<1x1x128xf32> to vector<1x128xf32>
    %47 = vector.shape_cast %29 : vector<1x128xf32> to vector<1x1x128xf32>
    tpu.vector_store %arg9[%c0_26, %c0_27, %c0_28], %47 {strides = array<i32>} : memref<1x1x128xf32, #tpu.memory_space<vmem>>, vector<1x1x128xf32>,
    return
  }
  func.func @transform_0(%arg0: i32) -> (i32, i32, i32) {
    %c0_i32 = arith.constant 0 : i32
    %c0_i32_0 = arith.constant 0 : i32
    %c0_i32_1 = arith.constant 0 : i32
    return %arg0, %c0_i32, %c0_i32_0 : i32, i32, i32
  }
  func.func @transform_1(%arg0: i32) -> (i32, i32) {
    %c0_i32 = arith.constant 0 : i32
    %c0_i32_0 = arith.constant 0 : i32
    %c0_i32_1 = arith.constant 0 : i32
    return %c0_i32, %c0_i32_0 : i32, i32
  }
  func.func @transform_2(%arg0: i32) -> (i32, i32) {
    %c0_i32 = arith.constant 0 : i32
    %c0_i32_0 = arith.constant 0 : i32
    %c0_i32_1 = arith.constant 0 : i32
    return %c0_i32, %c0_i32_0 : i32, i32
  }
  func.func @transform_3(%arg0: i32) -> (i32, i32) {
    %c0_i32 = arith.constant 0 : i32
    %c0_i32_0 = arith.constant 0 : i32
    %c0_i32_1 = arith.constant 0 : i32
    return %c0_i32, %c0_i32_0 : i32, i32
  }
  func.func @transform_4(%arg0: i32) -> (i32, i32) {
    %c0_i32 = arith.constant 0 : i32
    %c0_i32_0 = arith.constant 0 : i32
    %c0_i32_1 = arith.constant 0 : i32
    return %c0_i32, %c0_i32_0 : i32, i32
  }
  func.func @transform_5(%arg0: i32) -> (i32, i32) {
    %c0_i32 = arith.constant 0 : i32
    %c0_i32_0 = arith.constant 0 : i32
    %c0_i32_1 = arith.constant 0 : i32
    return %c0_i32, %c0_i32_0 : i32, i32
  }
  func.func @transform_6(%arg0: i32) -> (i32, i32) {
    %c0_i32 = arith.constant 0 : i32
    %c0_i32_0 = arith.constant 0 : i32
    %c0_i32_1 = arith.constant 0 : i32
    return %c0_i32, %c0_i32_0 : i32, i32
  }
  func.func @transform_7(%arg0: i32) -> (i32, i32, i32) {
    %c0_i32 = arith.constant 0 : i32
    %c0_i32_0 = arith.constant 0 : i32
    %c0_i32_1 = arith.constant 0 : i32
    return %arg0, %c0_i32, %c0_i32_0 : i32, i32, i32
  }
  func.func @transform_8(%arg0: i32) -> (i32, i32, i32) {
    %c0_i32 = arith.constant 0 : i32
    %c0_i32_0 = arith.constant 0 : i32
    %c0_i32_1 = arith.constant 0 : i32
    return %arg0, %c0_i32, %c0_i32_0 : i32, i32, i32
  }
}

</mosaic_0001>

<bundles_post_ra>
// kernel: _lambda_.11
= control target key start
LH: loop header
LB: loop body
LE: loop exit
PB: predicated region body
PF: predicated region fallthrough
CT: control target
= control target key end

     0   :  { %vm126_vm0 = vcmask 1044480   ;;  %vm77_vm1 = vcmask 80896   ;;  %s669_s1 = inlined_call_operand.vmem [shape: bf16[10,128], index: 1, kind: input, shape index: {}]   ;;  %s670_s0 = inlined_call_operand.vmem [shape: f32[254,10], index: 0, kind: input, shape index: {}]   ;;  %s671_s2 = inlined_call_operand.vmem [shape: f32[1,128], index: 2, kind: input, shape index: {}]   ;;  %s672_s3 = inlined_call_operand.vmem [shape: f32[254,128], index: 3, kind: output, shape index: {}]  }
   0x1   :  { %v400_v0 = vld [vmem:[%s669_s1] sm:$0x1f]   ;;  %v16_v2 = vld [vmem:[%s670_s0 + $0x8] sm:$0xff]  ;;  %v17_v7 = vld [vmem:[%s670_s0 + $0x10] sm:$0xff] }
   0x2   :  { %v15_v1 = vld [vmem:[%s670_s0] sm:$0xff]  ;;  %398 = vmatprep.subr.msk.bf16.mxu0 %vm126_vm0, %v400_v0  ;;  %399 = vmatprep.subr.msk.bf16.mxu1 %vm126_vm0, %v400_v0  ;;  %v128_v4 = vsel %vm126_vm0, %v400_v0, 0  ;;  %v32_v6 = vld [vmem:[%s670_s0 + $0x88] sm:$0xff]  ;;  %v18_v8 = vld [vmem:[%s670_s0 + $0x18] sm:$0xff] }
   0x3   :  { %v31_v3 = vld [vmem:[%s670_s0 + $0x80] sm:$0xff]  ;;  %v47_v5 = vpack.c.bf16 %v16_v2, %v15_v1  ;;  %363 = vmatpush3.bf16.msra.mxu0 %v128_v4  ;;  %397 = vmatpush3.bf16.msra.mxu1 %v128_v4  ;;  %v48_v10 = vpack.c.bf16 %v18_v8, %v17_v7  ;;  %v33_v11 = vld [vmem:[%s670_s0 + $0x90] sm:$0xff]  ;;  %v34_v12 = vld [vmem:[%s670_s0 + $0x98] sm:$0xff] }
   0x4   :  { %v55_v9 = vpack.c.bf16 %v32_v6, %v31_v3  ;;  %v19_v13 = vld [vmem:[%s670_s0 + $0x20] sm:$0xff]  ;;  %v56_v14 = vpack.c.bf16 %v34_v12, %v33_v11  ;;  %v20_v15 = vld [vmem:[%s670_s0 + $0x28] sm:$0xff]  ;;  %v21_v20 = vld [vmem:[%s670_s0 + $0x30] sm:$0xff] }
   0x5   :  { %364 = vmatprep.mubr.msk.bf16.mxu0 %vm77_vm1, %v47_v5  ;;  %v35_v16 = vld [vmem:[%s670_s0 + $0xa0] sm:$0xff]  ;;  %v36_v17 = vld [vmem:[%s670_s0 + $0xa8] sm:$0xff]  ;;  %v49_v18 = vpack.c.bf16 %v20_v15, %v19_v13  ;;  %v22_v21 = vld [vmem:[%s670_s0 + $0x38] sm:$0xff] }
   0x6   :  { %380 = vmatprep.mubr.msk.bf16.mxu1 %vm77_vm1, %v55_v9  ;;  %v57_v19 = vpack.c.bf16 %v36_v17, %v35_v16  ;;  %365 = vmatmul.mubr.msk.bf16.vlgmr.msra.gmra.mxu0 %vm77_vm1, %v48_v10  ;;  %v37_v22 = vld [vmem:[%s670_s0 + $0xb0] sm:$0xff]  ;;  %v38_v23 = vld [vmem:[%s670_s0 + $0xb8] sm:$0xff]  ;;  %v23_v24 = vld [vmem:[%s670_s0 + $0x40] sm:$0xff]  ;;  %v50_v28 = vpack.c.bf16 %v22_v21, %v21_v20 }
   0x7   :  { %381 = vmatmul.mubr.msk.bf16.vlgmr.msra.gmra.mxu1 %vm77_vm1, %v56_v14  ;;  %368 = vmatprep.mubr.msk.bf16.mxu0 %vm77_vm1, %v49_v18  ;;  %v24_v25 = vld [vmem:[%s670_s0 + $0x48] sm:$0xff]  ;;  %v39_v26 = vld [vmem:[%s670_s0 + $0xc0] sm:$0xff]  ;;  %v58_v29 = vpack.c.bf16 %v38_v23, %v37_v22  ;;  %v25_v32 = vld [vmem:[%s670_s0 + $0x50] sm:$0xff] }
   0x8   :  { %384 = vmatprep.mubr.msk.bf16.mxu1 %vm77_vm1, %v57_v19  ;;  %v40_v27 = vld [vmem:[%s670_s0 + $0xc8] sm:$0xff]  ;;  %v51_v30 = vpack.c.bf16 %v24_v25, %v23_v24  ;;  %v26_v33 = vld [vmem:[%s670_s0 + $0x58] sm:$0xff]  ;;  %v41_v34 = vld [vmem:[%s670_s0 + $0xd0] sm:$0xff] }
   0x9   :  { %v59_v31 = vpack.c.bf16 %v40_v27, %v39_v26  ;;  %v42_v35 = vld [vmem:[%s670_s0 + $0xd8] sm:$0xff]  ;;  %v27_v36 = vld [vmem:[%s670_s0 + $0x60] sm:$0xff]  ;;  %v28_v37 = vld [vmem:[%s670_s0 + $0x68] sm:$0xff]  ;;  %v52_v40 = vpack.c.bf16 %v26_v33, %v25_v32 }
   0xa   :  { %v43_v38 = vld [vmem:[%s670_s0 + $0xe0] sm:$0xff]  ;;  %v44_v39 = vld [vmem:[%s670_s0 + $0xe8] sm:$0xff]  ;;  %v60_v41 = vpack.c.bf16 %v42_v35, %v41_v34  ;;  %v53_v42 = vpack.c.bf16 %v28_v37, %v27_v36  ;;  %v29_v44 = vld [vmem:[%s670_s0 + $0x70] sm:$0xff] }
   0xb   :  { %v61_v43 = vpack.c.bf16 %v44_v39, %v43_v38  ;;  %v30_v45 = vld [vmem:[%s670_s0 + $0x78] sm:$0xff]  ;;  %v45_v46 = vld [vmem:[%s670_s0 + $0xf0] sm:$0xff]  ;;  %v539_v50 = vld [vmem:[%s671_s2] ss:$0 sm:$0xff] }
   0xc   :  { %v46_v47 = vld [vmem:[%s670_s0 + $0xf8] sm:$0x3f]  ;;  %v54_v48 = vpack.c.bf16 %v30_v45, %v29_v44 }
   0xd   :  { %v62_v49 = vpack.c.bf16 %v46_v47, %v45_v46 }
   0xe   :  { %369 = vmatmul.mubr.msk.bf16.gmra.mxu0 %vm77_vm1, %v50_v28 }
   0xf   :  { %385 = vmatmul.mubr.msk.bf16.gmra.mxu1 %vm77_vm1, %v58_v29  ;;  %372 = vmatprep.mubr.msk.bf16.mxu0 %vm77_vm1, %v51_v30 }
  0x10   :  { %388 = vmatprep.mubr.msk.bf16.mxu1 %vm77_vm1, %v59_v31 }
  0x16   :  { %373 = vmatmul.mubr.msk.bf16.gmra.mxu0 %vm77_vm1, %v52_v40 }
  0x17   :  { %389 = vmatmul.mubr.msk.bf16.gmra.mxu1 %vm77_vm1, %v60_v41  ;;  %376 = vmatprep.mubr.msk.bf16.mxu0 %vm77_vm1, %v53_v42 }
  0x18   :  { %392 = vmatprep.mubr.msk.bf16.mxu1 %vm77_vm1, %v61_v43 }
  0x1e   :  { %377 = vmatmul.mubr.msk.bf16.gmra.mxu0 %vm77_vm1, %v54_v48 }
  0x1f   :  { %393 = vmatmul.mubr.msk.bf16.gmra.mxu1 %vm77_vm1, %v62_v49 }
  0xc6   :  { %v366_v51 = vpop.f32.mrf.mxu0 }
  0xc7   :  { %v382_v52 = vpop.f32.mrf.mxu1  ;;  %v173_v53 = vadd.f32 %v366_v51, %v539_v50 }
  0xc8   :  { %v237_v54 = vadd.f32 %v382_v52, %v539_v50  ;;  %v164_v55 = vpop.f32.mrf.mxu0 }
  0xc9   :  { %v228_v56 = vpop.f32.mrf.mxu1  ;;  %293 = vst [vmem:[%s672_s3 + $0x10] sm:$0xff] %v173_v53  ;;  %v165_v57 = vadd.f32 %v539_v50, %v164_v55 }
  0xca   :  { %309 = vst [vmem:[%s672_s3 + $0x90] sm:$0xff] %v237_v54  ;;  %v229_v58 = vadd.f32 %v539_v50, %v228_v56  ;;  %v367_v59 = vpop.f32.mrf.mxu0 }
  0xcb   :  { %v383_v60 = vpop.f32.mrf.mxu1  ;;  %291 = vst [vmem:[%s672_s3] sm:$0xff] %v165_v57  ;;  %v176_v61 = vadd.f32 %v367_v59, %v539_v50 }
  0xcc   :  { %307 = vst [vmem:[%s672_s3 + $0x80] sm:$0xff] %v229_v58  ;;  %v240_v62 = vadd.f32 %v383_v60, %v539_v50  ;;  %v167_v63 = vpop.f32.mrf.mxu0 }
  0xcd   :  { %v231_v0 = vpop.f32.mrf.mxu1  ;;  %294 = vst [vmem:[%s672_s3 + $0x18] sm:$0xff] %v176_v61  ;;  %v168_v1 = vadd.f32 %v539_v50, %v167_v63 }
  0xce   :  { %310 = vst [vmem:[%s672_s3 + $0x98] sm:$0xff] %v240_v62  ;;  %v232_v2 = vadd.f32 %v539_v50, %v231_v0  ;;  %v370_v3 = vpop.f32.mrf.mxu0 }
  0xcf   :  { %v386_v4 = vpop.f32.mrf.mxu1  ;;  %292 = vst [vmem:[%s672_s3 + $0x8] sm:$0xff] %v168_v1  ;;  %v189_v5 = vadd.f32 %v370_v3, %v539_v50 }
  0xd0   :  { %308 = vst [vmem:[%s672_s3 + $0x88] sm:$0xff] %v232_v2  ;;  %v253_v6 = vadd.f32 %v386_v4, %v539_v50  ;;  %v180_v7 = vpop.f32.mrf.mxu0 }
  0xd1   :  { %v244_v8 = vpop.f32.mrf.mxu1  ;;  %297 = vst [vmem:[%s672_s3 + $0x30] sm:$0xff] %v189_v5  ;;  %v181_v9 = vadd.f32 %v539_v50, %v180_v7 }
  0xd2   :  { %313 = vst [vmem:[%s672_s3 + $0xb0] sm:$0xff] %v253_v6  ;;  %v245_v10 = vadd.f32 %v539_v50, %v244_v8  ;;  %v371_v11 = vpop.f32.mrf.mxu0 }
  0xd3   :  { %v387_v12 = vpop.f32.mrf.mxu1  ;;  %295 = vst [vmem:[%s672_s3 + $0x20] sm:$0xff] %v181_v9  ;;  %v192_v13 = vadd.f32 %v371_v11, %v539_v50 }
  0xd4   :  { %311 = vst [vmem:[%s672_s3 + $0xa0] sm:$0xff] %v245_v10  ;;  %v256_v14 = vadd.f32 %v387_v12, %v539_v50  ;;  %v183_v15 = vpop.f32.mrf.mxu0 }
  0xd5   :  { %v247_v16 = vpop.f32.mrf.mxu1  ;;  %298 = vst [vmem:[%s672_s3 + $0x38] sm:$0xff] %v192_v13  ;;  %v184_v17 = vadd.f32 %v539_v50, %v183_v15 }
  0xd6   :  { %314 = vst [vmem:[%s672_s3 + $0xb8] sm:$0xff] %v256_v14  ;;  %v248_v18 = vadd.f32 %v539_v50, %v247_v16  ;;  %v374_v19 = vpop.f32.mrf.mxu0 }
  0xd7   :  { %v390_v20 = vpop.f32.mrf.mxu1  ;;  %296 = vst [vmem:[%s672_s3 + $0x28] sm:$0xff] %v184_v17  ;;  %v205_v21 = vadd.f32 %v374_v19, %v539_v50 }
  0xd8   :  { %312 = vst [vmem:[%s672_s3 + $0xa8] sm:$0xff] %v248_v18  ;;  %v269_v22 = vadd.f32 %v390_v20, %v539_v50  ;;  %v196_v23 = vpop.f32.mrf.mxu0 }
  0xd9   :  { %v260_v24 = vpop.f32.mrf.mxu1  ;;  %301 = vst [vmem:[%s672_s3 + $0x50] sm:$0xff] %v205_v21  ;;  %v197_v25 = vadd.f32 %v539_v50, %v196_v23 }
  0xda   :  { %317 = vst [vmem:[%s672_s3 + $0xd0] sm:$0xff] %v269_v22  ;;  %v261_v26 = vadd.f32 %v539_v50, %v260_v24  ;;  %v375_v27 = vpop.f32.mrf.mxu0 }
  0xdb   :  { %v391_v28 = vpop.f32.mrf.mxu1  ;;  %299 = vst [vmem:[%s672_s3 + $0x40] sm:$0xff] %v197_v25  ;;  %v208_v29 = vadd.f32 %v375_v27, %v539_v50 }
  0xdc   :  { %315 = vst [vmem:[%s672_s3 + $0xc0] sm:$0xff] %v261_v26  ;;  %v272_v30 = vadd.f32 %v391_v28, %v539_v50  ;;  %v199_v31 = vpop.f32.mrf.mxu0 }
  0xdd   :  { %v263_v32 = vpop.f32.mrf.mxu1  ;;  %302 = vst [vmem:[%s672_s3 + $0x58] sm:$0xff] %v208_v29  ;;  %v200_v33 = vadd.f32 %v539_v50, %v199_v31 }
  0xde   :  { %318 = vst [vmem:[%s672_s3 + $0xd8] sm:$0xff] %v272_v30  ;;  %v264_v34 = vadd.f32 %v539_v50, %v263_v32  ;;  %v378_v35 = vpop.f32.mrf.mxu0 }
  0xdf   :  { %v394_v36 = vpop.f32.mrf.mxu1  ;;  %300 = vst [vmem:[%s672_s3 + $0x48] sm:$0xff] %v200_v33  ;;  %v221_v37 = vadd.f32 %v378_v35, %v539_v50 }
  0xe0   :  { %316 = vst [vmem:[%s672_s3 + $0xc8] sm:$0xff] %v264_v34  ;;  %v285_v38 = vadd.f32 %v394_v36, %v539_v50  ;;  %v212_v39 = vpop.f32.mrf.mxu0 }
  0xe1   :  { %v276_v40 = vpop.f32.mrf.mxu1  ;;  %305 = vst [vmem:[%s672_s3 + $0x70] sm:$0xff] %v221_v37  ;;  %v213_v41 = vadd.f32 %v539_v50, %v212_v39 }
  0xe2   :  { %321 = vst [vmem:[%s672_s3 + $0xf0] sm:$0xff] %v285_v38  ;;  %v277_v42 = vadd.f32 %v539_v50, %v276_v40  ;;  %v379_v43 = vpop.f32.mrf.mxu0 }
  0xe3   :  { %v395_v44 = vpop.f32.mrf.mxu1  ;;  %303 = vst [vmem:[%s672_s3 + $0x60] sm:$0xff] %v213_v41  ;;  %v224_v45 = vadd.f32 %v379_v43, %v539_v50 }
  0xe4   :  { %319 = vst [vmem:[%s672_s3 + $0xe0] sm:$0xff] %v277_v42  ;;  %v288_v46 = vadd.f32 %v395_v44, %v539_v50  ;;  %v215_v47 = vpop.f32.mrf.mxu0 }
  0xe5   :  { %v279_v48 = vpop.f32.mrf.mxu1  ;;  %306 = vst [vmem:[%s672_s3 + $0x78] sm:$0xff] %v224_v45  ;;  %v216_v49 = vadd.f32 %v539_v50, %v215_v47 }
  0xe6   :  { %322 = vst [vmem:[%s672_s3 + $0xf8] sm:$0x3f] %v288_v46  ;;  %v280_v51 = vadd.f32 %v539_v50, %v279_v48 }
  0xe7   :  { %304 = vst [vmem:[%s672_s3 + $0x68] sm:$0xff] %v216_v49 }
  0xe8   :  { %320 = vst [vmem:[%s672_s3 + $0xe8] sm:$0xff] %v280_v51 }

// kernel: _lambda_.12
= control target key start
LH: loop header
LB: loop body
LE: loop exit
PB: predicated region body
PF: predicated region fallthrough
CT: control target
= control target key end

     0   :  { %s631_s12 = smov 0   ;;  %s865_s0 = inlined_call_operand.vmem [shape: f32[2,127,128], index: 0, kind: input, shape index: {}]   ;;  %s866_s1 = inlined_call_operand.vmem [shape: f32[1,128], index: 1, kind: input, shape index: {}]   ;;  %s867_s2 = inlined_call_operand.vmem [shape: f32[1,128], index: 2, kind: input, shape index: {}]   ;;  %s868_s3 = inlined_call_operand.vmem [shape: f32[2,127,128], index: 3, kind: output, shape index: {}]  }
   0x1 LB: > { %s546_s13 = sadd.s32 4294967295, %s609_s12   ;;  %p550_p0 = scmp.ge.s32.totalorder %s609_s12, 1  ;;  %s609_s12 = sphi %s631_s12, %s13_s12  }
   0x2   : > { %p137_p1 = scmp.lt.s32.totalorder %s609_s12, 3 }
   0x4   : > { %p138_p2 = pnand %p550_p0, %p137_p1 }
   0x5   : > { %p161_p3 = scmp.lt.s32.totalorder (!%p138_p2), %s546_s13, 1 }
   0x6   : > { %141 = sbr.rel (%p138_p2) target bundleno = 192 (0xc0), region = 32 }
   0xb   : > { %s870_s13 = smov (!%p161_p3, %s546_s13), 1  ;;  %vm201_vm0 = vcmask 1046528  }
   0xc   : > { %s559_s14 = sshll.u32 %s870_s13, 7 }
   0xd   : > { %s165_s17 = scalar_lea.vmem %s865_s0, %s559_s14  ;;  %s824_s24 = scalar_lea.vmem %s868_s3, %s559_s14 }
   0xe   : > { %v171_v0 = vld [vmem:[%s165_s17] sm:$0xff]  ;;  %v172_v1 = vld [vmem:[%s165_s17 + $0x8] sm:$0xff]  ;;  %v173_v2 = vld [vmem:[%s165_s17 + $0x10] sm:$0xff] }
   0xf   : > { %v187_v3 = vadd.f32 %v172_v1, %v171_v0  ;;  %v174_v4 = vld [vmem:[%s165_s17 + $0x18] sm:$0xff]  ;;  %v175_v6 = vld [vmem:[%s165_s17 + $0x20] sm:$0xff]  ;;  %v176_v8 = vld [vmem:[%s165_s17 + $0x28] sm:$0xff] }
  0x10   : > { %v177_v10 = vld [vmem:[%s165_s17 + $0x30] sm:$0xff]  ;;  %v178_v12 = vld [vmem:[%s165_s17 + $0x38] sm:$0xff]  ;;  %v179_v14 = vld [vmem:[%s165_s17 + $0x40] sm:$0xff] }
  0x11   : > { %v188_v5 = vadd.f32 %v187_v3, %v173_v2  ;;  %v180_v16 = vld [vmem:[%s165_s17 + $0x48] sm:$0xff]  ;;  %v181_v18 = vld [vmem:[%s165_s17 + $0x50] sm:$0xff]  ;;  %v182_v20 = vld [vmem:[%s165_s17 + $0x58] sm:$0xff] }
  0x12   : > { %v183_v22 = vld [vmem:[%s165_s17 + $0x60] sm:$0xff]  ;;  %v184_v24 = vld [vmem:[%s165_s17 + $0x68] sm:$0xff]  ;;  %v186_v25 = vld [vmem:[%s165_s17 + $0x78] sm:$0x7f] }
  0x13   : > { %v189_v7 = vadd.f32 %v188_v5, %v174_v4  ;;  %v185_v27 = vld [vmem:[%s165_s17 + $0x70] sm:$0xff]  ;;  %v202_v29 = vsel %vm201_vm0, %v186_v25, 0.0 }
  0x15   : > { %v190_v9 = vadd.f32 %v189_v7, %v175_v6 }
  0x17   : > { %v191_v11 = vadd.f32 %v190_v9, %v176_v8 }
  0x19   : > { %v192_v13 = vadd.f32 %v191_v11, %v177_v10 }
  0x1b   : > { %v193_v15 = vadd.f32 %v192_v13, %v178_v12 }
  0x1d   : > { %v194_v17 = vadd.f32 %v193_v15, %v179_v14 }
  0x1f   : > { %v195_v19 = vadd.f32 %v194_v17, %v180_v16 }
  0x21   : > { %v196_v21 = vadd.f32 %v195_v19, %v181_v18 }
  0x23   : > { %v197_v23 = vadd.f32 %v196_v21, %v182_v20 }
  0x25   : > { %v198_v26 = vadd.f32 %v197_v23, %v183_v22 }
  0x27   : > { %v199_v28 = vadd.f32 %v198_v26, %v184_v24 }
  0x29   : > { %v200_v30 = vadd.f32 %v199_v28, %v185_v27 }
  0x2b   : > { %v203_v31 = vadd.f32 %v202_v29, %v200_v30 }
  0x2d   : > { %v204_v32 = vrot.slane %v203_v31, 4 }
  0x2f   : > { %v205_v33 = vadd.f32 %v204_v32, %v203_v31  ;;  %v686_v32 = vld [vmem:[%s866_s1] ss:$0 sm:$0xff] }
  0x31   : > { %v206_v34 = vrot.slane %v205_v33, 2 }
  0x33   : > { %v207_v35 = vadd.f32 %v206_v34, %v205_v33 }
  0x35   : > { %v208_v36 = vrot.slane %v207_v35, 1 }
  0x37   : > { %v209_v37 = vadd.f32 %v208_v36, %v207_v35 }
  0x39   : > { %v211_v38 = vmul.f32 0.007874016, %v209_v37  ;;  %v695_v37 = vld [vmem:[%s867_s2] ss:$0 sm:$0xff] }
  0x3b   : > { %v212_v39 = vsub.f32 %v171_v0, %v211_v38  ;;  %v213_v40 = vsub.f32 %v172_v1, %v211_v38  ;;  %v214_v41 = vsub.f32 %v173_v2, %v211_v38  ;;  %v215_v42 = vsub.f32 %v174_v4, %v211_v38 }
  0x3c   : > { %v216_v45 = vsub.f32 %v175_v6, %v211_v38  ;;  %v217_v47 = vsub.f32 %v176_v8, %v211_v38  ;;  %v218_v50 = vsub.f32 %v177_v10, %v211_v38  ;;  %v219_v53 = vsub.f32 %v178_v12, %v211_v38 }
  0x3d   : > { %v228_v43 = vmul.f32 %v212_v39, %v212_v39  ;;  %v229_v44 = vmul.f32 %v213_v40, %v213_v40  ;;  %v230_v46 = vmul.f32 %v214_v41, %v214_v41  ;;  %v231_v48 = vmul.f32 %v215_v42, %v215_v42 }
  0x3e   : > { %v232_v51 = vmul.f32 %v216_v45, %v216_v45  ;;  %v233_v54 = vmul.f32 %v217_v47, %v217_v47  ;;  %v648_v56 = vsub.f32 %v179_v14, %v211_v38  ;;  %v234_v57 = vmul.f32 %v218_v50, %v218_v50 }
  0x3f   : > { %v244_v49 = vadd.f32 %v229_v44, %v228_v43  ;;  %v650_v59 = vsub.f32 %v180_v16, %v211_v38  ;;  %v235_v60 = vmul.f32 %v219_v53, %v219_v53  ;;  %v652_v62 = vsub.f32 %v181_v18, %v211_v38 }
  0x40   : > { %v236_v63 = vmul.f32 %v648_v56, %v648_v56  ;;  %v656_v1 = vsub.f32 %v182_v20, %v211_v38  ;;  %v660_v4 = vsub.f32 %v183_v22, %v211_v38  ;;  %v664_v7 = vsub.f32 %v184_v24, %v211_v38 }
  0x41   : > { %v245_v52 = vadd.f32 %v244_v49, %v230_v46  ;;  %v237_v2 = vmul.f32 %v650_v59, %v650_v59  ;;  %v238_v5 = vmul.f32 %v652_v62, %v652_v62  ;;  %v668_v10 = vsub.f32 %v186_v25, %v211_v38 }
  0x42   : > { %v239_v8 = vmul.f32 %v656_v1, %v656_v1  ;;  %v670_v11 = vsub.f32 %v185_v27, %v211_v38  ;;  %v240_v12 = vmul.f32 %v660_v4, %v660_v4  ;;  %v241_v14 = vmul.f32 %v664_v7, %v664_v7 }
  0x43   : > { %v246_v55 = vadd.f32 %v245_v52, %v231_v48  ;;  %v243_v16 = vmul.f32 %v668_v10, %v668_v10 }
  0x44   : > { %v242_v17 = vmul.f32 %v670_v11, %v670_v11 }
  0x45   : > { %v247_v58 = vadd.f32 %v246_v55, %v232_v51  ;;  %v258_v20 = vsel %vm201_vm0, %v243_v16, 0.0 }
  0x47   : > { %v248_v61 = vadd.f32 %v247_v58, %v233_v54 }
  0x49   : > { %v249_v0 = vadd.f32 %v248_v61, %v234_v57 }
  0x4b   : > { %v250_v3 = vadd.f32 %v249_v0, %v235_v60 }
  0x4d   : > { %v251_v6 = vadd.f32 %v250_v3, %v236_v63 }
  0x4f   : > { %v252_v9 = vadd.f32 %v251_v6, %v237_v2 }
  0x51   : > { %v253_v13 = vadd.f32 %v252_v9, %v238_v5 }
  0x53   : > { %v254_v15 = vadd.f32 %v253_v13, %v239_v8 }
  0x55   : > { %v255_v18 = vadd.f32 %v254_v15, %v240_v12 }
  0x57   : > { %v256_v19 = vadd.f32 %v255_v18, %v241_v14 }
  0x59   : > { %v257_v21 = vadd.f32 %v256_v19, %v242_v17 }
  0x5b   : > { %v259_v22 = vadd.f32 %v258_v20, %v257_v21 }
  0x5d   : > { %v260_v23 = vrot.slane %v259_v22, 4 }
  0x5f   : > { %v261_v24 = vadd.f32 %v260_v23, %v259_v22 }
  0x61   : > { %v262_v25 = vrot.slane %v261_v24, 2 }
  0x63   : > { %v263_v26 = vadd.f32 %v262_v25, %v261_v24 }
  0x65   : > { %v264_v27 = vrot.slane %v263_v26, 1 }
  0x67   : > { %v265_v28 = vadd.f32 %v264_v27, %v263_v26 }
  0x69   : > { %v266_v29 = vmul.f32 0.007874016, %v265_v28 }
  0x6b   : > { %v267_v30 = vadd.f32 1e-05, %v266_v29 }
  0x6d   : > { %569 = vrsqrt.f32 %v267_v30 }
  0x7a   : > { %v681_v31 = vpop.eup %569 }
  0x7b   : > { %v269_v33 = vmul.f32 %v681_v31, %v212_v39  ;;  %v270_v34 = vmul.f32 %v681_v31, %v213_v40  ;;  %v271_v35 = vmul.f32 %v681_v31, %v214_v41  ;;  %v272_v36 = vmul.f32 %v681_v31, %v215_v42 }
  0x7c   : > { %v273_v38 = vmul.f32 %v681_v31, %v216_v45  ;;  %v274_v43 = vmul.f32 %v681_v31, %v217_v47  ;;  %v275_v44 = vmul.f32 %v681_v31, %v218_v50  ;;  %v276_v46 = vmul.f32 %v681_v31, %v219_v53 }
  0x7d   : > { %v292_v39 = vmul.f32 %v686_v32, %v269_v33  ;;  %v293_v40 = vmul.f32 %v686_v32, %v270_v34  ;;  %v294_v41 = vmul.f32 %v686_v32, %v271_v35  ;;  %v295_v42 = vmul.f32 %v686_v32, %v272_v36 }
  0x7e   : > { %v296_v48 = vmul.f32 %v686_v32, %v273_v38  ;;  %v297_v49 = vmul.f32 %v686_v32, %v274_v43  ;;  %v298_v45 = vmul.f32 %v686_v32, %v275_v44  ;;  %v299_v55 = vmul.f32 %v686_v32, %v276_v46 }
  0x7f   : > { %v315_v47 = vadd.f32 %v695_v37, %v292_v39  ;;  %v316_v50 = vadd.f32 %v695_v37, %v293_v40  ;;  %v711_v51 = vadd.f32 %v695_v37, %v294_v41  ;;  %v714_v52 = vadd.f32 %v695_v37, %v295_v42 }
  0x80   : > { %v717_v53 = vadd.f32 %v695_v37, %v296_v48  ;;  %v720_v54 = vadd.f32 %v695_v37, %v297_v49  ;;  %v726_v63 = vadd.f32 %v695_v37, %v298_v45  ;;  %v733_v9 = vadd.f32 %v695_v37, %v299_v55 }
  0x81   : > { %v347_v57 = vmul.f32 0.044715, %v315_v47  ;;  %v348_v58 = vmul.f32 0.044715, %v316_v50  ;;  %v349_v60 = vmul.f32 0.044715, %v711_v51  ;;  %v277_v46 = vmul.f32 %v681_v31, %v648_v56 }
  0x82   : > { %v350_v61 = vmul.f32 0.044715, %v714_v52  ;;  %v351_v3 = vmul.f32 0.044715, %v717_v53  ;;  %v352_v8 = vmul.f32 0.044715, %v720_v54  ;;  %v278_v41 = vmul.f32 %v681_v31, %v650_v59 }
  0x83   : > { %v363_v0 = vmul.f32 %v347_v57, %v315_v47  ;;  %v364_v2 = vmul.f32 %v348_v58, %v316_v50  ;;  %v365_v5 = vmul.f32 %v349_v60, %v711_v51  ;;  %v735_v12 = vmul.f32 0.5, %v315_v47 }
  0x84   : > { %v366_v6 = vmul.f32 %v350_v61, %v714_v52  ;;  %v367_v15 = vmul.f32 %v351_v3, %v717_v53  ;;  %v368_v18 = vmul.f32 %v352_v8, %v720_v54  ;;  %v353_v19 = vmul.f32 0.044715, %v726_v63 }
  0x85   : > { %v379_v13 = vmul.f32 %v363_v0, %v315_v47  ;;  %v380_v14 = vmul.f32 %v364_v2, %v316_v50  ;;  %v381_v16 = vmul.f32 %v365_v5, %v711_v51  ;;  %v742_v21 = vmul.f32 0.5, %v316_v50 }
  0x86   : > { %v382_v17 = vmul.f32 %v366_v6, %v714_v52  ;;  %v383_v23 = vmul.f32 %v367_v15, %v717_v53  ;;  %v384_v26 = vmul.f32 %v368_v18, %v720_v54  ;;  %v369_v27 = vmul.f32 %v353_v19, %v726_v63 }
  0x87   : > { %v395_v20 = vadd.f32 %v379_v13, %v315_v47  ;;  %v396_v22 = vadd.f32 %v380_v14, %v316_v50  ;;  %v397_v24 = vadd.f32 %v381_v16, %v711_v51  ;;  %v354_v33 = vmul.f32 0.044715, %v733_v9 }
  0x88   : > { %v398_v25 = vadd.f32 %v382_v17, %v714_v52  ;;  %v399_v30 = vadd.f32 %v383_v23, %v717_v53  ;;  %v400_v36 = vadd.f32 %v384_v26, %v720_v54  ;;  %v385_v38 = vmul.f32 %v369_v27, %v726_v63 }
  0x89   : > { %v411_v28 = vmul.f32 0.7978846, %v395_v20  ;;  %v412_v29 = vmul.f32 0.7978846, %v396_v22  ;;  %v413_v34 = vmul.f32 0.7978846, %v397_v24  ;;  %v370_v44 = vmul.f32 %v354_v33, %v733_v9 }
  0x8a   : > { %v414_v35 = vmul.f32 0.7978846, %v398_v25  ;;  %v415_v43 = vmul.f32 0.7978846, %v399_v30  ;;  %v416_v39 = vmul.f32 0.7978846, %v400_v36  ;;  %v401_v40 = vadd.f32 %v385_v38, %v726_v63 }
  0x8b   : > { %571 = vtanh.f32 %v411_v28  ;;  %v386_v42 = vmul.f32 %v370_v44, %v733_v9  ;;  %v300_v48 = vmul.f32 %v686_v32, %v277_v46  ;;  %v279_v49 = vmul.f32 %v681_v31, %v652_v62 }
  0x8c   : > { %573 = vtanh.f32 %v412_v29  ;;  %v417_v45 = vmul.f32 0.7978846, %v401_v40  ;;  %v301_v47 = vmul.f32 %v686_v32, %v278_v41  ;;  %v280_v56 = vmul.f32 %v681_v31, %v656_v1 }
  0x8d   : > { %575 = vtanh.f32 %v413_v34  ;;  %v402_v50 = vadd.f32 %v386_v42, %v733_v9  ;;  %v768_v59 = vadd.f32 %v695_v37, %v300_v48  ;;  %v302_v55 = vmul.f32 %v686_v32, %v279_v49 }
  0x8e   : > { %577 = vtanh.f32 %v414_v35  ;;  %v772_v57 = vadd.f32 %v695_v37, %v301_v47  ;;  %v303_v62 = vmul.f32 %v686_v32, %v280_v56  ;;  %v281_v58 = vmul.f32 %v681_v31, %v660_v4 }
  0x8f   : > { %579 = vtanh.f32 %v415_v43  ;;  %v333_v60 = vmul.f32 0.5, %v711_v51  ;;  %v418_v1 = vmul.f32 0.7978846, %v402_v50  ;;  %v355_v61 = vmul.f32 0.044715, %v768_v59 }
  0x90   : > { %581 = vtanh.f32 %v416_v39  ;;  %v334_v0 = vmul.f32 0.5, %v714_v52  ;;  %v356_v2 = vmul.f32 0.044715, %v772_v57  ;;  %v782_v3 = vadd.f32 %v695_v37, %v302_v55 }
  0x91   : > { %583 = vtanh.f32 %v417_v45  ;;  %v785_v5 = vadd.f32 %v695_v37, %v303_v62  ;;  %v371_v6 = vmul.f32 %v355_v61, %v768_v59  ;;  %v304_v4 = vmul.f32 %v686_v32, %v281_v58 }
  0x92   : > { %585 = vtanh.f32 %v418_v1  ;;  %v282_v51 = vmul.f32 %v681_v31, %v664_v7  ;;  %v335_v8 = vmul.f32 0.5, %v717_v53  ;;  %v336_v52 = vmul.f32 0.5, %v720_v54 }
  0x93   : > { %v372_v13 = vmul.f32 %v356_v2, %v772_v57  ;;  %v357_v14 = vmul.f32 0.044715, %v782_v3  ;;  %v387_v15 = vmul.f32 %v371_v6, %v768_v59  ;;  %v358_v16 = vmul.f32 0.044715, %v785_v5 }
  0x94   : > { %v798_v17 = vadd.f32 %v695_v37, %v304_v4  ;;  %v305_v18 = vmul.f32 %v686_v32, %v282_v51  ;;  %v337_v19 = vmul.f32 0.5, %v726_v63  ;;  %v283_v54 = vmul.f32 %v681_v31, %v670_v11 }
  0x95   : > { %v388_v7 = vmul.f32 %v372_v13, %v772_v57  ;;  %v373_v53 = vmul.f32 %v357_v14, %v782_v3  ;;  %v338_v20 = vmul.f32 0.5, %v733_v9  ;;  %v403_v22 = vadd.f32 %v387_v15, %v768_v59 }
  0x96   : > { %v374_v23 = vmul.f32 %v358_v16, %v785_v5  ;;  %v359_v24 = vmul.f32 0.044715, %v798_v17  ;;  %v813_v27 = vadd.f32 %v695_v37, %v305_v18  ;;  %v284_v11 = vmul.f32 %v681_v31, %v668_v10 }
  0x97   : > { %v404_v26 = vadd.f32 %v388_v7, %v772_v57  ;;  %v389_v63 = vmul.f32 %v373_v53, %v782_v3  ;;  %v419_v9 = vmul.f32 0.7978846, %v403_v22  ;;  %v306_v10 = vmul.f32 %v686_v32, %v283_v54 }
  0x98   : > { %v572_v25 = vpop.eup %571  ;;  %v390_v30 = vmul.f32 %v374_v23, %v785_v5  ;;  %v375_v33 = vmul.f32 %v359_v24, %v798_v17  ;;  %v340_v23 = vmul.f32 0.5, %v772_v57 }
  0x99   : > { %v574_v28 = vpop.eup %573  ;;  %v443_v29 = vadd.f32 1.0, %v572_v25  ;;  %v420_v36 = vmul.f32 0.7978846, %v404_v26  ;;  %v405_v38 = vadd.f32 %v389_v63, %v782_v3  ;;  %587 = vtanh.f32 %v419_v9 }
  0x9a   : > { %v576_v34 = vpop.eup %575  ;;  %v444_v35 = vadd.f32 1.0, %v574_v28  ;;  %v406_v46 = vadd.f32 %v390_v30, %v785_v5  ;;  %v329_v6 = vadd.f32 %v695_v37, %v306_v10  ;;  %v341_v63 = vmul.f32 0.5, %v782_v3 }
  0x9b   : > { %v578_v31 = vpop.eup %577  ;;  %v459_v43 = vmul.f32 %v443_v29, %v735_v12  ;;  %v445_v44 = vadd.f32 1.0, %v576_v34  ;;  %589 = vtanh.f32 %v420_v36  ;;  %v421_v42 = vmul.f32 0.7978846, %v405_v38 }
  0x9c   : > { %v580_v39 = vpop.eup %579  ;;  %v460_v40 = vmul.f32 %v444_v35, %v742_v21  ;;  %v446_v41 = vadd.f32 1.0, %v578_v31  ;;  %v422_v47 = vmul.f32 0.7978846, %v406_v46  ;;  %v391_v12 = vmul.f32 %v375_v33, %v798_v17 }
  0x9d   : > { %v582_v48 = vpop.eup %581  ;;  %475 = vst [vmem:[%s824_s24] sm:$0xff] %v459_v43  ;;  %v461_v49 = vmul.f32 %v445_v44, %v333_v60  ;;  %v447_v45 = vadd.f32 1.0, %v580_v39  ;;  %591 = vtanh.f32 %v421_v42  ;;  %v360_v21 = vmul.f32 0.044715, %v813_v27 }
  0x9e   : > { %v584_v56 = vpop.eup %583  ;;  %476 = vst [vmem:[%s824_s24 + $0x8] sm:$0xff] %v460_v40  ;;  %v462_v50 = vmul.f32 %v446_v41, %v334_v0  ;;  %v448_v55 = vadd.f32 1.0, %v582_v48  ;;  %593 = vtanh.f32 %v422_v47  ;;  %v407_v60 = vadd.f32 %v391_v12, %v798_v17 }
  0x9f   : > { %477 = vst [vmem:[%s824_s24 + $0x10] sm:$0xff] %v461_v49  ;;  %v463_v62 = vmul.f32 %v447_v45, %v335_v8  ;;  %v449_v58 = vadd.f32 1.0, %v584_v56  ;;  %v586_v1 = vpop.eup %585  ;;  %v376_v2 = vmul.f32 %v360_v21, %v813_v27  ;;  %v307_v0 = vmul.f32 %v686_v32, %v284_v11 }
  0xa0   : > { %478 = vst [vmem:[%s824_s24 + $0x18] sm:$0xff] %v462_v50  ;;  %v464_v61 = vmul.f32 %v448_v55, %v336_v52  ;;  %v450_v51 = vadd.f32 1.0, %v586_v1  ;;  %v423_v13 = vmul.f32 0.7978846, %v407_v60  ;;  %v361_v14 = vmul.f32 0.044715, %v329_v6 }
  0xa1   : > { %479 = vst [vmem:[%s824_s24 + $0x20] sm:$0xff] %v463_v62  ;;  %v465_v4 = vmul.f32 %v449_v58, %v337_v19  ;;  %v392_v8 = vmul.f32 %v376_v2, %v813_v27  ;;  %v330_v15 = vadd.f32 %v695_v37, %v307_v0  ;;  %v339_v19 = vmul.f32 0.5, %v768_v59 }
  0xa2   : > { %480 = vst [vmem:[%s824_s24 + $0x28] sm:$0xff] %v464_v61  ;;  %v466_v16 = vmul.f32 %v450_v51, %v338_v20  ;;  %595 = vtanh.f32 %v423_v13  ;;  %v377_v18 = vmul.f32 %v361_v14, %v329_v6  ;;  %v342_v59 = vmul.f32 0.5, %v785_v5 }
  0xa3   : > { %481 = vst [vmem:[%s824_s24 + $0x30] sm:$0xff] %v465_v4  ;;  %v408_v52 = vadd.f32 %v392_v8, %v813_v27  ;;  %v362_v7 = vmul.f32 0.044715, %v330_v15  ;;  %v343_v38 = vmul.f32 0.5, %v798_v17  ;;  %v344_v43 = vmul.f32 0.5, %v813_v27 }
  0xa4   : > { %482 = vst [vmem:[%s824_s24 + $0x38] sm:$0xff] %v466_v16  ;;  %v393_v32 = vmul.f32 %v377_v18, %v329_v6  ;;  %v345_v40 = vmul.f32 0.5, %v329_v6  ;;  %v346_v48 = vmul.f32 0.5, %v330_v15 }
  0xa5   : > { %v424_v53 = vmul.f32 0.7978846, %v408_v52  ;;  %v378_v54 = vmul.f32 %v362_v7, %v330_v15 }
  0xa6   : > { %v588_v22 = vpop.eup %587  ;;  %v409_v24 = vadd.f32 %v393_v32, %v329_v6 }
  0xa7   : > { %597 = vtanh.f32 %v424_v53  ;;  %v394_v37 = vmul.f32 %v378_v54, %v330_v15  ;;  %v451_v20 = vadd.f32 1.0, %v588_v22 }
  0xa8   : > { %v590_v25 = vpop.eup %589  ;;  %v425_v11 = vmul.f32 0.7978846, %v409_v24 }
  0xa9   : > { %v452_v26 = vadd.f32 1.0, %v590_v25  ;;  %v410_v28 = vadd.f32 %v394_v37, %v330_v15  ;;  %v467_v9 = vmul.f32 %v451_v20, %v339_v19 }
  0xaa   : > { %v592_v29 = vpop.eup %591  ;;  %599 = vtanh.f32 %v425_v11 }
  0xab   : > { %v594_v30 = vpop.eup %593  ;;  %v468_v57 = vmul.f32 %v452_v26, %v340_v23  ;;  %v453_v33 = vadd.f32 1.0, %v592_v29  ;;  %v426_v34 = vmul.f32 0.7978846, %v410_v28  ;;  %483 = vst [vmem:[%s824_s24 + $0x40] sm:$0xff] %v467_v9 }
  0xac   : > { %v454_v35 = vadd.f32 1.0, %v594_v30 }
  0xad   : > { %484 = vst [vmem:[%s824_s24 + $0x48] sm:$0xff] %v468_v57  ;;  %v469_v36 = vmul.f32 %v453_v33, %v341_v63  ;;  %601 = vtanh.f32 %v426_v34 }
  0xae   : > { %v470_v3 = vmul.f32 %v454_v35, %v342_v59 }
  0xaf   : > { %v596_v10 = vpop.eup %595  ;;  %485 = vst [vmem:[%s824_s24 + $0x50] sm:$0xff] %v469_v36 }
  0xb0   : > { %486 = vst [vmem:[%s824_s24 + $0x58] sm:$0xff] %v470_v3  ;;  %v455_v5 = vadd.f32 1.0, %v596_v10 }
  0xb2   : > { %v471_v31 = vmul.f32 %v455_v5, %v343_v38 }
  0xb4   : > { %v598_v44 = vpop.eup %597  ;;  %487 = vst [vmem:[%s824_s24 + $0x60] sm:$0xff] %v471_v31 }
  0xb5   : > { %v456_v46 = vadd.f32 1.0, %v598_v44 }
  0xb7   : > { %v472_v39 = vmul.f32 %v456_v46, %v344_v43  ;;  %v600_v41 = vpop.eup %599 }
  0xb8   : > { %v457_v42 = vadd.f32 1.0, %v600_v41 }
  0xb9   : > { %488 = vst [vmem:[%s824_s24 + $0x68] sm:$0xff] %v472_v39 }
  0xba   : > { %v602_v49 = vpop.eup %601  ;;  %v473_v17 = vmul.f32 %v457_v42, %v345_v40 }
  0xbb   : > { %v458_v45 = vadd.f32 1.0, %v602_v49 }
  0xbc   : > { %489 = vst [vmem:[%s824_s24 + $0x70] sm:$0xff] %v473_v17 }
  0xbd   : > { %v474_v47 = vmul.f32 %v458_v45, %v346_v48 }
  0xbf   : > { %490 = vst [vmem:[%s824_s24 + $0x78] sm:$0x7f] %v474_v47 }
  0xc0 PF: > { %s13_s12 = sadd.s32 1, %s609_s12  }
  0xc1   : > { %p10_p4 = scmp.ge.s32.totalorder %s13_s12, 4  }
  0xc3   :  { %12 = sbr.rel (!%p10_p4) target bundleno = 1 (0x1), region = 62 }

// kernel: _lambda_.14
= control target key start
LH: loop header
LB: loop body
LE: loop exit
PB: predicated region body
PF: predicated region fallthrough
CT: control target
= control target key end

     0   :  { %s683_s12 = smov 0   ;;  %s765_s0 = inlined_call_operand.vmem [shape: f32[2,31,256], index: 0, kind: input, shape index: {}]   ;;  %s766_s1 = inlined_call_operand.vmem [shape: bf16[2,128,128], index: 1, kind: input, shape index: {}]   ;;  %s767_s2 = inlined_call_operand.vmem [shape: f32[1,128], index: 2, kind: input, shape index: {}]   ;;  %s768_s3 = inlined_call_operand.vmem [shape: f32[2,31,128], index: 3, kind: output, shape index: {}]  }
   0x1 LB: > { %s517_s13 = sadd.s32 4294967295, %s661_s12   ;;  %p521_p0 = scmp.ge.s32.totalorder %s661_s12, 1  ;;  %s661_s12 = sphi %s683_s12, %s13_s12  }
   0x2   : > { %p137_p1 = scmp.lt.s32.totalorder %s661_s12, 3 }
   0x4   : > { %p138_p2 = pnand %p521_p0, %p137_p1 }
   0x5   : > { %p161_p3 = scmp.lt.s32.totalorder (!%p138_p2), %s517_s13, 1 }
   0x6   : > { %141 = sbr.rel (%p138_p2) target bundleno = 277 (0x115), region = 32 }
   0xb   : > { %v631_v0 = vld [vmem:[%s766_s1 + $0x78] sm:$0xff]   ;;  %v633_v2 = vld [vmem:[%s766_s1 + $0x70] sm:$0xff]   ;;  %v635_v4 = vld [vmem:[%s766_s1 + $0x68] sm:$0xff]   ;;  %s770_s13 = smov (!%p161_p3, %s517_s13), 1 }
   0xc   : > { %v632_v1 = vld [vmem:[%s766_s1 + $0x38] sm:$0xff]   ;;  %583 = vmatprep.subr.bf16.mxu0 %v631_v0  ;;  %v634_v3 = vld [vmem:[%s766_s1 + $0x30] sm:$0xff]   ;;  %v636_v5 = vld [vmem:[%s766_s1 + $0x28] sm:$0xff]   ;;  %s561_s30 = sshll.u32 %s770_s13, 6  ;;  %s562_s27 = sshll.u32 %s770_s13, 5 }
   0xd   : > { %603 = vmatprep.subr.bf16.mxu1 %v632_v1  ;;  %584 = vmatpush3.bf16.msra.mxu0 %v631_v0  ;;  %v637_v6 = vld [vmem:[%s766_s1 + $0x60] sm:$0xff]   ;;  %v639_v8 = vld [vmem:[%s766_s1 + $0x58] sm:$0xff]   ;;  %s727_s10 = scalar_lea.vmem %s765_s0, %s561_s30  ;;  %v641_v10 = vld [vmem:[%s766_s1 + $0x50] sm:$0xff]   ;;  %s170_s30 = scalar_lea.vmem %s768_s3, %s562_s27 }
   0xe   : > { %604 = vmatpush3.bf16.msra.mxu1 %v632_v1  ;;  %585 = vmatprep.subr.bf16.mxu0 %v633_v2  ;;  %v638_v7 = vld [vmem:[%s766_s1 + $0x20] sm:$0xff]   ;;  %v640_v9 = vld [vmem:[%s766_s1 + $0x18] sm:$0xff]   ;;  %v173_v11 = vld [vmem:[%s727_s10 + $0x8] sm:$0xff] }
   0xf   : > { %605 = vmatprep.subr.bf16.mxu1 %v634_v3  ;;  %v175_v12 = vld [vmem:[%s727_s10 + $0x18] sm:$0xff]  ;;  %v172_v13 = vld [vmem:[%s727_s10] sm:$0xff]  ;;  %v642_v14 = vld [vmem:[%s766_s1 + $0x10] sm:$0xff]  }
  0x10   : > { %v198_v15 = vpack.c.bf16 %v175_v12, %v173_v11  ;;  %v174_v16 = vld [vmem:[%s727_s10 + $0x10] sm:$0xff]  ;;  %v643_v18 = vld [vmem:[%s766_s1 + $0x48] sm:$0xff]   ;;  %v645_v20 = vld [vmem:[%s766_s1 + $0x40] sm:$0xff]  }
  0x11   : > { %586 = vmatpush3.bf16.msra.mxu0 %v633_v2  ;;  %v180_v17 = vpack.c.bf16 %v174_v16, %v172_v13  ;;  %v644_v19 = vld [vmem:[%s766_s1 + $0x8] sm:$0xff]   ;;  %v646_v21 = vld [vmem:[%s766_s1] sm:$0xff]   ;;  %v179_v23 = vld [vmem:[%s727_s10 + $0x38] sm:$0x7f] }
  0x12   : > { %606 = vmatpush3.bf16.msra.mxu1 %v634_v3  ;;  %587 = vmatprep.subr.bf16.mxu0 %v635_v4  ;;  %v177_v22 = vld [vmem:[%s727_s10 + $0x28] sm:$0xff]  ;;  %v176_v24 = vld [vmem:[%s727_s10 + $0x20] sm:$0xff]  ;;  %v178_v25 = vld [vmem:[%s727_s10 + $0x30] sm:$0x7f] }
  0x13   : > { %607 = vmatprep.subr.bf16.mxu1 %v636_v5  ;;  %599 = vmatprep.mubr.bf16.mxu0 %v198_v15  ;;  %v199_v26 = vpack.c.bf16 %v179_v23, %v177_v22  ;;  %v181_v27 = vpack.c.bf16 %v178_v25, %v176_v24  ;;  %v558_v30 = vld [vmem:[%s767_s2] ss:$0 sm:$0xff] }
  0x14   : > { %619 = vmatprep.mubr.bf16.mxu1 %v180_v17 }
  0x15   : > { %588 = vmatpush3.bf16.msra.mxu0 %v635_v4 }
  0x16   : > { %608 = vmatpush3.bf16.msra.mxu1 %v636_v5  ;;  %589 = vmatprep.subr.bf16.mxu0 %v637_v6 }
  0x17   : > { %609 = vmatprep.subr.bf16.mxu1 %v638_v7 }
  0x19   : > { %590 = vmatpush3.bf16.msra.mxu0 %v637_v6 }
  0x1a   : > { %610 = vmatpush3.bf16.msra.mxu1 %v638_v7  ;;  %591 = vmatprep.subr.bf16.mxu0 %v639_v8 }
  0x1b   : > { %611 = vmatprep.subr.bf16.mxu1 %v640_v9 }
  0x1d   : > { %592 = vmatpush3.bf16.msra.mxu0 %v639_v8 }
  0x1e   : > { %612 = vmatpush3.bf16.msra.mxu1 %v640_v9  ;;  %593 = vmatprep.subr.bf16.mxu0 %v641_v10 }
  0x1f   : > { %613 = vmatprep.subr.bf16.mxu1 %v642_v14 }
  0x21   : > { %594 = vmatpush3.bf16.msra.mxu0 %v641_v10 }
  0x22   : > { %614 = vmatpush3.bf16.msra.mxu1 %v642_v14  ;;  %595 = vmatprep.subr.bf16.mxu0 %v643_v18 }
  0x23   : > { %615 = vmatprep.subr.bf16.mxu1 %v644_v19 }
  0x25   : > { %596 = vmatpush3.bf16.msra.mxu0 %v643_v18 }
  0x26   : > { %616 = vmatpush3.bf16.msra.mxu1 %v644_v19  ;;  %597 = vmatprep.subr.bf16.mxu0 %v645_v20 }
  0x27   : > { %617 = vmatprep.subr.bf16.mxu1 %v646_v21 }
  0x29   : > { %598 = vmatpush3.bf16.msra.mxu0 %v645_v20 }
  0x2a   : > { %618 = vmatpush3.bf16.msra.mxu1 %v646_v21 }
  0x2c   : > { %600 = vmatmul.mubr.bf16.vlgmr.msra.gmra.mxu0 %v199_v26 }
  0x2d   : > { %620 = vmatmul.mubr.bf16.vlgmr.msra.gmra.mxu1 %v181_v27 }
  0xec   : > { %v601_v28 = vpop.f32.mrf.mxu0 }
  0xed   : > { %v621_v29 = vpop.f32.mrf.mxu1 }
  0xee   : > { %v405_v31 = vadd.f32 %v621_v29, %v601_v28  ;;  %v299_v32 = vpop.f32.mrf.mxu0 }
  0xef   : > { %v396_v33 = vpop.f32.mrf.mxu1 }
  0xf0   : > { %v420_v34 = vadd.f32 %v558_v30, %v405_v31  ;;  %v397_v35 = vadd.f32 %v396_v33, %v299_v32  ;;  %v602_v36 = vpop.f32.mrf.mxu0 }
  0xf1   : > { %v622_v37 = vpop.f32.mrf.mxu1 }
  0xf2   : > { %v428_v38 = vmul.f32 0.044715, %v420_v34  ;;  %v418_v39 = vadd.f32 %v558_v30, %v397_v35  ;;  %v408_v40 = vadd.f32 %v622_v37, %v602_v36  ;;  %v302_v41 = vpop.f32.mrf.mxu0  ;;  %v424_v2 = vmul.f32 0.5, %v420_v34 }
  0xf3   : > { %v399_v42 = vpop.f32.mrf.mxu1 }
  0xf4   : > { %v432_v43 = vmul.f32 %v428_v38, %v420_v34  ;;  %v426_v44 = vmul.f32 0.044715, %v418_v39  ;;  %v421_v45 = vadd.f32 %v558_v30, %v408_v40  ;;  %v400_v46 = vadd.f32 %v399_v42, %v302_v41 }
  0xf5   : > { %v422_v6 = vmul.f32 0.5, %v418_v39 }
  0xf6   : > { %v436_v47 = vmul.f32 %v432_v43, %v420_v34  ;;  %v430_v48 = vmul.f32 %v426_v44, %v418_v39  ;;  %v429_v49 = vmul.f32 0.044715, %v421_v45  ;;  %v419_v50 = vadd.f32 %v558_v30, %v400_v46 }
  0xf7   : > { %v425_v10 = vmul.f32 0.5, %v421_v45 }
  0xf8   : > { %v440_v51 = vadd.f32 %v436_v47, %v420_v34  ;;  %v434_v52 = vmul.f32 %v430_v48, %v418_v39  ;;  %v433_v53 = vmul.f32 %v429_v49, %v421_v45  ;;  %v427_v54 = vmul.f32 0.044715, %v419_v50 }
  0xf9   : > { %v423_v14 = vmul.f32 0.5, %v419_v50 }
  0xfa   : > { %v444_v55 = vmul.f32 0.7978846, %v440_v51  ;;  %v438_v56 = vadd.f32 %v434_v52, %v418_v39  ;;  %v437_v57 = vmul.f32 %v433_v53, %v421_v45  ;;  %v431_v58 = vmul.f32 %v427_v54, %v419_v50 }
  0xfc   : > { %647 = vtanh.f32 %v444_v55  ;;  %v442_v59 = vmul.f32 0.7978846, %v438_v56  ;;  %v441_v60 = vadd.f32 %v437_v57, %v421_v45  ;;  %v435_v61 = vmul.f32 %v431_v58, %v419_v50 }
  0xfe   : > { %649 = vtanh.f32 %v442_v59  ;;  %v445_v62 = vmul.f32 0.7978846, %v441_v60  ;;  %v439_v63 = vadd.f32 %v435_v61, %v419_v50 }
 0x100   : > { %651 = vtanh.f32 %v445_v62  ;;  %v443_v0 = vmul.f32 0.7978846, %v439_v63 }
 0x102   : > { %653 = vtanh.f32 %v443_v0 }
 0x109   : > { %v648_v1 = vpop.eup %647 }
 0x10a   : > { %v452_v3 = vadd.f32 1.0, %v648_v1 }
 0x10b   : > { %v650_v4 = vpop.eup %649 }
 0x10c   : > { %v456_v5 = vmul.f32 %v452_v3, %v424_v2  ;;  %v450_v7 = vadd.f32 1.0, %v650_v4 }
 0x10d   : > { %v652_v8 = vpop.eup %651 }
 0x10e   : > { %460 = vst [vmem:[%s170_s30 + $0x10] sm:$0xff] %v456_v5  ;;  %v454_v9 = vmul.f32 %v450_v7, %v422_v6  ;;  %v453_v11 = vadd.f32 1.0, %v652_v8 }
 0x10f   : > { %v654_v12 = vpop.eup %653 }
 0x110   : > { %458 = vst [vmem:[%s170_s30] sm:$0xff] %v454_v9  ;;  %v457_v13 = vmul.f32 %v453_v11, %v425_v10  ;;  %v451_v15 = vadd.f32 1.0, %v654_v12 }
 0x112   : > { %461 = vst [vmem:[%s170_s30 + $0x18] sm:$0x7f] %v457_v13  ;;  %v455_v16 = vmul.f32 %v451_v15, %v423_v14 }
 0x114   : > { %459 = vst [vmem:[%s170_s30 + $0x8] sm:$0xff] %v455_v16 }
 0x115 PF: > { %s13_s12 = sadd.s32 1, %s661_s12  }
 0x116   : > { %p10_p4 = scmp.ge.s32.totalorder %s13_s12, 4  }
 0x118   :  { %12 = sbr.rel (!%p10_p4) target bundleno = 1 (0x1), region = 63 }

// kernel: _lambda_.13
= control target key start
LH: loop header
LB: loop body
LE: loop exit
PB: predicated region body
PF: predicated region fallthrough
CT: control target
= control target key end

     0   :  { %s1049_s12 = smov 0   ;;  %s1228_s0 = inlined_call_operand.vmem [shape: f32[2,64,256], index: 0, kind: input, shape index: {}]   ;;  %s1229_s1 = inlined_call_operand.vmem [shape: bf16[3,128,128], index: 1, kind: input, shape index: {}]   ;;  %s1230_s2 = inlined_call_operand.vmem [shape: f32[1,128], index: 2, kind: input, shape index: {}]   ;;  %s1231_s3 = inlined_call_operand.vmem [shape: f32[2,63,128], index: 3, kind: output, shape index: {}]  }
   0x1 LB: > { %s779_s13 = sadd.s32 4294967295, %s1027_s12   ;;  %p783_p0 = scmp.ge.s32.totalorder %s1027_s12, 1  ;;  %s1027_s12 = sphi %s1049_s12, %s13_s12  }
   0x2   : > { %p137_p1 = scmp.lt.s32.totalorder %s1027_s12, 3 }
   0x4   : > { %p138_p2 = pnand %p783_p0, %p137_p1 }
   0x5   : > { %p161_p3 = scmp.lt.s32.totalorder (!%p138_p2), %s779_s13, 1 }
   0x6   : > { %141 = sbr.rel (%p138_p2) target bundleno = 309 (0x135), region = 32 }
   0xb   : > { %v981_v0 = vld [vmem:[%s1229_s1 + $0x78] sm:$0xff]   ;;  %v983_v2 = vld [vmem:[%s1229_s1 + $0x70] sm:$0xff]   ;;  %v985_v4 = vld [vmem:[%s1229_s1 + $0x68] sm:$0xff]   ;;  %s1233_s13 = smov (!%p161_p3, %s779_s13), 1  ;;  %vm472_vm0 = vsmask.f32 7424 }
   0xc   : > { %v982_v1 = vld [vmem:[%s1229_s1 + $0x38] sm:$0xff]   ;;  %885 = vmatprep.subr.bf16.mxu0 %v981_v0  ;;  %v984_v3 = vld [vmem:[%s1229_s1 + $0x30] sm:$0xff]   ;;  %v986_v5 = vld [vmem:[%s1229_s1 + $0x28] sm:$0xff]   ;;  %s847_s30 = sshll.u32 %s1233_s13, 7  ;;  %s848_s18 = sshll.u32 %s1233_s13, 6 }
   0xd   : > { %909 = vmatprep.subr.bf16.mxu1 %v982_v1  ;;  %886 = vmatpush3.bf16.msra.mxu0 %v981_v0  ;;  %v987_v6 = vld [vmem:[%s1229_s1 + $0x60] sm:$0xff]   ;;  %v989_v8 = vld [vmem:[%s1229_s1 + $0x58] sm:$0xff]   ;;  %s1093_s10 = scalar_lea.vmem %s1228_s0, %s847_s30  ;;  %v991_v10 = vld [vmem:[%s1229_s1 + $0x50] sm:$0xff]   ;;  %s1210_s21 = scalar_lea.vmem %s1231_s3, %s848_s18 }
   0xe   : > { %910 = vmatpush3.bf16.msra.mxu1 %v982_v1  ;;  %887 = vmatprep.subr.bf16.mxu0 %v983_v2  ;;  %v988_v7 = vld [vmem:[%s1229_s1 + $0x20] sm:$0xff]   ;;  %v990_v9 = vld [vmem:[%s1229_s1 + $0x18] sm:$0xff]   ;;  %v173_v11 = vld [vmem:[%s1093_s10 + $0x8] sm:$0xff] }
   0xf   : > { %911 = vmatprep.subr.bf16.mxu1 %v984_v3  ;;  %v175_v12 = vld [vmem:[%s1093_s10 + $0x18] sm:$0xff]  ;;  %v172_v13 = vld [vmem:[%s1093_s10] sm:$0xff]  ;;  %v992_v14 = vld [vmem:[%s1229_s1 + $0x10] sm:$0xff]  }
  0x10   : > { %v208_v15 = vpack.c.bf16 %v175_v12, %v173_v11  ;;  %v174_v16 = vld [vmem:[%s1093_s10 + $0x10] sm:$0xff]  ;;  %v993_v18 = vld [vmem:[%s1229_s1 + $0x48] sm:$0xff]   ;;  %v995_v20 = vld [vmem:[%s1229_s1 + $0x40] sm:$0xff]  }
  0x11   : > { %888 = vmatpush3.bf16.msra.mxu0 %v983_v2  ;;  %v188_v17 = vpack.c.bf16 %v174_v16, %v172_v13  ;;  %v994_v19 = vld [vmem:[%s1229_s1 + $0x8] sm:$0xff]   ;;  %v996_v21 = vld [vmem:[%s1229_s1] sm:$0xff]   ;;  %v179_v23 = vld [vmem:[%s1093_s10 + $0x38] sm:$0xff] }
  0x12   : > { %912 = vmatpush3.bf16.msra.mxu1 %v984_v3  ;;  %889 = vmatprep.subr.bf16.mxu0 %v985_v4  ;;  %v177_v22 = vld [vmem:[%s1093_s10 + $0x28] sm:$0xff]  ;;  %v180_v24 = vld [vmem:[%s1093_s10 + $0x40] sm:$0xff]  ;;  %v182_v26 = vld [vmem:[%s1093_s10 + $0x50] sm:$0xff] }
  0x13   : > { %913 = vmatprep.subr.bf16.mxu1 %v986_v5  ;;  %901 = vmatprep.mubr.bf16.mxu0 %v208_v15  ;;  %v176_v25 = vld [vmem:[%s1093_s10 + $0x20] sm:$0xff]  ;;  %v178_v27 = vld [vmem:[%s1093_s10 + $0x30] sm:$0xff]  ;;  %v997_v28 = vld [vmem:[%s1229_s1 + $0xb8] sm:$0xff]   ;;  %v190_v30 = vpack.c.bf16 %v182_v26, %v180_v24  ;;  %v476_v31 = vshll.u32 %v188_v17, 16  ;;  %v209_v32 = vpack.c.bf16 %v179_v23, %v177_v22  ;;  %v474_v41 = vshrl.u32 %v188_v17, 16 }
  0x14   : > { %925 = vmatprep.mubr.bf16.mxu1 %v188_v17  ;;  %v181_v29 = vld [vmem:[%s1093_s10 + $0x48] sm:$0xff]  ;;  %v183_v33 = vld [vmem:[%s1093_s10 + $0x58] sm:$0xff]  ;;  %v184_v34 = vld [vmem:[%s1093_s10 + $0x60] sm:$0xff]  ;;  %v1130_v36 = vpack.c.bf16 %v178_v27, %v176_v25 }
  0x15   : > { %890 = vmatpush3.bf16.msra.mxu0 %v985_v4  ;;  %v186_v35 = vld [vmem:[%s1093_s10 + $0x70] sm:$0xff]  ;;  %v489_v37 = vshll.u32 %v190_v30, 16  ;;  %v210_v39 = vpack.c.bf16 %v183_v33, %v181_v29  ;;  %v478_v42 = vrot.slane %v476_v31, 1  ;;  %v185_v44 = vld [vmem:[%s1093_s10 + $0x68] sm:$0xff]  ;;  %v187_v45 = vld [vmem:[%s1093_s10 + $0x78] sm:$0xff]  ;;  %v493_v47 = vshrl.u32 %v190_v30, 16 }
  0x16   : > { %914 = vmatpush3.bf16.msra.mxu1 %v986_v5  ;;  %891 = vmatprep.subr.bf16.mxu0 %v987_v6  ;;  %v998_v38 = vld [vmem:[%s1229_s1 + $0xb0] sm:$0xff]   ;;  %v1135_v40 = vpack.c.bf16 %v186_v35, %v184_v34  ;;  %v481_v43 = vshll.u32 %v1130_v36, 16  ;;  %v999_v49 = vld [vmem:[%s1229_s1 + $0xa8] sm:$0xff]   ;;  %v211_v50 = vpack.c.bf16 %v187_v45, %v185_v44  ;;  %v1000_v55 = vld [vmem:[%s1229_s1 + $0xa0] sm:$0xff]   ;;  %v485_v61 = vshrl.u32 %v1130_v36, 16 }
  0x17   : > { %915 = vmatprep.subr.bf16.mxu1 %v988_v7  ;;  %v491_v46 = vrot.slane %v489_v37, 1  ;;  %v479_v51 = vor.u32 %v478_v42, %v474_v41  ;;  %v1001_v58 = vld [vmem:[%s1229_s1 + $0x98] sm:$0xff]   ;;  %v1002_v59 = vld [vmem:[%s1229_s1 + $0x90] sm:$0xff]   ;;  %v1003_v60 = vld [vmem:[%s1229_s1 + $0x88] sm:$0xff]  }
  0x18   : > { %v497_v48 = vshll.u32 %v1135_v40, 16  ;;  %v483_v52 = vrot.slane %v481_v43, 1  ;;  %v1004_v62 = vld [vmem:[%s1229_s1 + $0x80] sm:$0xff]   ;;  %v501_v63 = vshrl.u32 %v1135_v40, 16 }
  0x19   : > { %892 = vmatpush3.bf16.msra.mxu0 %v987_v6  ;;  %v495_v53 = vor.u32 %v493_v47, %v491_v46  ;;  %v844_v22 = vld [vmem:[%s1230_s2] ss:$0 sm:$0xff] }
  0x1a   : > { %916 = vmatpush3.bf16.msra.mxu1 %v988_v7  ;;  %893 = vmatprep.subr.bf16.mxu0 %v989_v8  ;;  %v499_v54 = vrot.slane %v497_v48, 1  ;;  %v484_v56 = vsel %vm472_vm0, %v479_v51, %v483_v52  ;;  %v487_v0 = vor.u32 %v485_v61, %v483_v52 }
  0x1b   : > { %917 = vmatprep.subr.bf16.mxu1 %v990_v9 }
  0x1c   : > { %v500_v57 = vsel %vm472_vm0, %v495_v53, %v499_v54  ;;  %v503_v1 = vor.u32 %v501_v63, %v499_v54  ;;  %v492_v2 = vsel %vm472_vm0, %v487_v0, %v491_v46 }
  0x1d   : > { %894 = vmatpush3.bf16.msra.mxu0 %v989_v8 }
  0x1e   : > { %918 = vmatpush3.bf16.msra.mxu1 %v990_v9  ;;  %895 = vmatprep.subr.bf16.mxu0 %v991_v10 }
  0x1f   : > { %919 = vmatprep.subr.bf16.mxu1 %v992_v14 }
  0x21   : > { %896 = vmatpush3.bf16.msra.mxu0 %v991_v10 }
  0x22   : > { %920 = vmatpush3.bf16.msra.mxu1 %v992_v14  ;;  %897 = vmatprep.subr.bf16.mxu0 %v993_v18 }
  0x23   : > { %921 = vmatprep.subr.bf16.mxu1 %v994_v19 }
  0x25   : > { %898 = vmatpush3.bf16.msra.mxu0 %v993_v18 }
  0x26   : > { %922 = vmatpush3.bf16.msra.mxu1 %v994_v19  ;;  %899 = vmatprep.subr.bf16.mxu0 %v995_v20 }
  0x27   : > { %923 = vmatprep.subr.bf16.mxu1 %v996_v21 }
  0x29   : > { %900 = vmatpush3.bf16.msra.mxu0 %v995_v20 }
  0x2a   : > { %924 = vmatpush3.bf16.msra.mxu1 %v996_v21  ;;  %933 = vmatprep.subr.bf16.mxu0 %v997_v28 }
  0x2b   : > { %957 = vmatprep.subr.bf16.mxu1 %v997_v28 }
  0x2c   : > { %902 = vmatmul.mubr.bf16.vlgmr.msra.gmra.mxu0 %v209_v32 }
  0x2d   : > { %926 = vmatmul.mubr.bf16.vlgmr.msra.gmra.mxu1 %v1130_v36  ;;  %934 = vmatpush3.bf16.msra.mxu0 %v997_v28 }
  0x2e   : > { %965 = vmatpush3.bf16.msra.mxu1 %v997_v28  ;;  %935 = vmatprep.subr.bf16.mxu0 %v998_v38 }
  0x2f   : > { %958 = vmatprep.subr.bf16.mxu1 %v998_v38  ;;  %905 = vmatprep.mubr.bf16.mxu0 %v210_v39 }
  0x30   : > { %929 = vmatprep.mubr.bf16.mxu1 %v190_v30 }
  0x31   : > { %936 = vmatpush3.bf16.msra.mxu0 %v998_v38 }
  0x32   : > { %966 = vmatpush3.bf16.msra.mxu1 %v998_v38  ;;  %937 = vmatprep.subr.bf16.mxu0 %v999_v49 }
  0x33   : > { %959 = vmatprep.subr.bf16.mxu1 %v999_v49 }
  0x34   : > { %906 = vmatmul.mubr.bf16.gmra.mxu0 %v211_v50 }
  0x35   : > { %938 = vmatpush3.bf16.msra.mxu0 %v999_v49  ;;  %930 = vmatmul.mubr.bf16.gmra.mxu1 %v1135_v40 }
  0x36   : > { %967 = vmatpush3.bf16.msra.mxu1 %v999_v49  ;;  %939 = vmatprep.subr.bf16.mxu0 %v1000_v55 }
  0x37   : > { %960 = vmatprep.subr.bf16.mxu1 %v1000_v55  ;;  %949 = vmatprep.mubr.bf16.mxu0 %v484_v56 }
  0x38   : > { %953 = vmatprep.mubr.bf16.mxu1 %v500_v57 }
  0x39   : > { %940 = vmatpush3.bf16.msra.mxu0 %v1000_v55 }
  0x3a   : > { %968 = vmatpush3.bf16.msra.mxu1 %v1000_v55  ;;  %941 = vmatprep.subr.bf16.mxu0 %v1001_v58 }
  0x3b   : > { %961 = vmatprep.subr.bf16.mxu1 %v1001_v58 }
  0x3d   : > { %942 = vmatpush3.bf16.msra.mxu0 %v1001_v58 }
  0x3e   : > { %969 = vmatpush3.bf16.msra.mxu1 %v1001_v58  ;;  %943 = vmatprep.subr.bf16.mxu0 %v1002_v59 }
  0x3f   : > { %962 = vmatprep.subr.bf16.mxu1 %v1002_v59 }
  0x41   : > { %944 = vmatpush3.bf16.msra.mxu0 %v1002_v59 }
  0x42   : > { %970 = vmatpush3.bf16.msra.mxu1 %v1002_v59  ;;  %945 = vmatprep.subr.bf16.mxu0 %v1003_v60 }
  0x43   : > { %963 = vmatprep.subr.bf16.mxu1 %v1003_v60 }
  0x45   : > { %946 = vmatpush3.bf16.msra.mxu0 %v1003_v60 }
  0x46   : > { %971 = vmatpush3.bf16.msra.mxu1 %v1003_v60  ;;  %947 = vmatprep.subr.bf16.mxu0 %v1004_v62 }
  0x47   : > { %964 = vmatprep.subr.bf16.mxu1 %v1004_v62 }
  0x49   : > { %948 = vmatpush3.bf16.msra.mxu0 %v1004_v62 }
  0x4a   : > { %972 = vmatpush3.bf16.msra.mxu1 %v1004_v62 }
  0x4c   : > { %950 = vmatmul.mubr.bf16.vlgmr.msra.gmra.mxu0 %v492_v2 }
  0x4d   : > { %954 = vmatmul.mubr.bf16.vlgmr.msra.gmra.mxu1 %v503_v1 }
  0xec   : > { %v903_v3 = vpop.f32.mrf.mxu0 }
  0xed   : > { %v927_v4 = vpop.f32.mrf.mxu1 }
  0xee   : > { %v311_v5 = vpop.f32.mrf.mxu0  ;;  %v433_v18 = vadd.f32 %v927_v4, %v903_v3 }
  0xef   : > { %v424_v6 = vpop.f32.mrf.mxu1 }
  0xf0   : > { %v904_v7 = vpop.f32.mrf.mxu0  ;;  %v425_v23 = vadd.f32 %v424_v6, %v311_v5 }
  0xf1   : > { %v928_v8 = vpop.f32.mrf.mxu1 }
  0xf2   : > { %v314_v9 = vpop.f32.mrf.mxu0  ;;  %v436_v29 = vadd.f32 %v928_v8, %v904_v7 }
  0xf3   : > { %v427_v10 = vpop.f32.mrf.mxu1 }
  0xf4   : > { %v907_v11 = vpop.f32.mrf.mxu0  ;;  %v428_v51 = vadd.f32 %v427_v10, %v314_v9 }
  0xf5   : > { %v931_v12 = vpop.f32.mrf.mxu1 }
  0xf6   : > { %v327_v13 = vpop.f32.mrf.mxu0  ;;  %v449_v20 = vadd.f32 %v931_v12, %v907_v11 }
  0xf7   : > { %v440_v14 = vpop.f32.mrf.mxu1 }
  0xf8   : > { %v908_v15 = vpop.f32.mrf.mxu0  ;;  %v441_v26 = vadd.f32 %v440_v14, %v327_v13 }
  0xf9   : > { %v932_v16 = vpop.f32.mrf.mxu1 }
  0xfa   : > { %v330_v17 = vpop.f32.mrf.mxu0  ;;  %v452_v33 = vadd.f32 %v932_v16, %v908_v15 }
  0xfb   : > { %v443_v19 = vpop.f32.mrf.mxu1 }
  0xfc   : > { %v444_v56 = vadd.f32 %v443_v19, %v330_v17 }
 0x10c   : > { %v951_v21 = vpop.f32.mrf.mxu0 }
 0x10d   : > { %v623_v24 = vadd.f32 %v951_v21, %v433_v18  ;;  %v955_v25 = vpop.f32.mrf.mxu1 }
 0x10e   : > { %v627_v27 = vadd.f32 %v955_v25, %v449_v20  ;;  %v590_v28 = vpop.f32.mrf.mxu0 }
 0x10f   : > { %v1169_v30 = vadd.f32 %v844_v22, %v623_v24  ;;  %v621_v31 = vadd.f32 %v590_v28, %v425_v23  ;;  %v606_v32 = vpop.f32.mrf.mxu1 }
 0x110   : > { %v1171_v34 = vadd.f32 %v844_v22, %v627_v27  ;;  %v625_v35 = vadd.f32 %v606_v32, %v441_v26  ;;  %v952_v36 = vpop.f32.mrf.mxu0 }
 0x111   : > { %v654_v37 = vmul.f32 0.044715, %v1169_v30  ;;  %v1174_v38 = vadd.f32 %v844_v22, %v621_v31  ;;  %v624_v39 = vadd.f32 %v952_v36, %v436_v29  ;;  %v956_v40 = vpop.f32.mrf.mxu1  ;;  %v646_v31 = vmul.f32 0.5, %v1169_v30 }
 0x112   : > { %v658_v41 = vmul.f32 0.044715, %v1171_v34  ;;  %v1177_v42 = vadd.f32 %v844_v22, %v625_v35  ;;  %v628_v43 = vadd.f32 %v956_v40, %v452_v33  ;;  %v593_v50 = vpop.f32.mrf.mxu0  ;;  %v650_v35 = vmul.f32 0.5, %v1171_v34 }
 0x113   : > { %v662_v44 = vmul.f32 %v654_v37, %v1169_v30  ;;  %v652_v45 = vmul.f32 0.044715, %v1174_v38  ;;  %v1181_v46 = vadd.f32 %v844_v22, %v624_v39  ;;  %v609_v55 = vpop.f32.mrf.mxu1  ;;  %v622_v63 = vadd.f32 %v593_v50, %v428_v51 }
 0x114   : > { %v666_v47 = vmul.f32 %v658_v41, %v1171_v34  ;;  %v656_v48 = vmul.f32 0.044715, %v1177_v42  ;;  %v1185_v49 = vadd.f32 %v844_v22, %v628_v43  ;;  %v626_v3 = vadd.f32 %v609_v55, %v444_v56 }
 0x115   : > { %v670_v52 = vmul.f32 %v662_v44, %v1169_v30  ;;  %v660_v53 = vmul.f32 %v652_v45, %v1174_v38  ;;  %v655_v54 = vmul.f32 0.044715, %v1181_v46  ;;  %v637_v7 = vadd.f32 %v844_v22, %v622_v63 }
 0x116   : > { %v674_v57 = vmul.f32 %v666_v47, %v1171_v34  ;;  %v664_v58 = vmul.f32 %v656_v48, %v1177_v42  ;;  %v659_v59 = vmul.f32 0.044715, %v1185_v49  ;;  %v641_v11 = vadd.f32 %v844_v22, %v626_v3 }
 0x117   : > { %v678_v60 = vadd.f32 %v670_v52, %v1169_v30  ;;  %v668_v61 = vmul.f32 %v660_v53, %v1174_v38  ;;  %v663_v62 = vmul.f32 %v655_v54, %v1181_v46  ;;  %v653_v16 = vmul.f32 0.044715, %v637_v7 }
 0x118   : > { %v682_v0 = vadd.f32 %v674_v57, %v1171_v34  ;;  %v672_v1 = vmul.f32 %v664_v58, %v1177_v42  ;;  %v667_v2 = vmul.f32 %v659_v59, %v1185_v49  ;;  %v657_v18 = vmul.f32 0.044715, %v641_v11 }
 0x119   : > { %v686_v4 = vmul.f32 0.7978846, %v678_v60  ;;  %v676_v5 = vadd.f32 %v668_v61, %v1174_v38  ;;  %v671_v6 = vmul.f32 %v663_v62, %v1181_v46  ;;  %v661_v20 = vmul.f32 %v653_v16, %v637_v7 }
 0x11a   : > { %v690_v8 = vmul.f32 0.7978846, %v682_v0  ;;  %v680_v9 = vadd.f32 %v672_v1, %v1177_v42  ;;  %v675_v10 = vmul.f32 %v667_v2, %v1185_v49  ;;  %v665_v21 = vmul.f32 %v657_v18, %v641_v11 }
 0x11b   : > { %1005 = vtanh.f32 %v686_v4  ;;  %v684_v12 = vmul.f32 0.7978846, %v676_v5  ;;  %v679_v13 = vadd.f32 %v671_v6, %v1181_v46  ;;  %v669_v22 = vmul.f32 %v661_v20, %v637_v7 }
 0x11c   : > { %1007 = vtanh.f32 %v690_v8  ;;  %v688_v14 = vmul.f32 0.7978846, %v680_v9  ;;  %v683_v15 = vadd.f32 %v675_v10, %v1185_v49  ;;  %v673_v23 = vmul.f32 %v665_v21, %v641_v11 }
 0x11d   : > { %1009 = vtanh.f32 %v684_v12  ;;  %v687_v17 = vmul.f32 0.7978846, %v679_v13  ;;  %v677_v24 = vadd.f32 %v669_v22, %v637_v7  ;;  %v644_v40 = vmul.f32 0.5, %v1174_v38 }
 0x11e   : > { %1011 = vtanh.f32 %v688_v14  ;;  %v691_v19 = vmul.f32 0.7978846, %v683_v15  ;;  %v681_v25 = vadd.f32 %v673_v23, %v641_v11  ;;  %v648_v44 = vmul.f32 0.5, %v1177_v42 }
 0x11f   : > { %1013 = vtanh.f32 %v687_v17  ;;  %v685_v26 = vmul.f32 0.7978846, %v677_v24  ;;  %v647_v34 = vmul.f32 0.5, %v1181_v46  ;;  %v651_v52 = vmul.f32 0.5, %v1185_v49 }
 0x120   : > { %1015 = vtanh.f32 %v691_v19  ;;  %v689_v27 = vmul.f32 0.7978846, %v681_v25  ;;  %v645_v56 = vmul.f32 0.5, %v637_v7  ;;  %v649_v58 = vmul.f32 0.5, %v641_v11 }
 0x121   : > { %1017 = vtanh.f32 %v685_v26 }
 0x122   : > { %1019 = vtanh.f32 %v689_v27 }
 0x128   : > { %v1006_v28 = vpop.eup %1005 }
 0x129   : > { %v1008_v29 = vpop.eup %1007  ;;  %v702_v32 = vadd.f32 1.0, %v1006_v28 }
 0x12a   : > { %v1010_v33 = vpop.eup %1009  ;;  %v706_v36 = vadd.f32 1.0, %v1008_v29 }
 0x12b   : > { %v1012_v37 = vpop.eup %1011  ;;  %v710_v39 = vmul.f32 %v702_v32, %v646_v31  ;;  %v700_v41 = vadd.f32 1.0, %v1010_v33 }
 0x12c   : > { %v1014_v30 = vpop.eup %1013  ;;  %v714_v43 = vmul.f32 %v706_v36, %v650_v35  ;;  %v704_v45 = vadd.f32 1.0, %v1012_v37 }
 0x12d   : > { %v1016_v47 = vpop.eup %1015  ;;  %718 = vst [vmem:[%s1210_s21 + $0x10] sm:$0xff] %v710_v39  ;;  %v708_v48 = vmul.f32 %v700_v41, %v644_v40  ;;  %v703_v50 = vadd.f32 1.0, %v1014_v30 }
 0x12e   : > { %722 = vst [vmem:[%s1210_s21 + $0x30] sm:$0xff] %v714_v43  ;;  %v712_v51 = vmul.f32 %v704_v45, %v648_v44  ;;  %v707_v38 = vadd.f32 1.0, %v1016_v47  ;;  %v1018_v42 = vpop.eup %1017 }
 0x12f   : > { %716 = vst [vmem:[%s1210_s21] sm:$0xff] %v708_v48  ;;  %v711_v53 = vmul.f32 %v703_v50, %v647_v34  ;;  %v1020_v55 = vpop.eup %1019  ;;  %v701_v57 = vadd.f32 1.0, %v1018_v42 }
 0x130   : > { %720 = vst [vmem:[%s1210_s21 + $0x20] sm:$0xff] %v712_v51  ;;  %v715_v54 = vmul.f32 %v707_v38, %v651_v52  ;;  %v705_v46 = vadd.f32 1.0, %v1020_v55 }
 0x131   : > { %719 = vst [vmem:[%s1210_s21 + $0x18] sm:$0xff] %v711_v53  ;;  %v709_v59 = vmul.f32 %v701_v57, %v645_v56 }
 0x132   : > { %723 = vst [vmem:[%s1210_s21 + $0x38] sm:$0x7f] %v715_v54  ;;  %v713_v60 = vmul.f32 %v705_v46, %v649_v58 }
 0x133   : > { %717 = vst [vmem:[%s1210_s21 + $0x8] sm:$0xff] %v709_v59 }
 0x134   : > { %721 = vst [vmem:[%s1210_s21 + $0x28] sm:$0xff] %v713_v60 }
 0x135 PF: > { %s13_s12 = sadd.s32 1, %s1027_s12  }
 0x136   : > { %p10_p4 = scmp.ge.s32.totalorder %s13_s12, 4  }
 0x138   :  { %12 = sbr.rel (!%p10_p4) target bundleno = 1 (0x1), region = 64 }

// kernel: _lambda_.15
= control target key start
LH: loop header
LB: loop body
LE: loop exit
PB: predicated region body
PF: predicated region fallthrough
CT: control target
= control target key end

     0   :  { %vm43_vm0 = vcmask 1045504   ;;  %s543_s0 = inlined_call_operand.vmem [shape: f32[62,128], index: 0, kind: input, shape index: {}]   ;;  %s544_s3 = inlined_call_operand.vmem [shape: bf16[128,128], index: 3, kind: input, shape index: {}]   ;;  %s545_s1 = inlined_call_operand.vmem [shape: f32[1,128], index: 1, kind: input, shape index: {}]   ;;  %s546_s2 = inlined_call_operand.vmem [shape: f32[1,128], index: 2, kind: input, shape index: {}]   ;;  %s547_s4 = inlined_call_operand.vmem [shape: f32[1,128], index: 4, kind: input, shape index: {}]   ;;  %s548_s5 = inlined_call_operand.vmem [shape: f32[62,128], index: 5, kind: output, shape index: {}]  }
   0x1   :  { %v25_v0 = vld [vmem:[%s543_s0 + $0x20] sm:$0xff]  ;;  %v26_v2 = vld [vmem:[%s543_s0 + $0x28] sm:$0xff]  ;;  %v28_v4 = vld [vmem:[%s543_s0 + $0x38] sm:$0x3f] }
   0x2   :  { %v21_v1 = vld [vmem:[%s543_s0] sm:$0xff]  ;;  %37 = vadd.xlane.f32.xlu1 %v25_v0  ;;  %v22_v3 = vld [vmem:[%s543_s0 + $0x8] sm:$0xff]  ;;  %v23_v5 = vld [vmem:[%s543_s0 + $0x10] sm:$0xff]  ;;  %v44_v6 = vsel %vm43_vm0, %v28_v4, 0.0 }
   0x3   :  { %29 = vadd.xlane.f32.xlu0 %v21_v1  ;;  %v27_v7 = vld [vmem:[%s543_s0 + $0x30] sm:$0xff]  ;;  %v24_v8 = vld [vmem:[%s543_s0 + $0x18] sm:$0xff]  ;;  %v368_v44 = vld [vmem:[%s544_s3 + $0x28] sm:$0xff]  }
   0x4   :  { %v366_v42 = vld [vmem:[%s544_s3 + $0x38] sm:$0xff]   ;;  %v367_v43 = vld [vmem:[%s544_s3 + $0x30] sm:$0xff]   ;;  %v369_v45 = vld [vmem:[%s544_s3 + $0x20] sm:$0xff]  }
   0x5   :  { %326 = vmatprep.subr.bf16.mxu0 %v366_v42  ;;  %350 = vmatprep.subr.bf16.mxu1 %v366_v42  ;;  %v370_v46 = vld [vmem:[%s544_s3 + $0x18] sm:$0xff]   ;;  %v371_v47 = vld [vmem:[%s544_s3 + $0x10] sm:$0xff]   ;;  %v372_v48 = vld [vmem:[%s544_s3 + $0x8] sm:$0xff]  }
   0x6   :  { %39 = vadd.xlane.f32.xlu1 %v26_v2  ;;  %327 = vmatpush3.bf16.msra.mxu0 %v366_v42  ;;  %v373_v49 = vld [vmem:[%s544_s3] sm:$0xff]  }
   0x7   :  { %31 = vadd.xlane.f32.xlu0 %v22_v3  ;;  %358 = vmatpush3.bf16.msra.mxu1 %v366_v42 }
   0x8   :  { %328 = vmatprep.subr.bf16.mxu0 %v367_v43  ;;  %351 = vmatprep.subr.bf16.mxu1 %v367_v43 }
   0xa   :  { %33 = vadd.xlane.f32.xlu1 %v23_v5  ;;  %329 = vmatpush3.bf16.msra.mxu0 %v367_v43 }
   0xb   :  { %45 = vadd.xlane.f32.xlu0 %v44_v6  ;;  %359 = vmatpush3.bf16.msra.mxu1 %v367_v43 }
   0xc   :  { %330 = vmatprep.subr.bf16.mxu0 %v368_v44  ;;  %352 = vmatprep.subr.bf16.mxu1 %v368_v44 }
   0xe   :  { %41 = vadd.xlane.f32.xlu1 %v27_v7  ;;  %331 = vmatpush3.bf16.msra.mxu0 %v368_v44 }
   0xf   :  { %35 = vadd.xlane.f32.xlu0 %v24_v8  ;;  %360 = vmatpush3.bf16.msra.mxu1 %v368_v44 }
  0x10   :  { %332 = vmatprep.subr.bf16.mxu0 %v369_v45  ;;  %353 = vmatprep.subr.bf16.mxu1 %v369_v45 }
  0x12   :  { %333 = vmatpush3.bf16.msra.mxu0 %v369_v45 }
  0x13   :  { %361 = vmatpush3.bf16.msra.mxu1 %v369_v45  ;;  %334 = vmatprep.subr.bf16.mxu0 %v370_v46 }
  0x14   :  { %354 = vmatprep.subr.bf16.mxu1 %v370_v46 }
  0x16   :  { %335 = vmatpush3.bf16.msra.mxu0 %v370_v46 }
  0x17   :  { %362 = vmatpush3.bf16.msra.mxu1 %v370_v46  ;;  %336 = vmatprep.subr.bf16.mxu0 %v371_v47 }
  0x18   :  { %355 = vmatprep.subr.bf16.mxu1 %v371_v47 }
  0x1a   :  { %337 = vmatpush3.bf16.msra.mxu0 %v371_v47 }
  0x1b   :  { %363 = vmatpush3.bf16.msra.mxu1 %v371_v47  ;;  %338 = vmatprep.subr.bf16.mxu0 %v372_v48 }
  0x1c   :  { %356 = vmatprep.subr.bf16.mxu1 %v372_v48 }
  0x1e   :  { %339 = vmatpush3.bf16.msra.mxu0 %v372_v48 }
  0x1f   :  { %364 = vmatpush3.bf16.msra.mxu1 %v372_v48  ;;  %340 = vmatprep.subr.bf16.mxu0 %v373_v49 }
  0x20   :  { %357 = vmatprep.subr.bf16.mxu1 %v373_v49 }
  0x22   :  { %341 = vmatpush3.bf16.msra.mxu0 %v373_v49 }
  0x23   :  { %365 = vmatpush3.bf16.msra.mxu1 %v373_v49 }
  0x8b   :  { %v38_v9 = vpop.xlane.xlu1 %37 }
  0x8c   :  { %v30_v10 = vpop.xlane.xlu0 %29  ;;  %v52_v11 = vmul.f32 0.0078125, %v38_v9 }
  0x8d   :  { %v48_v12 = vmul.f32 0.0078125, %v30_v10 }
  0x8e   :  { %v445_v13 = vsub.f32 %v25_v0, %v52_v11 }
  0x8f   :  { %v447_v14 = vsub.f32 %v21_v1, %v48_v12  ;;  %v40_v15 = vpop.xlane.xlu1 %39  ;;  %v303_v12 = vld [vmem:[%s545_s1] ss:$0 sm:$0xff] }
  0x90   :  { %v32_v16 = vpop.xlane.xlu0 %31  ;;  %v53_v17 = vmul.f32 0.0078125, %v40_v15  ;;  %v68_v22 = vmul.f32 %v445_v13, %v445_v13 }
  0x91   :  { %v49_v18 = vmul.f32 0.0078125, %v32_v16  ;;  %v64_v19 = vmul.f32 %v447_v14, %v447_v14 }
  0x92   :  { %v451_v20 = vsub.f32 %v26_v2, %v53_v17 }
  0x93   :  { %v453_v21 = vsub.f32 %v22_v3, %v49_v18  ;;  %72 = vadd.xlane.f32.xlu0 %v64_v19  ;;  %v34_v23 = vpop.xlane.xlu1 %33  ;;  %v304_v19 = vld [vmem:[%s546_s2] ss:$0 sm:$0xff] }
  0x94   :  { %v46_v24 = vpop.xlane.xlu0 %45  ;;  %v50_v25 = vmul.f32 0.0078125, %v34_v23  ;;  %v69_v29 = vmul.f32 %v451_v20, %v451_v20 }
  0x95   :  { %v65_v26 = vmul.f32 %v453_v21, %v453_v21  ;;  %v55_v27 = vmul.f32 0.0078125, %v46_v24 }
  0x96   :  { %v459_v28 = vsub.f32 %v23_v5, %v50_v25 }
  0x97   :  { %80 = vadd.xlane.f32.xlu0 %v68_v22  ;;  %74 = vadd.xlane.f32.xlu1 %v65_v26  ;;  %v42_v30 = vpop.xlane.xlu1 %41  ;;  %v465_v35 = vsub.f32 %v28_v4, %v55_v27 }
  0x98   :  { %v36_v31 = vpop.xlane.xlu0 %35  ;;  %v54_v32 = vmul.f32 0.0078125, %v42_v30  ;;  %v66_v34 = vmul.f32 %v459_v28, %v459_v28 }
  0x99   :  { %v51_v33 = vmul.f32 0.0078125, %v36_v31  ;;  %v71_v40 = vmul.f32 %v465_v35, %v465_v35 }
  0x9a   :  { %v467_v36 = vsub.f32 %v27_v7, %v54_v32 }
  0x9b   :  { %v469_v37 = vsub.f32 %v24_v8, %v51_v33  ;;  %76 = vadd.xlane.f32.xlu0 %v66_v34  ;;  %82 = vadd.xlane.f32.xlu1 %v69_v29  ;;  %v86_v41 = vsel %vm43_vm0, %v71_v40, 0.0 }
  0x9c   :  { %v70_v38 = vmul.f32 %v467_v36, %v467_v36 }
  0x9d   :  { %v67_v39 = vmul.f32 %v469_v37, %v469_v37 }
  0x9f   :  { %84 = vadd.xlane.f32.xlu0 %v70_v38  ;;  %78 = vadd.xlane.f32.xlu1 %v67_v39 }
  0xa3   :  { %87 = vadd.xlane.f32.xlu1 %v86_v41 }
 0x11c   :  { %v73_v50 = vpop.xlane.xlu0 %72 }
 0x11d   :  { %v89_v51 = vmul.f32 0.0078125, %v73_v50 }
 0x11f   :  { %v97_v52 = vadd.f32 1e-05, %v89_v51 }
 0x120   :  { %v75_v53 = vpop.xlane.xlu1 %74  ;;  %v81_v54 = vpop.xlane.xlu0 %80 }
 0x121   :  { %374 = vrsqrt.f32 %v97_v52  ;;  %v90_v55 = vmul.f32 0.0078125, %v75_v53  ;;  %v93_v56 = vmul.f32 0.0078125, %v81_v54 }
 0x123   :  { %v98_v57 = vadd.f32 1e-05, %v90_v55  ;;  %v101_v58 = vadd.f32 1e-05, %v93_v56 }
 0x124   :  { %v83_v59 = vpop.xlane.xlu1 %82  ;;  %v77_v60 = vpop.xlane.xlu0 %76 }
 0x125   :  { %376 = vrsqrt.f32 %v98_v57  ;;  %v94_v61 = vmul.f32 0.0078125, %v83_v59  ;;  %v91_v62 = vmul.f32 0.0078125, %v77_v60 }
 0x126   :  { %378 = vrsqrt.f32 %v101_v58 }
 0x127   :  { %v102_v63 = vadd.f32 1e-05, %v94_v61  ;;  %v99_v0 = vadd.f32 1e-05, %v91_v62 }
 0x128   :  { %v79_v1 = vpop.xlane.xlu1 %78  ;;  %v85_v2 = vpop.xlane.xlu0 %84 }
 0x129   :  { %380 = vrsqrt.f32 %v102_v63  ;;  %v92_v3 = vmul.f32 0.0078125, %v79_v1  ;;  %v95_v4 = vmul.f32 0.0078125, %v85_v2 }
 0x12a   :  { %382 = vrsqrt.f32 %v99_v0 }
 0x12b   :  { %v100_v5 = vadd.f32 1e-05, %v92_v3  ;;  %v103_v6 = vadd.f32 1e-05, %v95_v4 }
 0x12c   :  { %v88_v7 = vpop.xlane.xlu1 %87 }
 0x12d   :  { %384 = vrsqrt.f32 %v100_v5  ;;  %v96_v8 = vmul.f32 0.0078125, %v88_v7 }
 0x12e   :  { %v375_v9 = vpop.eup %374  ;;  %386 = vrsqrt.f32 %v103_v6 }
 0x12f   :  { %v104_v10 = vadd.f32 1e-05, %v96_v8  ;;  %v113_v11 = vmul.f32 %v375_v9, %v447_v14 }
 0x131   :  { %388 = vrsqrt.f32 %v104_v10  ;;  %v128_v18 = vmul.f32 %v303_v12, %v113_v11 }
 0x132   :  { %v377_v15 = vpop.eup %376 }
 0x133   :  { %v379_v16 = vpop.eup %378  ;;  %v114_v17 = vmul.f32 %v377_v15, %v453_v21  ;;  %v143_v14 = vadd.f32 %v304_v19, %v128_v18 }
 0x134   :  { %v117_v22 = vmul.f32 %v379_v16, %v445_v13 }
 0x135   :  { %v129_v23 = vmul.f32 %v303_v12, %v114_v17 }
 0x136   :  { %v381_v24 = vpop.eup %380  ;;  %v132_v29 = vmul.f32 %v303_v12, %v117_v22 }
 0x137   :  { %v383_v25 = vpop.eup %382  ;;  %v144_v26 = vadd.f32 %v304_v19, %v129_v23  ;;  %v118_v27 = vmul.f32 %v381_v24, %v451_v20 }
 0x138   :  { %v115_v30 = vmul.f32 %v383_v25, %v459_v28  ;;  %v147_v34 = vadd.f32 %v304_v19, %v132_v29 }
 0x139   :  { %v151_v31 = vpack.c.bf16 %v144_v26, %v143_v14  ;;  %v133_v32 = vmul.f32 %v303_v12, %v118_v27 }
 0x13a   :  { %v385_v21 = vpop.eup %384  ;;  %v130_v13 = vmul.f32 %v303_v12, %v115_v30 }
 0x13b   :  { %v387_v33 = vpop.eup %386  ;;  %342 = vmatprep.mubr.bf16.mxu0 %v151_v31  ;;  %v148_v38 = vadd.f32 %v304_v19, %v133_v32  ;;  %v116_v39 = vmul.f32 %v385_v21, %v469_v37 }
 0x13c   :  { %v119_v40 = vmul.f32 %v387_v33, %v467_v36  ;;  %v145_v20 = vadd.f32 %v304_v19, %v130_v13  ;;  %v305_v36 = vld [vmem:[%s547_s4] ss:$0 sm:$0xff] }
 0x13d   :  { %v153_v41 = vpack.c.bf16 %v148_v38, %v147_v34  ;;  %v131_v42 = vmul.f32 %v303_v12, %v116_v39 }
 0x13e   :  { %v389_v43 = vpop.eup %388  ;;  %v134_v45 = vmul.f32 %v303_v12, %v119_v40 }
 0x13f   :  { %346 = vmatprep.mubr.bf16.mxu1 %v153_v41  ;;  %v146_v44 = vadd.f32 %v304_v19, %v131_v42  ;;  %v120_v28 = vmul.f32 %v389_v43, %v465_v35 }
 0x140   :  { %v149_v48 = vadd.f32 %v304_v19, %v134_v45 }
 0x141   :  { %v152_v46 = vpack.c.bf16 %v146_v44, %v145_v20  ;;  %v135_v47 = vmul.f32 %v303_v12, %v120_v28 }
 0x143   :  { %343 = vmatmul.mubr.bf16.vlgmr.msra.gmra.mxu0 %v152_v46  ;;  %v150_v49 = vadd.f32 %v304_v19, %v135_v47 }
 0x145   :  { %v154_v50 = vpack.c.bf16 %v150_v49, %v149_v48 }
 0x147   :  { %347 = vmatmul.mubr.bf16.vlgmr.msra.gmra.mxu1 %v154_v50 }
 0x203   :  { %v344_v37 = vpop.f32.mrf.mxu0 }
 0x204   :  { %v269_v51 = vadd.f32 %v344_v37, %v305_v36 }
 0x205   :  { %v260_v52 = vpop.f32.mrf.mxu0 }
 0x206   :  { %293 = vst [vmem:[%s548_s5 + $0x10] sm:$0xff] %v269_v51  ;;  %v261_v35 = vadd.f32 %v305_v36, %v260_v52 }
 0x207   :  { %v345_v53 = vpop.f32.mrf.mxu0  ;;  %v348_v54 = vpop.f32.mrf.mxu1 }
 0x208   :  { %291 = vst [vmem:[%s548_s5] sm:$0xff] %v261_v35  ;;  %v272_v55 = vadd.f32 %v345_v53, %v305_v36  ;;  %v285_v56 = vadd.f32 %v348_v54, %v305_v36 }
 0x209   :  { %v263_v57 = vpop.f32.mrf.mxu0  ;;  %v276_v58 = vpop.f32.mrf.mxu1 }
 0x20a   :  { %294 = vst [vmem:[%s548_s5 + $0x18] sm:$0xff] %v272_v55  ;;  %297 = vst [vmem:[%s548_s5 + $0x30] sm:$0xff] %v285_v56  ;;  %v264_v59 = vadd.f32 %v305_v36, %v263_v57  ;;  %v277_v60 = vadd.f32 %v305_v36, %v276_v58 }
 0x20b   :  { %v349_v61 = vpop.f32.mrf.mxu1 }
 0x20c   :  { %292 = vst [vmem:[%s548_s5 + $0x8] sm:$0xff] %v264_v59  ;;  %295 = vst [vmem:[%s548_s5 + $0x20] sm:$0xff] %v277_v60  ;;  %v288_v62 = vadd.f32 %v349_v61, %v305_v36 }
 0x20d   :  { %v279_v63 = vpop.f32.mrf.mxu1 }
 0x20e   :  { %298 = vst [vmem:[%s548_s5 + $0x38] sm:$0x3f] %v288_v62  ;;  %v280_v0 = vadd.f32 %v305_v36, %v279_v63 }
 0x210   :  { %296 = vst [vmem:[%s548_s5 + $0x28] sm:$0xff] %v280_v0 }

// kernel: _lambda_.16
= control target key start
LH: loop header
LB: loop body
LE: loop exit
PB: predicated region body
PF: predicated region fallthrough
CT: control target
= control target key end

     0   :  { %s2055_s12 = smov 0   ;;  %s2422_s0 = inlined_call_operand.vmem [shape: f32[2,39,128], index: 0, kind: input, shape index: {}]   ;;  %s2423_s1 = inlined_call_operand.vmem [shape: bf16[9,128,128], index: 1, kind: input, shape index: {}]   ;;  %s2424_s2 = inlined_call_operand.vmem [shape: f32[1,128], index: 2, kind: input, shape index: {}]   ;;  %s2425_s3 = inlined_call_operand.vmem [shape: f32[2,31,128], index: 3, kind: output, shape index: {}]  }
   0x1 LB: > { %s1456_s13 = sadd.s32 4294967295, %s2033_s12   ;;  %p1460_p0 = scmp.ge.s32.totalorder %s2033_s12, 1  ;;  %s2033_s12 = sphi %s2055_s12, %s13_s12  }
   0x2   : > { %p137_p1 = scmp.lt.s32.totalorder %s2033_s12, 3 }
   0x4   : > { %p138_p2 = pnand %p1460_p0, %p137_p1 }
   0x5   : > { %p161_p3 = scmp.lt.s32.totalorder (!%p138_p2), %s1456_s13, 1 }
   0x6   : > { %141 = sbr.rel (%p138_p2) target bundleno = 406 (0x196), region = 32 }
   0xb   : > { %v1947_v0 = vld [vmem:[%s2423_s1 + $0x78] sm:$0xff]   ;;  %v1949_v2 = vld [vmem:[%s2423_s1 + $0x70] sm:$0xff]   ;;  %v1951_v4 = vld [vmem:[%s2423_s1 + $0x68] sm:$0xff]   ;;  %s2427_s13 = smov (!%p161_p3, %s1456_s13), 1  ;;  %vm212_vm0 = vsmask.f32 7424 }
   0xc   : > { %v1948_v1 = vld [vmem:[%s2423_s1 + $0x38] sm:$0xff]   ;;  %1758 = vmatprep.subr.bf16.mxu0 %v1947_v0  ;;  %v1950_v3 = vld [vmem:[%s2423_s1 + $0x30] sm:$0xff]   ;;  %v1952_v5 = vld [vmem:[%s2423_s1 + $0x28] sm:$0xff]   ;;  %s1938_s30 = smul.u32 40, %s2427_s13  ;;  %vm445_vm1 = vcmask 1046528   ;;  %vm966_vm3 = vcmask 1044480  }
   0xd   : > { %1778 = vmatprep.subr.bf16.mxu1 %v1948_v1  ;;  %1759 = vmatpush3.bf16.msra.mxu0 %v1947_v0  ;;  %v1953_v6 = vld [vmem:[%s2423_s1 + $0x60] sm:$0xff]   ;;  %v1955_v8 = vld [vmem:[%s2423_s1 + $0x58] sm:$0xff]   ;;  %v1957_v10 = vld [vmem:[%s2423_s1 + $0x50] sm:$0xff]   ;;  %vm571_vm2 = vsmask.f32 6400  ;;  %vm708_vm4 = vcmask 1045504  }
   0xe   : > { %1779 = vmatpush3.bf16.msra.mxu1 %v1948_v1  ;;  %1760 = vmatprep.subr.bf16.mxu0 %v1949_v2  ;;  %v1954_v7 = vld [vmem:[%s2423_s1 + $0x20] sm:$0xff]   ;;  %v1956_v9 = vld [vmem:[%s2423_s1 + $0x18] sm:$0xff]   ;;  %s2099_s10 = scalar_lea.vmem %s2422_s0, %s1938_s30  ;;  %v1958_v11 = vld [vmem:[%s2423_s1 + $0x10] sm:$0xff]   ;;  %vm834_vm5 = vsmask.f32 5376  ;;  %vm1379_vm7 = vcmask 1043456  }
   0xf   : > { %1780 = vmatprep.subr.bf16.mxu1 %v1950_v3  ;;  %v2108_v12 = vld [vmem:[%s2099_s10] sm:$0xff]  ;;  %v2111_v13 = vld [vmem:[%s2099_s10 + $0x8] sm:$0xff]  ;;  %v2114_v14 = vld [vmem:[%s2099_s10 + $0x10] sm:$0xff]  ;;  %vm1092_vm6 = vsmask.f32 4352  ;;  %s1667_s15 = sshll.u32 %s2427_s13, 5 }
  0x10   : > { %v2117_v15 = vld [vmem:[%s2099_s10 + $0x18] sm:$0xff]  ;;  %v2121_v16 = vpack.c.bf16 %v2111_v13, %v2108_v12  ;;  %v1959_v20 = vld [vmem:[%s2423_s1 + $0x48] sm:$0xff]   ;;  %v1961_v26 = vld [vmem:[%s2423_s1 + $0x40] sm:$0xff]   ;;  %s170_s17 = scalar_lea.vmem %s2425_s3, %s1667_s15 }
  0x11   : > { %1761 = vmatpush3.bf16.msra.mxu0 %v1949_v2  ;;  %v2125_v17 = vpack.c.bf16 %v2117_v15, %v2114_v14  ;;  %v1960_v22 = vld [vmem:[%s2423_s1 + $0x8] sm:$0xff]   ;;  %v1962_v27 = vld [vmem:[%s2423_s1] sm:$0xff]   ;;  %v1963_v30 = vld [vmem:[%s2423_s1 + $0xb8] sm:$0xff]  }
  0x12   : > { %1781 = vmatpush3.bf16.msra.mxu1 %v1950_v3  ;;  %1762 = vmatprep.subr.bf16.mxu0 %v1951_v4  ;;  %v2128_v18 = vshrl.u32 %v2121_v16, 16  ;;  %v2131_v19 = vshll.u32 %v2121_v16, 16  ;;  %v1964_v35 = vld [vmem:[%s2423_s1 + $0xf8] sm:$0xff]   ;;  %v446_v37 = vrot.slane %v2121_v16, 1  ;;  %v1965_v39 = vld [vmem:[%s2423_s1 + $0xb0] sm:$0xff]   ;;  %v1967_v44 = vld [vmem:[%s2423_s1 + $0xa8] sm:$0xff]  }
  0x13   : > { %1782 = vmatprep.subr.bf16.mxu1 %v1952_v5  ;;  %1794 = vmatprep.mubr.bf16.mxu1 %v2121_v16  ;;  %v2138_v21 = vshll.u32 %v2125_v17, 16  ;;  %v2154_v29 = vshrl.u32 %v2125_v17, 16  ;;  %v447_v38 = vrot.slane %v2125_v17, 1  ;;  %v1966_v42 = vld [vmem:[%s2423_s1 + $0xf0] sm:$0xff]   ;;  %v1968_v46 = vld [vmem:[%s2423_s1 + $0xe8] sm:$0xff]   ;;  %v1969_v48 = vld [vmem:[%s2423_s1 + $0xa0] sm:$0xff]  }
  0x14   : > { %v218_v23 = vrot.slane %v2131_v19, 1  ;;  %v572_v31 = vrot.slane %v2128_v18, 1  ;;  %v573_v32 = vrot.slane %v2131_v19, 2  ;;  %v2190_v47 = vld [vmem:[%s2099_s10 + $0x20] sm:$0x7f]  ;;  %v967_v51 = vrot.slane %v2121_v16, 3 }
  0x15   : > { %1763 = vmatpush3.bf16.msra.mxu0 %v1951_v4  ;;  %v223_v24 = vrot.slane %v2138_v21, 1  ;;  %v575_v33 = vrot.slane %v2154_v29, 1  ;;  %v576_v34 = vrot.slane %v2138_v21, 2  ;;  %v448_v43 = vsel %vm445_vm1, %v446_v37, %v447_v38  ;;  %v1970_v49 = vld [vmem:[%s2423_s1 + $0xe0] sm:$0xff]   ;;  %v1971_v53 = vld [vmem:[%s2423_s1 + $0x98] sm:$0xff]   ;;  %v1973_v58 = vld [vmem:[%s2423_s1 + $0x90] sm:$0xff]  }
  0x16   : > { %1783 = vmatpush3.bf16.msra.mxu1 %v1952_v5  ;;  %1764 = vmatprep.subr.bf16.mxu0 %v1953_v6  ;;  %v219_v25 = vor.u32 %v218_v23, %v2128_v18  ;;  %v574_v40 = vor.u32 %v573_v32, %v572_v31  ;;  %v2200_v50 = vpack.c.bf16 %v2190_v47, %v2190_v47  ;;  %v968_v52 = vrot.slane %v2125_v17, 3  ;;  %v1972_v55 = vld [vmem:[%s2423_s1 + $0xd8] sm:$0xff]   ;;  %v1974_v2 = vld [vmem:[%s2423_s1 + $0xd0] sm:$0xff]  }
  0x17   : > { %1784 = vmatprep.subr.bf16.mxu1 %v1954_v7  ;;  %v227_v36 = vor.u32 %v2154_v29, %v223_v24  ;;  %v2172_v41 = vor.u32 %v576_v34, %v575_v33  ;;  %v1093_v57 = vrot.slane %v2128_v18, 3  ;;  %v1094_v60 = vrot.slane %v2131_v19, 4  ;;  %v1982_v33 = vld [vmem:[%s2423_s1 + $0x170] sm:$0xff]  }
  0x18   : > { %v224_v28 = vsel %vm212_vm0, %v219_v25, %v223_v24  ;;  %v970_v54 = vrot.slane %v2200_v50, 3  ;;  %v2211_v56 = vsel %vm966_vm3, %v967_v51, %v968_v52  ;;  %v2221_v61 = vshrl.u32 %v2200_v50, 16 }
  0x19   : > { %1765 = vmatpush3.bf16.msra.mxu0 %v1953_v6  ;;  %1774 = vmatprep.mubr.bf16.mxu0 %v224_v28  ;;  %v578_v45 = vsel %vm571_vm2, %v574_v40, %v2172_v41  ;;  %v1096_v62 = vrot.slane %v2154_v29, 3  ;;  %v2225_v63 = vshll.u32 %v2200_v50, 16  ;;  %v1095_v0 = vor.u32 %v1094_v60, %v1093_v57  ;;  %v1975_v6 = vld [vmem:[%s2423_s1 + $0x88] sm:$0xff]   ;;  %v1985_v40 = vld [vmem:[%s2423_s1 + $0x120] sm:$0xff]  }
  0x1a   : > { %1785 = vmatpush3.bf16.msra.mxu1 %v1954_v7  ;;  %1766 = vmatprep.subr.bf16.mxu0 %v1955_v8  ;;  %v2217_v59 = vsel %vm966_vm3, %v968_v52, %v970_v54  ;;  %v1097_v1 = vrot.slane %v2138_v21, 4  ;;  %v1100_v3 = vrot.slane %v2221_v61, 3  ;;  %v836_v23 = vrot.slane %v2131_v19, 3 }
  0x1b   : > { %1786 = vmatprep.subr.bf16.mxu1 %v1956_v9  ;;  %v1101_v5 = vrot.slane %v2225_v63, 4  ;;  %v838_v24 = vrot.slane %v2154_v29, 2  ;;  %v449_v25 = vrot.slane %v2200_v50, 1  ;;  %v709_v19 = vrot.slane %v2121_v16, 2 }
  0x1c   : > { %v1098_v4 = vor.u32 %v1097_v1, %v1096_v62  ;;  %v710_v29 = vrot.slane %v2125_v17, 2  ;;  %v842_v51 = vrot.slane %v2221_v61, 2  ;;  %v843_v52 = vrot.slane %v2225_v63, 3  ;;  %v1998_v62 = vld [vmem:[%s2423_s1 + $0x1f0] sm:$0xff]   ;;  %v2002_v1 = vld [vmem:[%s2423_s1 + $0x1e0] sm:$0xff]  }
  0x1d   : > { %1767 = vmatpush3.bf16.msra.mxu0 %v1955_v8  ;;  %v1102_v7 = vor.u32 %v1101_v5, %v1100_v3  ;;  %v1976_v8 = vld [vmem:[%s2423_s1 + $0xc8] sm:$0xff]   ;;  %v712_v54 = vrot.slane %v2200_v50, 2  ;;  %v2005_v3 = vld [vmem:[%s2423_s1 + $0x190] sm:$0xff]  }
  0x1e   : > { %1787 = vmatpush3.bf16.msra.mxu1 %v1956_v9  ;;  %1768 = vmatprep.subr.bf16.mxu0 %v1957_v10  ;;  %v1977_v9 = vld [vmem:[%s2423_s1 + $0x80] sm:$0xff]   ;;  %v711_v34 = vsel %vm708_vm4, %v709_v19, %v710_v29  ;;  %v1099_v37 = vsel %vm1092_vm6, %v1095_v0, %v1098_v4  ;;  %v844_v57 = vor.u32 %v843_v52, %v842_v51  ;;  %v2007_v5 = vld [vmem:[%s2423_s1 + $0x188] sm:$0xff]  }
  0x1f   : > { %1788 = vmatprep.subr.bf16.mxu1 %v1958_v11  ;;  %v713_v60 = vsel %vm708_vm4, %v710_v29, %v712_v54  ;;  %v2001_v0 = vld [vmem:[%s2423_s1 + $0x1a0] sm:$0xff]  }
  0x21   : > { %1769 = vmatpush3.bf16.msra.mxu0 %v1957_v10  ;;  %v582_v10 = vrot.slane %v2221_v61, 1  ;;  %v1997_v61 = vld [vmem:[%s2423_s1 + $0x1b0] sm:$0xff]  }
  0x22   : > { %1789 = vmatpush3.bf16.msra.mxu1 %v1958_v11  ;;  %1770 = vmatprep.subr.bf16.mxu0 %v1959_v20  ;;  %v585_v11 = vrot.slane %v2225_v63, 2  ;;  %v2000_v63 = vld [vmem:[%s2423_s1 + $0x1e8] sm:$0xff]  }
  0x23   : > { %1790 = vmatprep.subr.bf16.mxu1 %v1960_v22 }
  0x24   : > { %v586_v28 = vor.u32 %v585_v11, %v582_v10  ;;  %v2012_v10 = vld [vmem:[%s2423_s1 + $0x230] sm:$0xff]   ;;  %v1207_v11 = vpack.c.bf16 %v2114_v14, %v2111_v13 }
  0x25   : > { %1771 = vmatpush3.bf16.msra.mxu0 %v1959_v20  ;;  %v1978_v20 = vld [vmem:[%s2423_s1 + $0xc0] sm:$0xff]  }
  0x26   : > { %1791 = vmatpush3.bf16.msra.mxu1 %v1960_v22  ;;  %1772 = vmatprep.subr.bf16.mxu0 %v1961_v26  ;;  %v835_v22 = vrot.slane %v2128_v18, 2  ;;  %v1980_v18 = vld [vmem:[%s2423_s1 + $0x178] sm:$0xff]   ;;  %v587_v16 = vsel %vm571_vm2, %v2172_v41, %v586_v28  ;;  %v1986_v41 = vld [vmem:[%s2423_s1 + $0x160] sm:$0xff]  }
  0x27   : > { %1792 = vmatprep.subr.bf16.mxu1 %v1962_v27 }
  0x28   : > { %v837_v31 = vor.u32 %v836_v23, %v835_v22  ;;  %v2014_v22 = vld [vmem:[%s2423_s1 + $0x220] sm:$0xff]   ;;  %v2016_v23 = vld [vmem:[%s2423_s1 + $0x210] sm:$0xff]  }
  0x29   : > { %1773 = vmatpush3.bf16.msra.mxu0 %v1961_v26  ;;  %v839_v26 = vrot.slane %v2138_v21, 3  ;;  %v450_v21 = vsel %vm445_vm1, %v447_v38, %v449_v25  ;;  %v2281_v38 = vsel %vm1092_vm6, %v1098_v4, %v1102_v7  ;;  %v2006_v4 = vld [vmem:[%s2423_s1 + $0x1d0] sm:$0xff]   ;;  %v2009_v7 = vld [vmem:[%s2423_s1 + $0x180] sm:$0xff]  }
  0x2a   : > { %1793 = vmatpush3.bf16.msra.mxu1 %v1962_v27  ;;  %1798 = vmatprep.subr.bf16.mxu0 %v1963_v30  ;;  %v1979_v27 = vld [vmem:[%s2423_s1 + $0x138] sm:$0xff]   ;;  %v2018_v25 = vld [vmem:[%s2423_s1 + $0x200] sm:$0xff]  }
  0x2b   : > { %1818 = vmatprep.subr.bf16.mxu1 %v1964_v35  ;;  %v2266_v32 = vor.u32 %v839_v26, %v838_v24  ;;  %v2017_v24 = vld [vmem:[%s2423_s1 + $0x208] sm:$0xff]   ;;  %v1208_v26 = vpack.c.bf16 %v2190_v47, %v2117_v15 }
  0x2c   : > { %1775 = vmatmul.mubr.bf16.vlgmr.msra.gmra.mxu0 %v227_v36 }
  0x2d   : > { %1795 = vmatmul.mubr.bf16.vlgmr.msra.gmra.mxu1 %v2125_v17  ;;  %1799 = vmatpush3.bf16.msra.mxu0 %v1963_v30  ;;  %v1981_v30 = vld [vmem:[%s2423_s1 + $0x130] sm:$0xff]   ;;  %v841_v36 = vsel %vm834_vm5, %v837_v31, %v2266_v32  ;;  %v845_v50 = vsel %vm834_vm5, %v2266_v32, %v844_v57  ;;  %v1999_v17 = vld [vmem:[%s2423_s1 + $0x1a8] sm:$0xff]  }
  0x2e   : > { %1819 = vmatpush3.bf16.msra.mxu1 %v1964_v35  ;;  %1800 = vmatprep.subr.bf16.mxu0 %v1965_v39  ;;  %v1983_v35 = vld [vmem:[%s2423_s1 + $0x128] sm:$0xff]  }
  0x2f   : > { %1820 = vmatprep.subr.bf16.mxu1 %v1966_v42  ;;  %1814 = vmatprep.mubr.bf16.mxu0 %v448_v43  ;;  %v1988_v43 = vld [vmem:[%s2423_s1 + $0x158] sm:$0xff]  }
  0x30   : > { %1834 = vmatprep.mubr.bf16.mxu1 %v578_v45  ;;  %v1990_v45 = vld [vmem:[%s2423_s1 + $0x150] sm:$0xff]  }
  0x31   : > { %1801 = vmatpush3.bf16.msra.mxu0 %v1965_v39  ;;  %v1984_v39 = vld [vmem:[%s2423_s1 + $0x168] sm:$0xff]  }
  0x32   : > { %1821 = vmatpush3.bf16.msra.mxu1 %v1966_v42  ;;  %1802 = vmatprep.subr.bf16.mxu0 %v1967_v44  ;;  %v1987_v42 = vld [vmem:[%s2423_s1 + $0x118] sm:$0xff]  }
  0x33   : > { %1822 = vmatprep.subr.bf16.mxu1 %v1968_v46 }
  0x35   : > { %1803 = vmatpush3.bf16.msra.mxu0 %v1967_v44  ;;  %v1989_v44 = vld [vmem:[%s2423_s1 + $0x110] sm:$0xff]  }
  0x36   : > { %1823 = vmatpush3.bf16.msra.mxu1 %v1968_v46  ;;  %1804 = vmatprep.subr.bf16.mxu0 %v1969_v48  ;;  %v1991_v46 = vld [vmem:[%s2423_s1 + $0x108] sm:$0xff]  }
  0x37   : > { %1824 = vmatprep.subr.bf16.mxu1 %v1970_v49 }
  0x39   : > { %1805 = vmatpush3.bf16.msra.mxu0 %v1969_v48  ;;  %v1992_v48 = vld [vmem:[%s2423_s1 + $0x148] sm:$0xff]  }
  0x3a   : > { %1825 = vmatpush3.bf16.msra.mxu1 %v1970_v49  ;;  %1806 = vmatprep.subr.bf16.mxu0 %v1971_v53  ;;  %v1993_v49 = vld [vmem:[%s2423_s1 + $0x100] sm:$0xff]  }
  0x3b   : > { %1826 = vmatprep.subr.bf16.mxu1 %v1972_v55 }
  0x3d   : > { %1807 = vmatpush3.bf16.msra.mxu0 %v1971_v53  ;;  %v1994_v53 = vld [vmem:[%s2423_s1 + $0x140] sm:$0xff]  }
  0x3e   : > { %1827 = vmatpush3.bf16.msra.mxu1 %v1972_v55  ;;  %1808 = vmatprep.subr.bf16.mxu0 %v1973_v58  ;;  %v1995_v55 = vld [vmem:[%s2423_s1 + $0x1b8] sm:$0xff]  }
  0x3f   : > { %1828 = vmatprep.subr.bf16.mxu1 %v1974_v2 }
  0x41   : > { %1809 = vmatpush3.bf16.msra.mxu0 %v1973_v58  ;;  %v1996_v58 = vld [vmem:[%s2423_s1 + $0x1f8] sm:$0xff]  }
  0x42   : > { %1829 = vmatpush3.bf16.msra.mxu1 %v1974_v2  ;;  %1810 = vmatprep.subr.bf16.mxu0 %v1975_v6  ;;  %v2004_v2 = vld [vmem:[%s2423_s1 + $0x1d8] sm:$0xff]  }
  0x43   : > { %1830 = vmatprep.subr.bf16.mxu1 %v1976_v8 }
  0x45   : > { %1811 = vmatpush3.bf16.msra.mxu0 %v1975_v6  ;;  %v2008_v6 = vld [vmem:[%s2423_s1 + $0x1c8] sm:$0xff]  }
  0x46   : > { %1831 = vmatpush3.bf16.msra.mxu1 %v1976_v8  ;;  %1812 = vmatprep.subr.bf16.mxu0 %v1977_v9  ;;  %v2010_v8 = vld [vmem:[%s2423_s1 + $0x1c0] sm:$0xff]  }
  0x47   : > { %1832 = vmatprep.subr.bf16.mxu1 %v1978_v20 }
  0x49   : > { %1813 = vmatpush3.bf16.msra.mxu0 %v1977_v9  ;;  %v2011_v9 = vld [vmem:[%s2423_s1 + $0x238] sm:$0xff]  }
  0x4a   : > { %1833 = vmatpush3.bf16.msra.mxu1 %v1978_v20  ;;  %1838 = vmatprep.subr.bf16.mxu0 %v1979_v27  ;;  %v2013_v20 = vld [vmem:[%s2423_s1 + $0x228] sm:$0xff]  }
  0x4b   : > { %1858 = vmatprep.subr.bf16.mxu1 %v1980_v18 }
  0x4c   : > { %1815 = vmatmul.mubr.bf16.vlgmr.msra.gmra.mxu0 %v450_v21 }
  0x4d   : > { %1839 = vmatpush3.bf16.msra.mxu0 %v1979_v27  ;;  %1835 = vmatmul.mubr.bf16.vlgmr.msra.gmra.mxu1 %v587_v16 }
  0x4e   : > { %1859 = vmatpush3.bf16.msra.mxu1 %v1980_v18  ;;  %1840 = vmatprep.subr.bf16.mxu0 %v1981_v30 }
  0x4f   : > { %1860 = vmatprep.subr.bf16.mxu1 %v1982_v33  ;;  %1854 = vmatprep.mubr.bf16.mxu0 %v711_v34 }
  0x50   : > { %1874 = vmatprep.mubr.bf16.mxu1 %v841_v36 }
  0x51   : > { %1841 = vmatpush3.bf16.msra.mxu0 %v1981_v30 }
  0x52   : > { %1861 = vmatpush3.bf16.msra.mxu1 %v1982_v33  ;;  %1842 = vmatprep.subr.bf16.mxu0 %v1983_v35 }
  0x53   : > { %1862 = vmatprep.subr.bf16.mxu1 %v1984_v39 }
  0x55   : > { %1843 = vmatpush3.bf16.msra.mxu0 %v1983_v35 }
  0x56   : > { %1863 = vmatpush3.bf16.msra.mxu1 %v1984_v39  ;;  %1844 = vmatprep.subr.bf16.mxu0 %v1985_v40 }
  0x57   : > { %1864 = vmatprep.subr.bf16.mxu1 %v1986_v41 }
  0x59   : > { %1845 = vmatpush3.bf16.msra.mxu0 %v1985_v40 }
  0x5a   : > { %1865 = vmatpush3.bf16.msra.mxu1 %v1986_v41  ;;  %1846 = vmatprep.subr.bf16.mxu0 %v1987_v42 }
  0x5b   : > { %1866 = vmatprep.subr.bf16.mxu1 %v1988_v43 }
  0x5d   : > { %1847 = vmatpush3.bf16.msra.mxu0 %v1987_v42 }
  0x5e   : > { %1867 = vmatpush3.bf16.msra.mxu1 %v1988_v43  ;;  %1848 = vmatprep.subr.bf16.mxu0 %v1989_v44 }
  0x5f   : > { %1868 = vmatprep.subr.bf16.mxu1 %v1990_v45 }
  0x61   : > { %1849 = vmatpush3.bf16.msra.mxu0 %v1989_v44 }
  0x62   : > { %1869 = vmatpush3.bf16.msra.mxu1 %v1990_v45  ;;  %1850 = vmatprep.subr.bf16.mxu0 %v1991_v46 }
  0x63   : > { %1870 = vmatprep.subr.bf16.mxu1 %v1992_v48 }
  0x65   : > { %1851 = vmatpush3.bf16.msra.mxu0 %v1991_v46 }
  0x66   : > { %1871 = vmatpush3.bf16.msra.mxu1 %v1992_v48  ;;  %1852 = vmatprep.subr.bf16.mxu0 %v1993_v49 }
  0x67   : > { %1872 = vmatprep.subr.bf16.mxu1 %v1994_v53 }
  0x69   : > { %1853 = vmatpush3.bf16.msra.mxu0 %v1993_v49 }
  0x6a   : > { %1873 = vmatpush3.bf16.msra.mxu1 %v1994_v53  ;;  %1878 = vmatprep.subr.bf16.mxu0 %v1995_v55 }
  0x6b   : > { %1898 = vmatprep.subr.bf16.mxu1 %v1996_v58 }
  0x6c   : > { %1855 = vmatmul.mubr.bf16.vlgmr.msra.gmra.mxu0 %v713_v60 }
  0x6d   : > { %1879 = vmatpush3.bf16.msra.mxu0 %v1995_v55  ;;  %1875 = vmatmul.mubr.bf16.vlgmr.msra.gmra.mxu1 %v845_v50 }
  0x6e   : > { %1899 = vmatpush3.bf16.msra.mxu1 %v1996_v58  ;;  %1880 = vmatprep.subr.bf16.mxu0 %v1997_v61 }
  0x6f   : > { %1900 = vmatprep.subr.bf16.mxu1 %v1998_v62  ;;  %1894 = vmatprep.mubr.bf16.mxu0 %v2211_v56  ;;  %v2003_v56 = vld [vmem:[%s2423_s1 + $0x198] sm:$0xff]  }
  0x70   : > { %1914 = vmatprep.mubr.bf16.mxu1 %v1099_v37 }
  0x71   : > { %1881 = vmatpush3.bf16.msra.mxu0 %v1997_v61 }
  0x72   : > { %1901 = vmatpush3.bf16.msra.mxu1 %v1998_v62  ;;  %1882 = vmatprep.subr.bf16.mxu0 %v1999_v17 }
  0x73   : > { %1902 = vmatprep.subr.bf16.mxu1 %v2000_v63 }
  0x75   : > { %1883 = vmatpush3.bf16.msra.mxu0 %v1999_v17 }
  0x76   : > { %1903 = vmatpush3.bf16.msra.mxu1 %v2000_v63  ;;  %1884 = vmatprep.subr.bf16.mxu0 %v2001_v0 }
  0x77   : > { %1904 = vmatprep.subr.bf16.mxu1 %v2002_v1 }
  0x79   : > { %1885 = vmatpush3.bf16.msra.mxu0 %v2001_v0 }
  0x7a   : > { %1905 = vmatpush3.bf16.msra.mxu1 %v2002_v1  ;;  %1886 = vmatprep.subr.bf16.mxu0 %v2003_v56 }
  0x7b   : > { %1906 = vmatprep.subr.bf16.mxu1 %v2004_v2 }
  0x7d   : > { %1887 = vmatpush3.bf16.msra.mxu0 %v2003_v56 }
  0x7e   : > { %1907 = vmatpush3.bf16.msra.mxu1 %v2004_v2  ;;  %1888 = vmatprep.subr.bf16.mxu0 %v2005_v3 }
  0x7f   : > { %1908 = vmatprep.subr.bf16.mxu1 %v2006_v4 }
  0x81   : > { %1889 = vmatpush3.bf16.msra.mxu0 %v2005_v3 }
  0x82   : > { %1909 = vmatpush3.bf16.msra.mxu1 %v2006_v4  ;;  %1890 = vmatprep.subr.bf16.mxu0 %v2007_v5 }
  0x83   : > { %1910 = vmatprep.subr.bf16.mxu1 %v2008_v6 }
  0x85   : > { %1891 = vmatpush3.bf16.msra.mxu0 %v2007_v5 }
  0x86   : > { %1911 = vmatpush3.bf16.msra.mxu1 %v2008_v6  ;;  %1892 = vmatprep.subr.bf16.mxu0 %v2009_v7 }
  0x87   : > { %1912 = vmatprep.subr.bf16.mxu1 %v2010_v8 }
  0x89   : > { %1893 = vmatpush3.bf16.msra.mxu0 %v2009_v7 }
  0x8a   : > { %1913 = vmatpush3.bf16.msra.mxu1 %v2010_v8  ;;  %1918 = vmatprep.subr.bf16.mxu0 %v2011_v9 }
  0x8c   : > { %1895 = vmatmul.mubr.bf16.vlgmr.msra.gmra.mxu0 %v2217_v59  ;;  %v2015_v59 = vld [vmem:[%s2423_s1 + $0x218] sm:$0xff]  }
  0x8d   : > { %1919 = vmatpush3.bf16.msra.mxu0 %v2011_v9  ;;  %1915 = vmatmul.mubr.bf16.vlgmr.msra.gmra.mxu1 %v2281_v38 }
  0x8e   : > { %1920 = vmatprep.subr.bf16.mxu0 %v2012_v10  ;;  %1934 = vmatprep.mubr.bf16.mxu0 %v1207_v11 }
  0x91   : > { %1921 = vmatpush3.bf16.msra.mxu0 %v2012_v10 }
  0x92   : > { %1922 = vmatprep.subr.bf16.mxu0 %v2013_v20 }
  0x95   : > { %1923 = vmatpush3.bf16.msra.mxu0 %v2013_v20 }
  0x96   : > { %1924 = vmatprep.subr.bf16.mxu0 %v2014_v22 }
  0x99   : > { %1925 = vmatpush3.bf16.msra.mxu0 %v2014_v22 }
  0x9a   : > { %1926 = vmatprep.subr.bf16.mxu0 %v2015_v59 }
  0x9d   : > { %1927 = vmatpush3.bf16.msra.mxu0 %v2015_v59 }
  0x9e   : > { %1928 = vmatprep.subr.bf16.mxu0 %v2016_v23 }
  0xa1   : > { %1929 = vmatpush3.bf16.msra.mxu0 %v2016_v23 }
  0xa2   : > { %1930 = vmatprep.subr.bf16.mxu0 %v2017_v24 }
  0xa5   : > { %1931 = vmatpush3.bf16.msra.mxu0 %v2017_v24  ;;  %v1664_v24 = vld [vmem:[%s2424_s2] ss:$0 sm:$0xff] }
  0xa6   : > { %1932 = vmatprep.subr.bf16.mxu0 %v2018_v25 }
  0xa9   : > { %1933 = vmatpush3.bf16.msra.mxu0 %v2018_v25 }
  0xac   : > { %1935 = vmatmul.mubr.bf16.vlgmr.msra.gmra.mxu0 %v1208_v26 }
  0xec   : > { %v1776_v27 = vpop.f32.mrf.mxu0 }
  0xed   : > { %v1796_v18 = vpop.f32.mrf.mxu1 }
  0xee   : > { %v312_v28 = vpop.f32.mrf.mxu0  ;;  %v418_v43 = vadd.f32 %v1796_v18, %v1776_v27 }
  0xef   : > { %v409_v29 = vpop.f32.mrf.mxu1 }
  0xf0   : > { %v1777_v19 = vpop.f32.mrf.mxu0  ;;  %v410_v45 = vadd.f32 %v409_v29, %v312_v28 }
  0xf1   : > { %v1797_v30 = vpop.f32.mrf.mxu1 }
  0xf2   : > { %v315_v21 = vpop.f32.mrf.mxu0  ;;  %v421_v49 = vadd.f32 %v1797_v30, %v1777_v19 }
  0xf3   : > { %v412_v32 = vpop.f32.mrf.mxu1 }
  0xf4   : > { %v413_v57 = vadd.f32 %v412_v32, %v315_v21 }
 0x10c   : > { %v1816_v31 = vpop.f32.mrf.mxu0 }
 0x10d   : > { %v1836_v33 = vpop.f32.mrf.mxu1  ;;  %v552_v46 = vadd.f32 %v1816_v31, %v418_v43 }
 0x10e   : > { %v535_v16 = vpop.f32.mrf.mxu0 }
 0x10f   : > { %v672_v35 = vpop.f32.mrf.mxu1  ;;  %v550_v51 = vadd.f32 %v535_v16, %v410_v45  ;;  %v689_v54 = vadd.f32 %v1836_v33, %v552_v46 }
 0x110   : > { %v1817_v34 = vpop.f32.mrf.mxu0 }
 0x111   : > { %v1837_v37 = vpop.f32.mrf.mxu1  ;;  %v553_v55 = vadd.f32 %v1817_v34, %v421_v49  ;;  %v687_v58 = vadd.f32 %v672_v35, %v550_v51 }
 0x112   : > { %v538_v36 = vpop.f32.mrf.mxu0 }
 0x113   : > { %v675_v39 = vpop.f32.mrf.mxu1  ;;  %v551_v61 = vadd.f32 %v538_v36, %v413_v57  ;;  %v690_v17 = vadd.f32 %v1837_v37, %v553_v55 }
 0x115   : > { %v688_v2 = vadd.f32 %v675_v39, %v551_v61  ;;  %v1385_v61 = vrot.slane %v2117_v15, 4 }
 0x12c   : > { %v1856_v38 = vpop.f32.mrf.mxu0 }
 0x12d   : > { %v1876_v41 = vpop.f32.mrf.mxu1  ;;  %v815_v60 = vadd.f32 %v1856_v38, %v689_v54 }
 0x12e   : > { %v798_v40 = vpop.f32.mrf.mxu0 }
 0x12f   : > { %v930_v44 = vpop.f32.mrf.mxu1  ;;  %v813_v63 = vadd.f32 %v798_v40, %v687_v58  ;;  %v947_v1 = vadd.f32 %v1876_v41, %v815_v60 }
 0x130   : > { %v1857_v42 = vpop.f32.mrf.mxu0 }
 0x131   : > { %v1877_v52 = vpop.f32.mrf.mxu1  ;;  %v816_v56 = vadd.f32 %v1857_v42, %v690_v17  ;;  %v945_v4 = vadd.f32 %v930_v44, %v813_v63  ;;  %v1380_v17 = vrot.slane %v2108_v12, 4  ;;  %v1381_v63 = vrot.slane %v2111_v13, 4 }
 0x132   : > { %v801_v48 = vpop.f32.mrf.mxu0 }
 0x133   : > { %v933_v50 = vpop.f32.mrf.mxu1  ;;  %v814_v7 = vadd.f32 %v801_v48, %v688_v2  ;;  %v948_v8 = vadd.f32 %v1877_v52, %v816_v56  ;;  %v1382_v12 = vsel %vm1379_vm7, %v1380_v17, %v1381_v63 }
 0x135   : > { %v946_v59 = vadd.f32 %v933_v50, %v814_v7  ;;  %v1383_v50 = vrot.slane %v2114_v14, 4 }
 0x137   : > { %v1386_v2 = vsel %vm1379_vm7, %v1383_v50, %v1385_v61 }
 0x14c   : > { %v1896_v53 = vpop.f32.mrf.mxu0 }
 0x14d   : > { %v1916_v0 = vpop.f32.mrf.mxu1  ;;  %v1073_v5 = vadd.f32 %v1896_v53, %v947_v1 }
 0x14e   : > { %v1056_v62 = vpop.f32.mrf.mxu0 }
 0x14f   : > { %v1188_v6 = vpop.f32.mrf.mxu1  ;;  %v1071_v9 = vadd.f32 %v1056_v62, %v945_v4  ;;  %v1205_v11 = vadd.f32 %v1916_v0, %v1073_v5 }
 0x150   : > { %v1897_v3 = vpop.f32.mrf.mxu0 }
 0x151   : > { %v1074_v20 = vadd.f32 %v1897_v3, %v948_v8  ;;  %v1917_v22 = vpop.f32.mrf.mxu1  ;;  %v1203_v25 = vadd.f32 %v1188_v6, %v1071_v9  ;;  %v1387_v3 = vrot.slane %v2190_v47, 4 }
 0x152   : > { %v1059_v10 = vpop.f32.mrf.mxu0 }
 0x153   : > { %v1072_v27 = vadd.f32 %v1059_v10, %v946_v59  ;;  %v1206_v18 = vadd.f32 %v1917_v22, %v1074_v20  ;;  %v1191_v19 = vpop.f32.mrf.mxu1  ;;  %v1388_v9 = vsel %vm1379_vm7, %v1385_v61, %v1387_v3 }
 0x155   : > { %v1204_v33 = vadd.f32 %v1191_v19, %v1072_v27 }
 0x16c   : > { %v1936_v23 = vpop.f32.mrf.mxu0 }
 0x16d   : > { %v1325_v26 = vadd.f32 %v1936_v23, %v1205_v11  ;;  %v1384_v23 = vsel %vm1379_vm7, %v1381_v63, %v1383_v50 }
 0x16e   : > { %v1308_v28 = vpop.f32.mrf.mxu0 }
 0x16f   : > { %v1336_v29 = vadd.f32 %v1664_v24, %v1325_v26  ;;  %v1323_v21 = vadd.f32 %v1308_v28, %v1203_v25 }
 0x170   : > { %v1937_v30 = vpop.f32.mrf.mxu0 }
 0x171   : > { %v1344_v31 = vmul.f32 0.044715, %v1336_v29  ;;  %v1334_v32 = vadd.f32 %v1664_v24, %v1323_v21  ;;  %v1326_v16 = vadd.f32 %v1937_v30, %v1206_v18  ;;  %v1340_v0 = vmul.f32 0.5, %v1336_v29 }
 0x172   : > { %v1311_v34 = vpop.f32.mrf.mxu0 }
 0x173   : > { %v1348_v35 = vmul.f32 %v1344_v31, %v1336_v29  ;;  %v1342_v36 = vmul.f32 0.044715, %v1334_v32  ;;  %v1337_v37 = vadd.f32 %v1664_v24, %v1326_v16  ;;  %v1324_v38 = vadd.f32 %v1311_v34, %v1204_v33 }
 0x174   : > { %v1338_v5 = vmul.f32 0.5, %v1334_v32 }
 0x175   : > { %v1352_v39 = vmul.f32 %v1348_v35, %v1336_v29  ;;  %v1346_v40 = vmul.f32 %v1342_v36, %v1334_v32  ;;  %v1345_v41 = vmul.f32 0.044715, %v1337_v37  ;;  %v1335_v42 = vadd.f32 %v1664_v24, %v1324_v38 }
 0x176   : > { %v1341_v7 = vmul.f32 0.5, %v1337_v37 }
 0x177   : > { %v1356_v43 = vadd.f32 %v1352_v39, %v1336_v29  ;;  %v1350_v44 = vmul.f32 %v1346_v40, %v1334_v32  ;;  %v1349_v45 = vmul.f32 %v1345_v41, %v1337_v37  ;;  %v1343_v46 = vmul.f32 0.044715, %v1335_v42 }
 0x178   : > { %v1339_v20 = vmul.f32 0.5, %v1335_v42 }
 0x179   : > { %v1360_v48 = vmul.f32 0.7978846, %v1356_v43  ;;  %v1354_v49 = vadd.f32 %v1350_v44, %v1334_v32  ;;  %v1353_v51 = vmul.f32 %v1349_v45, %v1337_v37  ;;  %v1347_v52 = vmul.f32 %v1343_v46, %v1335_v42 }
 0x17b   : > { %2019 = vtanh.f32 %v1360_v48  ;;  %v1358_v53 = vmul.f32 0.7978846, %v1354_v49  ;;  %v1357_v54 = vadd.f32 %v1353_v51, %v1337_v37  ;;  %v1351_v55 = vmul.f32 %v1347_v52, %v1335_v42 }
 0x17d   : > { %2021 = vtanh.f32 %v1358_v53  ;;  %v1361_v57 = vmul.f32 0.7978846, %v1357_v54  ;;  %v1355_v58 = vadd.f32 %v1351_v55, %v1335_v42 }
 0x17f   : > { %2023 = vtanh.f32 %v1361_v57  ;;  %v1359_v60 = vmul.f32 0.7978846, %v1355_v58 }
 0x181   : > { %2025 = vtanh.f32 %v1359_v60 }
 0x188   : > { %v2020_v62 = vpop.eup %2019 }
 0x189   : > { %v1368_v1 = vadd.f32 1.0, %v2020_v62 }
 0x18a   : > { %v2022_v56 = vpop.eup %2021 }
 0x18b   : > { %v1372_v4 = vmul.f32 %v1368_v1, %v1340_v0  ;;  %v1366_v6 = vadd.f32 1.0, %v2022_v56 }
 0x18c   : > { %v2024_v14 = vpop.eup %2023 }
 0x18d   : > { %v1395_v15 = vadd.f32 %v1386_v2, %v1372_v4  ;;  %v1370_v13 = vmul.f32 %v1366_v6, %v1338_v5  ;;  %v1369_v8 = vadd.f32 1.0, %v2024_v14 }
 0x18e   : > { %v2026_v10 = vpop.eup %2025 }
 0x18f   : > { %1399 = vst [vmem:[%s170_s17 + $0x10] sm:$0xff] %v1395_v15  ;;  %v1393_v11 = vadd.f32 %v1382_v12, %v1370_v13  ;;  %v1373_v47 = vmul.f32 %v1369_v8, %v1341_v7  ;;  %v1367_v22 = vadd.f32 1.0, %v2026_v10 }
 0x191   : > { %1397 = vst [vmem:[%s170_s17] sm:$0xff] %v1393_v11  ;;  %v1396_v59 = vadd.f32 %v1388_v9, %v1373_v47  ;;  %v1371_v24 = vmul.f32 %v1367_v22, %v1339_v20 }
 0x193   : > { %1400 = vst [vmem:[%s170_s17 + $0x18] sm:$0x7f] %v1396_v59  ;;  %v1394_v25 = vadd.f32 %v1384_v23, %v1371_v24 }
 0x195   : > { %1398 = vst [vmem:[%s170_s17 + $0x8] sm:$0xff] %v1394_v25 }
 0x196 PF: > { %s13_s12 = sadd.s32 1, %s2033_s12  }
 0x197   : > { %p10_p4 = scmp.ge.s32.totalorder %s13_s12, 4  }
 0x199   :  { %12 = sbr.rel (!%p10_p4) target bundleno = 1 (0x1), region = 70 }

// kernel: _lambda_.17
= control target key start
LH: loop header
LB: loop body
LE: loop exit
PB: predicated region body
PF: predicated region fallthrough
CT: control target
= control target key end

     0   :  { %s2164_s24 = smov 0   ;;  %s2476_s0 = inlined_call_operand.vmem [shape: f32[2,31,128], index: 0, kind: input, shape index: {}]   ;;  %s2477_s1 = inlined_call_operand.vmem [shape: bf16[128,384], index: 1, kind: input, shape index: {}]   ;;  %s2478_s2 = inlined_call_operand.vmem [shape: f32[1,384], index: 2, kind: input, shape index: {}]   ;;  %s2479_s3 = inlined_call_operand.vmem [shape: bf16[128,128], index: 3, kind: input, shape index: {}]   ;;  %s2480_s4 = inlined_call_operand.vmem [shape: f32[1,128], index: 4, kind: input, shape index: {}]   ;;  %s2481_s5 = inlined_call_operand.vmem [shape: f32[1,128], index: 5, kind: input, shape index: {}]   ;;  %s2482_s6 = inlined_call_operand.vmem [shape: f32[1,128], index: 6, kind: input, shape index: {}]   ;;  %s2483_s7 = inlined_call_operand.vmem [shape: f32[2,31,128], index: 7, kind: output, shape index: {}]  }
   0x1 LB: > { %s1730_s25 = sadd.s32 4294967295, %s2117_s24   ;;  %p1734_p0 = scmp.ge.s32.totalorder %s2117_s24, 1  ;;  %s2117_s24 = sphi %s2164_s24, %s17_s24  }
   0x2   : > { %p237_p1 = scmp.lt.s32.totalorder %s2117_s24, 3 }
   0x4   : > { %p238_p2 = pnand %p1734_p0, %p237_p1 }
   0x5   : > { %p269_p3 = scmp.lt.s32.totalorder (!%p238_p2), %s1730_s25, 1  ;;  %s2121_s19 = smov (!%p238_p2), 96  }
   0x6   : > { %241 = sbr.rel (%p238_p2) target bundleno = 3003 (0xbbb), region = 48  ;;  %s2122_s26 = smov (!%p238_p2), 64  }
   0x7   : > { %s2123_s27 = smov (!%p238_p2), 32  }
   0xb   : > { %v1997_v0 = vld [vmem:[%s2477_s1 + $0xac] ss:$12 sps:$4 sm:$0xff]   ;;  %v1999_v1 = vld [vmem:[%s2477_s1 + $0xa8] ss:$12 sps:$4 sm:$0xff]   ;;  %v2119_v2 = vmov 0   ;;  %s2485_s25 = smov (!%p269_p3, %s1730_s25), 1  ;;  %v320_v23 = vlaneseq }
   0xc   : > { %495 = vmatprep.mubr.bf16.mxu0 %v2119_v2  ;;  %463 = vmatprep.subr.bf16.mxu0 %v1997_v0  ;;  %v2000_v3 = vld [vmem:[%s2477_s1 + $0x94] ss:$12 sps:$4 sm:$0xff]   ;;  %v2002_v4 = vld [vmem:[%s2477_s1 + $0x90] ss:$12 sps:$4 sm:$0xff]   ;;  %s1800_s13 = sshll.u32 %s2485_s25, 5  ;;  %vm589_vm0 = vcmask 261120  }
   0xd   : > { %464 = vmatpush1.bf16.msra.mxu0 %v1999_v1  ;;  %v2003_v5 = vld [vmem:[%s2477_s1 + $0x7c] ss:$12 sps:$4 sm:$0xff]   ;;  %v2005_v6 = vld [vmem:[%s2477_s1 + $0x78] ss:$12 sps:$4 sm:$0xff]   ;;  %s2198_s18 = scalar_lea.vmem %s2476_s0, %s1800_s13  ;;  %v2008_v9 = vld [vmem:[%s2477_s1 + $0x60] ss:$12 sps:$4 sm:$0xff]   ;;  %s278_s28 = scalar_lea.vmem %s2483_s7, %s1800_s13 }
   0xe   : > { %465 = vmatprep.subr.bf16.mxu0 %v2000_v3  ;;  %v2006_v7 = vld [vmem:[%s2477_s1 + $0x64] ss:$12 sps:$4 sm:$0xff]   ;;  %v281_v10 = vld [vmem:[%s2198_s18 + $0x8] sm:$0xff]  ;;  %v2012_v14 = vld [vmem:[%s2477_s1 + $0x34] ss:$12 sps:$4 sm:$0xff]   ;;  %v2243_v24 = vshrl.u32 %v320_v23, 7 }
   0xf   : > { %v280_v8 = vld [vmem:[%s2198_s18] sm:$0xff]  ;;  %v2009_v11 = vld [vmem:[%s2477_s1 + $0x4c] ss:$12 sps:$4 sm:$0xff]   ;;  %v2011_v13 = vld [vmem:[%s2477_s1 + $0x48] ss:$12 sps:$4 sm:$0xff]   ;;  %vm651_vm1 = vcmask 252928  }
  0x10   : > { %v284_v12 = vpack.c.bf16 %v281_v10, %v280_v8  ;;  %v2014_v15 = vld [vmem:[%s2477_s1 + $0x30] ss:$12 sps:$4 sm:$0xff]   ;;  %v2017_v17 = vld [vmem:[%s2477_s1 + $0x18] ss:$12 sps:$4 sm:$0xff]   ;;  %v2020_v19 = vld [vmem:[%s2477_s1] ss:$12 sps:$4 sm:$0xff]  }
  0x11   : > { %466 = vmatpush1.bf16.msra.mxu0 %v2002_v4  ;;  %v2015_v16 = vld [vmem:[%s2477_s1 + $0x1c] ss:$12 sps:$4 sm:$0xff]   ;;  %v2018_v18 = vld [vmem:[%s2477_s1 + $0x4] ss:$12 sps:$4 sm:$0xff]   ;;  %v322_v25 = vsub.s32 0, %v2243_v24  ;;  %v326_v37 = vsub.s32 1, %v2243_v24 }
  0x12   : > { %467 = vmatprep.subr.bf16.mxu0 %v2003_v5  ;;  %1876 = vmatprep.mubr.bf16.mxu1 %v284_v12  ;;  %v2233_v20 = vld [vmem:[%s2198_s18 + $0x10] sm:$0xff]  ;;  %v2236_v21 = vld [vmem:[%s2198_s18 + $0x18] sm:$0x7f]  ;;  %v2249_v26 = vld [vmem:[%s2478_s2] sm:$0x7]  ;;  %vm661_vm2 = vcmask 251904  }
  0x13   : > { %v2240_v22 = vpack.c.bf16 %v2236_v21, %v2233_v20  ;;  %v323_v27 = vrot.slane %v2249_v26, %v322_v25  ;;  %v327_v41 = vrot.slane %v2249_v26, %v326_v37  ;;  %v2021_v56 = vld [vmem:[%s2477_s1 + $0xb0] ss:$12 sps:$4 sm:$0xff]   ;;  %v2022_v57 = vld [vmem:[%s2477_s1 + $0x98] ss:$12 sps:$4 sm:$0xff]   ;;  %v2023_v58 = vld [vmem:[%s2477_s1 + $0x80] ss:$12 sps:$4 sm:$0xff]  }
  0x14   : > { %1860 = vmatprep.subr.bf16.mxu1 %v2021_v56  ;;  %v2024_v59 = vld [vmem:[%s2477_s1 + $0x68] ss:$12 sps:$4 sm:$0xff]   ;;  %v2025_v60 = vld [vmem:[%s2477_s1 + $0x50] ss:$12 sps:$4 sm:$0xff]   ;;  %v2026_v61 = vld [vmem:[%s2477_s1 + $0x38] ss:$12 sps:$4 sm:$0xff]  }
  0x15   : > { %468 = vmatpush1.bf16.msra.mxu0 %v2005_v6  ;;  %1861 = vmatpush3.bf16.msra.mxu1 %v2021_v56  ;;  %v2027_v62 = vld [vmem:[%s2477_s1 + $0x20] ss:$12 sps:$4 sm:$0xff]   ;;  %v2028_v63 = vld [vmem:[%s2477_s1 + $0x8] ss:$12 sps:$4 sm:$0xff]   ;;  %v330_v23 = vsub.s32 2, %v2243_v24  ;;  %vm707_vm3 = vcmask 1046528  }
  0x16   : > { %469 = vmatprep.subr.bf16.mxu0 %v2006_v7  ;;  %1862 = vmatprep.subr.bf16.mxu1 %v2022_v57  ;;  %vm708_vm4 = vcmask 1047552  }
  0x19   : > { %470 = vmatpush1.bf16.msra.mxu0 %v2008_v9  ;;  %1863 = vmatpush3.bf16.msra.mxu1 %v2022_v57 }
  0x1a   : > { %471 = vmatprep.subr.bf16.mxu0 %v2009_v11  ;;  %1864 = vmatprep.subr.bf16.mxu1 %v2023_v58 }
  0x1d   : > { %472 = vmatpush1.bf16.msra.mxu0 %v2011_v13  ;;  %1865 = vmatpush3.bf16.msra.mxu1 %v2023_v58 }
  0x1e   : > { %473 = vmatprep.subr.bf16.mxu0 %v2012_v14  ;;  %1866 = vmatprep.subr.bf16.mxu1 %v2024_v59 }
  0x21   : > { %474 = vmatpush1.bf16.msra.mxu0 %v2014_v15  ;;  %1867 = vmatpush3.bf16.msra.mxu1 %v2024_v59 }
  0x22   : > { %475 = vmatprep.subr.bf16.mxu0 %v2015_v16  ;;  %1868 = vmatprep.subr.bf16.mxu1 %v2025_v60 }
  0x25   : > { %476 = vmatpush1.bf16.msra.mxu0 %v2017_v17  ;;  %1869 = vmatpush3.bf16.msra.mxu1 %v2025_v60 }
  0x26   : > { %477 = vmatprep.subr.bf16.mxu0 %v2018_v18  ;;  %1870 = vmatprep.subr.bf16.mxu1 %v2026_v61 }
  0x29   : > { %478 = vmatpush1.bf16.msra.mxu0 %v2020_v19  ;;  %1871 = vmatpush3.bf16.msra.mxu1 %v2026_v61 }
  0x2a   : > { %1872 = vmatprep.subr.bf16.mxu1 %v2027_v62 }
  0x2c   : > { %496 = vmatmul.mubr.bf16.vlgmr.msra.gmra.mxu0 %v284_v12 }
  0x2d   : > { %505 = vmatprep.mubr.bf16.mxu0 %v2119_v2  ;;  %1873 = vmatpush3.bf16.msra.mxu1 %v2027_v62 }
  0x2e   : > { %1874 = vmatprep.subr.bf16.mxu1 %v2028_v63 }
  0x31   : > { %1875 = vmatpush3.bf16.msra.mxu1 %v2028_v63 }
  0x34   : > { %506 = vmatmul.mubr.bf16.gmra.mxu0 %v2240_v22  ;;  %1877 = vmatmul.mubr.bf16.vlgmr.msra.gmra.mxu1 %v2240_v22 }
  0xec   : > { %v497_v28 = vpop.f32.mrf.mxu0 }
  0xed   : > { %v498_v30 = vadd.f32 %v497_v28, %v323_v27  ;;  %v331_v28 = vrot.slane %v2249_v26, %v330_v23  ;;  %v2120_v26 = vmov 65535  }
  0xee   : > { %v499_v29 = vpop.f32.mrf.mxu0 }
  0xef   : > { %v581_v34 = vmul.f32 0.17677669, %v498_v30  ;;  %v500_v46 = vadd.f32 %v499_v29, %v327_v41 }
  0xf0   : > { %v501_v31 = vpop.f32.mrf.mxu0 }
  0xf1   : > { %v502_v32 = vadd.f32 %v501_v31, %v323_v27 }
  0xf2   : > { %v503_v33 = vpop.f32.mrf.mxu0 }
  0xf3   : > { %v582_v35 = vmul.f32 0.17677669, %v502_v32  ;;  %v504_v43 = vadd.f32 %v503_v33, %v327_v41 }
  0xf4   : > { %v507_v36 = vpop.f32.mrf.mxu0  ;;  %v1878_v22 = vpop.f32.mrf.mxu1 }
  0xf5   : > { %v2253_v38 = vpack.c.bf16 %v582_v35, %v581_v34  ;;  %v2260_v48 = vpack.c.bf16 %v504_v43, %v500_v46  ;;  %v508_v51 = vadd.f32 %v507_v36, %v323_v27  ;;  %v559_v32 = vadd.f32 %v1878_v22, %v331_v28 }
  0xf6   : > { %v509_v39 = vpop.f32.mrf.mxu0  ;;  %v550_v25 = vpop.f32.mrf.mxu1 }
  0xf7   : > { %1884 = vmatprep.mubr.msk.bf16.mxu0 %vm589_vm0, %v2253_v38  ;;  %v510_v44 = vadd.f32 %v509_v39, %v327_v41  ;;  %v597_v52 = vsel %vm589_vm0, %v2260_v48, 0  ;;  %v583_v54 = vmul.f32 0.17677669, %v508_v51  ;;  %v709_v39 = vsel %vm707_vm3, 4294967295, %v2120_v26 }
  0xf8   : > { %v511_v40 = vpop.f32.mrf.mxu0  ;;  %v1879_v30 = vpop.f32.mrf.mxu1 }
  0xf9   : > { %v512_v50 = vadd.f32 %v511_v40, %v323_v27  ;;  %v562_v33 = vadd.f32 %v1879_v30, %v331_v28 }
  0xfa   : > { %v513_v42 = vpop.f32.mrf.mxu0  ;;  %v553_v43 = vpop.f32.mrf.mxu1 }
  0xfb   : > { %v514_v45 = vadd.f32 %v513_v42, %v327_v41  ;;  %v584_v53 = vmul.f32 0.17677669, %v512_v50  ;;  %v2308_v24 = vpack.c.bf16 %v562_v33, %v559_v32  ;;  %v551_v41 = vadd.f32 %v550_v25, %v331_v28 }
  0xfc   : > { %v2312_v42 = vsel %vm708_vm4, %v709_v39, 0 }
  0xfd   : > { %v2258_v47 = vpack.c.bf16 %v514_v45, %v510_v44  ;;  %v2270_v55 = vpack.c.bf16 %v584_v53, %v583_v54  ;;  %v712_v44 = vand.u32 %v2312_v42, %v2308_v24  ;;  %v554_v45 = vadd.f32 %v553_v43, %v331_v28 }
  0xff   : > { %1976 = vmatprep.subr.msk.bf16.mxu0 %vm589_vm0, %v2258_v47  ;;  %v600_v49 = vsel %vm589_vm0, %v2258_v47, 0  ;;  %1888 = vmatprep.subr.bf16.mxu1 %v712_v44  ;;  %v2316_v46 = vpack.c.bf16 %v554_v45, %v551_v41 }
 0x100   : > { %1881 = vmatpush3.bf16.xpose.msra.mxu0 %v600_v49  ;;  %1889 = vmatpush3.bf16.msra.mxu1 %v712_v44 }
 0x101   : > { %1977 = vmatprep.subr.msk.bf16.mxu0 %vm589_vm0, %v2260_v48  ;;  %1890 = vmatprep.subr.bf16.mxu1 %v2316_v46 }
 0x104   : > { %1891 = vmatpush3.bf16.msra.mxu1 %v2316_v46 }
 0x108   : > { %1883 = vmatpush3.bf16.xpose.msra.mxu0 %v597_v52 }
 0x10f   : > { %1885 = vmatmul.mubr.msk.bf16.vlgmr.msra.gmra.mxu0 %vm589_vm0, %v2270_v55 }
 0x1cf   : > { %v1886_v0 = vpop.f32.mrf.mxu0 }
 0x1d0   : > { %v658_v1 = vsel %vm651_vm1, %v1886_v0, -inf }
 0x1d1   : > { %659 = vmax.xlane.f32.xlu1 %v658_v1  ;;  %v636_v2 = vpop.f32.mrf.mxu0 }
 0x1d2   : > { %v652_v3 = vsel %vm651_vm1, %v636_v2, -inf }
 0x1d3   : > { %653 = vmax.xlane.f32.xlu0 %v652_v3  ;;  %v1887_v4 = vpop.f32.mrf.mxu0 }
 0x1d4   : > { %v662_v5 = vsel %vm661_vm2, %v1887_v4, -inf }
 0x1d5   : > { %663 = vmax.xlane.f32.xlu1 %v662_v5  ;;  %v639_v6 = vpop.f32.mrf.mxu0 }
 0x1d6   : > { %v655_v7 = vsel %vm651_vm1, %v639_v6, -inf }
 0x1d7   : > { %656 = vmax.xlane.f32.xlu0 %v655_v7  ;;  %v2030_v7 = vld [vmem:[%s2479_s3] sm:$0xff]  }
 0x25a   : > { %v660_v8 = vpop.xlane.xlu1 %659 }
 0x25b   : > { %v667_v9 = vsub.f32 %v1886_v0, %v660_v8 }
 0x25c   : > { %v654_v10 = vpop.xlane.xlu0 %653 }
 0x25d   : > { %v673_v11 = vmul.f32 1.442695, %v667_v9  ;;  %v665_v12 = vsub.f32 %v636_v2, %v654_v10 }
 0x25e   : > { %v664_v13 = vpop.xlane.xlu1 %663 }
 0x25f   : > { %2037 = vpow2.f32 %v673_v11  ;;  %v669_v14 = vmul.f32 1.442695, %v665_v12  ;;  %v668_v15 = vsub.f32 %v1887_v4, %v664_v13 }
 0x260   : > { %v657_v16 = vpop.xlane.xlu0 %656 }
 0x261   : > { %2039 = vpow2.f32 %v669_v14  ;;  %v666_v17 = vsub.f32 %v639_v6, %v657_v16  ;;  %v675_v18 = vmul.f32 1.442695, %v668_v15  ;;  %v2029_v6 = vld [vmem:[%s2479_s3 + $0x8] sm:$0xff]  }
 0x263   : > { %v671_v19 = vmul.f32 1.442695, %v666_v17 }
 0x265   : > { %2041 = vpow2.f32 %v671_v19 }
 0x266   : > { %2043 = vpow2.f32 %v675_v18 }
 0x26c   : > { %v2038_v27 = vpop.eup %2037 }
 0x26d   : > { %v683_v29 = vsel %vm651_vm1, %v2038_v27, 0.0 }
 0x26e   : > { %v2040_v31 = vpop.eup %2039  ;;  %684 = vadd.xlane.f32.xlu0 %v683_v29 }
 0x26f   : > { %v677_v34 = vsel %vm651_vm1, %v2040_v31, 0.0 }
 0x272   : > { %v2042_v35 = vpop.eup %2041  ;;  %678 = vadd.xlane.f32.xlu0 %v677_v34 }
 0x273   : > { %v680_v36 = vsel %vm651_vm1, %v2042_v35, 0.0  ;;  %v2044_v37 = vpop.eup %2043 }
 0x274   : > { %681 = vadd.xlane.f32.xlu1 %v680_v36  ;;  %v686_v40 = vsel %vm661_vm2, %v2044_v37, 0.0 }
 0x278   : > { %687 = vadd.xlane.f32.xlu1 %v686_v40 }
 0x288   : > { %775 = vrot.lane.b32.xlu0 %v2258_v47, %s2121_s19 }
 0x289   : > { %773 = vrot.lane.b32.xlu1 %v2260_v48, %s2121_s19 }
 0x28d   : > { %767 = vrot.lane.b32.xlu1 %v2253_v38, %s2121_s19 }
 0x291   : > { %769 = vrot.lane.b32.xlu1 %v2270_v55, %s2121_s19 }
 0x2f7   : > { %v685_v49 = vpop.xlane.xlu0 %684 }
 0x2fb   : > { %v679_v50 = vpop.xlane.xlu0 %678 }
 0x2fc   : > { %2045 = vrcp.f32 %v679_v50 }
 0x2fd   : > { %v682_v51 = vpop.xlane.xlu1 %681 }
 0x2fe   : > { %2047 = vrcp.f32 %v682_v51 }
 0x2ff   : > { %v776_v52 = vpop.permute.xlu0 %775  ;;  %2049 = vrcp.f32 %v685_v49 }
 0x300   : > { %1978 = vmatprep.subr.msk.bf16.mxu1 %vm589_vm0, %v776_v52  ;;  %v787_v2 = vsel %vm589_vm0, %v776_v52, 0 }
 0x301   : > { %v688_v53 = vpop.xlane.xlu1 %687 }
 0x302   : > { %2051 = vrcp.f32 %v688_v53 }
 0x305   : > { %v774_v60 = vpop.permute.xlu1 %773 }
 0x306   : > { %v784_v4 = vsel %vm589_vm0, %v774_v60, 0 }
 0x309   : > { %v2046_v54 = vpop.eup %2045  ;;  %v768_v3 = vpop.permute.xlu1 %767 }
 0x30a   : > { %v693_v57 = vmul.f32 %v2046_v54, %v2040_v31 }
 0x30b   : > { %v2048_v56 = vpop.eup %2047 }
 0x30c   : > { %v694_v58 = vmul.f32 %v2048_v56, %v2042_v35  ;;  %v2050_v59 = vpop.eup %2049 }
 0x30d   : > { %v695_v63 = vmul.f32 %v2050_v59, %v2038_v27  ;;  %v770_v5 = vpop.permute.xlu1 %769 }
 0x30e   : > { %v697_v61 = vpack.c.bf16 %v694_v58, %v693_v57 }
 0x30f   : > { %v2052_v62 = vpop.eup %2051 }
 0x310   : > { %1892 = vmatprep.mubr.msk.bf16.mxu1 %vm651_vm1, %v697_v61  ;;  %v696_v0 = vmul.f32 %v2052_v62, %v2044_v37 }
 0x312   : > { %v698_v1 = vpack.c.bf16 %v696_v0, %v695_v63 }
 0x314   : > { %1893 = vmatmul.mubr.msk.bf16.vlgmr.msra.gmra.mxu1 %vm651_vm1, %v698_v1  ;;  %v2032_v1 = vld [vmem:[%s2479_s3 + $0x10] sm:$0xff]  }
 0x315   : > { %1897 = vmatpush3.bf16.xpose.msra.mxu1 %v787_v2  ;;  %1900 = vmatprep.mubr.msk.bf16.mxu1 %vm589_vm0, %v768_v3 }
 0x316   : > { %1979 = vmatprep.subr.msk.bf16.mxu1 %vm589_vm0, %v774_v60 }
 0x31d   : > { %1899 = vmatpush3.bf16.xpose.msra.mxu1 %v784_v4 }
 0x31e   : > { %1920 = vmatprep.subr.bf16.mxu1 %v2029_v6 }
 0x324   : > { %1901 = vmatmul.mubr.msk.bf16.vlgmr.msra.gmra.mxu1 %vm589_vm0, %v770_v5 }
 0x325   : > { %1921 = vmatpush3.bf16.msra.mxu1 %v2029_v6 }
 0x326   : > { %1922 = vmatprep.subr.bf16.mxu1 %v2030_v7 }
 0x329   : > { %1923 = vmatpush3.bf16.msra.mxu1 %v2030_v7 }
 0x3d4   : > { %v1894_v8 = vpop.f32.mrf.mxu1 }
 0x3d6   : > { %v748_v9 = vpop.f32.mrf.mxu1 }
 0x3d8   : > { %v1895_v10 = vpop.f32.mrf.mxu1 }
 0x3d9   : > { %v764_v13 = vpack.c.bf16 %v1895_v10, %v1894_v8 }
 0x3da   : > { %v751_v11 = vpop.f32.mrf.mxu1 }
 0x3db   : > { %v763_v12 = vpack.c.bf16 %v751_v11, %v748_v9 }
 0x3dd   : > { %1924 = vmatprep.mubr.msk.bf16.mxu1 %vm589_vm0, %v763_v12 }
 0x3de   : > { %1925 = vmatmul.mubr.msk.bf16.vlgmr.msra.gmra.mxu1 %vm589_vm0, %v764_v13 }
 0x3e4   : > { %v1902_v14 = vpop.f32.mrf.mxu1 }
 0x3e5   : > { %v844_v19 = vsel %vm651_vm1, %v1902_v14, -inf }
 0x3e6   : > { %v823_v15 = vpop.f32.mrf.mxu1 }
 0x3e7   : > { %v838_v16 = vsel %vm651_vm1, %v823_v15, -inf }
 0x3e8   : > { %839 = vmax.xlane.f32.xlu0 %v838_v16  ;;  %v1903_v17 = vpop.f32.mrf.mxu1 }
 0x3e9   : > { %v847_v23 = vsel %vm661_vm2, %v1903_v17, -inf }
 0x3ea   : > { %v826_v18 = vpop.f32.mrf.mxu1 }
 0x3eb   : > { %v841_v22 = vsel %vm651_vm1, %v826_v18, -inf }
 0x3ec   : > { %845 = vmax.xlane.f32.xlu0 %v844_v19  ;;  %842 = vmax.xlane.f32.xlu1 %v841_v22 }
 0x3f0   : > { %848 = vmax.xlane.f32.xlu0 %v847_v23 }
 0x471   : > { %v840_v25 = vpop.xlane.xlu0 %839 }
 0x472   : > { %v850_v27 = vsub.f32 %v823_v15, %v840_v25 }
 0x474   : > { %v854_v31 = vmul.f32 1.442695, %v850_v27 }
 0x475   : > { %v846_v28 = vpop.xlane.xlu0 %845  ;;  %v843_v29 = vpop.xlane.xlu1 %842 }
 0x476   : > { %v852_v30 = vsub.f32 %v1902_v14, %v846_v28  ;;  %v851_v33 = vsub.f32 %v826_v18, %v843_v29 }
 0x478   : > { %v858_v32 = vmul.f32 1.442695, %v852_v30  ;;  %v856_v36 = vmul.f32 1.442695, %v851_v33 }
 0x479   : > { %v849_v34 = vpop.xlane.xlu0 %848 }
 0x47a   : > { %2053 = vpow2.f32 %v858_v32  ;;  %v853_v35 = vsub.f32 %v1903_v17, %v849_v34 }
 0x47b   : > { %2055 = vpow2.f32 %v854_v31 }
 0x47c   : > { %v860_v37 = vmul.f32 1.442695, %v853_v35 }
 0x47e   : > { %2057 = vpow2.f32 %v860_v37 }
 0x47f   : > { %2059 = vpow2.f32 %v856_v36 }
 0x487   : > { %v2054_v26 = vpop.eup %2053 }
 0x488   : > { %v868_v39 = vsel %vm651_vm1, %v2054_v26, 0.0  ;;  %v2056_v40 = vpop.eup %2055 }
 0x489   : > { %869 = vadd.xlane.f32.xlu0 %v868_v39  ;;  %v862_v43 = vsel %vm651_vm1, %v2056_v40, 0.0 }
 0x48b   : > { %v2058_v41 = vpop.eup %2057 }
 0x48c   : > { %v871_v44 = vsel %vm661_vm2, %v2058_v41, 0.0  ;;  %v2060_v45 = vpop.eup %2059 }
 0x48d   : > { %863 = vadd.xlane.f32.xlu0 %v862_v43  ;;  %872 = vadd.xlane.f32.xlu1 %v871_v44  ;;  %v865_v49 = vsel %vm651_vm1, %v2060_v45, 0.0 }
 0x491   : > { %866 = vadd.xlane.f32.xlu1 %v865_v49 }
 0x4a2   : > { %886 = vrot.lane.b32.xlu1 %v2316_v46, %s2121_s19 }
 0x4a3   : > { %888 = vrot.lane.b32.xlu0 %v2308_v24, %s2121_s19 }
 0x4a6   : > { %1091 = vrot.lane.b32.xlu1 %v2258_v47, %s2122_s26 }
 0x4a7   : > { %1085 = vrot.lane.b32.xlu0 %v2253_v38, %s2122_s26 }
 0x4aa   : > { %1089 = vrot.lane.b32.xlu1 %v2260_v48, %s2122_s26 }
 0x4ab   : > { %1342 = vrot.lane.b32.xlu0 %v2258_v47, %s2123_s27 }
 0x4ae   : > { %1087 = vrot.lane.b32.xlu1 %v2270_v55, %s2122_s26 }
 0x4af   : > { %1336 = vrot.lane.b32.xlu0 %v2253_v38, %s2123_s27 }
 0x4b2   : > { %1340 = vrot.lane.b32.xlu1 %v2260_v48, %s2123_s27  ;;  %v2031_v48 = vld [vmem:[%s2479_s3 + $0x18] sm:$0xff]  }
 0x4b6   : > { %1338 = vrot.lane.b32.xlu1 %v2270_v55, %s2123_s27 }
 0x512   : > { %v870_v50 = vpop.xlane.xlu0 %869 }
 0x516   : > { %v864_v51 = vpop.xlane.xlu0 %863  ;;  %v873_v52 = vpop.xlane.xlu1 %872 }
 0x517   : > { %2061 = vrcp.f32 %v873_v52 }
 0x518   : > { %2063 = vrcp.f32 %v864_v51 }
 0x519   : > { %2065 = vrcp.f32 %v870_v50 }
 0x51a   : > { %v889_v53 = vpop.permute.xlu0 %888  ;;  %v867_v47 = vpop.xlane.xlu1 %866 }
 0x51b   : > { %v898_v54 = vand.u32 %v889_v53, %v2312_v42  ;;  %2067 = vrcp.f32 %v867_v47 }
 0x51d   : > { %1904 = vmatprep.subr.bf16.mxu0 %v898_v54 }
 0x51e   : > { %1905 = vmatpush3.bf16.msra.mxu0 %v898_v54  ;;  %v887_v38 = vpop.permute.xlu1 %886  ;;  %v1086_v9 = vpop.permute.xlu0 %1085 }
 0x51f   : > { %1906 = vmatprep.subr.bf16.mxu0 %v887_v38 }
 0x522   : > { %1907 = vmatpush3.bf16.msra.mxu0 %v887_v38  ;;  %v1092_v2 = vpop.permute.xlu1 %1091  ;;  %v1343_v13 = vpop.permute.xlu0 %1342 }
 0x523   : > { %1912 = vmatprep.subr.bf16.mxu0 %v2031_v48  ;;  %v1103_v10 = vsel %vm589_vm0, %v1092_v2, 0  ;;  %v1354_v15 = vsel %vm589_vm0, %v1343_v13, 0 }
 0x524   : > { %v2062_v55 = vpop.eup %2061 }
 0x525   : > { %v2064_v56 = vpop.eup %2063  ;;  %v881_v59 = vmul.f32 %v2062_v55, %v2058_v41 }
 0x526   : > { %v2066_v57 = vpop.eup %2065  ;;  %v878_v60 = vmul.f32 %v2064_v56, %v2056_v40  ;;  %v1090_v11 = vpop.permute.xlu1 %1089 }
 0x527   : > { %v880_v62 = vmul.f32 %v2066_v57, %v2054_v26  ;;  %v1100_v12 = vsel %vm589_vm0, %v1090_v11, 0  ;;  %v1337_v16 = vpop.permute.xlu0 %1336 }
 0x528   : > { %v2068_v58 = vpop.eup %2067 }
 0x529   : > { %v879_v61 = vmul.f32 %v2068_v58, %v2060_v45  ;;  %v883_v0 = vpack.c.bf16 %v881_v59, %v880_v62 }
 0x52a   : > { %v1088_v14 = vpop.permute.xlu1 %1087 }
 0x52b   : > { %v882_v63 = vpack.c.bf16 %v879_v61, %v878_v60 }
 0x52d   : > { %1908 = vmatprep.mubr.msk.bf16.mxu0 %vm651_vm1, %v882_v63 }
 0x52e   : > { %1909 = vmatmul.mubr.msk.bf16.vlgmr.msra.gmra.mxu0 %vm651_vm1, %v883_v0  ;;  %v1341_v17 = vpop.permute.xlu1 %1340 }
 0x52f   : > { %1913 = vmatpush3.bf16.msra.mxu0 %v2031_v48  ;;  %v1351_v18 = vsel %vm589_vm0, %v1341_v17, 0 }
 0x530   : > { %1914 = vmatprep.subr.bf16.mxu0 %v2032_v1 }
 0x532   : > { %v1339_v19 = vpop.permute.xlu1 %1338 }
 0x533   : > { %1915 = vmatpush3.bf16.msra.mxu0 %v2032_v1 }
 0x534   : > { %1980 = vmatprep.subr.msk.bf16.mxu0 %vm589_vm0, %v1092_v2 }
 0x5ee   : > { %v1910_v3 = vpop.f32.mrf.mxu0 }
 0x5f0   : > { %v934_v4 = vpop.f32.mrf.mxu0 }
 0x5f2   : > { %v1911_v5 = vpop.f32.mrf.mxu0 }
 0x5f3   : > { %v950_v8 = vpack.c.bf16 %v1911_v5, %v1910_v3 }
 0x5f4   : > { %v937_v6 = vpop.f32.mrf.mxu0 }
 0x5f5   : > { %v949_v7 = vpack.c.bf16 %v937_v6, %v934_v4 }
 0x5f7   : > { %1916 = vmatprep.mubr.msk.bf16.mxu0 %vm589_vm0, %v949_v7 }
 0x5f8   : > { %1917 = vmatmul.mubr.msk.bf16.vlgmr.msra.gmra.mxu0 %vm589_vm0, %v950_v8 }
 0x5f9   : > { %1929 = vmatpush3.bf16.xpose.msra.mxu0 %v1103_v10  ;;  %1932 = vmatprep.mubr.msk.bf16.mxu0 %vm589_vm0, %v1086_v9 }
 0x5fa   : > { %1981 = vmatprep.subr.msk.bf16.mxu0 %vm589_vm0, %v1090_v11 }
 0x601   : > { %1931 = vmatpush3.bf16.xpose.msra.mxu0 %v1100_v12 }
 0x602   : > { %1982 = vmatprep.subr.msk.bf16.mxu0 %vm589_vm0, %v1343_v13 }
 0x608   : > { %1933 = vmatmul.mubr.msk.bf16.vlgmr.msra.gmra.mxu0 %vm589_vm0, %v1088_v14 }
 0x609   : > { %1953 = vmatpush3.bf16.xpose.msra.mxu0 %v1354_v15  ;;  %1956 = vmatprep.mubr.msk.bf16.mxu0 %vm589_vm0, %v1337_v16 }
 0x60a   : > { %1983 = vmatprep.subr.msk.bf16.mxu0 %vm589_vm0, %v1341_v17 }
 0x611   : > { %1955 = vmatpush3.bf16.xpose.msra.mxu0 %v1351_v18 }
 0x618   : > { %1957 = vmatmul.mubr.msk.bf16.vlgmr.msra.gmra.mxu0 %vm589_vm0, %v1339_v19 }
 0x6b8   : > { %v2395_v22 = vpop.f32.mrf.mxu0 }
 0x6ba   : > { %v2397_v23 = vpop.f32.mrf.mxu0 }
 0x6bc   : > { %v2399_v25 = vpop.f32.mrf.mxu0 }
 0x6be   : > { %v2401_v27 = vpop.f32.mrf.mxu0 }
 0x6c8   : > { %v1934_v28 = vpop.f32.mrf.mxu0 }
 0x6c9   : > { %v1160_v33 = vsel %vm651_vm1, %v1934_v28, -inf }
 0x6ca   : > { %v1139_v29 = vpop.f32.mrf.mxu0 }
 0x6cb   : > { %v1154_v30 = vsel %vm651_vm1, %v1139_v29, -inf }
 0x6cc   : > { %1155 = vmax.xlane.f32.xlu0 %v1154_v30  ;;  %v1935_v31 = vpop.f32.mrf.mxu0 }
 0x6cd   : > { %v1163_v35 = vsel %vm661_vm2, %v1935_v31, -inf }
 0x6ce   : > { %v1142_v32 = vpop.f32.mrf.mxu0 }
 0x6cf   : > { %v1157_v34 = vsel %vm651_vm1, %v1142_v32, -inf }
 0x6d0   : > { %1161 = vmax.xlane.f32.xlu0 %v1160_v33  ;;  %1158 = vmax.xlane.f32.xlu1 %v1157_v34 }
 0x6d4   : > { %1164 = vmax.xlane.f32.xlu0 %v1163_v35 }
 0x6d8   : > { %v1958_v57 = vpop.f32.mrf.mxu0 }
 0x6d9   : > { %v1411_v62 = vsel %vm651_vm1, %v1958_v57, -inf }
 0x6da   : > { %v1390_v58 = vpop.f32.mrf.mxu0 }
 0x6db   : > { %v1405_v63 = vsel %vm651_vm1, %v1390_v58, -inf }
 0x6dc   : > { %v1959_v59 = vpop.f32.mrf.mxu0 }
 0x6dd   : > { %v1414_v0 = vsel %vm661_vm2, %v1959_v59, -inf }
 0x6de   : > { %v1393_v60 = vpop.f32.mrf.mxu0 }
 0x6df   : > { %v1408_v61 = vsel %vm651_vm1, %v1393_v60, -inf }
 0x755   : > { %v1156_v36 = vpop.xlane.xlu0 %1155 }
 0x756   : > { %v1166_v37 = vsub.f32 %v1139_v29, %v1156_v36 }
 0x758   : > { %v1170_v41 = vmul.f32 1.442695, %v1166_v37 }
 0x759   : > { %v1162_v26 = vpop.xlane.xlu0 %1161  ;;  %v1159_v39 = vpop.xlane.xlu1 %1158 }
 0x75a   : > { %v1168_v40 = vsub.f32 %v1934_v28, %v1162_v26  ;;  %v1167_v44 = vsub.f32 %v1142_v32, %v1159_v39 }
 0x75c   : > { %v1174_v43 = vmul.f32 1.442695, %v1168_v40  ;;  %v1172_v50 = vmul.f32 1.442695, %v1167_v44 }
 0x75d   : > { %v1165_v45 = vpop.xlane.xlu0 %1164 }
 0x75e   : > { %2069 = vpow2.f32 %v1174_v43  ;;  %v1169_v49 = vsub.f32 %v1935_v31, %v1165_v45 }
 0x75f   : > { %2071 = vpow2.f32 %v1170_v41 }
 0x760   : > { %v1176_v51 = vmul.f32 1.442695, %v1169_v49 }
 0x762   : > { %2073 = vpow2.f32 %v1176_v51  ;;  %v2034_v51 = vld [vmem:[%s2479_s3 + $0x20] sm:$0xff]  }
 0x763   : > { %2075 = vpow2.f32 %v1172_v50  ;;  %v2033_v50 = vld [vmem:[%s2479_s3 + $0x28] sm:$0xff]  }
 0x76b   : > { %v2070_v52 = vpop.eup %2069 }
 0x76c   : > { %v1184_v53 = vsel %vm651_vm1, %v2070_v52, 0.0  ;;  %v2072_v47 = vpop.eup %2071 }
 0x76d   : > { %1185 = vadd.xlane.f32.xlu0 %v1184_v53  ;;  %v1178_v38 = vsel %vm651_vm1, %v2072_v47, 0.0 }
 0x76f   : > { %v2074_v54 = vpop.eup %2073 }
 0x770   : > { %v1187_v48 = vsel %vm661_vm2, %v2074_v54, 0.0  ;;  %v2076_v55 = vpop.eup %2075 }
 0x771   : > { %1179 = vadd.xlane.f32.xlu0 %v1178_v38  ;;  %1188 = vadd.xlane.f32.xlu1 %v1187_v48  ;;  %v1181_v56 = vsel %vm651_vm1, %v2076_v55, 0.0 }
 0x775   : > { %1182 = vadd.xlane.f32.xlu1 %v1181_v56 }
 0x786   : > { %1200 = vrot.lane.b32.xlu1 %v2316_v46, %s2122_s26 }
 0x787   : > { %1202 = vrot.lane.b32.xlu0 %v2308_v24, %s2122_s26 }
 0x7a6   : > { %1409 = vmax.xlane.f32.xlu0 %v1408_v61 }
 0x7aa   : > { %1412 = vmax.xlane.f32.xlu0 %v1411_v62  ;;  %1406 = vmax.xlane.f32.xlu1 %v1405_v63 }
 0x7ae   : > { %1415 = vmax.xlane.f32.xlu1 %v1414_v0 }
 0x7f6   : > { %v1186_v1 = vpop.xlane.xlu0 %1185 }
 0x7fa   : > { %v1180_v2 = vpop.xlane.xlu0 %1179  ;;  %v1189_v3 = vpop.xlane.xlu1 %1188 }
 0x7fb   : > { %2077 = vrcp.f32 %v1189_v3 }
 0x7fc   : > { %2079 = vrcp.f32 %v1180_v2 }
 0x7fd   : > { %2081 = vrcp.f32 %v1186_v1 }
 0x7fe   : > { %v1203_v4 = vpop.permute.xlu0 %1202  ;;  %v1183_v5 = vpop.xlane.xlu1 %1182 }
 0x7ff   : > { %v1212_v6 = vand.u32 %v1203_v4, %v2312_v42  ;;  %2083 = vrcp.f32 %v1183_v5 }
 0x801   : > { %1936 = vmatprep.subr.bf16.mxu1 %v1212_v6 }
 0x802   : > { %1937 = vmatpush3.bf16.msra.mxu1 %v1212_v6  ;;  %v1201_v7 = vpop.permute.xlu1 %1200 }
 0x803   : > { %1938 = vmatprep.subr.bf16.mxu1 %v1201_v7 }
 0x806   : > { %1939 = vmatpush3.bf16.msra.mxu1 %v1201_v7 }
 0x807   : > { %1944 = vmatprep.subr.bf16.mxu1 %v2033_v50 }
 0x808   : > { %v2078_v8 = vpop.eup %2077 }
 0x809   : > { %v2080_v9 = vpop.eup %2079  ;;  %v1197_v12 = vmul.f32 %v2078_v8, %v2074_v54 }
 0x80a   : > { %v2082_v10 = vpop.eup %2081  ;;  %v1194_v13 = vmul.f32 %v2080_v9, %v2072_v47  ;;  %v2035_v9 = vld [vmem:[%s2479_s3 + $0x38] sm:$0xff]  }
 0x80b   : > { %v1196_v15 = vmul.f32 %v2082_v10, %v2070_v52  ;;  %v1926_v52 = vpop.f32.mrf.mxu1  ;;  %v2036_v10 = vld [vmem:[%s2479_s3 + $0x30] sm:$0xff]  }
 0x80c   : > { %v2084_v11 = vpop.eup %2083 }
 0x80d   : > { %v1195_v14 = vmul.f32 %v2084_v11, %v2076_v55  ;;  %v1199_v17 = vpack.c.bf16 %v1197_v12, %v1196_v15  ;;  %v1070_v53 = vpop.f32.mrf.mxu1  ;;  %v1079_v11 = vadd.f32 %v1926_v52, %v2395_v22 }
 0x80f   : > { %v1198_v16 = vpack.c.bf16 %v1195_v14, %v1194_v13  ;;  %v1927_v47 = vpop.f32.mrf.mxu1  ;;  %v1071_v13 = vadd.f32 %v1070_v53, %v2397_v23 }
 0x811   : > { %1940 = vmatprep.mubr.msk.bf16.mxu1 %vm651_vm1, %v1198_v16  ;;  %v1073_v54 = vpop.f32.mrf.mxu1  ;;  %v1082_v16 = vadd.f32 %v1927_v47, %v2399_v25  ;;  %v2110_v47 = vld [vmem:[%s2198_s18 + $0x8] sm:$0xff] }
 0x812   : > { %1941 = vmatmul.mubr.msk.bf16.vlgmr.msra.gmra.mxu1 %vm651_vm1, %v1199_v17 }
 0x813   : > { %1945 = vmatpush3.bf16.msra.mxu1 %v2033_v50 }
 0x814   : > { %1946 = vmatprep.subr.bf16.mxu1 %v2034_v51 }
 0x817   : > { %1947 = vmatpush3.bf16.msra.mxu1 %v2034_v51 }
 0x82f   : > { %v1410_v18 = vpop.xlane.xlu0 %1409 }
 0x830   : > { %v1418_v31 = vsub.f32 %v1393_v60, %v1410_v18 }
 0x832   : > { %v1423_v36 = vmul.f32 1.442695, %v1418_v31 }
 0x833   : > { %v1413_v19 = vpop.xlane.xlu0 %1412  ;;  %v1407_v28 = vpop.xlane.xlu1 %1406 }
 0x834   : > { %v1419_v29 = vsub.f32 %v1958_v57, %v1413_v19  ;;  %v1417_v30 = vsub.f32 %v1390_v58, %v1407_v28  ;;  %v1074_v19 = vadd.f32 %v1073_v54, %v2401_v27  ;;  %v1795_v27 = vld [vmem:[%s2480_s4] ss:$0 sm:$0xff] }
 0x836   : > { %v1425_v32 = vmul.f32 1.442695, %v1419_v29  ;;  %v1421_v33 = vmul.f32 1.442695, %v1417_v30 }
 0x837   : > { %v1416_v34 = vpop.xlane.xlu1 %1415 }
 0x838   : > { %2085 = vpow2.f32 %v1425_v32  ;;  %v1420_v35 = vsub.f32 %v1959_v59, %v1416_v34 }
 0x839   : > { %2087 = vpow2.f32 %v1421_v33 }
 0x83a   : > { %v1427_v37 = vmul.f32 1.442695, %v1420_v35 }
 0x83c   : > { %2089 = vpow2.f32 %v1427_v37 }
 0x83d   : > { %2091 = vpow2.f32 %v1423_v36 }
 0x845   : > { %v2086_v26 = vpop.eup %2085 }
 0x846   : > { %v1435_v39 = vsel %vm651_vm1, %v2086_v26, 0.0  ;;  %v2088_v40 = vpop.eup %2087 }
 0x847   : > { %1436 = vadd.xlane.f32.xlu0 %v1435_v39  ;;  %v1429_v43 = vsel %vm651_vm1, %v2088_v40, 0.0 }
 0x849   : > { %v2090_v41 = vpop.eup %2089 }
 0x84a   : > { %v1438_v44 = vsel %vm661_vm2, %v2090_v41, 0.0  ;;  %v2092_v45 = vpop.eup %2091 }
 0x84b   : > { %1430 = vadd.xlane.f32.xlu0 %v1429_v43  ;;  %1439 = vadd.xlane.f32.xlu1 %v1438_v44  ;;  %v1432_v49 = vsel %vm651_vm1, %v2092_v45, 0.0 }
 0x84f   : > { %1433 = vadd.xlane.f32.xlu1 %v1432_v49 }
 0x860   : > { %1451 = vrot.lane.b32.xlu1 %v2316_v46, %s2123_s27 }
 0x861   : > { %1453 = vrot.lane.b32.xlu0 %v2308_v24, %s2123_s27 }
 0x8d0   : > { %v1437_v38 = vpop.xlane.xlu0 %1436 }
 0x8d2   : > { %v1942_v48 = vpop.f32.mrf.mxu1 }
 0x8d4   : > { %v1248_v55 = vpop.f32.mrf.mxu1  ;;  %v1431_v56 = vpop.xlane.xlu0 %1430 }
 0x8d5   : > { %v1440_v57 = vpop.xlane.xlu1 %1439 }
 0x8d6   : > { %v1943_v58 = vpop.f32.mrf.mxu1  ;;  %2093 = vrcp.f32 %v1440_v57 }
 0x8d7   : > { %2095 = vrcp.f32 %v1431_v56  ;;  %v1264_v24 = vpack.c.bf16 %v1943_v58, %v1942_v48 }
 0x8d8   : > { %v1251_v59 = vpop.f32.mrf.mxu1  ;;  %v1454_v60 = vpop.permute.xlu0 %1453  ;;  %2097 = vrcp.f32 %v1437_v38 }
 0x8d9   : > { %v1263_v61 = vpack.c.bf16 %v1251_v59, %v1248_v55  ;;  %v1463_v46 = vand.u32 %v1454_v60, %v2312_v42  ;;  %v1434_v62 = vpop.xlane.xlu1 %1433 }
 0x8da   : > { %2099 = vrcp.f32 %v1434_v62 }
 0x8db   : > { %1948 = vmatprep.mubr.msk.bf16.mxu1 %vm589_vm0, %v1263_v61  ;;  %1960 = vmatprep.subr.bf16.mxu1 %v1463_v46 }
 0x8dc   : > { %1949 = vmatmul.mubr.msk.bf16.vlgmr.msra.gmra.mxu1 %vm589_vm0, %v1264_v24 }
 0x8dd   : > { %1961 = vmatpush3.bf16.msra.mxu1 %v1463_v46  ;;  %v1452_v63 = vpop.permute.xlu1 %1451 }
 0x8de   : > { %1962 = vmatprep.subr.bf16.mxu1 %v1452_v63 }
 0x8e1   : > { %1963 = vmatpush3.bf16.msra.mxu1 %v1452_v63 }
 0x8e2   : > { %1968 = vmatprep.subr.bf16.mxu1 %v2035_v9 }
 0x8e3   : > { %v2094_v0 = vpop.eup %2093 }
 0x8e4   : > { %v2096_v1 = vpop.eup %2095  ;;  %v1448_v4 = vmul.f32 %v2094_v0, %v2090_v41 }
 0x8e5   : > { %v2098_v2 = vpop.eup %2097  ;;  %v1445_v5 = vmul.f32 %v2096_v1, %v2088_v40 }
 0x8e6   : > { %v1447_v42 = vmul.f32 %v2098_v2, %v2086_v26 }
 0x8e7   : > { %v2100_v3 = vpop.eup %2099 }
 0x8e8   : > { %v1446_v6 = vmul.f32 %v2100_v3, %v2092_v45  ;;  %v1450_v8 = vpack.c.bf16 %v1448_v4, %v1447_v42  ;;  %v2109_v45 = vld [vmem:[%s2198_s18] sm:$0xff] }
 0x8ea   : > { %v1449_v7 = vpack.c.bf16 %v1446_v6, %v1445_v5 }
 0x8ec   : > { %1964 = vmatprep.mubr.msk.bf16.mxu1 %vm651_vm1, %v1449_v7 }
 0x8ed   : > { %1965 = vmatmul.mubr.msk.bf16.vlgmr.msra.gmra.mxu1 %vm651_vm1, %v1450_v8 }
 0x8ee   : > { %1969 = vmatpush3.bf16.msra.mxu1 %v2035_v9 }
 0x8ef   : > { %1970 = vmatprep.subr.bf16.mxu1 %v2036_v10 }
 0x8f2   : > { %1971 = vmatpush3.bf16.msra.mxu1 %v2036_v10 }
 0x99c   : > { %v1950_v12 = vpop.f32.mrf.mxu1 }
 0x99d   : > { %v1334_v14 = vadd.f32 %v1950_v12, %v1079_v11 }
 0x99e   : > { %v1317_v15 = vpop.f32.mrf.mxu1 }
 0x99f   : > { %v1332_v17 = vadd.f32 %v1317_v15, %v1071_v13  ;;  %v1796_v15 = vld [vmem:[%s2481_s5] ss:$0 sm:$0xff] }
 0x9a0   : > { %v1951_v18 = vpop.f32.mrf.mxu1 }
 0x9a1   : > { %v1335_v28 = vadd.f32 %v1951_v18, %v1082_v16 }
 0x9a2   : > { %v1320_v29 = vpop.f32.mrf.mxu1 }
 0x9a3   : > { %v1333_v30 = vadd.f32 %v1320_v29, %v1074_v19 }
 0x9ad   : > { %v1966_v31 = vpop.f32.mrf.mxu1 }
 0x9af   : > { %v1499_v32 = vpop.f32.mrf.mxu1 }
 0x9b1   : > { %v1967_v33 = vpop.f32.mrf.mxu1 }
 0x9b2   : > { %v1515_v35 = vpack.c.bf16 %v1967_v33, %v1966_v31 }
 0x9b3   : > { %v1502_v34 = vpop.f32.mrf.mxu1 }
 0x9b4   : > { %v1514_v22 = vpack.c.bf16 %v1502_v34, %v1499_v32 }
 0x9b6   : > { %1972 = vmatprep.mubr.msk.bf16.mxu1 %vm589_vm0, %v1514_v22 }
 0x9b7   : > { %1973 = vmatmul.mubr.msk.bf16.vlgmr.msra.gmra.mxu1 %vm589_vm0, %v1515_v35 }
 0xa77   : > { %v1974_v23 = vpop.f32.mrf.mxu1 }
 0xa78   : > { %v1585_v40 = vadd.f32 %v1974_v23, %v1334_v14 }
 0xa79   : > { %v1568_v25 = vpop.f32.mrf.mxu1 }
 0xa7a   : > { %v1583_v36 = vadd.f32 %v1568_v25, %v1332_v17  ;;  %v1596_v52 = vadd.f32 %v1795_v27, %v1585_v40  ;;  %v1797_v17 = vld [vmem:[%s2482_s6] ss:$0 sm:$0xff] }
 0xa7b   : > { %v1975_v37 = vpop.f32.mrf.mxu1 }
 0xa7c   : > { %v1594_v26 = vadd.f32 %v1795_v27, %v1583_v36  ;;  %v1586_v39 = vadd.f32 %v1975_v37, %v1335_v28  ;;  %v1600_v38 = vadd.f32 %v1596_v52, %v2233_v20 }
 0xa7d   : > { %v1571_v41 = vpop.f32.mrf.mxu1 }
 0xa7e   : > { %v1597_v43 = vadd.f32 %v1795_v27, %v1586_v39  ;;  %v1584_v44 = vadd.f32 %v1571_v41, %v1333_v30  ;;  %v1598_v49 = vadd.f32 %v2109_v45, %v1594_v26 }
 0xa80   : > { %v1595_v50 = vadd.f32 %v1795_v27, %v1584_v44  ;;  %1602 = vadd.xlane.f32.xlu0 %v1598_v49  ;;  %v1601_v51 = vadd.f32 %v1597_v43, %v2236_v21 }
 0xa82   : > { %v1608_v53 = vsel %vm707_vm3, %v1601_v51, 0.0  ;;  %v1599_v54 = vadd.f32 %v2110_v47, %v1595_v50 }
 0xa83   : > { %1609 = vadd.xlane.f32.xlu1 %v1608_v53 }
 0xa84   : > { %1604 = vadd.xlane.f32.xlu0 %v1599_v54 }
 0xa87   : > { %1606 = vadd.xlane.f32.xlu1 %v1600_v38 }
 0xb09   : > { %v1603_v48 = vpop.xlane.xlu0 %1602 }
 0xb0a   : > { %v1612_v55 = vmul.f32 0.0078125, %v1603_v48 }
 0xb0c   : > { %v1616_v56 = vsub.f32 %v1598_v49, %v1612_v55  ;;  %v1610_v57 = vpop.xlane.xlu1 %1609 }
 0xb0d   : > { %v1615_v58 = vmul.f32 0.0078125, %v1610_v57  ;;  %v1605_v59 = vpop.xlane.xlu0 %1604 }
 0xb0e   : > { %v1613_v60 = vmul.f32 0.0078125, %v1605_v59  ;;  %v1620_v61 = vmul.f32 %v1616_v56, %v1616_v56 }
 0xb0f   : > { %v1619_v46 = vsub.f32 %v1601_v51, %v1615_v58 }
 0xb10   : > { %v1617_v21 = vsub.f32 %v1599_v54, %v1613_v60  ;;  %v1607_v62 = vpop.xlane.xlu1 %1606  ;;  %1624 = vadd.xlane.f32.xlu0 %v1620_v61 }
 0xb11   : > { %v1614_v24 = vmul.f32 0.0078125, %v1607_v62  ;;  %v1623_v1 = vmul.f32 %v1619_v46, %v1619_v46 }
 0xb12   : > { %v1621_v63 = vmul.f32 %v1617_v21, %v1617_v21 }
 0xb13   : > { %v1618_v0 = vsub.f32 %v1600_v38, %v1614_v24  ;;  %v1630_v20 = vsel %vm707_vm3, %v1623_v1, 0.0 }
 0xb14   : > { %1626 = vadd.xlane.f32.xlu1 %v1621_v63 }
 0xb15   : > { %v1622_v2 = vmul.f32 %v1618_v0, %v1618_v0 }
 0xb17   : > { %1628 = vadd.xlane.f32.xlu0 %v1622_v2 }
 0xb18   : > { %1631 = vadd.xlane.f32.xlu1 %v1630_v20 }
 0xb99   : > { %v1625_v3 = vpop.xlane.xlu0 %1624 }
 0xb9a   : > { %v1633_v4 = vmul.f32 0.0078125, %v1625_v3 }
 0xb9c   : > { %v1637_v5 = vadd.f32 1e-05, %v1633_v4 }
 0xb9d   : > { %v1627_v6 = vpop.xlane.xlu1 %1626 }
 0xb9e   : > { %2101 = vrsqrt.f32 %v1637_v5  ;;  %v1634_v42 = vmul.f32 0.0078125, %v1627_v6 }
 0xba0   : > { %v1638_v7 = vadd.f32 1e-05, %v1634_v42  ;;  %v1629_v8 = vpop.xlane.xlu0 %1628 }
 0xba1   : > { %v1635_v9 = vmul.f32 0.0078125, %v1629_v8  ;;  %v1632_v10 = vpop.xlane.xlu1 %1631 }
 0xba2   : > { %2103 = vrsqrt.f32 %v1638_v7  ;;  %v1636_v11 = vmul.f32 0.0078125, %v1632_v10 }
 0xba3   : > { %v1639_v12 = vadd.f32 1e-05, %v1635_v9 }
 0xba4   : > { %v1640_v13 = vadd.f32 1e-05, %v1636_v11 }
 0xba5   : > { %2105 = vrsqrt.f32 %v1639_v12 }
 0xba6   : > { %2107 = vrsqrt.f32 %v1640_v13 }
 0xbab   : > { %v2102_v14 = vpop.eup %2101 }
 0xbac   : > { %v1645_v16 = vmul.f32 %v2102_v14, %v1616_v56 }
 0xbae   : > { %v1656_v18 = vmul.f32 %v1796_v15, %v1645_v16 }
 0xbaf   : > { %v2104_v19 = vpop.eup %2103 }
 0xbb0   : > { %v1667_v28 = vadd.f32 %v1797_v17, %v1656_v18  ;;  %v1646_v29 = vmul.f32 %v2104_v19, %v1617_v21 }
 0xbb2   : > { %v2106_v30 = vpop.eup %2105  ;;  %1671 = vst [vmem:[%s278_s28] sm:$0xff] %v1667_v28  ;;  %v1657_v31 = vmul.f32 %v1796_v15, %v1646_v29 }
 0xbb3   : > { %v2108_v32 = vpop.eup %2107  ;;  %v1647_v33 = vmul.f32 %v2106_v30, %v1618_v0 }
 0xbb4   : > { %v1668_v34 = vadd.f32 %v1797_v17, %v1657_v31  ;;  %v1648_v22 = vmul.f32 %v2108_v32, %v1619_v46 }
 0xbb5   : > { %v1658_v35 = vmul.f32 %v1796_v15, %v1647_v33 }
 0xbb6   : > { %1672 = vst [vmem:[%s278_s28 + $0x8] sm:$0xff] %v1668_v34  ;;  %v1659_v23 = vmul.f32 %v1796_v15, %v1648_v22 }
 0xbb7   : > { %v1669_v25 = vadd.f32 %v1797_v17, %v1658_v35 }
 0xbb8   : > { %v1670_v36 = vadd.f32 %v1797_v17, %v1659_v23 }
 0xbb9   : > { %1673 = vst [vmem:[%s278_s28 + $0x10] sm:$0xff] %v1669_v25 }
 0xbba   : > { %1674 = vst [vmem:[%s278_s28 + $0x18] sm:$0x7f] %v1670_v36 }
 0xbbb PF: > { %s17_s24 = sadd.s32 1, %s2117_s24  }
 0xbbc   : > { %p14_p4 = scmp.ge.s32.totalorder %s17_s24, 4  }
 0xbbe   :  { %16 = sbr.rel (!%p14_p4) target bundleno = 1 (0x1), region = 78 }

// kernel: _lambda_.21
= control target key start
LH: loop header
LB: loop body
LE: loop exit
PB: predicated region body
PF: predicated region fallthrough
CT: control target
= control target key end

     0   :  { %s1392_s0 = inlined_call_operand.vmem [shape: f32[2,31,128], index: 0, kind: input, shape index: {}]   ;;  %s1393_s1 = inlined_call_operand.vmem [shape: f32[1,128], index: 1, kind: input, shape index: {}]   ;;  %s1394_s2 = inlined_call_operand.vmem [shape: f32[1,128], index: 2, kind: input, shape index: {}]   ;;  %s1395_s3 = inlined_call_operand.vmem [shape: bf16[128,256], index: 3, kind: input, shape index: {}]   ;;  %s1396_s4 = inlined_call_operand.vmem [shape: f32[1,256], index: 4, kind: input, shape index: {}]   ;;  %s1397_s5 = inlined_call_operand.vmem [shape: bf16[256,8], index: 5, kind: input, shape index: {}]   ;;  %s1398_s6 = inlined_call_operand.vmem [shape: f32[1,8], index: 6, kind: input, shape index: {}]   ;;  %s1399_s7 = inlined_call_operand.hbm [shape: f32[2,1,8], index: 7, kind: output, shape index: {0}]   ;;  %s1400_s8 = inlined_call_operand.hbm [shape: f32[2,1,128], index: 8, kind: output, shape index: {1}]  }
   0x1   :  { %1402 = sst [smem:[#allocation8_spill]] %s1392_s0 }
   0x2   :  { %14 = vsyncpa [#allocation3], 0 }
   0x3   :  { %16 = vsyncpa [#allocation3 + $0x1], 0 }
   0x4   :  { %17 = vsyncpa [#allocation5], 0 }
   0x5   :  { %19 = vsyncpa [#allocation5 + $0x1], 0  ;;  %s1139_s27 = smov 0   ;;  %s1141_s28 = smov 0  }
   0x6   :  { %s1143_s29 = smov 0   ;;  %s1145_s30 = smov 0  }
   0x7 LB: > { %s1160_s9 = sadd.s32 4294967295, %s1089_s30   ;;  %s839_s10 = sadd.s32 4294967294, %s1089_s30   ;;  %s1089_s30 = sphi %s1145_s30, %s1410_s30   ;;  %s1085_s29 = sphi %s1143_s29, %s1409_s29   ;;  %s1081_s28 = sphi %s1141_s28, %s1408_s28   ;;  %s1077_s27 = sphi %s1139_s27, %s1407_s27  }
   0x8   : > { %s1164_s11 = sadd.s32 1, %s1089_s30   ;;  %s184_s12 = sadd.s32 1, %s1085_s29 }
   0x9   : > { %s181_s13 = ssub.s32 %s1089_s30, %s1164_s11  ;;  %p194_p0 = scmp.ne.s32.totalorder %s1085_s29, %s1081_s28 }
   0xa   : > { %p182_p1 = scmp.eq.s32.totalorder %s181_s13, 0  ;;  %p195_p2 = scmp.eq.s32.totalorder %s1160_s9, 1 }
   0xb   : > { %p200_p3 = scmp.ne.s32.totalorder %s1081_s28, %s1077_s27  ;;  %p201_p4 = scmp.eq.s32.totalorder %s839_s10, 1 }
   0xc   : > { %s1175_s14 = scalar_select %p182_p1, %s1085_s29, %s184_s12  }
   0xd   : > { %p1177_p5 = por %p195_p2, %p194_p0  ;;  %p1181_p6 = por %p201_p4, %p200_p3 }
   0xe   : > { %p842_p7 = scmp.ge.s32.totalorder %s1089_s30, 1  ;;  %p271_p8 = scmp.lt.s32.totalorder %s1089_s30, 3 }
  0x10   : > { %p272_p9 = pnand %p842_p7, %p271_p8 }
  0x11   : > { %p308_p10 = scmp.lt.s32.totalorder (!%p272_p9), %s1160_s9, 1  ;;  %s1405_s0 = sld [smem:[#allocation8_spill]] (!%p272_p9) }
  0x12   : > { %275 = sbr.rel (%p272_p9) target bundleno = 775 (0x307), region = 48  ;;  %s1401_s13 = sshll.u32 (!%p272_p9), %s1160_s9, 4 }
  0x13   : > { %s1092_s25 = smov (!%p272_p9), [#allocation4]  }
  0x14   : > { %s1003_s26 = sshll.u32 (!%p272_p9), %s1092_s25, 4  ;;  %s1004_s26 = int_to_ptr.vmem [resolvable:$false] %s1003_s26 }
  0x15   : > { %s1005_s10 = scalar_lea.vmem (!%p272_p9), %s1004_s26, 32 }
  0x17   : > { %s309_s17 = scalar_select %p308_p10, %s1160_s9, 1  ;;  %vm324_vm0 = vcmask 1046528   ;;  %v951_v22 = vld [vmem:[%s1395_s3 + $0x74] ss:$8 sps:$4 sm:$0xff]   ;;  %v953_v23 = vld [vmem:[%s1395_s3 + $0x70] ss:$8 sps:$4 sm:$0xff]  }
  0x18   : > { %509 = vmatprep.subr.bf16.mxu0 %v951_v22  ;;  %v954_v24 = vld [vmem:[%s1395_s3 + $0x64] ss:$8 sps:$4 sm:$0xff]   ;;  %v956_v25 = vld [vmem:[%s1395_s3 + $0x60] ss:$8 sps:$4 sm:$0xff]   ;;  %v957_v26 = vld [vmem:[%s1395_s3 + $0x54] ss:$8 sps:$4 sm:$0xff]  }
  0x19   : > { %s883_s18 = sshll.u32 %s309_s17, 5  ;;  %510 = vmatpush1.bf16.msra.mxu0 %v953_v23  ;;  %v959_v27 = vld [vmem:[%s1395_s3 + $0x50] ss:$8 sps:$4 sm:$0xff]   ;;  %v960_v28 = vld [vmem:[%s1395_s3 + $0x44] ss:$8 sps:$4 sm:$0xff]   ;;  %v1091_v31 = vmov 0  }
  0x1a   : > { %s312_s21 = scalar_lea.vmem %s1405_s0, %s883_s18  ;;  %511 = vmatprep.subr.bf16.mxu0 %v954_v24  ;;  %v962_v29 = vld [vmem:[%s1395_s3 + $0x40] ss:$8 sps:$4 sm:$0xff]   ;;  %v963_v30 = vld [vmem:[%s1395_s3 + $0x34] ss:$8 sps:$4 sm:$0xff]   ;;  %541 = vmatprep.mubr.bf16.mxu0 %v1091_v31  ;;  %v965_v32 = vld [vmem:[%s1395_s3 + $0x30] ss:$8 sps:$4 sm:$0xff]  }
  0x1b   : > { %v314_v0 = vld [vmem:[%s312_s21] sm:$0xff]  ;;  %v316_v1 = vld [vmem:[%s312_s21 + $0x10] sm:$0xff]  ;;  %v317_v2 = vld [vmem:[%s312_s21 + $0x18] sm:$0x7f]  ;;  %s1306_s17 = sand.u32 1, %s1081_s28  }
  0x1c   : > { %318 = vadd.xlane.f32.xlu0 %v314_v0  ;;  %322 = vadd.xlane.f32.xlu1 %v316_v1  ;;  %v315_v3 = vld [vmem:[%s312_s21 + $0x8] sm:$0xff]  ;;  %v325_v4 = vsel %vm324_vm0, %v317_v2, 0.0  ;;  %v969_v35 = vld [vmem:[%s1395_s3 + $0x14] ss:$8 sps:$4 sm:$0xff]   ;;  %v971_v36 = vld [vmem:[%s1395_s3 + $0x10] ss:$8 sps:$4 sm:$0xff]   ;;  %s754_s21 = scalar_lea.hbm %s1400_s8, %s1401_s13 }
  0x1d   : > { %512 = vmatpush1.bf16.msra.mxu0 %v956_v25  ;;  %v966_v33 = vld [vmem:[%s1395_s3 + $0x24] ss:$8 sps:$4 sm:$0xff]   ;;  %v968_v34 = vld [vmem:[%s1395_s3 + $0x20] ss:$8 sps:$4 sm:$0xff]   ;;  %v975_v39 = vld [vmem:[%s1397_s5 + $0x78] sm:$0xff]   ;;  %s307_s18 = scalar_lea.vmem [#allocation4], %s1306_s17 }
  0x1e   : > { %513 = vmatprep.subr.bf16.mxu0 %v957_v26  ;;  %v972_v37 = vld [vmem:[%s1395_s3 + $0x4] ss:$8 sps:$4 sm:$0xff]   ;;  %v974_v38 = vld [vmem:[%s1395_s3] ss:$8 sps:$4 sm:$0xff]   ;;  %v976_v40 = vld [vmem:[%s1397_s5 + $0x38] sm:$0xff]   ;;  %884 = vmatprep.subr.bf16.mxu1 %v975_v39  ;;  %s756_s22 = sshll.u32 %s307_s18, 4  ;;  %s757_s22 = int_to_ptr.vmem [resolvable:$true] %s756_s22 }
  0x1f   : > { %v977_v41 = vld [vmem:[%s1397_s5 + $0x70] sm:$0xff]   ;;  %885 = vmatpush3.bf16.msra.mxu1 %v976_v40  ;;  %v979_v43 = vld [vmem:[%s1397_s5 + $0x68] sm:$0xff]   ;;  %v981_v45 = vld [vmem:[%s1397_s5 + $0x60] sm:$0xff]   ;;  %s731_s23 = scalar_lea.sflag [#allocation5], %s1306_s17  ;;  %s999_s24 = scalar_lea.vmem %s757_s22, 16 }
  0x20   : > { %320 = vadd.xlane.f32.xlu0 %v315_v3  ;;  %326 = vadd.xlane.f32.xlu1 %v325_v4  ;;  %v978_v42 = vld [vmem:[%s1397_s5 + $0x30] sm:$0xff]   ;;  %v980_v44 = vld [vmem:[%s1397_s5 + $0x28] sm:$0xff]   ;;  %v982_v46 = vld [vmem:[%s1397_s5 + $0x20] sm:$0xff]   ;;  %p1000_p11 = scmp.ne.s32.totalorder %s757_s22, %s999_s24  ;;  %p1006_p0 = scmp.lt.s32.totalorder %s757_s22, %s1004_s26 }
  0x21   : > { %514 = vmatpush1.bf16.msra.mxu0 %v959_v27  ;;  %886 = vmatprep.subr.bf16.mxu1 %v977_v41  ;;  %v983_v47 = vld [vmem:[%s1397_s5 + $0x58] sm:$0xff]   ;;  %v985_v49 = vld [vmem:[%s1397_s5 + $0x50] sm:$0xff]   ;;  %v989_v31 = vld [vmem:[%s1397_s5 + $0x40] sm:$0xff]   ;;  %p1007_p1 = scmp.lt.s32.totalorder %s1005_s10, %s999_s24 }
  0x22   : > { %515 = vmatprep.subr.bf16.mxu0 %v960_v28  ;;  %v984_v48 = vld [vmem:[%s1397_s5 + $0x18] sm:$0xff]   ;;  %v986_v50 = vld [vmem:[%s1397_s5 + $0x10] sm:$0xff]   ;;  %p1001_p12 = pnand %p1000_p11, %p1177_p5 }
  0x23   : > { %887 = vmatpush3.bf16.msra.mxu1 %v978_v42  ;;  %p1008_p2 = por %p1007_p1, %p1006_p0 }
  0x24   : > { %888 = vmatprep.subr.bf16.mxu1 %v979_v43  ;;  %p1002_p13 = pneg %p1001_p12 }
  0x25   : > { %516 = vmatpush1.bf16.msra.mxu0 %v962_v29  ;;  %v987_v29 = vld [vmem:[%s1397_s5 + $0x48] sm:$0xff]  }
  0x26   : > { %517 = vmatprep.subr.bf16.mxu0 %v963_v30  ;;  %v988_v30 = vld [vmem:[%s1397_s5 + $0x8] sm:$0xff]   ;;  %p1009_p3 = pnand %p1008_p2, %p1002_p13 }
  0x27   : > { %889 = vmatpush3.bf16.msra.mxu1 %v980_v44 }
  0x28   : > { %890 = vmatprep.subr.bf16.mxu1 %v981_v45 }
  0x29   : > { %518 = vmatpush1.bf16.msra.mxu0 %v965_v32  ;;  %v990_v32 = vld [vmem:[%s1397_s5] sm:$0xff]  }
  0x2a   : > { %519 = vmatprep.subr.bf16.mxu0 %v966_v33  ;;  %v499_v33 = vlaneseq }
  0x2b   : > { %891 = vmatpush3.bf16.msra.mxu1 %v982_v46 }
  0x2c   : > { %892 = vmatprep.subr.bf16.mxu1 %v983_v47 }
  0x2d   : > { %520 = vmatpush1.bf16.msra.mxu0 %v968_v34  ;;  %v500_v34 = vshrl.u32 %v499_v33, 7 }
  0x2e   : > { %521 = vmatprep.subr.bf16.mxu0 %v969_v35 }
  0x2f   : > { %893 = vmatpush3.bf16.msra.mxu1 %v984_v48  ;;  %v501_v35 = vsub.s32 0, %v500_v34 }
  0x30   : > { %894 = vmatprep.subr.bf16.mxu1 %v985_v49 }
  0x31   : > { %522 = vmatpush1.bf16.msra.mxu0 %v971_v36  ;;  %v417_v36 = vld [vmem:[%s1396_s4] sm:$0x3] }
  0x32   : > { %523 = vmatprep.subr.bf16.mxu0 %v972_v37  ;;  %v505_v37 = vsub.s32 1, %v500_v34 }
  0x33   : > { %895 = vmatpush3.bf16.msra.mxu1 %v986_v50 }
  0x34   : > { %896 = vmatprep.subr.bf16.mxu1 %v987_v29  ;;  %v506_v39 = vrot.slane %v417_v36, %v505_v37 }
  0x35   : > { %524 = vmatpush1.bf16.msra.mxu0 %v974_v38  ;;  %v502_v38 = vrot.slane %v417_v36, %v501_v35 }
  0x37   : > { %897 = vmatpush3.bf16.msra.mxu1 %v988_v30 }
  0x38   : > { %898 = vmatprep.subr.bf16.mxu1 %v989_v31 }
  0x3b   : > { %899 = vmatpush3.bf16.msra.mxu1 %v990_v32 }
  0xa5   : > { %v319_v5 = vpop.xlane.xlu0 %318  ;;  %v323_v6 = vpop.xlane.xlu1 %322 }
  0xa6   : > { %v329_v7 = vmul.f32 0.0078125, %v319_v5  ;;  %v331_v8 = vmul.f32 0.0078125, %v323_v6 }
  0xa8   : > { %v1193_v9 = vsub.f32 %v314_v0, %v329_v7  ;;  %v1195_v10 = vsub.f32 %v316_v1, %v331_v8  ;;  %v845_v1 = vld [vmem:[%s1393_s1] ss:$0 sm:$0xff] }
  0xa9   : > { %v321_v11 = vpop.xlane.xlu0 %320  ;;  %v327_v12 = vpop.xlane.xlu1 %326  ;;  %v846_v7 = vld [vmem:[%s1394_s2] ss:$0 sm:$0xff] }
  0xaa   : > { %v330_v13 = vmul.f32 0.0078125, %v321_v11  ;;  %v332_v14 = vmul.f32 0.0078125, %v327_v12  ;;  %v337_v15 = vmul.f32 %v1193_v9, %v1193_v9  ;;  %v339_v18 = vmul.f32 %v1195_v10, %v1195_v10 }
  0xac   : > { %v1199_v16 = vsub.f32 %v315_v3, %v330_v13  ;;  %v1201_v17 = vsub.f32 %v317_v2, %v332_v14  ;;  %341 = vadd.xlane.f32.xlu0 %v337_v15 }
  0xae   : > { %v338_v19 = vmul.f32 %v1199_v16, %v1199_v16  ;;  %v340_v20 = vmul.f32 %v1201_v17, %v1201_v17 }
  0xb0   : > { %345 = vadd.xlane.f32.xlu0 %v339_v18  ;;  %343 = vadd.xlane.f32.xlu1 %v338_v19  ;;  %v347_v21 = vsel %vm324_vm0, %v340_v20, 0.0 }
  0xb4   : > { %348 = vadd.xlane.f32.xlu1 %v347_v21 }
 0x135   : > { %v342_v51 = vpop.xlane.xlu0 %341 }
 0x136   : > { %v350_v52 = vmul.f32 0.0078125, %v342_v51 }
 0x138   : > { %v354_v53 = vadd.f32 1e-05, %v350_v52 }
 0x139   : > { %v344_v54 = vpop.xlane.xlu1 %343  ;;  %v346_v55 = vpop.xlane.xlu0 %345 }
 0x13a   : > { %991 = vrsqrt.f32 %v354_v53  ;;  %v351_v56 = vmul.f32 0.0078125, %v344_v54  ;;  %v352_v57 = vmul.f32 0.0078125, %v346_v55 }
 0x13c   : > { %v355_v58 = vadd.f32 1e-05, %v351_v56  ;;  %v356_v59 = vadd.f32 1e-05, %v352_v57 }
 0x13d   : > { %v349_v60 = vpop.xlane.xlu1 %348 }
 0x13e   : > { %993 = vrsqrt.f32 %v355_v58  ;;  %v353_v61 = vmul.f32 0.0078125, %v349_v60 }
 0x13f   : > { %995 = vrsqrt.f32 %v356_v59 }
 0x140   : > { %v357_v62 = vadd.f32 1e-05, %v353_v61 }
 0x142   : > { %997 = vrsqrt.f32 %v357_v62 }
 0x147   : > { %v992_v63 = vpop.eup %991 }
 0x148   : > { %v362_v0 = vmul.f32 %v992_v63, %v1193_v9 }
 0x14a   : > { %v373_v4 = vmul.f32 %v845_v1, %v362_v0 }
 0x14b   : > { %v994_v2 = vpop.eup %993 }
 0x14c   : > { %v996_v3 = vpop.eup %995  ;;  %v363_v5 = vmul.f32 %v994_v2, %v1199_v16  ;;  %v384_v13 = vadd.f32 %v846_v7, %v373_v4 }
 0x14d   : > { %v364_v6 = vmul.f32 %v996_v3, %v1195_v10 }
 0x14e   : > { %v374_v8 = vmul.f32 %v845_v1, %v363_v5 }
 0x14f   : > { %v998_v11 = vpop.eup %997  ;;  %v375_v12 = vmul.f32 %v845_v1, %v364_v6 }
 0x150   : > { %v365_v9 = vmul.f32 %v998_v11, %v1201_v17  ;;  %v385_v14 = vadd.f32 %v846_v7, %v374_v8 }
 0x151   : > { %v386_v18 = vadd.f32 %v846_v7, %v375_v12 }
 0x152   : > { %v376_v15 = vmul.f32 %v845_v1, %v365_v9  ;;  %v388_v19 = vadd.f32 %v385_v14, %v384_v13 }
 0x154   : > { %v387_v20 = vadd.f32 %v846_v7, %v376_v15  ;;  %v389_v21 = vadd.f32 %v388_v19, %v386_v18 }
 0x156   : > { %v390_v16 = vsel %vm324_vm0, %v387_v20, 0.0 }
 0x157   : > { %v391_v10 = vadd.f32 %v390_v16, %v389_v21 }
 0x159   : > { %v392_v22 = vrot.slane %v391_v10, 4 }
 0x15b   : > { %v393_v23 = vadd.f32 %v392_v22, %v391_v10 }
 0x15d   : > { %v394_v24 = vrot.slane %v393_v23, 2 }
 0x15f   : > { %v395_v25 = vadd.f32 %v394_v24, %v393_v23 }
 0x161   : > { %v396_v26 = vrot.slane %v395_v25, 1 }
 0x163   : > { %v397_v17 = vadd.f32 %v396_v26, %v395_v25 }
 0x165   : > { %v399_v27 = vmul.f32 0.032258064, %v397_v17 }
 0x167   : > { %v400_v28 = vpack.c.bf16 %v399_v27, %v399_v27  ;;  %725 = vst [vmem:[%s307_s18] sm:$0x1] %v399_v27 }
 0x169   : > { %542 = vmatmul.mubr.bf16.vlgmr.msra.gmra.mxu0 %v400_v28 }
 0x229   : > { %v543_v40 = vpop.f32.mrf.mxu0 }
 0x22a   : > { %v544_v41 = vadd.f32 %v543_v40, %v502_v38 }
 0x22b   : > { %v545_v42 = vpop.f32.mrf.mxu0 }
 0x22c   : > { %v546_v43 = vadd.f32 %v545_v42, %v506_v39  ;;  %v550_v44 = vmax.f32 %v544_v41, 0.0 }
 0x22d   : > { %v547_v45 = vpop.f32.mrf.mxu0 }
 0x22e   : > { %v551_v46 = vmax.f32 %v546_v43, 0.0  ;;  %v552_v49 = vpack.c.bf16 %v550_v44, %v550_v44 }
 0x22f   : > { %v548_v47 = vpop.f32.mrf.mxu0 }
 0x230   : > { %v553_v48 = vpack.c.bf16 %v551_v46, %v551_v46 }
 0x232   : > { %715 = vmatprep.mubr.bf16.mxu1 %v553_v48 }
 0x233   : > { %716 = vmatmul.mubr.bf16.vlgmr.msra.gmra.mxu1 %v552_v49 }
 0x234   : > { %1012 = shalt.err (!%p1009_p3)
}
 0x235   : > { %s1013_s12 = scalar_lea.hbm %s754_s21, 16  ;;  %s1017_s20 = scalar_lea.hbm %s1400_s8, 32 }
 0x236   : > { %p1014_p4 = scmp.ne.s32.totalorder %s754_s21, %s1013_s12  ;;  %p1018_p9 = scmp.lt.s32.totalorder %s754_s21, %s1400_s8 }
 0x237   : > { %p1019_p10 = scmp.lt.s32.totalorder %s1017_s20, %s1013_s12 }
 0x238   : > { %p1015_p7 = pnand %p1014_p4, %p1177_p5 }
 0x239   : > { %p1020_p11 = por %p1019_p10, %p1018_p9 }
 0x23a   : > { %p1016_p8 = pneg %p1015_p7 }
 0x23c   : > { %p1021_p12 = pnand %p1020_p11, %p1016_p8 }
 0x23e   : > { %1024 = shalt.err (!%p1021_p12)
}
 0x23f   : > { %907 = dma.vmem_to_hbm [thread:$0]  (%p1177_p5), %s757_s22, 16, %s754_s21, %s731_s23   ;;  %v586_v51 = vld [vmem:[%s1398_s6] sm:$0x1]  ;;  %vm723_vm1 = vcmask 57344  }
 0x240   : > { %s301_s26 = scalar_lea.vmem [#allocation2], %s1306_s17  ;;  %s1406_s13 = sshll.u32 %s1160_s9, 4 }
 0x241   : > { %s743_s0 = sshll.u32 %s301_s26, 4  ;;  %s1356_s18 = scalar_lea.hbm %s1399_s7, %s1406_s13  ;;  %s744_s0 = int_to_ptr.vmem [resolvable:$true] %s743_s0 }
 0x242   : > { %s727_s21 = scalar_lea.sflag [#allocation3], %s1306_s17  ;;  %s1025_s22 = scalar_lea.vmem %s744_s0, 16 }
 0x243   : > { %p1026_p13 = scmp.ne.s32.totalorder %s744_s0, %s1025_s22  ;;  %s1093_s23 = smov [#allocation2]  }
 0x244   : > { %s1029_s19 = sshll.u32 %s1093_s23, 4  ;;  %s1030_s19 = int_to_ptr.vmem [resolvable:$false] %s1029_s19 }
 0x245   : > { %p1027_p0 = pnand %p1026_p13, %p1177_p5  ;;  %s1031_s20 = scalar_lea.vmem %s1030_s19, 32 }
 0x246   : > { %p1032_p2 = scmp.lt.s32.totalorder %s744_s0, %s1030_s19  ;;  %p1033_p3 = scmp.lt.s32.totalorder %s1031_s20, %s1025_s22 }
 0x247   : > { %p1028_p1 = pneg %p1027_p0 }
 0x248   : > { %p1034_p4 = por %p1033_p3, %p1032_p2 }
 0x24a   : > { %p1035_p7 = pnand %p1034_p4, %p1028_p1 }
 0x2f3   : > { %v900_v50 = vpop.f32.mrf.mxu1 }
 0x2f5   : > { %v901_v52 = vpop.f32.mrf.mxu1 }
 0x2f6   : > { %v902_v53 = vadd.f32 %v901_v52, %v900_v50 }
 0x2f7   : > { %v903_v54 = vpop.f32.mrf.mxu1 }
 0x2f8   : > { %v718_v55 = vadd.f32 %v902_v53, %v586_v51 }
 0x2f9   : > { %v904_v56 = vpop.f32.mrf.mxu1 }
 0x2fa   : > { %724 = vst.msk [vmem:[%s301_s26] sm:$0x1] %vm723_vm1, %v718_v55 }
 0x2fb   : > { %1038 = shalt.err (!%p1035_p7)
}
 0x2fc   : > { %s1039_s9 = scalar_lea.hbm %s1356_s18, 16  ;;  %s1043_s25 = scalar_lea.hbm %s1399_s7, 32 }
 0x2fd   : > { %p1040_p8 = scmp.ne.s32.totalorder %s1356_s18, %s1039_s9  ;;  %p1044_p11 = scmp.lt.s32.totalorder %s1356_s18, %s1399_s7 }
 0x2fe   : > { %p1045_p12 = scmp.lt.s32.totalorder %s1043_s25, %s1039_s9 }
 0x2ff   : > { %p1041_p9 = pnand %p1040_p8, %p1177_p5 }
 0x300   : > { %p1046_p13 = por %p1045_p12, %p1044_p11 }
 0x301   : > { %p1042_p10 = pneg %p1041_p9 }
 0x303   : > { %p1047_p0 = pnand %p1046_p13, %p1042_p10 }
 0x305   : > { %1050 = shalt.err (!%p1047_p0)
}
 0x306   : > { %906 = dma.vmem_to_hbm [thread:$0]  (%p1177_p5), %s744_s0, 16, %s1356_s18, %s727_s21  }
 0x307 PF: > { %p917_p1 = scmp.ge.s32.totalorder %s1089_s30, 2  ;;  %s768_s10 = sand.u32 1, %s1077_s27  }
 0x308   : > { %s769_s12 = scalar_lea.sflag [#allocation3], %s768_s10 }
 0x309   : > { %p911_p2 = pnand %p917_p1, %p1181_p6 }
 0x30b   : > { %p912_p3 = pneg %p911_p2 }
 0x30d   : > { %1068 = dma.done.wait (%p912_p3), %s769_s12, 16  }
 0x30e   : > { %1070 = vsyncadd (%p912_p3), %s769_s12, 4294967280  ;;  %s777_s22 = scalar_lea.sflag [#allocation5], %s768_s10 }
 0x30f   : > { %1072 = dma.done.wait (%p912_p3), %s777_s22, 16  }
 0x310   : > { %1074 = vsyncadd (%p912_p3), %s777_s22, 4294967280  ;;  %p22_p5 = scmp.ge.s32.totalorder %s1164_s11, 4   ;;  %s1407_s27 = smov %s1081_s28 }
 0x311   : > { %s1408_s28 = smov %s1085_s29  ;;  %s1409_s29 = smov %s1175_s14 }
 0x312   : > { %s1410_s30 = smov %s1164_s11  ;;  %24 = sbr.rel (!%p22_p5) target bundleno = 7 (0x7), region = 100 }
 0x317   :  { %781 = vsyncpa [#allocation3], 1 }
 0x318   :  { %783 = vsyncpa [#allocation3 + $0x1], 1 }
 0x319   :  { %784 = vsyncpa [#allocation5], 1 }
 0x31a   :  { %786 = vsyncpa [#allocation5 + $0x1], 1 }

// kernel: _lambda_.18
= control target key start
LH: loop header
LB: loop body
LE: loop exit
PB: predicated region body
PF: predicated region fallthrough
CT: control target
= control target key end

     0   :  { %v1554_v1 = vmov 0   ;;  %vm1118_vm0 = vcmask 1045504   ;;  %s2303_s1 = inlined_call_operand.vmem [shape: bf16[128,512], index: 1, kind: input, shape index: {}]   ;;  %s2304_s0 = inlined_call_operand.vmem [shape: f32[62,128], index: 0, kind: input, shape index: {}]   ;;  %s2305_s3 = inlined_call_operand.vmem [shape: bf16[512,128], index: 3, kind: input, shape index: {}]   ;;  %s2306_s2 = inlined_call_operand.vmem [shape: f32[1,512], index: 2, kind: input, shape index: {}]   ;;  %s2307_s4 = inlined_call_operand.vmem [shape: f32[1,128], index: 4, kind: input, shape index: {}]   ;;  %s2308_s5 = inlined_call_operand.vmem [shape: f32[1,128], index: 5, kind: input, shape index: {}]   ;;  %s2309_s6 = inlined_call_operand.vmem [shape: f32[1,128], index: 6, kind: input, shape index: {}]   ;;  %s2310_s7 = inlined_call_operand.vmem [shape: f32[62,128], index: 7, kind: output, shape index: {}]  }
   0x1   :  { %v1386_v0 = vld [vmem:[%s2303_s1 + $0xe4] ss:$16 sps:$4 sm:$0xff]   ;;  %285 = vmatprep.mubr.bf16.mxu0 %v1554_v1  ;;  %358 = vmatprep.mubr.bf16.mxu1 %v1554_v1  ;;  %v1388_v2 = vld [vmem:[%s2303_s1 + $0xec] ss:$16 sps:$4 sm:$0xff]   ;;  %v1390_v3 = vld [vmem:[%s2303_s1 + $0xe0] ss:$16 sps:$4 sm:$0xff]  }
   0x2   :  { %253 = vmatprep.subr.bf16.mxu0 %v1386_v0  ;;  %v1391_v4 = vld [vmem:[%s2303_s1 + $0xe8] ss:$16 sps:$4 sm:$0xff]   ;;  %326 = vmatprep.subr.bf16.mxu1 %v1388_v2  ;;  %v1392_v5 = vld [vmem:[%s2303_s1 + $0xc4] ss:$16 sps:$4 sm:$0xff]   ;;  %v1394_v6 = vld [vmem:[%s2303_s1 + $0xcc] ss:$16 sps:$4 sm:$0xff]  }
   0x3   :  { %254 = vmatpush1.bf16.msra.mxu0 %v1390_v3  ;;  %327 = vmatpush1.bf16.msra.mxu1 %v1391_v4  ;;  %v1396_v7 = vld [vmem:[%s2303_s1 + $0xc0] ss:$16 sps:$4 sm:$0xff]   ;;  %v1397_v8 = vld [vmem:[%s2303_s1 + $0xc8] ss:$16 sps:$4 sm:$0xff]   ;;  %v1398_v9 = vld [vmem:[%s2303_s1 + $0xa4] ss:$16 sps:$4 sm:$0xff]  }
   0x4   :  { %255 = vmatprep.subr.bf16.mxu0 %v1392_v5  ;;  %328 = vmatprep.subr.bf16.mxu1 %v1394_v6  ;;  %v1400_v10 = vld [vmem:[%s2303_s1 + $0xac] ss:$16 sps:$4 sm:$0xff]   ;;  %v1402_v11 = vld [vmem:[%s2303_s1 + $0xa0] ss:$16 sps:$4 sm:$0xff]   ;;  %v1403_v12 = vld [vmem:[%s2303_s1 + $0xa8] ss:$16 sps:$4 sm:$0xff]  }
   0x5   :  { %v1404_v13 = vld [vmem:[%s2303_s1 + $0x84] ss:$16 sps:$4 sm:$0xff]   ;;  %v1406_v14 = vld [vmem:[%s2303_s1 + $0x8c] ss:$16 sps:$4 sm:$0xff]   ;;  %v1408_v15 = vld [vmem:[%s2303_s1 + $0x80] ss:$16 sps:$4 sm:$0xff]  }
   0x6   :  { %v1409_v16 = vld [vmem:[%s2303_s1 + $0x88] ss:$16 sps:$4 sm:$0xff]   ;;  %v1410_v17 = vld [vmem:[%s2303_s1 + $0x64] ss:$16 sps:$4 sm:$0xff]   ;;  %v1412_v18 = vld [vmem:[%s2303_s1 + $0x6c] ss:$16 sps:$4 sm:$0xff]  }
   0x7   :  { %256 = vmatpush1.bf16.msra.mxu0 %v1396_v7  ;;  %329 = vmatpush1.bf16.msra.mxu1 %v1397_v8  ;;  %v1414_v19 = vld [vmem:[%s2303_s1 + $0x60] ss:$16 sps:$4 sm:$0xff]   ;;  %v1415_v20 = vld [vmem:[%s2303_s1 + $0x68] ss:$16 sps:$4 sm:$0xff]   ;;  %v1416_v21 = vld [vmem:[%s2303_s1 + $0x44] ss:$16 sps:$4 sm:$0xff]  }
   0x8   :  { %257 = vmatprep.subr.bf16.mxu0 %v1398_v9  ;;  %330 = vmatprep.subr.bf16.mxu1 %v1400_v10  ;;  %v1418_v22 = vld [vmem:[%s2303_s1 + $0x4c] ss:$16 sps:$4 sm:$0xff]   ;;  %v1420_v23 = vld [vmem:[%s2303_s1 + $0x40] ss:$16 sps:$4 sm:$0xff]   ;;  %v1421_v24 = vld [vmem:[%s2303_s1 + $0x48] ss:$16 sps:$4 sm:$0xff]  }
   0x9   :  { %v1422_v25 = vld [vmem:[%s2303_s1 + $0x24] ss:$16 sps:$4 sm:$0xff]   ;;  %v1424_v26 = vld [vmem:[%s2303_s1 + $0x2c] ss:$16 sps:$4 sm:$0xff]   ;;  %v1426_v27 = vld [vmem:[%s2303_s1 + $0x20] ss:$16 sps:$4 sm:$0xff]  }
   0xa   :  { %v1427_v28 = vld [vmem:[%s2303_s1 + $0x28] ss:$16 sps:$4 sm:$0xff]   ;;  %v1428_v29 = vld [vmem:[%s2303_s1 + $0x4] ss:$16 sps:$4 sm:$0xff]   ;;  %v1430_v30 = vld [vmem:[%s2303_s1 + $0xc] ss:$16 sps:$4 sm:$0xff]  }
   0xb   :  { %258 = vmatpush1.bf16.msra.mxu0 %v1402_v11  ;;  %331 = vmatpush1.bf16.msra.mxu1 %v1403_v12  ;;  %v1432_v31 = vld [vmem:[%s2303_s1] ss:$16 sps:$4 sm:$0xff]   ;;  %v1433_v32 = vld [vmem:[%s2303_s1 + $0x8] ss:$16 sps:$4 sm:$0xff]  }
   0xc   :  { %259 = vmatprep.subr.bf16.mxu0 %v1404_v13  ;;  %332 = vmatprep.subr.bf16.mxu1 %v1406_v14  ;;  %v27_v33 = vld [vmem:[%s2304_s0] sm:$0xff]  ;;  %v28_v34 = vld [vmem:[%s2304_s0 + $0x8] sm:$0xff]  ;;  %v29_v36 = vld [vmem:[%s2304_s0 + $0x10] sm:$0xff]  ;;  %v73_v13 = vlaneseq }
   0xd   :  { %v35_v35 = vpack.c.bf16 %v28_v34, %v27_v33  ;;  %v30_v37 = vld [vmem:[%s2304_s0 + $0x18] sm:$0xff]  ;;  %v31_v39 = vld [vmem:[%s2304_s0 + $0x20] sm:$0xff]  ;;  %v32_v40 = vld [vmem:[%s2304_s0 + $0x28] sm:$0xff] }
   0xe   :  { %v36_v38 = vpack.c.bf16 %v30_v37, %v29_v36  ;;  %v37_v41 = vpack.c.bf16 %v32_v40, %v31_v39  ;;  %v33_v42 = vld [vmem:[%s2304_s0 + $0x30] sm:$0xff]  ;;  %v34_v43 = vld [vmem:[%s2304_s0 + $0x38] sm:$0x3f]  ;;  %v1442_v53 = vld [vmem:[%s2305_s3 + $0x68] sm:$0xff]   ;;  %v74_v14 = vshrl.u32 %v73_v13, 7 }
   0xf   :  { %260 = vmatpush1.bf16.msra.mxu0 %v1408_v15  ;;  %333 = vmatpush1.bf16.msra.mxu1 %v1409_v16  ;;  %v38_v44 = vpack.c.bf16 %v34_v43, %v33_v42  ;;  %v1434_v45 = vld [vmem:[%s2305_s3 + $0x78] sm:$0xff]   ;;  %v1438_v49 = vld [vmem:[%s2305_s3 + $0x70] sm:$0xff]   ;;  %v1444_v54 = vld [vmem:[%s2305_s3 + $0xe8] sm:$0xff]  }
  0x10   :  { %261 = vmatprep.subr.bf16.mxu0 %v1410_v17  ;;  %334 = vmatprep.subr.bf16.mxu1 %v1412_v18  ;;  %v1435_v46 = vld [vmem:[%s2305_s3 + $0x38] sm:$0xff]   ;;  %v1440_v50 = vld [vmem:[%s2305_s3 + $0xf0] sm:$0xff]   ;;  %v1443_v55 = vld [vmem:[%s2305_s3 + $0x28] sm:$0xff]   ;;  %v75_v15 = vsub.s32 0, %v74_v14  ;;  %v83_v16 = vsub.s32 2, %v74_v14  ;;  %v79_v18 = vsub.s32 1, %v74_v14 }
  0x11   :  { %v1436_v47 = vld [vmem:[%s2305_s3 + $0xf8] sm:$0xff]   ;;  %v1439_v51 = vld [vmem:[%s2305_s3 + $0x30] sm:$0xff]   ;;  %v1445_v56 = vld [vmem:[%s2305_s3 + $0xa8] sm:$0xff]  }
  0x12   :  { %v1437_v48 = vld [vmem:[%s2305_s3 + $0xb8] sm:$0xff]   ;;  %v1441_v52 = vld [vmem:[%s2305_s3 + $0xb0] sm:$0xff]   ;;  %v1446_v57 = vld [vmem:[%s2305_s3 + $0x60] sm:$0xff]  }
  0x13   :  { %262 = vmatpush1.bf16.msra.mxu0 %v1414_v19  ;;  %335 = vmatpush1.bf16.msra.mxu1 %v1415_v20  ;;  %v1448_v58 = vld [vmem:[%s2305_s3 + $0xe0] sm:$0xff]   ;;  %v1450_v61 = vld [vmem:[%s2305_s3 + $0x58] sm:$0xff]   ;;  %v1456_v2 = vld [vmem:[%s2305_s3 + $0xd0] sm:$0xff]   ;;  %v87_v19 = vsub.s32 3, %v74_v14 }
  0x14   :  { %263 = vmatprep.subr.bf16.mxu0 %v1416_v21  ;;  %336 = vmatprep.subr.bf16.mxu1 %v1418_v22  ;;  %v1447_v59 = vld [vmem:[%s2305_s3 + $0x20] sm:$0xff]   ;;  %v1452_v62 = vld [vmem:[%s2305_s3 + $0xd8] sm:$0xff]   ;;  %v1455_v3 = vld [vmem:[%s2305_s3 + $0x10] sm:$0xff]  }
  0x15   :  { %v1449_v60 = vld [vmem:[%s2305_s3 + $0xa0] sm:$0xff]   ;;  %v1451_v63 = vld [vmem:[%s2305_s3 + $0x18] sm:$0xff]   ;;  %v1457_v4 = vld [vmem:[%s2305_s3 + $0x90] sm:$0xff]  }
  0x16   :  { %v1453_v0 = vld [vmem:[%s2305_s3 + $0x98] sm:$0xff]   ;;  %v1458_v5 = vld [vmem:[%s2305_s3 + $0x48] sm:$0xff]   ;;  %v1462_v9 = vld [vmem:[%s2305_s3 + $0x40] sm:$0xff]  }
  0x17   :  { %264 = vmatpush1.bf16.msra.mxu0 %v1420_v23  ;;  %337 = vmatpush1.bf16.msra.mxu1 %v1421_v24  ;;  %v1460_v6 = vld [vmem:[%s2305_s3 + $0xc8] sm:$0xff]   ;;  %v1464_v10 = vld [vmem:[%s2305_s3 + $0xc0] sm:$0xff]  }
  0x18   :  { %265 = vmatprep.subr.bf16.mxu0 %v1422_v25  ;;  %338 = vmatprep.subr.bf16.mxu1 %v1424_v26  ;;  %v1459_v7 = vld [vmem:[%s2305_s3 + $0x8] sm:$0xff]   ;;  %v1463_v11 = vld [vmem:[%s2305_s3] sm:$0xff]  }
  0x19   :  { %v1461_v8 = vld [vmem:[%s2305_s3 + $0x88] sm:$0xff]   ;;  %v1465_v12 = vld [vmem:[%s2305_s3 + $0x80] sm:$0xff]  }
  0x1a   :  { %v71_v17 = vld [vmem:[%s2306_s2] sm:$0xf] }
  0x1b   :  { %266 = vmatpush1.bf16.msra.mxu0 %v1426_v27  ;;  %339 = vmatpush1.bf16.msra.mxu1 %v1427_v28  ;;  %v1822_v20 = vrot.slane %v71_v17, %v75_v15  ;;  %v1824_v21 = vrot.slane %v71_v17, %v83_v16  ;;  %v1826_v24 = vrot.slane %v71_v17, %v79_v18 }
  0x1c   :  { %267 = vmatprep.subr.bf16.mxu0 %v1428_v29  ;;  %340 = vmatprep.subr.bf16.mxu1 %v1430_v30  ;;  %v1828_v25 = vrot.slane %v71_v17, %v87_v19 }
  0x1f   :  { %268 = vmatpush1.bf16.msra.mxu0 %v1432_v31  ;;  %341 = vmatpush1.bf16.msra.mxu1 %v1433_v32 }
  0x20   :  { %1305 = vmatprep.subr.bf16.mxu0 %v1434_v45  ;;  %1345 = vmatprep.subr.bf16.mxu1 %v1436_v47 }
  0x22   :  { %286 = vmatmul.mubr.bf16.vlgmr.msra.gmra.mxu0 %v35_v35  ;;  %359 = vmatmul.mubr.bf16.vlgmr.msra.gmra.mxu1 %v35_v35 }
  0x23   :  { %295 = vmatprep.mubr.bf16.mxu0 %v1554_v1  ;;  %368 = vmatprep.mubr.bf16.mxu1 %v1554_v1 }
  0x24   :  { %1306 = vmatpush3.bf16.msra.mxu0 %v1435_v46  ;;  %1346 = vmatpush3.bf16.msra.mxu1 %v1437_v48 }
  0x25   :  { %1307 = vmatprep.subr.bf16.mxu0 %v1438_v49  ;;  %1347 = vmatprep.subr.bf16.mxu1 %v1440_v50 }
  0x28   :  { %1308 = vmatpush3.bf16.msra.mxu0 %v1439_v51  ;;  %1348 = vmatpush3.bf16.msra.mxu1 %v1441_v52 }
  0x29   :  { %1309 = vmatprep.subr.bf16.mxu0 %v1442_v53  ;;  %1349 = vmatprep.subr.bf16.mxu1 %v1444_v54 }
  0x2a   :  { %296 = vmatmul.mubr.bf16.gmra.mxu0 %v36_v38  ;;  %369 = vmatmul.mubr.bf16.gmra.mxu1 %v36_v38 }
  0x2b   :  { %305 = vmatprep.mubr.bf16.mxu0 %v1554_v1  ;;  %378 = vmatprep.mubr.bf16.mxu1 %v1554_v1 }
  0x2c   :  { %1310 = vmatpush3.bf16.msra.mxu0 %v1443_v55  ;;  %1350 = vmatpush3.bf16.msra.mxu1 %v1445_v56 }
  0x2d   :  { %1311 = vmatprep.subr.bf16.mxu0 %v1446_v57  ;;  %1351 = vmatprep.subr.bf16.mxu1 %v1448_v58 }
  0x30   :  { %1312 = vmatpush3.bf16.msra.mxu0 %v1447_v59  ;;  %1352 = vmatpush3.bf16.msra.mxu1 %v1449_v60 }
  0x31   :  { %1313 = vmatprep.subr.bf16.mxu0 %v1450_v61  ;;  %1353 = vmatprep.subr.bf16.mxu1 %v1452_v62 }
  0x32   :  { %306 = vmatmul.mubr.bf16.gmra.mxu0 %v37_v41  ;;  %379 = vmatmul.mubr.bf16.gmra.mxu1 %v37_v41 }
  0x33   :  { %315 = vmatprep.mubr.bf16.mxu0 %v1554_v1  ;;  %388 = vmatprep.mubr.bf16.mxu1 %v1554_v1  ;;  %v1454_v1 = vld [vmem:[%s2305_s3 + $0x50] sm:$0xff]  }
  0x34   :  { %1314 = vmatpush3.bf16.msra.mxu0 %v1451_v63  ;;  %1354 = vmatpush3.bf16.msra.mxu1 %v1453_v0 }
  0x35   :  { %1315 = vmatprep.subr.bf16.mxu0 %v1454_v1  ;;  %1355 = vmatprep.subr.bf16.mxu1 %v1456_v2 }
  0x38   :  { %1316 = vmatpush3.bf16.msra.mxu0 %v1455_v3  ;;  %1356 = vmatpush3.bf16.msra.mxu1 %v1457_v4 }
  0x39   :  { %1317 = vmatprep.subr.bf16.mxu0 %v1458_v5  ;;  %1357 = vmatprep.subr.bf16.mxu1 %v1460_v6 }
  0x3a   :  { %316 = vmatmul.mubr.bf16.gmra.mxu0 %v38_v44  ;;  %389 = vmatmul.mubr.bf16.gmra.mxu1 %v38_v44 }
  0x3c   :  { %1318 = vmatpush3.bf16.msra.mxu0 %v1459_v7  ;;  %1358 = vmatpush3.bf16.msra.mxu1 %v1461_v8 }
  0x3d   :  { %1319 = vmatprep.subr.bf16.mxu0 %v1462_v9  ;;  %1359 = vmatprep.subr.bf16.mxu1 %v1464_v10 }
  0x40   :  { %1320 = vmatpush3.bf16.msra.mxu0 %v1463_v11  ;;  %1360 = vmatpush3.bf16.msra.mxu1 %v1465_v12 }
  0xe2   :  { %v287_v22 = vpop.f32.mrf.mxu0  ;;  %v360_v23 = vpop.f32.mrf.mxu1 }
  0xe3   :  { %v288_v26 = vadd.f32 %v287_v22, %v1822_v20  ;;  %v361_v27 = vadd.f32 %v360_v23, %v1824_v21 }
  0xe4   :  { %v289_v28 = vpop.f32.mrf.mxu0  ;;  %v362_v29 = vpop.f32.mrf.mxu1 }
  0xe5   :  { %v431_v30 = vmul.f32 0.044715, %v288_v26  ;;  %v433_v31 = vmul.f32 0.044715, %v361_v27  ;;  %v1833_v32 = vadd.f32 %v289_v28, %v1826_v24  ;;  %v1836_v33 = vadd.f32 %v362_v29, %v1828_v25 }
  0xe6   :  { %v291_v34 = vpop.f32.mrf.mxu0  ;;  %v364_v35 = vpop.f32.mrf.mxu1  ;;  %v1845_v53 = vmul.f32 0.5, %v288_v26  ;;  %v1850_v58 = vmul.f32 0.5, %v361_v27 }
  0xe7   :  { %v463_v36 = vmul.f32 %v431_v30, %v288_v26  ;;  %v465_v37 = vmul.f32 %v433_v31, %v361_v27  ;;  %v292_v38 = vadd.f32 %v291_v34, %v1822_v20  ;;  %v365_v39 = vadd.f32 %v364_v35, %v1824_v21 }
  0xe8   :  { %v293_v40 = vpop.f32.mrf.mxu0  ;;  %v366_v41 = vpop.f32.mrf.mxu1  ;;  %v432_v45 = vmul.f32 0.044715, %v1833_v32  ;;  %v434_v50 = vmul.f32 0.044715, %v1836_v33  ;;  %v1853_v61 = vmul.f32 0.5, %v1833_v32  ;;  %v1871_v13 = vmul.f32 0.5, %v1836_v33 }
  0xe9   :  { %v495_v42 = vmul.f32 %v463_v36, %v288_v26  ;;  %v497_v43 = vmul.f32 %v465_v37, %v361_v27  ;;  %v435_v44 = vmul.f32 0.044715, %v292_v38  ;;  %v437_v46 = vmul.f32 0.044715, %v365_v39 }
  0xea   :  { %v297_v47 = vpop.f32.mrf.mxu0  ;;  %v370_v48 = vpop.f32.mrf.mxu1  ;;  %v1843_v52 = vadd.f32 %v293_v40, %v1826_v24  ;;  %v1848_v55 = vadd.f32 %v366_v41, %v1828_v25  ;;  %2319 = vst [vmem:[#allocation2_spill] sm:$0xff] %v1853_v61  ;;  %v464_v62 = vmul.f32 %v432_v45, %v1833_v32  ;;  %v466_v5 = vmul.f32 %v434_v50, %v1836_v33 }
  0xeb   :  { %v527_v49 = vadd.f32 %v495_v42, %v288_v26  ;;  %v467_v51 = vmul.f32 %v435_v44, %v292_v38  ;;  %v469_v54 = vmul.f32 %v437_v46, %v365_v39  ;;  %v529_v59 = vadd.f32 %v497_v43, %v361_v27  ;;  %2320 = vst [vmem:[#allocation3_spill] sm:$0xff] %v1871_v13 }
  0xec   :  { %v299_v56 = vpop.f32.mrf.mxu0  ;;  %v372_v57 = vpop.f32.mrf.mxu1  ;;  %v1857_v0 = vadd.f32 %v297_v47, %v1822_v20  ;;  %v1860_v1 = vadd.f32 %v370_v48, %v1824_v21  ;;  %v436_v6 = vmul.f32 0.044715, %v1843_v52  ;;  %v1867_v8 = vmul.f32 0.5, %v292_v38 }
  0xed   :  { %v499_v60 = vmul.f32 %v467_v51, %v292_v38  ;;  %v501_v63 = vmul.f32 %v469_v54, %v365_v39  ;;  %v559_v4 = vmul.f32 0.7978846, %v527_v49  ;;  %v1865_v7 = vadd.f32 %v299_v56, %v1826_v24 }
  0xee   :  { %v301_v2 = vpop.f32.mrf.mxu0  ;;  %v374_v3 = vpop.f32.mrf.mxu1  ;;  %v438_v10 = vmul.f32 0.044715, %v1848_v55  ;;  %v561_v14 = vmul.f32 0.7978846, %v529_v59  ;;  %v1873_v15 = vmul.f32 0.5, %v365_v39  ;;  %v1877_v18 = vmul.f32 %v464_v62, %v1833_v32 }
  0xef   :  { %v531_v9 = vadd.f32 %v499_v60, %v292_v38  ;;  %v533_v16 = vadd.f32 %v501_v63, %v365_v39  ;;  %v439_v17 = vmul.f32 0.044715, %v1857_v0  ;;  %v441_v19 = vmul.f32 0.044715, %v1860_v1 }
  0xf0   :  { %v303_v11 = vpop.f32.mrf.mxu0  ;;  %v376_v12 = vpop.f32.mrf.mxu1  ;;  %2321 = vst [vmem:[#allocation4_spill] sm:$0xff] %v1873_v15  ;;  %v440_v22 = vmul.f32 0.044715, %v1865_v7  ;;  %v1882_v23 = vadd.f32 %v372_v57, %v1828_v25  ;;  %1466 = vtanh.f32 %v559_v4  ;;  %v1885_v28 = vmul.f32 %v466_v5, %v1836_v33 }
  0xf1   :  { %v468_v29 = vmul.f32 %v436_v6, %v1843_v52  ;;  %v1889_v30 = vadd.f32 %v301_v2, %v1822_v20  ;;  %v563_v31 = vmul.f32 0.7978846, %v531_v9  ;;  %v470_v34 = vmul.f32 %v438_v10, %v1848_v55 }
  0xf2   :  { %v307_v26 = vpop.f32.mrf.mxu0  ;;  %v380_v27 = vpop.f32.mrf.mxu1  ;;  %v442_v35 = vmul.f32 0.044715, %v1882_v23  ;;  %v1894_v36 = vadd.f32 %v374_v3, %v1824_v21  ;;  %1468 = vtanh.f32 %v561_v14  ;;  %v565_v39 = vmul.f32 0.7978846, %v533_v16 }
  0xf3   :  { %v471_v40 = vmul.f32 %v439_v17, %v1857_v0  ;;  %v1898_v41 = vadd.f32 %v303_v11, %v1826_v24  ;;  %v473_v42 = vmul.f32 %v441_v19, %v1860_v1  ;;  %v472_v43 = vmul.f32 %v440_v22, %v1865_v7 }
  0xf4   :  { %v309_v37 = vpop.f32.mrf.mxu0  ;;  %v382_v38 = vpop.f32.mrf.mxu1  ;;  %v1903_v44 = vadd.f32 %v376_v12, %v1828_v25  ;;  %v1906_v45 = vadd.f32 %v307_v26, %v1822_v20  ;;  %v1909_v48 = vmul.f32 %v468_v29, %v1843_v52  ;;  %v443_v49 = vmul.f32 0.044715, %v1889_v30 }
  0xf5   :  { %v1913_v50 = vadd.f32 %v380_v27, %v1824_v21  ;;  %v1916_v51 = vadd.f32 %v309_v37, %v1826_v24  ;;  %1470 = vtanh.f32 %v563_v31  ;;  %v1919_v54 = vmul.f32 %v470_v34, %v1848_v55 }
  0xf6   :  { %2322 = vst [vmem:[#allocation5_spill] sm:$0xff] %v1906_v45  ;;  %v311_v46 = vpop.f32.mrf.mxu0  ;;  %v384_v47 = vpop.f32.mrf.mxu1  ;;  %v474_v56 = vmul.f32 %v442_v35, %v1882_v23  ;;  %v445_v57 = vmul.f32 0.044715, %v1894_v36  ;;  %1472 = vtanh.f32 %v565_v39  ;;  %v1924_v62 = vmul.f32 %v471_v40, %v1857_v0 }
  0xf7   :  { %2323 = vst [vmem:[#allocation6_spill] sm:$0xff] %v1913_v50  ;;  %v444_v63 = vmul.f32 0.044715, %v1898_v41  ;;  %v446_v2 = vmul.f32 0.044715, %v1903_v44  ;;  %v1929_v3 = vmul.f32 %v473_v42, %v1860_v1  ;;  %v1932_v4 = vmul.f32 %v472_v43, %v1865_v7 }
  0xf8   :  { %v313_v59 = vpop.f32.mrf.mxu0  ;;  %v386_v60 = vpop.f32.mrf.mxu1  ;;  %v447_v5 = vmul.f32 0.044715, %v1906_v45  ;;  %v1936_v6 = vadd.f32 %v382_v38, %v1828_v25  ;;  %v475_v11 = vmul.f32 %v443_v49, %v1889_v30  ;;  %v449_v12 = vmul.f32 0.044715, %v1913_v50 }
  0xf9   :  { %v448_v14 = vmul.f32 0.044715, %v1916_v51  ;;  %v1942_v16 = vadd.f32 %v311_v46, %v1822_v20  ;;  %v1945_v17 = vmul.f32 %v474_v56, %v1882_v23  ;;  %v477_v19 = vmul.f32 %v445_v57, %v1894_v36 }
  0xfa   :  { %v317_v9 = vpop.f32.mrf.mxu0  ;;  %v390_v10 = vpop.f32.mrf.mxu1  ;;  %v450_v22 = vmul.f32 0.044715, %v1936_v6  ;;  %v1950_v26 = vadd.f32 %v384_v47, %v1824_v21  ;;  %v476_v31 = vmul.f32 %v444_v63, %v1898_v41  ;;  %v478_v34 = vmul.f32 %v446_v2, %v1903_v44 }
  0xfb   :  { %2324 = vst [vmem:[#allocation7_spill] sm:$0xff] %v1942_v16  ;;  %v451_v35 = vmul.f32 0.044715, %v1942_v16  ;;  %v1956_v37 = vadd.f32 %v313_v59, %v1826_v24  ;;  %v479_v38 = vmul.f32 %v447_v5, %v1906_v45  ;;  %v1961_v40 = vadd.f32 %v386_v60, %v1828_v25 }
  0xfc   :  { %2325 = vst [vmem:[#allocation8_spill] sm:$0xff] %v1950_v26  ;;  %v319_v27 = vpop.f32.mrf.mxu0  ;;  %v392_v29 = vpop.f32.mrf.mxu1  ;;  %v453_v39 = vmul.f32 0.044715, %v1950_v26  ;;  %v1964_v42 = vadd.f32 %v317_v9, %v1822_v20  ;;  %v1967_v46 = vmul.f32 %v475_v11, %v1889_v30  ;;  %v481_v47 = vmul.f32 %v449_v12, %v1913_v50 }
  0xfd   :  { %v480_v49 = vmul.f32 %v448_v14, %v1916_v51  ;;  %v482_v56 = vmul.f32 %v450_v22, %v1936_v6  ;;  %v1467_v59 = vpop.eup %1466  ;;  %v1973_v63 = vmul.f32 %v477_v19, %v1894_v36  ;;  %v452_v60 = vmul.f32 0.044715, %v1956_v37 }
  0xfe   :  { %v321_v43 = vpop.f32.mrf.mxu0  ;;  %v394_v57 = vpop.f32.mrf.mxu1  ;;  %v1977_v2 = vadd.f32 %v390_v10, %v1824_v21  ;;  %v1980_v5 = vadd.f32 %v319_v27, %v1826_v24  ;;  %v1983_v9 = vmul.f32 %v476_v31, %v1898_v41  ;;  %v483_v11 = vmul.f32 %v451_v35, %v1942_v16 }
  0xff   :  { %v454_v12 = vmul.f32 0.044715, %v1961_v40  ;;  %v455_v14 = vmul.f32 0.044715, %v1964_v42  ;;  %v1988_v22 = vpop.eup %1468  ;;  %v1991_v19 = vmul.f32 %v478_v34, %v1903_v44  ;;  %v1994_v10 = vmul.f32 %v479_v38, %v1906_v45 }
 0x100   :  { %v485_v27 = vmul.f32 %v453_v39, %v1950_v26  ;;  %v1998_v13 = vadd.f32 %v392_v29, %v1828_v25  ;;  %v323_v31 = vpop.f32.mrf.mxu0  ;;  %v2001_v35 = vmul.f32 %v481_v47, %v1913_v50  ;;  %v2004_v61 = vmul.f32 %v480_v49, %v1916_v51  ;;  %v396_v38 = vpop.f32.mrf.mxu1 }
 0x101   :  { %2326 = vst [vmem:[#allocation9_spill] sm:$0xff] %v1994_v10  ;;  %v2007_v15 = vmul.f32 %v482_v56, %v1936_v6  ;;  %v2010_v34 = vadd.f32 %v321_v43, %v1822_v20  ;;  %v484_v10 = vmul.f32 %v452_v60, %v1956_v37  ;;  %v457_v39 = vmul.f32 0.044715, %v1977_v2 }
 0x102   :  { %2327 = vst [vmem:[#allocation10_spill] sm:$0xff] %v2001_v35  ;;  %v456_v29 = vmul.f32 0.044715, %v1980_v5  ;;  %v2016_v45 = vadd.f32 %v394_v57, %v1824_v21  ;;  %v1471_v47 = vpop.eup %1470  ;;  %v2019_v49 = vmul.f32 %v483_v11, %v1942_v16  ;;  %v486_v56 = vmul.f32 %v454_v12, %v1961_v40 }
 0x103   :  { %v487_v35 = vmul.f32 %v455_v14, %v1964_v42  ;;  %v2024_v20 = vadd.f32 %v323_v31, %v1826_v24  ;;  %v1473_v43 = vpop.eup %1472  ;;  %v2027_v60 = vmul.f32 %v485_v27, %v1950_v26  ;;  %v458_v50 = vmul.f32 0.044715, %v1998_v13 }
 0x104   :  { %2328 = vst [vmem:[#allocation11_spill] sm:$0xff] %v2019_v49  ;;  %v459_v21 = vmul.f32 0.044715, %v2010_v34  ;;  %v2032_v57 = vadd.f32 %v396_v38, %v1828_v25  ;;  %v461_v11 = vmul.f32 0.044715, %v2016_v45  ;;  %v528_v14 = vadd.f32 %v1877_v18, %v1833_v32 }
 0x105   :  { %2329 = vst [vmem:[#allocation12_spill] sm:$0xff] %v2027_v60  ;;  %v460_v12 = vmul.f32 0.044715, %v2024_v20  ;;  %v532_v24 = vadd.f32 %v1909_v48, %v1843_v52  ;;  %v2041_v27 = vmul.f32 %v484_v10, %v1956_v37  ;;  %v489_v31 = vmul.f32 %v457_v39, %v1977_v2 }
 0x106   :  { %v488_v60 = vmul.f32 %v456_v29, %v1980_v5  ;;  %v462_v25 = vmul.f32 0.044715, %v2032_v57  ;;  %v2047_v38 = vmul.f32 %v486_v56, %v1961_v40  ;;  %v2050_v26 = vmul.f32 %v487_v35, %v1964_v42 }
 0x107   :  { %v560_v49 = vmul.f32 0.7978846, %v528_v14  ;;  %v564_v32 = vmul.f32 0.7978846, %v532_v24  ;;  %v490_v18 = vmul.f32 %v458_v50, %v1998_v13  ;;  %v491_v48 = vmul.f32 %v459_v21, %v2010_v34 }
 0x108   :  { %v530_v10 = vadd.f32 %v1885_v28, %v1836_v33  ;;  %v534_v39 = vadd.f32 %v1919_v54, %v1848_v55  ;;  %v493_v29 = vmul.f32 %v461_v11, %v2016_v45  ;;  %v492_v56 = vmul.f32 %v460_v12, %v2024_v20 }
 0x109   :  { %v494_v16 = vmul.f32 %v462_v25, %v2032_v57  ;;  %1474 = vtanh.f32 %v560_v49  ;;  %v623_v24 = vadd.f32 1.0, %v1467_v59  ;;  %v2062_v50 = vmul.f32 %v489_v31, %v1977_v2 }
 0x10a   :  { %1476 = vtanh.f32 %v564_v32  ;;  %v562_v35 = vmul.f32 0.7978846, %v530_v10  ;;  %v566_v14 = vmul.f32 0.7978846, %v534_v39  ;;  %v2065_v21 = vmul.f32 %v488_v60, %v1980_v5 }
 0x10b   :  { %v404_v33 = vmul.f32 0.5, %v1843_v52  ;;  %v627_v28 = vadd.f32 1.0, %v1471_v47  ;;  %v2069_v54 = vmul.f32 %v490_v18, %v1998_v13  ;;  %v2072_v11 = vmul.f32 0.5, %v1848_v55 }
 0x10c   :  { %1478 = vtanh.f32 %v562_v35  ;;  %v536_v49 = vadd.f32 %v1932_v4, %v1865_v7  ;;  %v2077_v59 = vmul.f32 %v491_v48, %v2010_v34  ;;  %v2080_v12 = vmul.f32 %v493_v29, %v2016_v45 }
 0x10d   :  { %v2083_v60 = vmul.f32 %v492_v56, %v2024_v20  ;;  %1480 = vtanh.f32 %v566_v14  ;;  %v2086_v52 = vmul.f32 %v494_v16, %v2032_v57  ;;  %v2089_v55 = vmul.f32 %v623_v24, %v1845_v53  ;;  %v2330_v56 = vld [vmem:[#allocation4_spill] sm:$0xff] }
 0x10e   :  { %v540_v47 = vadd.f32 %v1983_v9, %v1898_v41  ;;  %v568_v4 = vmul.f32 0.7978846, %v536_v49  ;;  %v2094_v31 = vmul.f32 %v627_v28, %v1867_v8  ;;  %v625_v25 = vadd.f32 1.0, %v1988_v22 }
 0x10f   :  { %v538_v32 = vadd.f32 %v1945_v17, %v1882_v23  ;;  %v542_v18 = vadd.f32 %v1991_v19, %v1903_v44  ;;  %v629_v16 = vadd.f32 1.0, %v1473_v43  ;;  %v535_v53 = vadd.f32 %v1924_v62, %v1857_v0 }
 0x110   :  { %v572_v48 = vmul.f32 0.7978846, %v540_v47  ;;  %1482 = vtanh.f32 %v568_v4  ;;  %v2104_v9 = vmul.f32 0.5, %v1865_v7  ;;  %v539_v22 = vadd.f32 %v1967_v46, %v1889_v30 }
 0x111   :  { %v570_v10 = vmul.f32 0.7978846, %v538_v32  ;;  %v574_v8 = vmul.f32 0.7978846, %v542_v18  ;;  %v2109_v39 = vmul.f32 0.5, %v1898_v41  ;;  %v537_v19 = vadd.f32 %v1929_v3, %v1860_v1 }
 0x112   :  { %1484 = vtanh.f32 %v572_v48  ;;  %v567_v17 = vmul.f32 0.7978846, %v535_v53  ;;  %v687_v43 = vpack.c.bf16 %v2094_v31, %v2089_v55  ;;  %v571_v62 = vmul.f32 0.7978846, %v539_v22 }
 0x113   :  { %1486 = vtanh.f32 %v570_v10  ;;  %v541_v7 = vadd.f32 %v1973_v63, %v1894_v36  ;;  %v2118_v29 = vmul.f32 %v625_v25, %v1850_v58  ;;  %v569_v46 = vmul.f32 0.7978846, %v537_v19  ;;  %v2332_v10 = vld [vmem:[#allocation5_spill] sm:$0xff]  ;;  %v2335_v19 = vld [vmem:[#allocation11_spill] sm:$0xff] }
 0x114   :  { %1488 = vtanh.f32 %v574_v8  ;;  %v544_v41 = vadd.f32 %v2004_v61, %v1916_v51  ;;  %v2123_v35 = vmul.f32 %v629_v16, %v2330_v56  ;;  %v548_v14 = vadd.f32 %v2041_v27, %v1956_v37  ;;  %v2333_v8 = vld [vmem:[#allocation9_spill] sm:$0xff]  ;;  %v2336_v56 = vld [vmem:[#allocation3_spill] sm:$0xff] }
 0x115   :  { %1490 = vtanh.f32 %v567_v17  ;;  %v573_v3 = vmul.f32 0.7978846, %v541_v7  ;;  %v2128_v28 = vmul.f32 0.5, %v1882_v23  ;;  %v546_v63 = vadd.f32 %v2007_v15, %v1936_v6  ;;  %v2331_v23 = vld [vmem:[#allocation2_spill] sm:$0xff]  ;;  %v2334_v17 = vld [vmem:[#allocation7_spill] sm:$0xff] }
 0x116   :  { %v1475_v24 = vpop.eup %1474  ;;  %1492 = vtanh.f32 %v571_v62  ;;  %v576_v58 = vmul.f32 0.7978846, %v544_v41  ;;  %v580_v61 = vmul.f32 0.7978846, %v548_v14  ;;  %v550_v47 = vadd.f32 %v2047_v38, %v1961_v40  ;;  %v2337_v14 = vld [vmem:[#allocation6_spill] sm:$0xff] }
 0x117   :  { %v1477_v49 = vpop.eup %1476  ;;  %v624_v55 = vadd.f32 1.0, %v1475_v24  ;;  %1494 = vtanh.f32 %v569_v46  ;;  %v414_v31 = vmul.f32 0.5, %v1903_v44  ;;  %v578_v27 = vmul.f32 0.7978846, %v546_v63  ;;  %v2338_v24 = vld [vmem:[#allocation10_spill] sm:$0xff] }
 0x118   :  { %v628_v4 = vadd.f32 1.0, %v1477_v49  ;;  %1496 = vtanh.f32 %v573_v3  ;;  %v689_v18 = vpack.c.bf16 %v2123_v35, %v2118_v29  ;;  %v582_v15 = vmul.f32 0.7978846, %v550_v47  ;;  %v2339_v49 = vld [vmem:[#allocation8_spill] sm:$0xff] }
 0x119   :  { %v1479_v25 = vpop.eup %1478  ;;  %v656_v32 = vmul.f32 %v624_v55, %v2331_v23  ;;  %1498 = vtanh.f32 %v576_v58  ;;  %v543_v38 = vadd.f32 %v2333_v8, %v2332_v10  ;;  %v407_v44 = vmul.f32 0.5, %v1857_v0  ;;  %v2340_v55 = vld [vmem:[#allocation12_spill] sm:$0xff] }
 0x11a   :  { %v1481_v16 = vpop.eup %1480  ;;  %v660_v48 = vmul.f32 %v628_v4, %v404_v33  ;;  %v626_v53 = vadd.f32 1.0, %v1479_v25  ;;  %1500 = vtanh.f32 %v580_v61  ;;  %v547_v62 = vadd.f32 %v2335_v19, %v2334_v17 }
 0x11b   :  { %v630_v22 = vadd.f32 1.0, %v1481_v16  ;;  %1502 = vtanh.f32 %v578_v27  ;;  %v411_v46 = vmul.f32 0.5, %v1889_v30  ;;  %v575_v29 = vmul.f32 0.7978846, %v543_v38 }
 0x11c   :  { %v688_v7 = vpack.c.bf16 %v660_v48, %v656_v32  ;;  %1504 = vtanh.f32 %v582_v15  ;;  %v658_v33 = vmul.f32 %v626_v53, %v2336_v56  ;;  %v579_v3 = vmul.f32 0.7978846, %v547_v62 }
 0x11d   :  { %v1483_v41 = vpop.eup %1482  ;;  %v662_v35 = vmul.f32 %v630_v22, %v2072_v11  ;;  %v545_v58 = vadd.f32 %v2338_v24, %v2337_v14  ;;  %v409_v63 = vmul.f32 0.5, %v1860_v1  ;;  %1506 = vtanh.f32 %v575_v29 }
 0x11e   :  { %998 = vmatprep.mubr.bf16.mxu0 %v688_v7  ;;  %v632_v0 = vadd.f32 1.0, %v1483_v41  ;;  %v549_v61 = vadd.f32 %v2340_v55, %v2339_v49  ;;  %v413_v4 = vmul.f32 0.5, %v1894_v36  ;;  %1508 = vtanh.f32 %v579_v3 }
 0x11f   :  { %v1485_v30 = vpop.eup %1484  ;;  %v690_v47 = vpack.c.bf16 %v662_v35, %v658_v33  ;;  %999 = vmatmul.mubr.bf16.vlgmr.msra.gmra.mxu0 %v687_v43  ;;  %v577_v27 = vmul.f32 0.7978846, %v545_v58  ;;  %v416_v23 = vmul.f32 0.5, %v1916_v51  ;;  %v552_v15 = vadd.f32 %v2065_v21, %v1980_v5 }
 0x120   :  { %v1487_v11 = vpop.eup %1486  ;;  %v636_v25 = vadd.f32 1.0, %v1485_v30  ;;  %v581_v32 = vmul.f32 0.7978846, %v549_v61  ;;  %v664_v16 = vmul.f32 %v632_v0, %v2104_v9  ;;  %v556_v43 = vadd.f32 %v2083_v60, %v2024_v20 }
 0x121   :  { %v1489_v1 = vpop.eup %1488  ;;  %1063 = vmatprep.mubr.bf16.mxu1 %v690_v47  ;;  %v634_v48 = vadd.f32 1.0, %v1487_v11  ;;  %1510 = vtanh.f32 %v577_v27  ;;  %v584_v51 = vmul.f32 0.7978846, %v552_v15  ;;  %v420_v19 = vmul.f32 0.5, %v1956_v37 }
 0x122   :  { %v1491_v36 = vpop.eup %1490  ;;  %1064 = vmatmul.mubr.bf16.vlgmr.msra.gmra.mxu1 %v689_v18  ;;  %v668_v53 = vmul.f32 %v636_v25, %v2109_v39  ;;  %v638_v8 = vadd.f32 1.0, %v1489_v1  ;;  %1512 = vtanh.f32 %v581_v32  ;;  %v588_v62 = vmul.f32 0.7978846, %v556_v43 }
 0x123   :  { %v1493_v38 = vpop.eup %1492  ;;  %v666_v22 = vmul.f32 %v634_v48, %v2128_v28  ;;  %v631_v21 = vadd.f32 1.0, %v1491_v36  ;;  %1514 = vtanh.f32 %v584_v51  ;;  %v554_v39 = vadd.f32 %v2069_v54, %v1998_v13 }
 0x124   :  { %v1495_v9 = vpop.eup %1494  ;;  %v692_v7 = vpack.c.bf16 %v668_v53, %v664_v16  ;;  %v670_v29 = vmul.f32 %v638_v8, %v414_v31  ;;  %v635_v41 = vadd.f32 1.0, %v1493_v38  ;;  %1516 = vtanh.f32 %v588_v62 }
 0x125   :  { %v1497_v60 = vpop.eup %1496  ;;  %v663_v56 = vmul.f32 %v631_v21, %v407_v44  ;;  %v633_v18 = vadd.f32 1.0, %v1495_v9  ;;  %v558_v37 = vadd.f32 %v2086_v52, %v2032_v57  ;;  %v418_v0 = vmul.f32 0.5, %v1936_v6 }
 0x126   :  { %v1499_v33 = vpop.eup %1498  ;;  %1006 = vmatprep.mubr.bf16.mxu0 %v692_v7  ;;  %v694_v35 = vpack.c.bf16 %v670_v29, %v666_v22  ;;  %v667_v28 = vmul.f32 %v635_v41, %v411_v46  ;;  %v637_v3 = vadd.f32 1.0, %v1497_v60  ;;  %v586_v55 = vmul.f32 0.7978846, %v554_v39 }
 0x127   :  { %v1501_v24 = vpop.eup %1500  ;;  %v665_v58 = vmul.f32 %v633_v18, %v409_v63  ;;  %v640_v31 = vadd.f32 1.0, %v1499_v33  ;;  %v590_v54 = vmul.f32 0.7978846, %v558_v37  ;;  %v422_v46 = vmul.f32 0.5, %v1961_v40 }
 0x128   :  { %v1503_v44 = vpop.eup %1502  ;;  %1071 = vmatprep.mubr.bf16.mxu1 %v694_v35  ;;  %v691_v61 = vpack.c.bf16 %v667_v28, %v663_v56  ;;  %v669_v30 = vmul.f32 %v637_v3, %v413_v4  ;;  %v644_v47 = vadd.f32 1.0, %v1501_v24  ;;  %1518 = vtanh.f32 %v586_v55 }
 0x129   :  { %v1505_v27 = vpop.eup %1504  ;;  %v672_v11 = vmul.f32 %v640_v31, %v416_v23  ;;  %v642_v25 = vadd.f32 1.0, %v1503_v44  ;;  %1520 = vtanh.f32 %v590_v54  ;;  %v415_v6 = vmul.f32 0.5, %v2332_v10 }
 0x12a   :  { %1007 = vmatmul.mubr.bf16.gmra.mxu0 %v691_v61  ;;  %v693_v52 = vpack.c.bf16 %v669_v30, %v665_v58  ;;  %v676_v32 = vmul.f32 %v644_v47, %v420_v19  ;;  %v646_v63 = vadd.f32 1.0, %v1505_v27  ;;  %v1507_v15 = vpop.eup %1506  ;;  %v419_v1 = vmul.f32 0.5, %v2334_v17 }
 0x12b   :  { %v551_v4 = vadd.f32 %v2050_v26, %v1964_v42  ;;  %v555_v23 = vadd.f32 %v2077_v59, %v2010_v34  ;;  %v1509_v16 = vpop.eup %1508  ;;  %v674_v48 = vmul.f32 %v642_v25, %v418_v0  ;;  %v639_v36 = vadd.f32 1.0, %v1507_v15 }
 0x12c   :  { %1072 = vmatmul.mubr.bf16.gmra.mxu1 %v693_v52  ;;  %v696_v40 = vpack.c.bf16 %v676_v32, %v672_v11  ;;  %v678_v43 = vmul.f32 %v646_v63, %v422_v46  ;;  %v643_v53 = vadd.f32 1.0, %v1509_v16  ;;  %v553_v10 = vadd.f32 %v2062_v50, %v1977_v2 }
 0x12d   :  { %v583_v8 = vmul.f32 0.7978846, %v551_v4  ;;  %v587_v51 = vmul.f32 0.7978846, %v555_v23  ;;  %v671_v22 = vmul.f32 %v639_v36, %v415_v6  ;;  %v417_v26 = vmul.f32 0.5, %v2337_v14 }
 0x12e   :  { %v1511_v38 = vpop.eup %1510  ;;  %1014 = vmatprep.mubr.bf16.mxu0 %v696_v40  ;;  %v698_v17 = vpack.c.bf16 %v678_v43, %v674_v48  ;;  %v557_v59 = vadd.f32 %v2080_v12, %v2016_v45  ;;  %v675_v19 = vmul.f32 %v643_v53, %v419_v1  ;;  %v585_v9 = vmul.f32 0.7978846, %v553_v10 }
 0x12f   :  { %v1513_v21 = vpop.eup %1512  ;;  %v641_v62 = vadd.f32 1.0, %v1511_v38  ;;  %1522 = vtanh.f32 %v583_v8  ;;  %v421_v7 = vmul.f32 0.5, %v2339_v49  ;;  %v424_v12 = vmul.f32 0.5, %v1980_v5 }
 0x130   :  { %1079 = vmatprep.mubr.bf16.mxu1 %v698_v17  ;;  %v645_v29 = vadd.f32 1.0, %v1513_v21  ;;  %1524 = vtanh.f32 %v587_v51  ;;  %v589_v50 = vmul.f32 0.7978846, %v557_v59  ;;  %v1515_v41 = vpop.eup %1514  ;;  %v695_v60 = vpack.c.bf16 %v675_v19, %v671_v22  ;;  %v1546_v59 = vld [vmem:[%s2304_s0] sm:$0xff] }
 0x131   :  { %1526 = vtanh.f32 %v585_v9  ;;  %v1517_v56 = vpop.eup %1516  ;;  %v673_v18 = vmul.f32 %v641_v62, %v417_v26  ;;  %v648_v39 = vadd.f32 1.0, %v1515_v41  ;;  %v428_v33 = vmul.f32 0.5, %v2024_v20 }
 0x132   :  { %v677_v14 = vmul.f32 %v645_v29, %v421_v7  ;;  %1528 = vtanh.f32 %v589_v50  ;;  %1015 = vmatmul.mubr.bf16.gmra.mxu0 %v695_v60  ;;  %v652_v35 = vadd.f32 1.0, %v1517_v56  ;;  %v426_v0 = vmul.f32 0.5, %v1998_v13  ;;  %v1547_v50 = vld [vmem:[%s2304_s0 + $0x8] sm:$0xff] }
 0x133   :  { %v680_v3 = vmul.f32 %v648_v39, %v424_v12  ;;  %v430_v55 = vmul.f32 0.5, %v2032_v57  ;;  %v423_v11 = vmul.f32 0.5, %v1964_v42  ;;  %v427_v46 = vmul.f32 0.5, %v2010_v34  ;;  %v2190_v42 = vld [vmem:[%s2307_s4] ss:$0 sm:$0xff] }
 0x134   :  { %v697_v28 = vpack.c.bf16 %v677_v14, %v673_v18  ;;  %v684_v49 = vmul.f32 %v652_v35, %v428_v33  ;;  %v425_v13 = vmul.f32 0.5, %v1977_v2  ;;  %v429_v15 = vmul.f32 0.5, %v2016_v45 }
 0x135   :  { %v1519_v37 = vpop.eup %1518 }
 0x136   :  { %1080 = vmatmul.mubr.bf16.gmra.mxu1 %v697_v28  ;;  %v1521_v24 = vpop.eup %1520  ;;  %v700_v58 = vpack.c.bf16 %v684_v49, %v680_v3  ;;  %v650_v31 = vadd.f32 1.0, %v1519_v37 }
 0x137   :  { %v654_v44 = vadd.f32 1.0, %v1521_v24  ;;  %v1548_v24 = vld [vmem:[%s2304_s0 + $0x10] sm:$0xff] }
 0x138   :  { %1022 = vmatprep.mubr.bf16.mxu0 %v700_v58  ;;  %v682_v61 = vmul.f32 %v650_v31, %v426_v0 }
 0x139   :  { %v686_v30 = vmul.f32 %v654_v44, %v430_v55 }
 0x13b   :  { %v702_v47 = vpack.c.bf16 %v686_v30, %v682_v61  ;;  %v1549_v61 = vld [vmem:[%s2304_s0 + $0x18] sm:$0xff] }
 0x13c   :  { %v1523_v5 = vpop.eup %1522 }
 0x13d   :  { %v1525_v20 = vpop.eup %1524  ;;  %v647_v54 = vadd.f32 1.0, %v1523_v5  ;;  %1087 = vmatprep.mubr.bf16.mxu1 %v702_v47 }
 0x13e   :  { %v1527_v27 = vpop.eup %1526  ;;  %v651_v25 = vadd.f32 1.0, %v1525_v20 }
 0x13f   :  { %v1529_v52 = vpop.eup %1528  ;;  %v649_v32 = vadd.f32 1.0, %v1527_v27  ;;  %v679_v57 = vmul.f32 %v647_v54, %v423_v11  ;;  %v1550_v11 = vld [vmem:[%s2304_s0 + $0x20] sm:$0xff] }
 0x140   :  { %v683_v63 = vmul.f32 %v651_v25, %v427_v46  ;;  %v653_v6 = vadd.f32 1.0, %v1529_v52 }
 0x141   :  { %v681_v4 = vmul.f32 %v649_v32, %v425_v13 }
 0x142   :  { %v699_v1 = vpack.c.bf16 %v683_v63, %v679_v57  ;;  %v685_v23 = vmul.f32 %v653_v6, %v429_v15 }
 0x144   :  { %1023 = vmatmul.mubr.bf16.gmra.mxu0 %v699_v1  ;;  %v701_v16 = vpack.c.bf16 %v685_v23, %v681_v4 }
 0x146   :  { %1088 = vmatmul.mubr.bf16.gmra.mxu1 %v701_v16 }
 0x1df   :  { %v1321_v40 = vpop.f32.mrf.mxu0 }
 0x1e1   :  { %v1322_v34 = vpop.f32.mrf.mxu0 }
 0x1e2   :  { %v1361_v2 = vpop.f32.mrf.mxu1  ;;  %v1323_v48 = vadd.f32 %v1322_v34, %v1321_v40 }
 0x1e3   :  { %v1324_v43 = vpop.f32.mrf.mxu0 }
 0x1e4   :  { %v1001_v36 = vadd.f32 %v1323_v48, %v2190_v42  ;;  %v1362_v45 = vpop.f32.mrf.mxu1 }
 0x1e5   :  { %v1363_v53 = vadd.f32 %v1362_v45, %v1361_v2  ;;  %v1325_v8 = vpop.f32.mrf.mxu0 }
 0x1e6   :  { %v1364_v51 = vpop.f32.mrf.mxu1  ;;  %v1326_v10 = vadd.f32 %v1325_v8, %v1324_v43 }
 0x1e7   :  { %v1066_v38 = vadd.f32 %v1363_v53, %v1001_v36  ;;  %v1551_v53 = vld [vmem:[%s2304_s0 + $0x30] sm:$0xff] }
 0x1e8   :  { %v1004_v17 = vadd.f32 %v1326_v10, %v2190_v42  ;;  %v1365_v22 = vpop.f32.mrf.mxu1 }
 0x1e9   :  { %v1366_v26 = vadd.f32 %v1365_v22, %v1364_v51  ;;  %v2197_v21 = vadd.f32 %v1546_v59, %v1066_v38 }
 0x1ea   :  { %v1327_v19 = vpop.f32.mrf.mxu0 }
 0x1eb   :  { %v1069_v62 = vadd.f32 %v1366_v26, %v1004_v17  ;;  %1104 = vadd.xlane.f32.xlu0 %v2197_v21  ;;  %v1552_v17 = vld [vmem:[%s2304_s0 + $0x38] sm:$0x3f] }
 0x1ec   :  { %v1367_v9 = vpop.f32.mrf.mxu1  ;;  %v1328_v7 = vpop.f32.mrf.mxu0 }
 0x1ed   :  { %v1329_v29 = vadd.f32 %v1328_v7, %v1327_v19  ;;  %v2203_v41 = vadd.f32 %v1547_v50, %v1069_v62  ;;  %v1553_v19 = vld [vmem:[%s2304_s0 + $0x28] sm:$0xff] }
 0x1ee   :  { %v1368_v60 = vpop.f32.mrf.mxu1  ;;  %v1330_v56 = vpop.f32.mrf.mxu0 }
 0x1ef   :  { %v1009_v18 = vadd.f32 %v1329_v29, %v2190_v42  ;;  %v1369_v14 = vadd.f32 %v1368_v60, %v1367_v9  ;;  %1106 = vadd.xlane.f32.xlu1 %v2203_v41 }
 0x1f0   :  { %v1370_v39 = vpop.f32.mrf.mxu1  ;;  %v1331_v12 = vpop.f32.mrf.mxu0 }
 0x1f1   :  { %v1074_v33 = vadd.f32 %v1369_v14, %v1009_v18  ;;  %v1332_v35 = vadd.f32 %v1331_v12, %v1330_v56 }
 0x1f2   :  { %v1371_v28 = vpop.f32.mrf.mxu1  ;;  %v1333_v37 = vpop.f32.mrf.mxu0 }
 0x1f3   :  { %v1012_v3 = vadd.f32 %v1332_v35, %v2190_v42  ;;  %v1372_v49 = vadd.f32 %v1371_v28, %v1370_v39  ;;  %v2211_v58 = vadd.f32 %v1548_v24, %v1074_v33 }
 0x1f4   :  { %v1334_v0 = vpop.f32.mrf.mxu0 }
 0x1f5   :  { %v1077_v31 = vadd.f32 %v1372_v49, %v1012_v3  ;;  %1108 = vadd.xlane.f32.xlu1 %v2211_v58  ;;  %v1335_v44 = vadd.f32 %v1334_v0, %v1333_v37 }
 0x1f6   :  { %v1373_v55 = vpop.f32.mrf.mxu1  ;;  %v1336_v27 = vpop.f32.mrf.mxu0 }
 0x1f7   :  { %v1099_v30 = vadd.f32 %v1549_v61, %v1077_v31  ;;  %v1017_v5 = vadd.f32 %v1335_v44, %v2190_v42 }
 0x1f8   :  { %v1374_v47 = vpop.f32.mrf.mxu1  ;;  %v1337_v52 = vpop.f32.mrf.mxu0 }
 0x1f9   :  { %v1375_v20 = vadd.f32 %v1374_v47, %v1373_v55  ;;  %1110 = vadd.xlane.f32.xlu0 %v1099_v30  ;;  %v1338_v16 = vadd.f32 %v1337_v52, %v1336_v27 }
 0x1fa   :  { %v1376_v25 = vpop.f32.mrf.mxu1 }
 0x1fb   :  { %v1082_v54 = vadd.f32 %v1375_v20, %v1017_v5  ;;  %v1020_v51 = vadd.f32 %v1338_v16, %v2190_v42 }
 0x1fc   :  { %v1377_v13 = vpop.f32.mrf.mxu1 }
 0x1fd   :  { %v1100_v46 = vadd.f32 %v1550_v11, %v1082_v54  ;;  %v1378_v38 = vadd.f32 %v1377_v13, %v1376_v25 }
 0x1ff   :  { %1112 = vadd.xlane.f32.xlu1 %v1100_v46  ;;  %v1085_v26 = vadd.f32 %v1378_v38, %v1020_v51 }
 0x201   :  { %v1101_v62 = vadd.f32 %v1553_v19, %v1085_v26 }
 0x204   :  { %v1339_v32 = vpop.f32.mrf.mxu0 }
 0x206   :  { %v1379_v57 = vpop.f32.mrf.mxu1  ;;  %v1340_v63 = vpop.f32.mrf.mxu0 }
 0x207   :  { %v1341_v15 = vadd.f32 %v1340_v63, %v1339_v32 }
 0x208   :  { %v1380_v6 = vpop.f32.mrf.mxu1  ;;  %v1342_v1 = vpop.f32.mrf.mxu0 }
 0x209   :  { %v1025_v4 = vadd.f32 %v1341_v15, %v2190_v42  ;;  %v1381_v23 = vadd.f32 %v1380_v6, %v1379_v57 }
 0x20a   :  { %v1382_v40 = vpop.f32.mrf.mxu1  ;;  %v1343_v34 = vpop.f32.mrf.mxu0 }
 0x20b   :  { %v1090_v2 = vadd.f32 %v1381_v23, %v1025_v4  ;;  %v1344_v48 = vadd.f32 %v1343_v34, %v1342_v1 }
 0x20c   :  { %v1383_v43 = vpop.f32.mrf.mxu1 }
 0x20d   :  { %v1028_v36 = vadd.f32 %v1344_v48, %v2190_v42  ;;  %v1384_v45 = vadd.f32 %v1383_v43, %v1382_v40  ;;  %v1102_v8 = vadd.f32 %v1551_v53, %v1090_v2  ;;  %v1303_v40 = vld [vmem:[%s2308_s5] ss:$0 sm:$0xff] }
 0x20e   :  { %v1304_v2 = vld [vmem:[%s2309_s6] ss:$0 sm:$0xff] }
 0x20f   :  { %v1093_v10 = vadd.f32 %v1384_v45, %v1028_v36  ;;  %1116 = vadd.xlane.f32.xlu1 %v1102_v8 }
 0x211   :  { %v1103_v22 = vadd.f32 %v1552_v17, %v1093_v10 }
 0x213   :  { %v1119_v59 = vsel %vm1118_vm0, %v1103_v22, 0.0 }
 0x214   :  { %1120 = vadd.xlane.f32.xlu0 %v1119_v59 }
 0x218   :  { %1114 = vadd.xlane.f32.xlu0 %v1101_v62 }
 0x274   :  { %v1105_v42 = vpop.xlane.xlu0 %1104 }
 0x275   :  { %v1123_v9 = vmul.f32 0.0078125, %v1105_v42 }
 0x277   :  { %v1131_v7 = vsub.f32 %v2197_v21, %v1123_v9 }
 0x278   :  { %v1107_v29 = vpop.xlane.xlu1 %1106 }
 0x279   :  { %v1124_v50 = vmul.f32 0.0078125, %v1107_v29  ;;  %v1139_v60 = vmul.f32 %v1131_v7, %v1131_v7 }
 0x27b   :  { %v2236_v56 = vsub.f32 %v2203_v41, %v1124_v50  ;;  %1147 = vadd.xlane.f32.xlu0 %v1139_v60 }
 0x27d   :  { %v1140_v18 = vmul.f32 %v2236_v56, %v2236_v56 }
 0x27e   :  { %v1109_v14 = vpop.xlane.xlu1 %1108 }
 0x27f   :  { %v1125_v39 = vmul.f32 0.0078125, %v1109_v14  ;;  %1149 = vadd.xlane.f32.xlu1 %v1140_v18 }
 0x281   :  { %v2241_v12 = vsub.f32 %v2211_v58, %v1125_v39 }
 0x282   :  { %v1111_v33 = vpop.xlane.xlu0 %1110 }
 0x283   :  { %v1126_v35 = vmul.f32 0.0078125, %v1111_v33  ;;  %v1141_v21 = vmul.f32 %v2241_v12, %v2241_v12 }
 0x285   :  { %v2245_v28 = vsub.f32 %v1099_v30, %v1126_v35  ;;  %1151 = vadd.xlane.f32.xlu0 %v1141_v21 }
 0x287   :  { %v1142_v41 = vmul.f32 %v2245_v28, %v2245_v28 }
 0x288   :  { %v1113_v3 = vpop.xlane.xlu1 %1112 }
 0x289   :  { %v1127_v49 = vmul.f32 0.0078125, %v1113_v3  ;;  %1153 = vadd.xlane.f32.xlu1 %v1142_v41 }
 0x28b   :  { %v2249_v37 = vsub.f32 %v1100_v46, %v1127_v49 }
 0x28d   :  { %v1143_v24 = vmul.f32 %v2249_v37, %v2249_v37 }
 0x28f   :  { %1155 = vadd.xlane.f32.xlu0 %v1143_v24 }
 0x298   :  { %v1117_v58 = vpop.xlane.xlu1 %1116 }
 0x299   :  { %v1129_v31 = vmul.f32 0.0078125, %v1117_v58 }
 0x29b   :  { %v2253_v0 = vsub.f32 %v1102_v8, %v1129_v31 }
 0x29d   :  { %v1121_v55 = vpop.xlane.xlu0 %1120  ;;  %v1145_v44 = vmul.f32 %v2253_v0, %v2253_v0 }
 0x29e   :  { %v1130_v61 = vmul.f32 0.0078125, %v1121_v55 }
 0x29f   :  { %1159 = vadd.xlane.f32.xlu0 %v1145_v44 }
 0x2a0   :  { %v2257_v47 = vsub.f32 %v1103_v22, %v1130_v61 }
 0x2a1   :  { %v1115_v30 = vpop.xlane.xlu0 %1114 }
 0x2a2   :  { %v1128_v5 = vmul.f32 0.0078125, %v1115_v30  ;;  %v1146_v27 = vmul.f32 %v2257_v47, %v2257_v47 }
 0x2a4   :  { %v2259_v20 = vsub.f32 %v1101_v62, %v1128_v5  ;;  %v1161_v11 = vsel %vm1118_vm0, %v1146_v27, 0.0 }
 0x2a6   :  { %v1144_v54 = vmul.f32 %v2259_v20, %v2259_v20 }
 0x2a8   :  { %1157 = vadd.xlane.f32.xlu1 %v1144_v54 }
 0x2ac   :  { %1162 = vadd.xlane.f32.xlu1 %v1161_v11 }
 0x304   :  { %v1148_v46 = vpop.xlane.xlu0 %1147 }
 0x305   :  { %v1164_v25 = vmul.f32 0.0078125, %v1148_v46 }
 0x307   :  { %v1172_v52 = vadd.f32 1e-05, %v1164_v25 }
 0x308   :  { %v1150_v13 = vpop.xlane.xlu1 %1149 }
 0x309   :  { %1530 = vrsqrt.f32 %v1172_v52  ;;  %v1165_v32 = vmul.f32 0.0078125, %v1150_v13 }
 0x30b   :  { %v1173_v57 = vadd.f32 1e-05, %v1165_v32 }
 0x30d   :  { %1532 = vrsqrt.f32 %v1173_v57 }
 0x30e   :  { %v1152_v63 = vpop.xlane.xlu0 %1151 }
 0x30f   :  { %v1166_v15 = vmul.f32 0.0078125, %v1152_v63 }
 0x311   :  { %v1174_v6 = vadd.f32 1e-05, %v1166_v15 }
 0x312   :  { %v1154_v1 = vpop.xlane.xlu1 %1153 }
 0x313   :  { %1534 = vrsqrt.f32 %v1174_v6  ;;  %v1167_v4 = vmul.f32 0.0078125, %v1154_v1 }
 0x315   :  { %v1175_v23 = vadd.f32 1e-05, %v1167_v4 }
 0x316   :  { %v1531_v16 = vpop.eup %1530 }
 0x317   :  { %v1188_v34 = vmul.f32 %v1531_v16, %v1131_v7  ;;  %1536 = vrsqrt.f32 %v1175_v23 }
 0x318   :  { %v1156_v48 = vpop.xlane.xlu0 %1155 }
 0x319   :  { %v1203_v43 = vmul.f32 %v1303_v40, %v1188_v34  ;;  %v1168_v36 = vmul.f32 0.0078125, %v1156_v48 }
 0x31a   :  { %v1533_v45 = vpop.eup %1532 }
 0x31b   :  { %v1218_v53 = vadd.f32 %v1304_v2, %v1203_v43  ;;  %v1189_v8 = vmul.f32 %v1533_v45, %v2236_v56  ;;  %v1176_v51 = vadd.f32 1e-05, %v1168_v36 }
 0x31d   :  { %1226 = vst [vmem:[%s2310_s7] sm:$0xff] %v1218_v53  ;;  %v1204_v10 = vmul.f32 %v1303_v40, %v1189_v8  ;;  %1538 = vrsqrt.f32 %v1176_v51 }
 0x31f   :  { %v1219_v38 = vadd.f32 %v1304_v2, %v1204_v10 }
 0x320   :  { %v1535_v17 = vpop.eup %1534 }
 0x321   :  { %1227 = vst [vmem:[%s2310_s7 + $0x8] sm:$0xff] %v1219_v38  ;;  %v1190_v22 = vmul.f32 %v1535_v17, %v2241_v12 }
 0x323   :  { %v1205_v26 = vmul.f32 %v1303_v40, %v1190_v22 }
 0x324   :  { %v1537_v59 = vpop.eup %1536 }
 0x325   :  { %v1220_v19 = vadd.f32 %v1304_v2, %v1205_v26  ;;  %v1191_v62 = vmul.f32 %v1537_v59, %v2245_v28 }
 0x327   :  { %1228 = vst [vmem:[%s2310_s7 + $0x10] sm:$0xff] %v1220_v19  ;;  %v1206_v42 = vmul.f32 %v1303_v40, %v1191_v62 }
 0x328   :  { %v1160_v9 = vpop.xlane.xlu0 %1159 }
 0x329   :  { %v1221_v7 = vadd.f32 %v1304_v2, %v1206_v42  ;;  %v1170_v29 = vmul.f32 0.0078125, %v1160_v9 }
 0x32a   :  { %v1539_v50 = vpop.eup %1538 }
 0x32b   :  { %1229 = vst [vmem:[%s2310_s7 + $0x18] sm:$0xff] %v1221_v7  ;;  %v1192_v60 = vmul.f32 %v1539_v50, %v2249_v37  ;;  %v1178_v56 = vadd.f32 1e-05, %v1170_v29 }
 0x32d   :  { %v1207_v18 = vmul.f32 %v1303_v40, %v1192_v60  ;;  %1540 = vrsqrt.f32 %v1178_v56 }
 0x32f   :  { %v1222_v14 = vadd.f32 %v1304_v2, %v1207_v18 }
 0x331   :  { %1230 = vst [vmem:[%s2310_s7 + $0x20] sm:$0xff] %v1222_v14  ;;  %v1158_v39 = vpop.xlane.xlu1 %1157 }
 0x332   :  { %v1169_v12 = vmul.f32 0.0078125, %v1158_v39 }
 0x334   :  { %v1177_v33 = vadd.f32 1e-05, %v1169_v12 }
 0x335   :  { %v1163_v35 = vpop.xlane.xlu1 %1162 }
 0x336   :  { %1542 = vrsqrt.f32 %v1177_v33  ;;  %v1171_v21 = vmul.f32 0.0078125, %v1163_v35 }
 0x338   :  { %v1179_v28 = vadd.f32 1e-05, %v1171_v21 }
 0x33a   :  { %v1541_v41 = vpop.eup %1540  ;;  %1544 = vrsqrt.f32 %v1179_v28 }
 0x33b   :  { %v1194_v3 = vmul.f32 %v1541_v41, %v2253_v0 }
 0x33d   :  { %v1209_v49 = vmul.f32 %v1303_v40, %v1194_v3 }
 0x33f   :  { %v1224_v37 = vadd.f32 %v1304_v2, %v1209_v49 }
 0x341   :  { %1232 = vst [vmem:[%s2310_s7 + $0x30] sm:$0xff] %v1224_v37 }
 0x343   :  { %v1543_v24 = vpop.eup %1542 }
 0x344   :  { %v1193_v58 = vmul.f32 %v1543_v24, %v2259_v20 }
 0x346   :  { %v1208_v31 = vmul.f32 %v1303_v40, %v1193_v58 }
 0x347   :  { %v1545_v55 = vpop.eup %1544 }
 0x348   :  { %v1223_v44 = vadd.f32 %v1304_v2, %v1208_v31  ;;  %v1195_v61 = vmul.f32 %v1545_v55, %v2257_v47 }
 0x34a   :  { %1231 = vst [vmem:[%s2310_s7 + $0x28] sm:$0xff] %v1223_v44  ;;  %v1210_v30 = vmul.f32 %v1303_v40, %v1195_v61 }
 0x34c   :  { %v1225_v0 = vadd.f32 %v1304_v2, %v1210_v30 }
 0x34e   :  { %1233 = vst [vmem:[%s2310_s7 + $0x38] sm:$0x3f] %v1225_v0 }

</bundles_post_ra>
